<compile_context>
chip_gen: v7x
topology: tpu7x:2x2x1
jax: 0.10.0
libtpu: 0.0.40
codegen_flags: <defaults>
</compile_context>

<pallas_src>
import math

import jax
import jax.numpy as jnp
from jax.experimental import pallas as pl
from jax.experimental.pallas import tpu as pltpu


# Fixed geometry implied by the module (fc1 expects 16*5*5 -> 3x32x32 input).
H0 = W0 = 32
C_IN, C1, C2 = 3, 6, 16
KS = 5
OH1 = H0 - KS + 1                                   # 28 (conv1 output H=W)
N1 = (OH1 - 1) * W0 + OH1                           # 892: conv1 flat extent
P1H = OH1 // 2                                      # 14 (pool1 output H=W)
N2 = 2 * (P1H - 1) * W0 + 2 * (P1H - 1) + 1         # 859: pool1 flat extent
OH2 = P1H - KS + 1                                  # 10 (conv2 output H=W)
N3 = 2 * W0 * (OH2 - 1) + 2 * (OH2 - 1) + 1         # 595: conv2 flat extent
P2H = OH2 // 2                                      # 5  (pool2 output H=W)
N4 = 4 * W0 * (P2H - 1) + 4 * (P2H - 1) + 1         # 529: pool2 flat extent
NFC1 = 400


# ------------------------------ fused kernel --------------------------------

def _nonsense_net_kernel(x_ref, w1_ref, b1_ref, w2_ref, b2_ref, sel_ref,
                         wf1_ref, bf1_ref, wf2_ref, bf2_ref,
                         wf3_ref, bf3_ref, wf4_ref, bf4_ref, out_ref):
    f32 = jnp.float32
    x = x_ref[0]                                     # [3, 1024] flat (H,W)

    # conv1 (5x5 valid): 25 shifted matmuls [6,3]@[3,N1], f32 accumulate.
    y1 = jnp.zeros((C1, N1), f32)
    for di in range(KS):
        for dj in range(KS):
            off = di * W0 + dj
            y1 = y1 + jnp.dot(w1_ref[di * KS + dj], x[:, off:off + N1],
                              preferred_element_type=f32)
    y1 = jnp.maximum(y1 + b1_ref[...], 0.0)          # bias + ReLU

    # pool1: 2x2 stride-2 max; decimation deferred (row stride stays W0=32).
    p1 = jnp.maximum(jnp.maximum(y1[:, 0:N2], y1[:, 1:N2 + 1]),
                     jnp.maximum(y1[:, W0:N2 + W0], y1[:, W0 + 1:N2 + W0 + 1]))

    # conv2 (5x5 valid) on the stride-(2*W0, 2) embedded 14x14 map.
    z = jnp.zeros((C2, N3), f32)
    for di in range(KS):
        for dj in range(KS):
            off = 2 * W0 * di + 2 * dj
            z = z + jnp.dot(w2_ref[di * KS + dj], p1[:, off:off + N3],
                            preferred_element_type=f32)
    z = jnp.maximum(z + b2_ref[...], 0.0)

    # pool2: neighbors at flat offsets {0, 2, 2*W0, 2*W0+2}.
    q = jnp.maximum(jnp.maximum(z[:, 0:N4], z[:, 2:N4 + 2]),
                    jnp.maximum(z[:, 2 * W0:N4 + 2 * W0],
                                z[:, 2 * W0 + 2:N4 + 2 * W0 + 2]))

    # Gather the 25 valid (5x5) columns per channel with a 0/1 selection
    # matmul -> feat [16, 25] in torch's (H, W) row-major order per channel.
    feat = jnp.dot(q, sel_ref[...], preferred_element_type=f32)

    # fc1 (400 -> 400) as 16 per-channel chunk matmuls: matches torch's
    # x.view(-1, 16*5*5) channel-major flatten without any in-kernel reshape.
    h = bf1_ref[...]                                 # [1, 400]
    for c in range(C2):
        h = h + jnp.dot(feat[c:c + 1, :], wf1_ref[c],
                        preferred_element_type=f32)
    h = jnp.maximum(h, 0.0)

    # fc2 / fc3 / fc4
    h = jnp.maximum(jnp.dot(h, wf2_ref[...], preferred_element_type=f32)
                    + bf2_ref[...], 0.0)
    h = jnp.maximum(jnp.dot(h, wf3_ref[...], preferred_element_type=f32)
                    + bf3_ref[...], 0.0)
    h = jnp.dot(h, wf4_ref[...], preferred_element_type=f32) + bf4_ref[...]

    out_ref[0] = h                                   # [1, 10]


# ------------------------------ host wrappers --------------------------------

def prep_params(params):
    """One-time weight layout prep (kept out of the per-call path)."""
    p = {}
    # conv taps repacked to [k*k, OC, C] so w_ref[tap] is the [OC, C] matmul LHS
    p["w1"] = jnp.transpose(params["conv1_w"], (2, 3, 0, 1)).reshape(
        KS * KS, C1, C_IN)
    p["b1"] = params["conv1_b"].reshape(C1, 1)
    p["w2"] = jnp.transpose(params["conv2_w"], (2, 3, 0, 1)).reshape(
        KS * KS, C2, C1)
    p["b2"] = params["conv2_b"].reshape(C2, 1)
    # 0/1 selection matrix gathering the 25 valid pool2 columns (row-major 5x5)
    j = jnp.arange(P2H * P2H)
    rows = 4 * W0 * (j // P2H) + 4 * (j % P2H)
    p["sel"] = jnp.zeros((N4, P2H * P2H), jnp.float32).at[rows, j].set(1.0)
    # fc weights pre-transposed to [in, out]; fc1 chunked per input channel
    p["wf1"] = params["fc1_w"].T.reshape(C2, P2H * P2H, NFC1)
    p["bf1"] = params["fc1_b"].reshape(1, -1)
    p["wf2"] = params["fc2_w"].T
    p["bf2"] = params["fc2_b"].reshape(1, -1)
    p["wf3"] = params["fc3_w"].T
    p["bf3"] = params["fc3_b"].reshape(1, -1)
    p["wf4"] = params["fc4_w"].T
    p["bf4"] = params["fc4_b"].reshape(1, -1)
    return jax.tree_util.tree_map(lambda a: a.astype(jnp.float32), p)


def nonsense_net_forward(x, pp):
    """x: [B, 3, 32, 32] NCHW (PyTorch layout) -> logits [B, 10]."""
    B = x.shape[0]
    x_flat = x.reshape(B, C_IN, H0 * W0)             # free view, row-major H,W

    def full(*shape):
        return pl.BlockSpec(shape, lambda b, _n=len(shape): (0,) * _n)

    out = pl.pallas_call(
        _nonsense_net_kernel,
        out_shape=jax.ShapeDtypeStruct((B, 1, 10), jnp.float32),
        grid=(B,),
        in_specs=[
            pl.BlockSpec((1, C_IN, H0 * W0), lambda b: (b, 0, 0)),
            full(KS * KS, C1, C_IN), full(C1, 1),
            full(KS * KS, C2, C1), full(C2, 1),
            full(N4, P2H * P2H),
            full(C2, P2H * P2H, NFC1), full(1, NFC1),
            full(NFC1, 120), full(1, 120),
            full(120, 84), full(1, 84),
            full(84, 10), full(1, 10),
        ],
        out_specs=pl.BlockSpec((1, 1, 10), lambda b: (b, 0, 0)),
        compiler_params=pltpu.CompilerParams(
            dimension_semantics=("parallel",)),
    )(x_flat, pp["w1"], pp["b1"], pp["w2"], pp["b2"], pp["sel"],
      pp["wf1"], pp["bf1"], pp["wf2"], pp["bf2"],
      pp["wf3"], pp["bf3"], pp["wf4"], pp["bf4"])
    return out.reshape(B, 10)


def init_params(key):
    """Deterministic init mimicking PyTorch defaults (U(-1/sqrt(fan_in), +))."""
    def uniform(k, shape, fan_in):
        bound = 1.0 / math.sqrt(fan_in)
        return jax.random.uniform(k, shape, jnp.float32, -bound, bound)

    ks = jax.random.split(key, 12)
    p = {}
    p["conv1_w"] = uniform(ks[0], (6, 3, 5, 5), 3 * 5 * 5)
    p["conv1_b"] = uniform(ks[1], (6,), 3 * 5 * 5)
    p["conv2_w"] = uniform(ks[2], (16, 6, 5, 5), 6 * 5 * 5)
    p["conv2_b"] = uniform(ks[3], (16,), 6 * 5 * 5)
    p["fc1_w"] = uniform(ks[4], (400, 400), 400)     # [out, in] like torch
    p["fc1_b"] = uniform(ks[5], (400,), 400)
    p["fc2_w"] = uniform(ks[6], (120, 400), 400)
    p["fc2_b"] = uniform(ks[7], (120,), 400)
    p["fc3_w"] = uniform(ks[8], (84, 120), 120)
    p["fc3_b"] = uniform(ks[9], (84,), 120)
    p["fc4_w"] = uniform(ks[10], (10, 84), 84)
    p["fc4_b"] = uniform(ks[11], (10,), 84)
    return p


if __name__ == "__main__":
    key = jax.random.PRNGKey(0)
    k_params, k_x = jax.random.split(key)
    params = init_params(k_params)
    pp = prep_params(params)                         # one-time layout prep
    # input must be 3x32x32 so that 16*5*5 = 400 after the two conv/pool stages
    x = jax.random.normal(k_x, (2, 3, 32, 32), jnp.float32)

    fwd = jax.jit(nonsense_net_forward)
    out = fwd(x, pp)
    jax.block_until_ready(out)
    assert out.shape == (2, 10) and out.dtype == jnp.float32
    print("KERNEL_OK")
</pallas_src>

<mosaic_0001>
module attributes {stable_mosaic.version = 11 : i64} {
  func.func @_nonsense_net_kernel(%arg0: i32, %arg1: memref<1x3x1024xf32, #tpu.memory_space<vmem>>, %arg2: memref<25x6x3xf32, #tpu.memory_space<vmem>>, %arg3: memref<6x1xf32, #tpu.memory_space<vmem>>, %arg4: memref<25x16x6xf32, #tpu.memory_space<vmem>>, %arg5: memref<16x1xf32, #tpu.memory_space<vmem>>, %arg6: memref<529x25xf32, #tpu.memory_space<vmem>>, %arg7: memref<16x25x400xf32, #tpu.memory_space<vmem>>, %arg8: memref<1x400xf32, #tpu.memory_space<vmem>>, %arg9: memref<400x120xf32, #tpu.memory_space<vmem>>, %arg10: memref<1x120xf32, #tpu.memory_space<vmem>>, %arg11: memref<120x84xf32, #tpu.memory_space<vmem>>, %arg12: memref<1x84xf32, #tpu.memory_space<vmem>>, %arg13: memref<84x10xf32, #tpu.memory_space<vmem>>, %arg14: memref<1x10xf32, #tpu.memory_space<vmem>>, %arg15: memref<1x1x10xf32, #tpu.memory_space<vmem>>) attributes {dimension_semantics = [#tpu.dimension_semantics<parallel>], iteration_bounds = array<i64: 2>, scalar_prefetch = 0 : i64, scratch_operands = 0 : i64, tpu.core_type = #tpu.core_type<tc>, window_params = [{transform_indices = @transform_0, window_bounds = array<i64: 1, 3, 1024>}, {pipeline_mode = #tpu.pipeline_mode<synchronous>, transform_indices = @transform_1, window_bounds = array<i64: 25, 6, 3>}, {pipeline_mode = #tpu.pipeline_mode<synchronous>, transform_indices = @transform_2, window_bounds = array<i64: 6, 1>}, {pipeline_mode = #tpu.pipeline_mode<synchronous>, transform_indices = @transform_3, window_bounds = array<i64: 25, 16, 6>}, {pipeline_mode = #tpu.pipeline_mode<synchronous>, transform_indices = @transform_4, window_bounds = array<i64: 16, 1>}, {pipeline_mode = #tpu.pipeline_mode<synchronous>, transform_indices = @transform_5, window_bounds = array<i64: 529, 25>}, {pipeline_mode = #tpu.pipeline_mode<synchronous>, transform_indices = @transform_6, window_bounds = array<i64: 16, 25, 400>}, {pipeline_mode = #tpu.pipeline_mode<synchronous>, transform_indices = @transform_7, window_bounds = array<i64: 1, 400>}, {pipeline_mode = #tpu.pipeline_mode<synchronous>, transform_indices = @transform_8, window_bounds = array<i64: 400, 120>}, {pipeline_mode = #tpu.pipeline_mode<synchronous>, transform_indices = @transform_9, window_bounds = array<i64: 1, 120>}, {pipeline_mode = #tpu.pipeline_mode<synchronous>, transform_indices = @transform_10, window_bounds = array<i64: 120, 84>}, {pipeline_mode = #tpu.pipeline_mode<synchronous>, transform_indices = @transform_11, window_bounds = array<i64: 1, 84>}, {pipeline_mode = #tpu.pipeline_mode<synchronous>, transform_indices = @transform_12, window_bounds = array<i64: 84, 10>}, {pipeline_mode = #tpu.pipeline_mode<synchronous>, transform_indices = @transform_13, window_bounds = array<i64: 1, 10>}, {transform_indices = @transform_14, window_bounds = array<i64: 1, 1, 10>}]} {
    %c0 = arith.constant 0 : index
    %c0_0 = arith.constant 0 : index
    %c0_1 = arith.constant 0 : index
    %0 = vector.load %arg1[%c0, %c0_0, %c0_1] : memref<1x3x1024xf32, #tpu.memory_space<vmem>>, vector<1x3x1024xf32>
    %1 = vector.shape_cast %0 : vector<1x3x1024xf32> to vector<3x1024xf32>
    %cst = arith.constant 0.000000e+00 : f32
    %2 = vector.broadcast %cst : f32 to vector<6x892xf32>
    %c0_2 = arith.constant 0 : index
    %c0_3 = arith.constant 0 : index
    %c0_4 = arith.constant 0 : index
    %3 = vector.load %arg2[%c0_2, %c0_3, %c0_4] : memref<25x6x3xf32, #tpu.memory_space<vmem>>, vector<1x6x3xf32>
    %4 = vector.shape_cast %3 : vector<1x6x3xf32> to vector<6x3xf32>
    %5 = vector.extract_strided_slice %1 {offsets = [0, 0], sizes = [3, 892], strides = [1, 1]} : vector<3x1024xf32> to vector<3x892xf32>
    %cst_5 = arith.constant dense<0.000000e+00> : vector<6x892xf32>
    %6 = tpu.matmul %4, %5, %cst_5 {dimension_numbers = #tpu.dot_dimension_numbers<[1], [0], [0], [1], [0, 0, 1, 1], [], []>} : vector<6x3xf32>, vector<3x892xf32>, vector<6x892xf32> -> vector<6x892xf32>
    %7 = arith.addf %2, %6 : vector<6x892xf32>
    %c1 = arith.constant 1 : index
    %c0_6 = arith.constant 0 : index
    %c0_7 = arith.constant 0 : index
    %8 = vector.load %arg2[%c1, %c0_6, %c0_7] : memref<25x6x3xf32, #tpu.memory_space<vmem>>, vector<1x6x3xf32>
    %9 = vector.shape_cast %8 : vector<1x6x3xf32> to vector<6x3xf32>
    %10 = vector.extract_strided_slice %1 {offsets = [0, 1], sizes = [3, 892], strides = [1, 1]} : vector<3x1024xf32> to vector<3x892xf32>
    %cst_8 = arith.constant dense<0.000000e+00> : vector<6x892xf32>
    %11 = tpu.matmul %9, %10, %cst_8 {dimension_numbers = #tpu.dot_dimension_numbers<[1], [0], [0], [1], [0, 0, 1, 1], [], []>} : vector<6x3xf32>, vector<3x892xf32>, vector<6x892xf32> -> vector<6x892xf32>
    %12 = arith.addf %7, %11 : vector<6x892xf32>
    %c2 = arith.constant 2 : index
    %c0_9 = arith.constant 0 : index
    %c0_10 = arith.constant 0 : index
    %13 = vector.load %arg2[%c2, %c0_9, %c0_10] : memref<25x6x3xf32, #tpu.memory_space<vmem>>, vector<1x6x3xf32>
    %14 = vector.shape_cast %13 : vector<1x6x3xf32> to vector<6x3xf32>
    %15 = vector.extract_strided_slice %1 {offsets = [0, 2], sizes = [3, 892], strides = [1, 1]} : vector<3x1024xf32> to vector<3x892xf32>
    %cst_11 = arith.constant dense<0.000000e+00> : vector<6x892xf32>
    %16 = tpu.matmul %14, %15, %cst_11 {dimension_numbers = #tpu.dot_dimension_numbers<[1], [0], [0], [1], [0, 0, 1, 1], [], []>} : vector<6x3xf32>, vector<3x892xf32>, vector<6x892xf32> -> vector<6x892xf32>
    %17 = arith.addf %12, %16 : vector<6x892xf32>
    %c3 = arith.constant 3 : index
    %c0_12 = arith.constant 0 : index
    %c0_13 = arith.constant 0 : index
    %18 = vector.load %arg2[%c3, %c0_12, %c0_13] : memref<25x6x3xf32, #tpu.memory_space<vmem>>, vector<1x6x3xf32>
    %19 = vector.shape_cast %18 : vector<1x6x3xf32> to vector<6x3xf32>
    %20 = vector.extract_strided_slice %1 {offsets = [0, 3], sizes = [3, 892], strides = [1, 1]} : vector<3x1024xf32> to vector<3x892xf32>
    %cst_14 = arith.constant dense<0.000000e+00> : vector<6x892xf32>
    %21 = tpu.matmul %19, %20, %cst_14 {dimension_numbers = #tpu.dot_dimension_numbers<[1], [0], [0], [1], [0, 0, 1, 1], [], []>} : vector<6x3xf32>, vector<3x892xf32>, vector<6x892xf32> -> vector<6x892xf32>
    %22 = arith.addf %17, %21 : vector<6x892xf32>
    %c4 = arith.constant 4 : index
    %c0_15 = arith.constant 0 : index
    %c0_16 = arith.constant 0 : index
    %23 = vector.load %arg2[%c4, %c0_15, %c0_16] : memref<25x6x3xf32, #tpu.memory_space<vmem>>, vector<1x6x3xf32>
    %24 = vector.shape_cast %23 : vector<1x6x3xf32> to vector<6x3xf32>
    %25 = vector.extract_strided_slice %1 {offsets = [0, 4], sizes = [3, 892], strides = [1, 1]} : vector<3x1024xf32> to vector<3x892xf32>
    %cst_17 = arith.constant dense<0.000000e+00> : vector<6x892xf32>
    %26 = tpu.matmul %24, %25, %cst_17 {dimension_numbers = #tpu.dot_dimension_numbers<[1], [0], [0], [1], [0, 0, 1, 1], [], []>} : vector<6x3xf32>, vector<3x892xf32>, vector<6x892xf32> -> vector<6x892xf32>
    %27 = arith.addf %22, %26 : vector<6x892xf32>
    %c5 = arith.constant 5 : index
    %c0_18 = arith.constant 0 : index
    %c0_19 = arith.constant 0 : index
    %28 = vector.load %arg2[%c5, %c0_18, %c0_19] : memref<25x6x3xf32, #tpu.memory_space<vmem>>, vector<1x6x3xf32>
    %29 = vector.shape_cast %28 : vector<1x6x3xf32> to vector<6x3xf32>
    %30 = vector.extract_strided_slice %1 {offsets = [0, 32], sizes = [3, 892], strides = [1, 1]} : vector<3x1024xf32> to vector<3x892xf32>
    %cst_20 = arith.constant dense<0.000000e+00> : vector<6x892xf32>
    %31 = tpu.matmul %29, %30, %cst_20 {dimension_numbers = #tpu.dot_dimension_numbers<[1], [0], [0], [1], [0, 0, 1, 1], [], []>} : vector<6x3xf32>, vector<3x892xf32>, vector<6x892xf32> -> vector<6x892xf32>
    %32 = arith.addf %27, %31 : vector<6x892xf32>
    %c6 = arith.constant 6 : index
    %c0_21 = arith.constant 0 : index
    %c0_22 = arith.constant 0 : index
    %33 = vector.load %arg2[%c6, %c0_21, %c0_22] : memref<25x6x3xf32, #tpu.memory_space<vmem>>, vector<1x6x3xf32>
    %34 = vector.shape_cast %33 : vector<1x6x3xf32> to vector<6x3xf32>
    %35 = vector.extract_strided_slice %1 {offsets = [0, 33], sizes = [3, 892], strides = [1, 1]} : vector<3x1024xf32> to vector<3x892xf32>
    %cst_23 = arith.constant dense<0.000000e+00> : vector<6x892xf32>
    %36 = tpu.matmul %34, %35, %cst_23 {dimension_numbers = #tpu.dot_dimension_numbers<[1], [0], [0], [1], [0, 0, 1, 1], [], []>} : vector<6x3xf32>, vector<3x892xf32>, vector<6x892xf32> -> vector<6x892xf32>
    %37 = arith.addf %32, %36 : vector<6x892xf32>
    %c7 = arith.constant 7 : index
    %c0_24 = arith.constant 0 : index
    %c0_25 = arith.constant 0 : index
    %38 = vector.load %arg2[%c7, %c0_24, %c0_25] : memref<25x6x3xf32, #tpu.memory_space<vmem>>, vector<1x6x3xf32>
    %39 = vector.shape_cast %38 : vector<1x6x3xf32> to vector<6x3xf32>
    %40 = vector.extract_strided_slice %1 {offsets = [0, 34], sizes = [3, 892], strides = [1, 1]} : vector<3x1024xf32> to vector<3x892xf32>
    %cst_26 = arith.constant dense<0.000000e+00> : vector<6x892xf32>
    %41 = tpu.matmul %39, %40, %cst_26 {dimension_numbers = #tpu.dot_dimension_numbers<[1], [0], [0], [1], [0, 0, 1, 1], [], []>} : vector<6x3xf32>, vector<3x892xf32>, vector<6x892xf32> -> vector<6x892xf32>
    %42 = arith.addf %37, %41 : vector<6x892xf32>
    %c8 = arith.constant 8 : index
    %c0_27 = arith.constant 0 : index
    %c0_28 = arith.constant 0 : index
    %43 = vector.load %arg2[%c8, %c0_27, %c0_28] : memref<25x6x3xf32, #tpu.memory_space<vmem>>, vector<1x6x3xf32>
    %44 = vector.shape_cast %43 : vector<1x6x3xf32> to vector<6x3xf32>
    %45 = vector.extract_strided_slice %1 {offsets = [0, 35], sizes = [3, 892], strides = [1, 1]} : vector<3x1024xf32> to vector<3x892xf32>
    %cst_29 = arith.constant dense<0.000000e+00> : vector<6x892xf32>
    %46 = tpu.matmul %44, %45, %cst_29 {dimension_numbers = #tpu.dot_dimension_numbers<[1], [0], [0], [1], [0, 0, 1, 1], [], []>} : vector<6x3xf32>, vector<3x892xf32>, vector<6x892xf32> -> vector<6x892xf32>
    %47 = arith.addf %42, %46 : vector<6x892xf32>
    %c9 = arith.constant 9 : index
    %c0_30 = arith.constant 0 : index
    %c0_31 = arith.constant 0 : index
    %48 = vector.load %arg2[%c9, %c0_30, %c0_31] : memref<25x6x3xf32, #tpu.memory_space<vmem>>, vector<1x6x3xf32>
    %49 = vector.shape_cast %48 : vector<1x6x3xf32> to vector<6x3xf32>
    %50 = vector.extract_strided_slice %1 {offsets = [0, 36], sizes = [3, 892], strides = [1, 1]} : vector<3x1024xf32> to vector<3x892xf32>
    %cst_32 = arith.constant dense<0.000000e+00> : vector<6x892xf32>
    %51 = tpu.matmul %49, %50, %cst_32 {dimension_numbers = #tpu.dot_dimension_numbers<[1], [0], [0], [1], [0, 0, 1, 1], [], []>} : vector<6x3xf32>, vector<3x892xf32>, vector<6x892xf32> -> vector<6x892xf32>
    %52 = arith.addf %47, %51 : vector<6x892xf32>
    %c10 = arith.constant 10 : index
    %c0_33 = arith.constant 0 : index
    %c0_34 = arith.constant 0 : index
    %53 = vector.load %arg2[%c10, %c0_33, %c0_34] : memref<25x6x3xf32, #tpu.memory_space<vmem>>, vector<1x6x3xf32>
    %54 = vector.shape_cast %53 : vector<1x6x3xf32> to vector<6x3xf32>
    %55 = vector.extract_strided_slice %1 {offsets = [0, 64], sizes = [3, 892], strides = [1, 1]} : vector<3x1024xf32> to vector<3x892xf32>
    %cst_35 = arith.constant dense<0.000000e+00> : vector<6x892xf32>
    %56 = tpu.matmul %54, %55, %cst_35 {dimension_numbers = #tpu.dot_dimension_numbers<[1], [0], [0], [1], [0, 0, 1, 1], [], []>} : vector<6x3xf32>, vector<3x892xf32>, vector<6x892xf32> -> vector<6x892xf32>
    %57 = arith.addf %52, %56 : vector<6x892xf32>
    %c11 = arith.constant 11 : index
    %c0_36 = arith.constant 0 : index
    %c0_37 = arith.constant 0 : index
    %58 = vector.load %arg2[%c11, %c0_36, %c0_37] : memref<25x6x3xf32, #tpu.memory_space<vmem>>, vector<1x6x3xf32>
    %59 = vector.shape_cast %58 : vector<1x6x3xf32> to vector<6x3xf32>
    %60 = vector.extract_strided_slice %1 {offsets = [0, 65], sizes = [3, 892], strides = [1, 1]} : vector<3x1024xf32> to vector<3x892xf32>
    %cst_38 = arith.constant dense<0.000000e+00> : vector<6x892xf32>
    %61 = tpu.matmul %59, %60, %cst_38 {dimension_numbers = #tpu.dot_dimension_numbers<[1], [0], [0], [1], [0, 0, 1, 1], [], []>} : vector<6x3xf32>, vector<3x892xf32>, vector<6x892xf32> -> vector<6x892xf32>
    %62 = arith.addf %57, %61 : vector<6x892xf32>
    %c12 = arith.constant 12 : index
    %c0_39 = arith.constant 0 : index
    %c0_40 = arith.constant 0 : index
    %63 = vector.load %arg2[%c12, %c0_39, %c0_40] : memref<25x6x3xf32, #tpu.memory_space<vmem>>, vector<1x6x3xf32>
    %64 = vector.shape_cast %63 : vector<1x6x3xf32> to vector<6x3xf32>
    %65 = vector.extract_strided_slice %1 {offsets = [0, 66], sizes = [3, 892], strides = [1, 1]} : vector<3x1024xf32> to vector<3x892xf32>
    %cst_41 = arith.constant dense<0.000000e+00> : vector<6x892xf32>
    %66 = tpu.matmul %64, %65, %cst_41 {dimension_numbers = #tpu.dot_dimension_numbers<[1], [0], [0], [1], [0, 0, 1, 1], [], []>} : vector<6x3xf32>, vector<3x892xf32>, vector<6x892xf32> -> vector<6x892xf32>
    %67 = arith.addf %62, %66 : vector<6x892xf32>
    %c13 = arith.constant 13 : index
    %c0_42 = arith.constant 0 : index
    %c0_43 = arith.constant 0 : index
    %68 = vector.load %arg2[%c13, %c0_42, %c0_43] : memref<25x6x3xf32, #tpu.memory_space<vmem>>, vector<1x6x3xf32>
    %69 = vector.shape_cast %68 : vector<1x6x3xf32> to vector<6x3xf32>
    %70 = vector.extract_strided_slice %1 {offsets = [0, 67], sizes = [3, 892], strides = [1, 1]} : vector<3x1024xf32> to vector<3x892xf32>
    %cst_44 = arith.constant dense<0.000000e+00> : vector<6x892xf32>
    %71 = tpu.matmul %69, %70, %cst_44 {dimension_numbers = #tpu.dot_dimension_numbers<[1], [0], [0], [1], [0, 0, 1, 1], [], []>} : vector<6x3xf32>, vector<3x892xf32>, vector<6x892xf32> -> vector<6x892xf32>
    %72 = arith.addf %67, %71 : vector<6x892xf32>
    %c14 = arith.constant 14 : index
    %c0_45 = arith.constant 0 : index
    %c0_46 = arith.constant 0 : index
    %73 = vector.load %arg2[%c14, %c0_45, %c0_46] : memref<25x6x3xf32, #tpu.memory_space<vmem>>, vector<1x6x3xf32>
    %74 = vector.shape_cast %73 : vector<1x6x3xf32> to vector<6x3xf32>
    %75 = vector.extract_strided_slice %1 {offsets = [0, 68], sizes = [3, 892], strides = [1, 1]} : vector<3x1024xf32> to vector<3x892xf32>
    %cst_47 = arith.constant dense<0.000000e+00> : vector<6x892xf32>
    %76 = tpu.matmul %74, %75, %cst_47 {dimension_numbers = #tpu.dot_dimension_numbers<[1], [0], [0], [1], [0, 0, 1, 1], [], []>} : vector<6x3xf32>, vector<3x892xf32>, vector<6x892xf32> -> vector<6x892xf32>
    %77 = arith.addf %72, %76 : vector<6x892xf32>
    %c15 = arith.constant 15 : index
    %c0_48 = arith.constant 0 : index
    %c0_49 = arith.constant 0 : index
    %78 = vector.load %arg2[%c15, %c0_48, %c0_49] : memref<25x6x3xf32, #tpu.memory_space<vmem>>, vector<1x6x3xf32>
    %79 = vector.shape_cast %78 : vector<1x6x3xf32> to vector<6x3xf32>
    %80 = vector.extract_strided_slice %1 {offsets = [0, 96], sizes = [3, 892], strides = [1, 1]} : vector<3x1024xf32> to vector<3x892xf32>
    %cst_50 = arith.constant dense<0.000000e+00> : vector<6x892xf32>
    %81 = tpu.matmul %79, %80, %cst_50 {dimension_numbers = #tpu.dot_dimension_numbers<[1], [0], [0], [1], [0, 0, 1, 1], [], []>} : vector<6x3xf32>, vector<3x892xf32>, vector<6x892xf32> -> vector<6x892xf32>
    %82 = arith.addf %77, %81 : vector<6x892xf32>
    %c16 = arith.constant 16 : index
    %c0_51 = arith.constant 0 : index
    %c0_52 = arith.constant 0 : index
    %83 = vector.load %arg2[%c16, %c0_51, %c0_52] : memref<25x6x3xf32, #tpu.memory_space<vmem>>, vector<1x6x3xf32>
    %84 = vector.shape_cast %83 : vector<1x6x3xf32> to vector<6x3xf32>
    %85 = vector.extract_strided_slice %1 {offsets = [0, 97], sizes = [3, 892], strides = [1, 1]} : vector<3x1024xf32> to vector<3x892xf32>
    %cst_53 = arith.constant dense<0.000000e+00> : vector<6x892xf32>
    %86 = tpu.matmul %84, %85, %cst_53 {dimension_numbers = #tpu.dot_dimension_numbers<[1], [0], [0], [1], [0, 0, 1, 1], [], []>} : vector<6x3xf32>, vector<3x892xf32>, vector<6x892xf32> -> vector<6x892xf32>
    %87 = arith.addf %82, %86 : vector<6x892xf32>
    %c17 = arith.constant 17 : index
    %c0_54 = arith.constant 0 : index
    %c0_55 = arith.constant 0 : index
    %88 = vector.load %arg2[%c17, %c0_54, %c0_55] : memref<25x6x3xf32, #tpu.memory_space<vmem>>, vector<1x6x3xf32>
    %89 = vector.shape_cast %88 : vector<1x6x3xf32> to vector<6x3xf32>
    %90 = vector.extract_strided_slice %1 {offsets = [0, 98], sizes = [3, 892], strides = [1, 1]} : vector<3x1024xf32> to vector<3x892xf32>
    %cst_56 = arith.constant dense<0.000000e+00> : vector<6x892xf32>
    %91 = tpu.matmul %89, %90, %cst_56 {dimension_numbers = #tpu.dot_dimension_numbers<[1], [0], [0], [1], [0, 0, 1, 1], [], []>} : vector<6x3xf32>, vector<3x892xf32>, vector<6x892xf32> -> vector<6x892xf32>
    %92 = arith.addf %87, %91 : vector<6x892xf32>
    %c18 = arith.constant 18 : index
    %c0_57 = arith.constant 0 : index
    %c0_58 = arith.constant 0 : index
    %93 = vector.load %arg2[%c18, %c0_57, %c0_58] : memref<25x6x3xf32, #tpu.memory_space<vmem>>, vector<1x6x3xf32>
    %94 = vector.shape_cast %93 : vector<1x6x3xf32> to vector<6x3xf32>
    %95 = vector.extract_strided_slice %1 {offsets = [0, 99], sizes = [3, 892], strides = [1, 1]} : vector<3x1024xf32> to vector<3x892xf32>
    %cst_59 = arith.constant dense<0.000000e+00> : vector<6x892xf32>
    %96 = tpu.matmul %94, %95, %cst_59 {dimension_numbers = #tpu.dot_dimension_numbers<[1], [0], [0], [1], [0, 0, 1, 1], [], []>} : vector<6x3xf32>, vector<3x892xf32>, vector<6x892xf32> -> vector<6x892xf32>
    %97 = arith.addf %92, %96 : vector<6x892xf32>
    %c19 = arith.constant 19 : index
    %c0_60 = arith.constant 0 : index
    %c0_61 = arith.constant 0 : index
    %98 = vector.load %arg2[%c19, %c0_60, %c0_61] : memref<25x6x3xf32, #tpu.memory_space<vmem>>, vector<1x6x3xf32>
    %99 = vector.shape_cast %98 : vector<1x6x3xf32> to vector<6x3xf32>
    %100 = vector.extract_strided_slice %1 {offsets = [0, 100], sizes = [3, 892], strides = [1, 1]} : vector<3x1024xf32> to vector<3x892xf32>
    %cst_62 = arith.constant dense<0.000000e+00> : vector<6x892xf32>
    %101 = tpu.matmul %99, %100, %cst_62 {dimension_numbers = #tpu.dot_dimension_numbers<[1], [0], [0], [1], [0, 0, 1, 1], [], []>} : vector<6x3xf32>, vector<3x892xf32>, vector<6x892xf32> -> vector<6x892xf32>
    %102 = arith.addf %97, %101 : vector<6x892xf32>
    %c20 = arith.constant 20 : index
    %c0_63 = arith.constant 0 : index
    %c0_64 = arith.constant 0 : index
    %103 = vector.load %arg2[%c20, %c0_63, %c0_64] : memref<25x6x3xf32, #tpu.memory_space<vmem>>, vector<1x6x3xf32>
    %104 = vector.shape_cast %103 : vector<1x6x3xf32> to vector<6x3xf32>
    %105 = vector.extract_strided_slice %1 {offsets = [0, 128], sizes = [3, 892], strides = [1, 1]} : vector<3x1024xf32> to vector<3x892xf32>
    %cst_65 = arith.constant dense<0.000000e+00> : vector<6x892xf32>
    %106 = tpu.matmul %104, %105, %cst_65 {dimension_numbers = #tpu.dot_dimension_numbers<[1], [0], [0], [1], [0, 0, 1, 1], [], []>} : vector<6x3xf32>, vector<3x892xf32>, vector<6x892xf32> -> vector<6x892xf32>
    %107 = arith.addf %102, %106 : vector<6x892xf32>
    %c21 = arith.constant 21 : index
    %c0_66 = arith.constant 0 : index
    %c0_67 = arith.constant 0 : index
    %108 = vector.load %arg2[%c21, %c0_66, %c0_67] : memref<25x6x3xf32, #tpu.memory_space<vmem>>, vector<1x6x3xf32>
    %109 = vector.shape_cast %108 : vector<1x6x3xf32> to vector<6x3xf32>
    %110 = vector.extract_strided_slice %1 {offsets = [0, 129], sizes = [3, 892], strides = [1, 1]} : vector<3x1024xf32> to vector<3x892xf32>
    %cst_68 = arith.constant dense<0.000000e+00> : vector<6x892xf32>
    %111 = tpu.matmul %109, %110, %cst_68 {dimension_numbers = #tpu.dot_dimension_numbers<[1], [0], [0], [1], [0, 0, 1, 1], [], []>} : vector<6x3xf32>, vector<3x892xf32>, vector<6x892xf32> -> vector<6x892xf32>
    %112 = arith.addf %107, %111 : vector<6x892xf32>
    %c22 = arith.constant 22 : index
    %c0_69 = arith.constant 0 : index
    %c0_70 = arith.constant 0 : index
    %113 = vector.load %arg2[%c22, %c0_69, %c0_70] : memref<25x6x3xf32, #tpu.memory_space<vmem>>, vector<1x6x3xf32>
    %114 = vector.shape_cast %113 : vector<1x6x3xf32> to vector<6x3xf32>
    %115 = vector.extract_strided_slice %1 {offsets = [0, 130], sizes = [3, 892], strides = [1, 1]} : vector<3x1024xf32> to vector<3x892xf32>
    %cst_71 = arith.constant dense<0.000000e+00> : vector<6x892xf32>
    %116 = tpu.matmul %114, %115, %cst_71 {dimension_numbers = #tpu.dot_dimension_numbers<[1], [0], [0], [1], [0, 0, 1, 1], [], []>} : vector<6x3xf32>, vector<3x892xf32>, vector<6x892xf32> -> vector<6x892xf32>
    %117 = arith.addf %112, %116 : vector<6x892xf32>
    %c23 = arith.constant 23 : index
    %c0_72 = arith.constant 0 : index
    %c0_73 = arith.constant 0 : index
    %118 = vector.load %arg2[%c23, %c0_72, %c0_73] : memref<25x6x3xf32, #tpu.memory_space<vmem>>, vector<1x6x3xf32>
    %119 = vector.shape_cast %118 : vector<1x6x3xf32> to vector<6x3xf32>
    %120 = vector.extract_strided_slice %1 {offsets = [0, 131], sizes = [3, 892], strides = [1, 1]} : vector<3x1024xf32> to vector<3x892xf32>
    %cst_74 = arith.constant dense<0.000000e+00> : vector<6x892xf32>
    %121 = tpu.matmul %119, %120, %cst_74 {dimension_numbers = #tpu.dot_dimension_numbers<[1], [0], [0], [1], [0, 0, 1, 1], [], []>} : vector<6x3xf32>, vector<3x892xf32>, vector<6x892xf32> -> vector<6x892xf32>
    %122 = arith.addf %117, %121 : vector<6x892xf32>
    %c24 = arith.constant 24 : index
    %c0_75 = arith.constant 0 : index
    %c0_76 = arith.constant 0 : index
    %123 = vector.load %arg2[%c24, %c0_75, %c0_76] : memref<25x6x3xf32, #tpu.memory_space<vmem>>, vector<1x6x3xf32>
    %124 = vector.shape_cast %123 : vector<1x6x3xf32> to vector<6x3xf32>
    %125 = vector.extract_strided_slice %1 {offsets = [0, 132], sizes = [3, 892], strides = [1, 1]} : vector<3x1024xf32> to vector<3x892xf32>
    %cst_77 = arith.constant dense<0.000000e+00> : vector<6x892xf32>
    %126 = tpu.matmul %124, %125, %cst_77 {dimension_numbers = #tpu.dot_dimension_numbers<[1], [0], [0], [1], [0, 0, 1, 1], [], []>} : vector<6x3xf32>, vector<3x892xf32>, vector<6x892xf32> -> vector<6x892xf32>
    %127 = arith.addf %122, %126 : vector<6x892xf32>
    %c0_78 = arith.constant 0 : index
    %c0_79 = arith.constant 0 : index
    %128 = vector.load %arg3[%c0_78, %c0_79] : memref<6x1xf32, #tpu.memory_space<vmem>>, vector<6x1xf32>
    %129 = vector.broadcast %128 : vector<6x1xf32> to vector<6x892xf32>
    %130 = arith.addf %127, %129 : vector<6x892xf32>
    %cst_80 = arith.constant 0.000000e+00 : f32
    %131 = vector.broadcast %cst_80 : f32 to vector<6x892xf32>
    %132 = arith.maximumf %130, %131 : vector<6x892xf32>
    %133 = vector.extract_strided_slice %132 {offsets = [0, 0], sizes = [6, 859], strides = [1, 1]} : vector<6x892xf32> to vector<6x859xf32>
    %134 = vector.extract_strided_slice %132 {offsets = [0, 1], sizes = [6, 859], strides = [1, 1]} : vector<6x892xf32> to vector<6x859xf32>
    %135 = arith.maximumf %133, %134 : vector<6x859xf32>
    %136 = vector.extract_strided_slice %132 {offsets = [0, 32], sizes = [6, 859], strides = [1, 1]} : vector<6x892xf32> to vector<6x859xf32>
    %137 = vector.extract_strided_slice %132 {offsets = [0, 33], sizes = [6, 859], strides = [1, 1]} : vector<6x892xf32> to vector<6x859xf32>
    %138 = arith.maximumf %136, %137 : vector<6x859xf32>
    %139 = arith.maximumf %135, %138 : vector<6x859xf32>
    %cst_81 = arith.constant 0.000000e+00 : f32
    %140 = vector.broadcast %cst_81 : f32 to vector<16x595xf32>
    %c0_82 = arith.constant 0 : index
    %c0_83 = arith.constant 0 : index
    %c0_84 = arith.constant 0 : index
    %141 = vector.load %arg4[%c0_82, %c0_83, %c0_84] : memref<25x16x6xf32, #tpu.memory_space<vmem>>, vector<1x16x6xf32>
    %142 = vector.shape_cast %141 : vector<1x16x6xf32> to vector<16x6xf32>
    %143 = vector.extract_strided_slice %139 {offsets = [0, 0], sizes = [6, 595], strides = [1, 1]} : vector<6x859xf32> to vector<6x595xf32>
    %cst_85 = arith.constant dense<0.000000e+00> : vector<16x595xf32>
    %144 = tpu.matmul %142, %143, %cst_85 {dimension_numbers = #tpu.dot_dimension_numbers<[1], [0], [0], [1], [0, 0, 1, 1], [], []>} : vector<16x6xf32>, vector<6x595xf32>, vector<16x595xf32> -> vector<16x595xf32>
    %145 = arith.addf %140, %144 : vector<16x595xf32>
    %c1_86 = arith.constant 1 : index
    %c0_87 = arith.constant 0 : index
    %c0_88 = arith.constant 0 : index
    %146 = vector.load %arg4[%c1_86, %c0_87, %c0_88] : memref<25x16x6xf32, #tpu.memory_space<vmem>>, vector<1x16x6xf32>
    %147 = vector.shape_cast %146 : vector<1x16x6xf32> to vector<16x6xf32>
    %148 = vector.extract_strided_slice %139 {offsets = [0, 2], sizes = [6, 595], strides = [1, 1]} : vector<6x859xf32> to vector<6x595xf32>
    %cst_89 = arith.constant dense<0.000000e+00> : vector<16x595xf32>
    %149 = tpu.matmul %147, %148, %cst_89 {dimension_numbers = #tpu.dot_dimension_numbers<[1], [0], [0], [1], [0, 0, 1, 1], [], []>} : vector<16x6xf32>, vector<6x595xf32>, vector<16x595xf32> -> vector<16x595xf32>
    %150 = arith.addf %145, %149 : vector<16x595xf32>
    %c2_90 = arith.constant 2 : index
    %c0_91 = arith.constant 0 : index
    %c0_92 = arith.constant 0 : index
    %151 = vector.load %arg4[%c2_90, %c0_91, %c0_92] : memref<25x16x6xf32, #tpu.memory_space<vmem>>, vector<1x16x6xf32>
    %152 = vector.shape_cast %151 : vector<1x16x6xf32> to vector<16x6xf32>
    %153 = vector.extract_strided_slice %139 {offsets = [0, 4], sizes = [6, 595], strides = [1, 1]} : vector<6x859xf32> to vector<6x595xf32>
    %cst_93 = arith.constant dense<0.000000e+00> : vector<16x595xf32>
    %154 = tpu.matmul %152, %153, %cst_93 {dimension_numbers = #tpu.dot_dimension_numbers<[1], [0], [0], [1], [0, 0, 1, 1], [], []>} : vector<16x6xf32>, vector<6x595xf32>, vector<16x595xf32> -> vector<16x595xf32>
    %155 = arith.addf %150, %154 : vector<16x595xf32>
    %c3_94 = arith.constant 3 : index
    %c0_95 = arith.constant 0 : index
    %c0_96 = arith.constant 0 : index
    %156 = vector.load %arg4[%c3_94, %c0_95, %c0_96] : memref<25x16x6xf32, #tpu.memory_space<vmem>>, vector<1x16x6xf32>
    %157 = vector.shape_cast %156 : vector<1x16x6xf32> to vector<16x6xf32>
    %158 = vector.extract_strided_slice %139 {offsets = [0, 6], sizes = [6, 595], strides = [1, 1]} : vector<6x859xf32> to vector<6x595xf32>
    %cst_97 = arith.constant dense<0.000000e+00> : vector<16x595xf32>
    %159 = tpu.matmul %157, %158, %cst_97 {dimension_numbers = #tpu.dot_dimension_numbers<[1], [0], [0], [1], [0, 0, 1, 1], [], []>} : vector<16x6xf32>, vector<6x595xf32>, vector<16x595xf32> -> vector<16x595xf32>
    %160 = arith.addf %155, %159 : vector<16x595xf32>
    %c4_98 = arith.constant 4 : index
    %c0_99 = arith.constant 0 : index
    %c0_100 = arith.constant 0 : index
    %161 = vector.load %arg4[%c4_98, %c0_99, %c0_100] : memref<25x16x6xf32, #tpu.memory_space<vmem>>, vector<1x16x6xf32>
    %162 = vector.shape_cast %161 : vector<1x16x6xf32> to vector<16x6xf32>
    %163 = vector.extract_strided_slice %139 {offsets = [0, 8], sizes = [6, 595], strides = [1, 1]} : vector<6x859xf32> to vector<6x595xf32>
    %cst_101 = arith.constant dense<0.000000e+00> : vector<16x595xf32>
    %164 = tpu.matmul %162, %163, %cst_101 {dimension_numbers = #tpu.dot_dimension_numbers<[1], [0], [0], [1], [0, 0, 1, 1], [], []>} : vector<16x6xf32>, vector<6x595xf32>, vector<16x595xf32> -> vector<16x595xf32>
    %165 = arith.addf %160, %164 : vector<16x595xf32>
    %c5_102 = arith.constant 5 : index
    %c0_103 = arith.constant 0 : index
    %c0_104 = arith.constant 0 : index
    %166 = vector.load %arg4[%c5_102, %c0_103, %c0_104] : memref<25x16x6xf32, #tpu.memory_space<vmem>>, vector<1x16x6xf32>
    %167 = vector.shape_cast %166 : vector<1x16x6xf32> to vector<16x6xf32>
    %168 = vector.extract_strided_slice %139 {offsets = [0, 64], sizes = [6, 595], strides = [1, 1]} : vector<6x859xf32> to vector<6x595xf32>
    %cst_105 = arith.constant dense<0.000000e+00> : vector<16x595xf32>
    %169 = tpu.matmul %167, %168, %cst_105 {dimension_numbers = #tpu.dot_dimension_numbers<[1], [0], [0], [1], [0, 0, 1, 1], [], []>} : vector<16x6xf32>, vector<6x595xf32>, vector<16x595xf32> -> vector<16x595xf32>
    %170 = arith.addf %165, %169 : vector<16x595xf32>
    %c6_106 = arith.constant 6 : index
    %c0_107 = arith.constant 0 : index
    %c0_108 = arith.constant 0 : index
    %171 = vector.load %arg4[%c6_106, %c0_107, %c0_108] : memref<25x16x6xf32, #tpu.memory_space<vmem>>, vector<1x16x6xf32>
    %172 = vector.shape_cast %171 : vector<1x16x6xf32> to vector<16x6xf32>
    %173 = vector.extract_strided_slice %139 {offsets = [0, 66], sizes = [6, 595], strides = [1, 1]} : vector<6x859xf32> to vector<6x595xf32>
    %cst_109 = arith.constant dense<0.000000e+00> : vector<16x595xf32>
    %174 = tpu.matmul %172, %173, %cst_109 {dimension_numbers = #tpu.dot_dimension_numbers<[1], [0], [0], [1], [0, 0, 1, 1], [], []>} : vector<16x6xf32>, vector<6x595xf32>, vector<16x595xf32> -> vector<16x595xf32>
    %175 = arith.addf %170, %174 : vector<16x595xf32>
    %c7_110 = arith.constant 7 : index
    %c0_111 = arith.constant 0 : index
    %c0_112 = arith.constant 0 : index
    %176 = vector.load %arg4[%c7_110, %c0_111, %c0_112] : memref<25x16x6xf32, #tpu.memory_space<vmem>>, vector<1x16x6xf32>
    %177 = vector.shape_cast %176 : vector<1x16x6xf32> to vector<16x6xf32>
    %178 = vector.extract_strided_slice %139 {offsets = [0, 68], sizes = [6, 595], strides = [1, 1]} : vector<6x859xf32> to vector<6x595xf32>
    %cst_113 = arith.constant dense<0.000000e+00> : vector<16x595xf32>
    %179 = tpu.matmul %177, %178, %cst_113 {dimension_numbers = #tpu.dot_dimension_numbers<[1], [0], [0], [1], [0, 0, 1, 1], [], []>} : vector<16x6xf32>, vector<6x595xf32>, vector<16x595xf32> -> vector<16x595xf32>
    %180 = arith.addf %175, %179 : vector<16x595xf32>
    %c8_114 = arith.constant 8 : index
    %c0_115 = arith.constant 0 : index
    %c0_116 = arith.constant 0 : index
    %181 = vector.load %arg4[%c8_114, %c0_115, %c0_116] : memref<25x16x6xf32, #tpu.memory_space<vmem>>, vector<1x16x6xf32>
    %182 = vector.shape_cast %181 : vector<1x16x6xf32> to vector<16x6xf32>
    %183 = vector.extract_strided_slice %139 {offsets = [0, 70], sizes = [6, 595], strides = [1, 1]} : vector<6x859xf32> to vector<6x595xf32>
    %cst_117 = arith.constant dense<0.000000e+00> : vector<16x595xf32>
    %184 = tpu.matmul %182, %183, %cst_117 {dimension_numbers = #tpu.dot_dimension_numbers<[1], [0], [0], [1], [0, 0, 1, 1], [], []>} : vector<16x6xf32>, vector<6x595xf32>, vector<16x595xf32> -> vector<16x595xf32>
    %185 = arith.addf %180, %184 : vector<16x595xf32>
    %c9_118 = arith.constant 9 : index
    %c0_119 = arith.constant 0 : index
    %c0_120 = arith.constant 0 : index
    %186 = vector.load %arg4[%c9_118, %c0_119, %c0_120] : memref<25x16x6xf32, #tpu.memory_space<vmem>>, vector<1x16x6xf32>
    %187 = vector.shape_cast %186 : vector<1x16x6xf32> to vector<16x6xf32>
    %188 = vector.extract_strided_slice %139 {offsets = [0, 72], sizes = [6, 595], strides = [1, 1]} : vector<6x859xf32> to vector<6x595xf32>
    %cst_121 = arith.constant dense<0.000000e+00> : vector<16x595xf32>
    %189 = tpu.matmul %187, %188, %cst_121 {dimension_numbers = #tpu.dot_dimension_numbers<[1], [0], [0], [1], [0, 0, 1, 1], [], []>} : vector<16x6xf32>, vector<6x595xf32>, vector<16x595xf32> -> vector<16x595xf32>
    %190 = arith.addf %185, %189 : vector<16x595xf32>
    %c10_122 = arith.constant 10 : index
    %c0_123 = arith.constant 0 : index
    %c0_124 = arith.constant 0 : index
    %191 = vector.load %arg4[%c10_122, %c0_123, %c0_124] : memref<25x16x6xf32, #tpu.memory_space<vmem>>, vector<1x16x6xf32>
    %192 = vector.shape_cast %191 : vector<1x16x6xf32> to vector<16x6xf32>
    %193 = vector.extract_strided_slice %139 {offsets = [0, 128], sizes = [6, 595], strides = [1, 1]} : vector<6x859xf32> to vector<6x595xf32>
    %cst_125 = arith.constant dense<0.000000e+00> : vector<16x595xf32>
    %194 = tpu.matmul %192, %193, %cst_125 {dimension_numbers = #tpu.dot_dimension_numbers<[1], [0], [0], [1], [0, 0, 1, 1], [], []>} : vector<16x6xf32>, vector<6x595xf32>, vector<16x595xf32> -> vector<16x595xf32>
    %195 = arith.addf %190, %194 : vector<16x595xf32>
    %c11_126 = arith.constant 11 : index
    %c0_127 = arith.constant 0 : index
    %c0_128 = arith.constant 0 : index
    %196 = vector.load %arg4[%c11_126, %c0_127, %c0_128] : memref<25x16x6xf32, #tpu.memory_space<vmem>>, vector<1x16x6xf32>
    %197 = vector.shape_cast %196 : vector<1x16x6xf32> to vector<16x6xf32>
    %198 = vector.extract_strided_slice %139 {offsets = [0, 130], sizes = [6, 595], strides = [1, 1]} : vector<6x859xf32> to vector<6x595xf32>
    %cst_129 = arith.constant dense<0.000000e+00> : vector<16x595xf32>
    %199 = tpu.matmul %197, %198, %cst_129 {dimension_numbers = #tpu.dot_dimension_numbers<[1], [0], [0], [1], [0, 0, 1, 1], [], []>} : vector<16x6xf32>, vector<6x595xf32>, vector<16x595xf32> -> vector<16x595xf32>
    %200 = arith.addf %195, %199 : vector<16x595xf32>
    %c12_130 = arith.constant 12 : index
    %c0_131 = arith.constant 0 : index
    %c0_132 = arith.constant 0 : index
    %201 = vector.load %arg4[%c12_130, %c0_131, %c0_132] : memref<25x16x6xf32, #tpu.memory_space<vmem>>, vector<1x16x6xf32>
    %202 = vector.shape_cast %201 : vector<1x16x6xf32> to vector<16x6xf32>
    %203 = vector.extract_strided_slice %139 {offsets = [0, 132], sizes = [6, 595], strides = [1, 1]} : vector<6x859xf32> to vector<6x595xf32>
    %cst_133 = arith.constant dense<0.000000e+00> : vector<16x595xf32>
    %204 = tpu.matmul %202, %203, %cst_133 {dimension_numbers = #tpu.dot_dimension_numbers<[1], [0], [0], [1], [0, 0, 1, 1], [], []>} : vector<16x6xf32>, vector<6x595xf32>, vector<16x595xf32> -> vector<16x595xf32>
    %205 = arith.addf %200, %204 : vector<16x595xf32>
    %c13_134 = arith.constant 13 : index
    %c0_135 = arith.constant 0 : index
    %c0_136 = arith.constant 0 : index
    %206 = vector.load %arg4[%c13_134, %c0_135, %c0_136] : memref<25x16x6xf32, #tpu.memory_space<vmem>>, vector<1x16x6xf32>
    %207 = vector.shape_cast %206 : vector<1x16x6xf32> to vector<16x6xf32>
    %208 = vector.extract_strided_slice %139 {offsets = [0, 134], sizes = [6, 595], strides = [1, 1]} : vector<6x859xf32> to vector<6x595xf32>
    %cst_137 = arith.constant dense<0.000000e+00> : vector<16x595xf32>
    %209 = tpu.matmul %207, %208, %cst_137 {dimension_numbers = #tpu.dot_dimension_numbers<[1], [0], [0], [1], [0, 0, 1, 1], [], []>} : vector<16x6xf32>, vector<6x595xf32>, vector<16x595xf32> -> vector<16x595xf32>
    %210 = arith.addf %205, %209 : vector<16x595xf32>
    %c14_138 = arith.constant 14 : index
    %c0_139 = arith.constant 0 : index
    %c0_140 = arith.constant 0 : index
    %211 = vector.load %arg4[%c14_138, %c0_139, %c0_140] : memref<25x16x6xf32, #tpu.memory_space<vmem>>, vector<1x16x6xf32>
    %212 = vector.shape_cast %211 : vector<1x16x6xf32> to vector<16x6xf32>
    %213 = vector.extract_strided_slice %139 {offsets = [0, 136], sizes = [6, 595], strides = [1, 1]} : vector<6x859xf32> to vector<6x595xf32>
    %cst_141 = arith.constant dense<0.000000e+00> : vector<16x595xf32>
    %214 = tpu.matmul %212, %213, %cst_141 {dimension_numbers = #tpu.dot_dimension_numbers<[1], [0], [0], [1], [0, 0, 1, 1], [], []>} : vector<16x6xf32>, vector<6x595xf32>, vector<16x595xf32> -> vector<16x595xf32>
    %215 = arith.addf %210, %214 : vector<16x595xf32>
    %c15_142 = arith.constant 15 : index
    %c0_143 = arith.constant 0 : index
    %c0_144 = arith.constant 0 : index
    %216 = vector.load %arg4[%c15_142, %c0_143, %c0_144] : memref<25x16x6xf32, #tpu.memory_space<vmem>>, vector<1x16x6xf32>
    %217 = vector.shape_cast %216 : vector<1x16x6xf32> to vector<16x6xf32>
    %218 = vector.extract_strided_slice %139 {offsets = [0, 192], sizes = [6, 595], strides = [1, 1]} : vector<6x859xf32> to vector<6x595xf32>
    %cst_145 = arith.constant dense<0.000000e+00> : vector<16x595xf32>
    %219 = tpu.matmul %217, %218, %cst_145 {dimension_numbers = #tpu.dot_dimension_numbers<[1], [0], [0], [1], [0, 0, 1, 1], [], []>} : vector<16x6xf32>, vector<6x595xf32>, vector<16x595xf32> -> vector<16x595xf32>
    %220 = arith.addf %215, %219 : vector<16x595xf32>
    %c16_146 = arith.constant 16 : index
    %c0_147 = arith.constant 0 : index
    %c0_148 = arith.constant 0 : index
    %221 = vector.load %arg4[%c16_146, %c0_147, %c0_148] : memref<25x16x6xf32, #tpu.memory_space<vmem>>, vector<1x16x6xf32>
    %222 = vector.shape_cast %221 : vector<1x16x6xf32> to vector<16x6xf32>
    %223 = vector.extract_strided_slice %139 {offsets = [0, 194], sizes = [6, 595], strides = [1, 1]} : vector<6x859xf32> to vector<6x595xf32>
    %cst_149 = arith.constant dense<0.000000e+00> : vector<16x595xf32>
    %224 = tpu.matmul %222, %223, %cst_149 {dimension_numbers = #tpu.dot_dimension_numbers<[1], [0], [0], [1], [0, 0, 1, 1], [], []>} : vector<16x6xf32>, vector<6x595xf32>, vector<16x595xf32> -> vector<16x595xf32>
    %225 = arith.addf %220, %224 : vector<16x595xf32>
    %c17_150 = arith.constant 17 : index
    %c0_151 = arith.constant 0 : index
    %c0_152 = arith.constant 0 : index
    %226 = vector.load %arg4[%c17_150, %c0_151, %c0_152] : memref<25x16x6xf32, #tpu.memory_space<vmem>>, vector<1x16x6xf32>
    %227 = vector.shape_cast %226 : vector<1x16x6xf32> to vector<16x6xf32>
    %228 = vector.extract_strided_slice %139 {offsets = [0, 196], sizes = [6, 595], strides = [1, 1]} : vector<6x859xf32> to vector<6x595xf32>
    %cst_153 = arith.constant dense<0.000000e+00> : vector<16x595xf32>
    %229 = tpu.matmul %227, %228, %cst_153 {dimension_numbers = #tpu.dot_dimension_numbers<[1], [0], [0], [1], [0, 0, 1, 1], [], []>} : vector<16x6xf32>, vector<6x595xf32>, vector<16x595xf32> -> vector<16x595xf32>
    %230 = arith.addf %225, %229 : vector<16x595xf32>
    %c18_154 = arith.constant 18 : index
    %c0_155 = arith.constant 0 : index
    %c0_156 = arith.constant 0 : index
    %231 = vector.load %arg4[%c18_154, %c0_155, %c0_156] : memref<25x16x6xf32, #tpu.memory_space<vmem>>, vector<1x16x6xf32>
    %232 = vector.shape_cast %231 : vector<1x16x6xf32> to vector<16x6xf32>
    %233 = vector.extract_strided_slice %139 {offsets = [0, 198], sizes = [6, 595], strides = [1, 1]} : vector<6x859xf32> to vector<6x595xf32>
    %cst_157 = arith.constant dense<0.000000e+00> : vector<16x595xf32>
    %234 = tpu.matmul %232, %233, %cst_157 {dimension_numbers = #tpu.dot_dimension_numbers<[1], [0], [0], [1], [0, 0, 1, 1], [], []>} : vector<16x6xf32>, vector<6x595xf32>, vector<16x595xf32> -> vector<16x595xf32>
    %235 = arith.addf %230, %234 : vector<16x595xf32>
    %c19_158 = arith.constant 19 : index
    %c0_159 = arith.constant 0 : index
    %c0_160 = arith.constant 0 : index
    %236 = vector.load %arg4[%c19_158, %c0_159, %c0_160] : memref<25x16x6xf32, #tpu.memory_space<vmem>>, vector<1x16x6xf32>
    %237 = vector.shape_cast %236 : vector<1x16x6xf32> to vector<16x6xf32>
    %238 = vector.extract_strided_slice %139 {offsets = [0, 200], sizes = [6, 595], strides = [1, 1]} : vector<6x859xf32> to vector<6x595xf32>
    %cst_161 = arith.constant dense<0.000000e+00> : vector<16x595xf32>
    %239 = tpu.matmul %237, %238, %cst_161 {dimension_numbers = #tpu.dot_dimension_numbers<[1], [0], [0], [1], [0, 0, 1, 1], [], []>} : vector<16x6xf32>, vector<6x595xf32>, vector<16x595xf32> -> vector<16x595xf32>
    %240 = arith.addf %235, %239 : vector<16x595xf32>
    %c20_162 = arith.constant 20 : index
    %c0_163 = arith.constant 0 : index
    %c0_164 = arith.constant 0 : index
    %241 = vector.load %arg4[%c20_162, %c0_163, %c0_164] : memref<25x16x6xf32, #tpu.memory_space<vmem>>, vector<1x16x6xf32>
    %242 = vector.shape_cast %241 : vector<1x16x6xf32> to vector<16x6xf32>
    %243 = vector.extract_strided_slice %139 {offsets = [0, 256], sizes = [6, 595], strides = [1, 1]} : vector<6x859xf32> to vector<6x595xf32>
    %cst_165 = arith.constant dense<0.000000e+00> : vector<16x595xf32>
    %244 = tpu.matmul %242, %243, %cst_165 {dimension_numbers = #tpu.dot_dimension_numbers<[1], [0], [0], [1], [0, 0, 1, 1], [], []>} : vector<16x6xf32>, vector<6x595xf32>, vector<16x595xf32> -> vector<16x595xf32>
    %245 = arith.addf %240, %244 : vector<16x595xf32>
    %c21_166 = arith.constant 21 : index
    %c0_167 = arith.constant 0 : index
    %c0_168 = arith.constant 0 : index
    %246 = vector.load %arg4[%c21_166, %c0_167, %c0_168] : memref<25x16x6xf32, #tpu.memory_space<vmem>>, vector<1x16x6xf32>
    %247 = vector.shape_cast %246 : vector<1x16x6xf32> to vector<16x6xf32>
    %248 = vector.extract_strided_slice %139 {offsets = [0, 258], sizes = [6, 595], strides = [1, 1]} : vector<6x859xf32> to vector<6x595xf32>
    %cst_169 = arith.constant dense<0.000000e+00> : vector<16x595xf32>
    %249 = tpu.matmul %247, %248, %cst_169 {dimension_numbers = #tpu.dot_dimension_numbers<[1], [0], [0], [1], [0, 0, 1, 1], [], []>} : vector<16x6xf32>, vector<6x595xf32>, vector<16x595xf32> -> vector<16x595xf32>
    %250 = arith.addf %245, %249 : vector<16x595xf32>
    %c22_170 = arith.constant 22 : index
    %c0_171 = arith.constant 0 : index
    %c0_172 = arith.constant 0 : index
    %251 = vector.load %arg4[%c22_170, %c0_171, %c0_172] : memref<25x16x6xf32, #tpu.memory_space<vmem>>, vector<1x16x6xf32>
    %252 = vector.shape_cast %251 : vector<1x16x6xf32> to vector<16x6xf32>
    %253 = vector.extract_strided_slice %139 {offsets = [0, 260], sizes = [6, 595], strides = [1, 1]} : vector<6x859xf32> to vector<6x595xf32>
    %cst_173 = arith.constant dense<0.000000e+00> : vector<16x595xf32>
    %254 = tpu.matmul %252, %253, %cst_173 {dimension_numbers = #tpu.dot_dimension_numbers<[1], [0], [0], [1], [0, 0, 1, 1], [], []>} : vector<16x6xf32>, vector<6x595xf32>, vector<16x595xf32> -> vector<16x595xf32>
    %255 = arith.addf %250, %254 : vector<16x595xf32>
    %c23_174 = arith.constant 23 : index
    %c0_175 = arith.constant 0 : index
    %c0_176 = arith.constant 0 : index
    %256 = vector.load %arg4[%c23_174, %c0_175, %c0_176] : memref<25x16x6xf32, #tpu.memory_space<vmem>>, vector<1x16x6xf32>
    %257 = vector.shape_cast %256 : vector<1x16x6xf32> to vector<16x6xf32>
    %258 = vector.extract_strided_slice %139 {offsets = [0, 262], sizes = [6, 595], strides = [1, 1]} : vector<6x859xf32> to vector<6x595xf32>
    %cst_177 = arith.constant dense<0.000000e+00> : vector<16x595xf32>
    %259 = tpu.matmul %257, %258, %cst_177 {dimension_numbers = #tpu.dot_dimension_numbers<[1], [0], [0], [1], [0, 0, 1, 1], [], []>} : vector<16x6xf32>, vector<6x595xf32>, vector<16x595xf32> -> vector<16x595xf32>
    %260 = arith.addf %255, %259 : vector<16x595xf32>
    %c24_178 = arith.constant 24 : index
    %c0_179 = arith.constant 0 : index
    %c0_180 = arith.constant 0 : index
    %261 = vector.load %arg4[%c24_178, %c0_179, %c0_180] : memref<25x16x6xf32, #tpu.memory_space<vmem>>, vector<1x16x6xf32>
    %262 = vector.shape_cast %261 : vector<1x16x6xf32> to vector<16x6xf32>
    %263 = vector.extract_strided_slice %139 {offsets = [0, 264], sizes = [6, 595], strides = [1, 1]} : vector<6x859xf32> to vector<6x595xf32>
    %cst_181 = arith.constant dense<0.000000e+00> : vector<16x595xf32>
    %264 = tpu.matmul %262, %263, %cst_181 {dimension_numbers = #tpu.dot_dimension_numbers<[1], [0], [0], [1], [0, 0, 1, 1], [], []>} : vector<16x6xf32>, vector<6x595xf32>, vector<16x595xf32> -> vector<16x595xf32>
    %265 = arith.addf %260, %264 : vector<16x595xf32>
    %c0_182 = arith.constant 0 : index
    %c0_183 = arith.constant 0 : index
    %266 = vector.load %arg5[%c0_182, %c0_183] : memref<16x1xf32, #tpu.memory_space<vmem>>, vector<16x1xf32>
    %267 = vector.broadcast %266 : vector<16x1xf32> to vector<16x595xf32>
    %268 = arith.addf %265, %267 : vector<16x595xf32>
    %cst_184 = arith.constant 0.000000e+00 : f32
    %269 = vector.broadcast %cst_184 : f32 to vector<16x595xf32>
    %270 = arith.maximumf %268, %269 : vector<16x595xf32>
    %271 = vector.extract_strided_slice %270 {offsets = [0, 0], sizes = [16, 529], strides = [1, 1]} : vector<16x595xf32> to vector<16x529xf32>
    %272 = vector.extract_strided_slice %270 {offsets = [0, 2], sizes = [16, 529], strides = [1, 1]} : vector<16x595xf32> to vector<16x529xf32>
    %273 = arith.maximumf %271, %272 : vector<16x529xf32>
    %274 = vector.extract_strided_slice %270 {offsets = [0, 64], sizes = [16, 529], strides = [1, 1]} : vector<16x595xf32> to vector<16x529xf32>
    %275 = vector.extract_strided_slice %270 {offsets = [0, 66], sizes = [16, 529], strides = [1, 1]} : vector<16x595xf32> to vector<16x529xf32>
    %276 = arith.maximumf %274, %275 : vector<16x529xf32>
    %277 = arith.maximumf %273, %276 : vector<16x529xf32>
    %c0_185 = arith.constant 0 : index
    %c0_186 = arith.constant 0 : index
    %278 = vector.load %arg6[%c0_185, %c0_186] : memref<529x25xf32, #tpu.memory_space<vmem>>, vector<529x25xf32>
    %cst_187 = arith.constant dense<0.000000e+00> : vector<16x25xf32>
    %279 = tpu.matmul %277, %278, %cst_187 {dimension_numbers = #tpu.dot_dimension_numbers<[1], [0], [0], [1], [0, 0, 1, 1], [], []>} : vector<16x529xf32>, vector<529x25xf32>, vector<16x25xf32> -> vector<16x25xf32>
    %c0_188 = arith.constant 0 : index
    %c0_189 = arith.constant 0 : index
    %280 = vector.load %arg8[%c0_188, %c0_189] : memref<1x400xf32, #tpu.memory_space<vmem>>, vector<1x400xf32>
    %281 = vector.extract_strided_slice %279 {offsets = [0, 0], sizes = [1, 25], strides = [1, 1]} : vector<16x25xf32> to vector<1x25xf32>
    %c0_190 = arith.constant 0 : index
    %c0_191 = arith.constant 0 : index
    %c0_192 = arith.constant 0 : index
    %282 = vector.load %arg7[%c0_190, %c0_191, %c0_192] : memref<16x25x400xf32, #tpu.memory_space<vmem>>, vector<1x25x400xf32>
    %283 = vector.shape_cast %282 : vector<1x25x400xf32> to vector<25x400xf32>
    %cst_193 = arith.constant dense<0.000000e+00> : vector<1x400xf32>
    %284 = tpu.matmul %281, %283, %cst_193 {dimension_numbers = #tpu.dot_dimension_numbers<[1], [0], [0], [1], [0, 0, 1, 1], [], []>} : vector<1x25xf32>, vector<25x400xf32>, vector<1x400xf32> -> vector<1x400xf32>
    %285 = arith.addf %280, %284 : vector<1x400xf32>
    %286 = vector.extract_strided_slice %279 {offsets = [1, 0], sizes = [1, 25], strides = [1, 1]} : vector<16x25xf32> to vector<1x25xf32>
    %c1_194 = arith.constant 1 : index
    %c0_195 = arith.constant 0 : index
    %c0_196 = arith.constant 0 : index
    %287 = vector.load %arg7[%c1_194, %c0_195, %c0_196] : memref<16x25x400xf32, #tpu.memory_space<vmem>>, vector<1x25x400xf32>
    %288 = vector.shape_cast %287 : vector<1x25x400xf32> to vector<25x400xf32>
    %cst_197 = arith.constant dense<0.000000e+00> : vector<1x400xf32>
    %289 = tpu.matmul %286, %288, %cst_197 {dimension_numbers = #tpu.dot_dimension_numbers<[1], [0], [0], [1], [0, 0, 1, 1], [], []>} : vector<1x25xf32>, vector<25x400xf32>, vector<1x400xf32> -> vector<1x400xf32>
    %290 = arith.addf %285, %289 : vector<1x400xf32>
    %291 = vector.extract_strided_slice %279 {offsets = [2, 0], sizes = [1, 25], strides = [1, 1]} : vector<16x25xf32> to vector<1x25xf32>
    %c2_198 = arith.constant 2 : index
    %c0_199 = arith.constant 0 : index
    %c0_200 = arith.constant 0 : index
    %292 = vector.load %arg7[%c2_198, %c0_199, %c0_200] : memref<16x25x400xf32, #tpu.memory_space<vmem>>, vector<1x25x400xf32>
    %293 = vector.shape_cast %292 : vector<1x25x400xf32> to vector<25x400xf32>
    %cst_201 = arith.constant dense<0.000000e+00> : vector<1x400xf32>
    %294 = tpu.matmul %291, %293, %cst_201 {dimension_numbers = #tpu.dot_dimension_numbers<[1], [0], [0], [1], [0, 0, 1, 1], [], []>} : vector<1x25xf32>, vector<25x400xf32>, vector<1x400xf32> -> vector<1x400xf32>
    %295 = arith.addf %290, %294 : vector<1x400xf32>
    %296 = vector.extract_strided_slice %279 {offsets = [3, 0], sizes = [1, 25], strides = [1, 1]} : vector<16x25xf32> to vector<1x25xf32>
    %c3_202 = arith.constant 3 : index
    %c0_203 = arith.constant 0 : index
    %c0_204 = arith.constant 0 : index
    %297 = vector.load %arg7[%c3_202, %c0_203, %c0_204] : memref<16x25x400xf32, #tpu.memory_space<vmem>>, vector<1x25x400xf32>
    %298 = vector.shape_cast %297 : vector<1x25x400xf32> to vector<25x400xf32>
    %cst_205 = arith.constant dense<0.000000e+00> : vector<1x400xf32>
    %299 = tpu.matmul %296, %298, %cst_205 {dimension_numbers = #tpu.dot_dimension_numbers<[1], [0], [0], [1], [0, 0, 1, 1], [], []>} : vector<1x25xf32>, vector<25x400xf32>, vector<1x400xf32> -> vector<1x400xf32>
    %300 = arith.addf %295, %299 : vector<1x400xf32>
    %301 = vector.extract_strided_slice %279 {offsets = [4, 0], sizes = [1, 25], strides = [1, 1]} : vector<16x25xf32> to vector<1x25xf32>
    %c4_206 = arith.constant 4 : index
    %c0_207 = arith.constant 0 : index
    %c0_208 = arith.constant 0 : index
    %302 = vector.load %arg7[%c4_206, %c0_207, %c0_208] : memref<16x25x400xf32, #tpu.memory_space<vmem>>, vector<1x25x400xf32>
    %303 = vector.shape_cast %302 : vector<1x25x400xf32> to vector<25x400xf32>
    %cst_209 = arith.constant dense<0.000000e+00> : vector<1x400xf32>
    %304 = tpu.matmul %301, %303, %cst_209 {dimension_numbers = #tpu.dot_dimension_numbers<[1], [0], [0], [1], [0, 0, 1, 1], [], []>} : vector<1x25xf32>, vector<25x400xf32>, vector<1x400xf32> -> vector<1x400xf32>
    %305 = arith.addf %300, %304 : vector<1x400xf32>
    %306 = vector.extract_strided_slice %279 {offsets = [5, 0], sizes = [1, 25], strides = [1, 1]} : vector<16x25xf32> to vector<1x25xf32>
    %c5_210 = arith.constant 5 : index
    %c0_211 = arith.constant 0 : index
    %c0_212 = arith.constant 0 : index
    %307 = vector.load %arg7[%c5_210, %c0_211, %c0_212] : memref<16x25x400xf32, #tpu.memory_space<vmem>>, vector<1x25x400xf32>
    %308 = vector.shape_cast %307 : vector<1x25x400xf32> to vector<25x400xf32>
    %cst_213 = arith.constant dense<0.000000e+00> : vector<1x400xf32>
    %309 = tpu.matmul %306, %308, %cst_213 {dimension_numbers = #tpu.dot_dimension_numbers<[1], [0], [0], [1], [0, 0, 1, 1], [], []>} : vector<1x25xf32>, vector<25x400xf32>, vector<1x400xf32> -> vector<1x400xf32>
    %310 = arith.addf %305, %309 : vector<1x400xf32>
    %311 = vector.extract_strided_slice %279 {offsets = [6, 0], sizes = [1, 25], strides = [1, 1]} : vector<16x25xf32> to vector<1x25xf32>
    %c6_214 = arith.constant 6 : index
    %c0_215 = arith.constant 0 : index
    %c0_216 = arith.constant 0 : index
    %312 = vector.load %arg7[%c6_214, %c0_215, %c0_216] : memref<16x25x400xf32, #tpu.memory_space<vmem>>, vector<1x25x400xf32>
    %313 = vector.shape_cast %312 : vector<1x25x400xf32> to vector<25x400xf32>
    %cst_217 = arith.constant dense<0.000000e+00> : vector<1x400xf32>
    %314 = tpu.matmul %311, %313, %cst_217 {dimension_numbers = #tpu.dot_dimension_numbers<[1], [0], [0], [1], [0, 0, 1, 1], [], []>} : vector<1x25xf32>, vector<25x400xf32>, vector<1x400xf32> -> vector<1x400xf32>
    %315 = arith.addf %310, %314 : vector<1x400xf32>
    %316 = vector.extract_strided_slice %279 {offsets = [7, 0], sizes = [1, 25], strides = [1, 1]} : vector<16x25xf32> to vector<1x25xf32>
    %c7_218 = arith.constant 7 : index
    %c0_219 = arith.constant 0 : index
    %c0_220 = arith.constant 0 : index
    %317 = vector.load %arg7[%c7_218, %c0_219, %c0_220] : memref<16x25x400xf32, #tpu.memory_space<vmem>>, vector<1x25x400xf32>
    %318 = vector.shape_cast %317 : vector<1x25x400xf32> to vector<25x400xf32>
    %cst_221 = arith.constant dense<0.000000e+00> : vector<1x400xf32>
    %319 = tpu.matmul %316, %318, %cst_221 {dimension_numbers = #tpu.dot_dimension_numbers<[1], [0], [0], [1], [0, 0, 1, 1], [], []>} : vector<1x25xf32>, vector<25x400xf32>, vector<1x400xf32> -> vector<1x400xf32>
    %320 = arith.addf %315, %319 : vector<1x400xf32>
    %321 = vector.extract_strided_slice %279 {offsets = [8, 0], sizes = [1, 25], strides = [1, 1]} : vector<16x25xf32> to vector<1x25xf32>
    %c8_222 = arith.constant 8 : index
    %c0_223 = arith.constant 0 : index
    %c0_224 = arith.constant 0 : index
    %322 = vector.load %arg7[%c8_222, %c0_223, %c0_224] : memref<16x25x400xf32, #tpu.memory_space<vmem>>, vector<1x25x400xf32>
    %323 = vector.shape_cast %322 : vector<1x25x400xf32> to vector<25x400xf32>
    %cst_225 = arith.constant dense<0.000000e+00> : vector<1x400xf32>
    %324 = tpu.matmul %321, %323, %cst_225 {dimension_numbers = #tpu.dot_dimension_numbers<[1], [0], [0], [1], [0, 0, 1, 1], [], []>} : vector<1x25xf32>, vector<25x400xf32>, vector<1x400xf32> -> vector<1x400xf32>
    %325 = arith.addf %320, %324 : vector<1x400xf32>
    %326 = vector.extract_strided_slice %279 {offsets = [9, 0], sizes = [1, 25], strides = [1, 1]} : vector<16x25xf32> to vector<1x25xf32>
    %c9_226 = arith.constant 9 : index
    %c0_227 = arith.constant 0 : index
    %c0_228 = arith.constant 0 : index
    %327 = vector.load %arg7[%c9_226, %c0_227, %c0_228] : memref<16x25x400xf32, #tpu.memory_space<vmem>>, vector<1x25x400xf32>
    %328 = vector.shape_cast %327 : vector<1x25x400xf32> to vector<25x400xf32>
    %cst_229 = arith.constant dense<0.000000e+00> : vector<1x400xf32>
    %329 = tpu.matmul %326, %328, %cst_229 {dimension_numbers = #tpu.dot_dimension_numbers<[1], [0], [0], [1], [0, 0, 1, 1], [], []>} : vector<1x25xf32>, vector<25x400xf32>, vector<1x400xf32> -> vector<1x400xf32>
    %330 = arith.addf %325, %329 : vector<1x400xf32>
    %331 = vector.extract_strided_slice %279 {offsets = [10, 0], sizes = [1, 25], strides = [1, 1]} : vector<16x25xf32> to vector<1x25xf32>
    %c10_230 = arith.constant 10 : index
    %c0_231 = arith.constant 0 : index
    %c0_232 = arith.constant 0 : index
    %332 = vector.load %arg7[%c10_230, %c0_231, %c0_232] : memref<16x25x400xf32, #tpu.memory_space<vmem>>, vector<1x25x400xf32>
    %333 = vector.shape_cast %332 : vector<1x25x400xf32> to vector<25x400xf32>
    %cst_233 = arith.constant dense<0.000000e+00> : vector<1x400xf32>
    %334 = tpu.matmul %331, %333, %cst_233 {dimension_numbers = #tpu.dot_dimension_numbers<[1], [0], [0], [1], [0, 0, 1, 1], [], []>} : vector<1x25xf32>, vector<25x400xf32>, vector<1x400xf32> -> vector<1x400xf32>
    %335 = arith.addf %330, %334 : vector<1x400xf32>
    %336 = vector.extract_strided_slice %279 {offsets = [11, 0], sizes = [1, 25], strides = [1, 1]} : vector<16x25xf32> to vector<1x25xf32>
    %c11_234 = arith.constant 11 : index
    %c0_235 = arith.constant 0 : index
    %c0_236 = arith.constant 0 : index
    %337 = vector.load %arg7[%c11_234, %c0_235, %c0_236] : memref<16x25x400xf32, #tpu.memory_space<vmem>>, vector<1x25x400xf32>
    %338 = vector.shape_cast %337 : vector<1x25x400xf32> to vector<25x400xf32>
    %cst_237 = arith.constant dense<0.000000e+00> : vector<1x400xf32>
    %339 = tpu.matmul %336, %338, %cst_237 {dimension_numbers = #tpu.dot_dimension_numbers<[1], [0], [0], [1], [0, 0, 1, 1], [], []>} : vector<1x25xf32>, vector<25x400xf32>, vector<1x400xf32> -> vector<1x400xf32>
    %340 = arith.addf %335, %339 : vector<1x400xf32>
    %341 = vector.extract_strided_slice %279 {offsets = [12, 0], sizes = [1, 25], strides = [1, 1]} : vector<16x25xf32> to vector<1x25xf32>
    %c12_238 = arith.constant 12 : index
    %c0_239 = arith.constant 0 : index
    %c0_240 = arith.constant 0 : index
    %342 = vector.load %arg7[%c12_238, %c0_239, %c0_240] : memref<16x25x400xf32, #tpu.memory_space<vmem>>, vector<1x25x400xf32>
    %343 = vector.shape_cast %342 : vector<1x25x400xf32> to vector<25x400xf32>
    %cst_241 = arith.constant dense<0.000000e+00> : vector<1x400xf32>
    %344 = tpu.matmul %341, %343, %cst_241 {dimension_numbers = #tpu.dot_dimension_numbers<[1], [0], [0], [1], [0, 0, 1, 1], [], []>} : vector<1x25xf32>, vector<25x400xf32>, vector<1x400xf32> -> vector<1x400xf32>
    %345 = arith.addf %340, %344 : vector<1x400xf32>
    %346 = vector.extract_strided_slice %279 {offsets = [13, 0], sizes = [1, 25], strides = [1, 1]} : vector<16x25xf32> to vector<1x25xf32>
    %c13_242 = arith.constant 13 : index
    %c0_243 = arith.constant 0 : index
    %c0_244 = arith.constant 0 : index
    %347 = vector.load %arg7[%c13_242, %c0_243, %c0_244] : memref<16x25x400xf32, #tpu.memory_space<vmem>>, vector<1x25x400xf32>
    %348 = vector.shape_cast %347 : vector<1x25x400xf32> to vector<25x400xf32>
    %cst_245 = arith.constant dense<0.000000e+00> : vector<1x400xf32>
    %349 = tpu.matmul %346, %348, %cst_245 {dimension_numbers = #tpu.dot_dimension_numbers<[1], [0], [0], [1], [0, 0, 1, 1], [], []>} : vector<1x25xf32>, vector<25x400xf32>, vector<1x400xf32> -> vector<1x400xf32>
    %350 = arith.addf %345, %349 : vector<1x400xf32>
    %351 = vector.extract_strided_slice %279 {offsets = [14, 0], sizes = [1, 25], strides = [1, 1]} : vector<16x25xf32> to vector<1x25xf32>
    %c14_246 = arith.constant 14 : index
    %c0_247 = arith.constant 0 : index
    %c0_248 = arith.constant 0 : index
    %352 = vector.load %arg7[%c14_246, %c0_247, %c0_248] : memref<16x25x400xf32, #tpu.memory_space<vmem>>, vector<1x25x400xf32>
    %353 = vector.shape_cast %352 : vector<1x25x400xf32> to vector<25x400xf32>
    %cst_249 = arith.constant dense<0.000000e+00> : vector<1x400xf32>
    %354 = tpu.matmul %351, %353, %cst_249 {dimension_numbers = #tpu.dot_dimension_numbers<[1], [0], [0], [1], [0, 0, 1, 1], [], []>} : vector<1x25xf32>, vector<25x400xf32>, vector<1x400xf32> -> vector<1x400xf32>
    %355 = arith.addf %350, %354 : vector<1x400xf32>
    %356 = vector.extract_strided_slice %279 {offsets = [15, 0], sizes = [1, 25], strides = [1, 1]} : vector<16x25xf32> to vector<1x25xf32>
    %c15_250 = arith.constant 15 : index
    %c0_251 = arith.constant 0 : index
    %c0_252 = arith.constant 0 : index
    %357 = vector.load %arg7[%c15_250, %c0_251, %c0_252] : memref<16x25x400xf32, #tpu.memory_space<vmem>>, vector<1x25x400xf32>
    %358 = vector.shape_cast %357 : vector<1x25x400xf32> to vector<25x400xf32>
    %cst_253 = arith.constant dense<0.000000e+00> : vector<1x400xf32>
    %359 = tpu.matmul %356, %358, %cst_253 {dimension_numbers = #tpu.dot_dimension_numbers<[1], [0], [0], [1], [0, 0, 1, 1], [], []>} : vector<1x25xf32>, vector<25x400xf32>, vector<1x400xf32> -> vector<1x400xf32>
    %360 = arith.addf %355, %359 : vector<1x400xf32>
    %cst_254 = arith.constant 0.000000e+00 : f32
    %361 = vector.broadcast %cst_254 : f32 to vector<1x400xf32>
    %362 = arith.maximumf %360, %361 : vector<1x400xf32>
    %c0_255 = arith.constant 0 : index
    %c0_256 = arith.constant 0 : index
    %363 = vector.load %arg9[%c0_255, %c0_256] : memref<400x120xf32, #tpu.memory_space<vmem>>, vector<400x120xf32>
    %cst_257 = arith.constant dense<0.000000e+00> : vector<1x120xf32>
    %364 = tpu.matmul %362, %363, %cst_257 {dimension_numbers = #tpu.dot_dimension_numbers<[1], [0], [0], [1], [0, 0, 1, 1], [], []>} : vector<1x400xf32>, vector<400x120xf32>, vector<1x120xf32> -> vector<1x120xf32>
    %c0_258 = arith.constant 0 : index
    %c0_259 = arith.constant 0 : index
    %365 = vector.load %arg10[%c0_258, %c0_259] : memref<1x120xf32, #tpu.memory_space<vmem>>, vector<1x120xf32>
    %366 = arith.addf %364, %365 : vector<1x120xf32>
    %cst_260 = arith.constant 0.000000e+00 : f32
    %367 = vector.broadcast %cst_260 : f32 to vector<1x120xf32>
    %368 = arith.maximumf %366, %367 : vector<1x120xf32>
    %c0_261 = arith.constant 0 : index
    %c0_262 = arith.constant 0 : index
    %369 = vector.load %arg11[%c0_261, %c0_262] : memref<120x84xf32, #tpu.memory_space<vmem>>, vector<120x84xf32>
    %cst_263 = arith.constant dense<0.000000e+00> : vector<1x84xf32>
    %370 = tpu.matmul %368, %369, %cst_263 {dimension_numbers = #tpu.dot_dimension_numbers<[1], [0], [0], [1], [0, 0, 1, 1], [], []>} : vector<1x120xf32>, vector<120x84xf32>, vector<1x84xf32> -> vector<1x84xf32>
    %c0_264 = arith.constant 0 : index
    %c0_265 = arith.constant 0 : index
    %371 = vector.load %arg12[%c0_264, %c0_265] : memref<1x84xf32, #tpu.memory_space<vmem>>, vector<1x84xf32>
    %372 = arith.addf %370, %371 : vector<1x84xf32>
    %cst_266 = arith.constant 0.000000e+00 : f32
    %373 = vector.broadcast %cst_266 : f32 to vector<1x84xf32>
    %374 = arith.maximumf %372, %373 : vector<1x84xf32>
    %c0_267 = arith.constant 0 : index
    %c0_268 = arith.constant 0 : index
    %375 = vector.load %arg13[%c0_267, %c0_268] : memref<84x10xf32, #tpu.memory_space<vmem>>, vector<84x10xf32>
    %cst_269 = arith.constant dense<0.000000e+00> : vector<1x10xf32>
    %376 = tpu.matmul %374, %375, %cst_269 {dimension_numbers = #tpu.dot_dimension_numbers<[1], [0], [0], [1], [0, 0, 1, 1], [], []>} : vector<1x84xf32>, vector<84x10xf32>, vector<1x10xf32> -> vector<1x10xf32>
    %c0_270 = arith.constant 0 : index
    %c0_271 = arith.constant 0 : index
    %377 = vector.load %arg14[%c0_270, %c0_271] : memref<1x10xf32, #tpu.memory_space<vmem>>, vector<1x10xf32>
    %378 = arith.addf %376, %377 : vector<1x10xf32>
    %c0_272 = arith.constant 0 : index
    %c0_273 = arith.constant 0 : index
    %c0_274 = arith.constant 0 : index
    %379 = vector.load %arg15[%c0_272, %c0_273, %c0_274] : memref<1x1x10xf32, #tpu.memory_space<vmem>>, vector<1x1x10xf32>
    %380 = vector.shape_cast %379 : vector<1x1x10xf32> to vector<1x10xf32>
    %381 = vector.shape_cast %378 : vector<1x10xf32> to vector<1x1x10xf32>
    tpu.vector_store %arg15[%c0_272, %c0_273, %c0_274], %381 {strides = array<i32>} : memref<1x1x10xf32, #tpu.memory_space<vmem>>, vector<1x1x10xf32>,
    return
  }
  func.func @transform_0(%arg0: i32) -> (i32, i32, i32) {
    %c0_i32 = arith.constant 0 : i32
    %c0_i32_0 = arith.constant 0 : i32
    %c0_i32_1 = arith.constant 0 : i32
    return %arg0, %c0_i32, %c0_i32_0 : i32, i32, i32
  }
  func.func @transform_1(%arg0: i32) -> (i32, i32, i32) {
    %c0_i32 = arith.constant 0 : i32
    %c0_i32_0 = arith.constant 0 : i32
    %c0_i32_1 = arith.constant 0 : i32
    %c0_i32_2 = arith.constant 0 : i32
    return %c0_i32, %c0_i32_0, %c0_i32_1 : i32, i32, i32
  }
  func.func @transform_2(%arg0: i32) -> (i32, i32) {
    %c0_i32 = arith.constant 0 : i32
    %c0_i32_0 = arith.constant 0 : i32
    %c0_i32_1 = arith.constant 0 : i32
    return %c0_i32, %c0_i32_0 : i32, i32
  }
  func.func @transform_3(%arg0: i32) -> (i32, i32, i32) {
    %c0_i32 = arith.constant 0 : i32
    %c0_i32_0 = arith.constant 0 : i32
    %c0_i32_1 = arith.constant 0 : i32
    %c0_i32_2 = arith.constant 0 : i32
    return %c0_i32, %c0_i32_0, %c0_i32_1 : i32, i32, i32
  }
  func.func @transform_4(%arg0: i32) -> (i32, i32) {
    %c0_i32 = arith.constant 0 : i32
    %c0_i32_0 = arith.constant 0 : i32
    %c0_i32_1 = arith.constant 0 : i32
    return %c0_i32, %c0_i32_0 : i32, i32
  }
  func.func @transform_5(%arg0: i32) -> (i32, i32) {
    %c0_i32 = arith.constant 0 : i32
    %c0_i32_0 = arith.constant 0 : i32
    %c0_i32_1 = arith.constant 0 : i32
    return %c0_i32, %c0_i32_0 : i32, i32
  }
  func.func @transform_6(%arg0: i32) -> (i32, i32, i32) {
    %c0_i32 = arith.constant 0 : i32
    %c0_i32_0 = arith.constant 0 : i32
    %c0_i32_1 = arith.constant 0 : i32
    %c0_i32_2 = arith.constant 0 : i32
    return %c0_i32, %c0_i32_0, %c0_i32_1 : i32, i32, i32
  }
  func.func @transform_7(%arg0: i32) -> (i32, i32) {
    %c0_i32 = arith.constant 0 : i32
    %c0_i32_0 = arith.constant 0 : i32
    %c0_i32_1 = arith.constant 0 : i32
    return %c0_i32, %c0_i32_0 : i32, i32
  }
  func.func @transform_8(%arg0: i32) -> (i32, i32) {
    %c0_i32 = arith.constant 0 : i32
    %c0_i32_0 = arith.constant 0 : i32
    %c0_i32_1 = arith.constant 0 : i32
    return %c0_i32, %c0_i32_0 : i32, i32
  }
  func.func @transform_9(%arg0: i32) -> (i32, i32) {
    %c0_i32 = arith.constant 0 : i32
    %c0_i32_0 = arith.constant 0 : i32
    %c0_i32_1 = arith.constant 0 : i32
    return %c0_i32, %c0_i32_0 : i32, i32
  }
  func.func @transform_10(%arg0: i32) -> (i32, i32) {
    %c0_i32 = arith.constant 0 : i32
    %c0_i32_0 = arith.constant 0 : i32
    %c0_i32_1 = arith.constant 0 : i32
    return %c0_i32, %c0_i32_0 : i32, i32
  }
  func.func @transform_11(%arg0: i32) -> (i32, i32) {
    %c0_i32 = arith.constant 0 : i32
    %c0_i32_0 = arith.constant 0 : i32
    %c0_i32_1 = arith.constant 0 : i32
    return %c0_i32, %c0_i32_0 : i32, i32
  }
  func.func @transform_12(%arg0: i32) -> (i32, i32) {
    %c0_i32 = arith.constant 0 : i32
    %c0_i32_0 = arith.constant 0 : i32
    %c0_i32_1 = arith.constant 0 : i32
    return %c0_i32, %c0_i32_0 : i32, i32
  }
  func.func @transform_13(%arg0: i32) -> (i32, i32) {
    %c0_i32 = arith.constant 0 : i32
    %c0_i32_0 = arith.constant 0 : i32
    %c0_i32_1 = arith.constant 0 : i32
    return %c0_i32, %c0_i32_0 : i32, i32
  }
  func.func @transform_14(%arg0: i32) -> (i32, i32, i32) {
    %c0_i32 = arith.constant 0 : i32
    %c0_i32_0 = arith.constant 0 : i32
    %c0_i32_1 = arith.constant 0 : i32
    return %arg0, %c0_i32, %c0_i32_0 : i32, i32, i32
  }
}

</mosaic_0001>

<bundles_post_ra>
// kernel: nonsense_net_forward.1
= control target key start
LH: loop header
LB: loop body
LE: loop exit
PB: predicated region body
PF: predicated region fallthrough
CT: control target
= control target key end

     0   :  { %s26258_s0 = inlined_call_operand.vmem [shape: f32[2,3,1024], index: 0, kind: input, shape index: {}]   ;;  %s26259_s1 = inlined_call_operand.vmem [shape: f32[25,6,3], index: 1, kind: input, shape index: {}]   ;;  %s26260_s2 = inlined_call_operand.vmem [shape: f32[6,1], index: 2, kind: input, shape index: {}]   ;;  %s26261_s3 = inlined_call_operand.vmem [shape: f32[25,16,6], index: 3, kind: input, shape index: {}]   ;;  %s26262_s4 = inlined_call_operand.vmem [shape: f32[16,1], index: 4, kind: input, shape index: {}]   ;;  %s26263_s5 = inlined_call_operand.vmem [shape: f32[529,25], index: 5, kind: input, shape index: {}]   ;;  %s26264_s6 = inlined_call_operand.vmem [shape: f32[16,25,400], index: 6, kind: input, shape index: {}]   ;;  %s26265_s7 = inlined_call_operand.vmem [shape: f32[1,400], index: 7, kind: input, shape index: {}]   ;;  %s26266_s8 = inlined_call_operand.vmem [shape: f32[400,120], index: 8, kind: input, shape index: {}]   ;;  %s26267_s9 = inlined_call_operand.vmem [shape: f32[1,120], index: 9, kind: input, shape index: {}]   ;;  %s26268_s10 = inlined_call_operand.vmem [shape: f32[120,84], index: 10, kind: input, shape index: {}]   ;;  %s26269_s11 = inlined_call_operand.vmem [shape: f32[1,84], index: 11, kind: input, shape index: {}]   ;;  %s26270_s12 = inlined_call_operand.vmem [shape: f32[84,10], index: 12, kind: input, shape index: {}]   ;;  %s26271_s13 = inlined_call_operand.vmem [shape: f32[1,10], index: 13, kind: input, shape index: {}]   ;;  %s26272_s14 = inlined_call_operand.hbm [shape: f32[2,1,10], index: 14, kind: output, shape index: {}]  }
   0x1   :  { %26308 = sst [smem:[#allocation16_spill]] %s26258_s0 }
   0x2   :  { %26309 = sst [smem:[#allocation17_spill]] %s26259_s1 }
   0x3   :  { %26310 = sst [smem:[#allocation18_spill]] %s26260_s2 }
   0x4   :  { %19 = vsyncpa [#allocation3], 0 }
   0x5   :  { %21 = vsyncpa [#allocation3 + $0x1], 0  ;;  %s22105_s29 = smov 0   ;;  %s22107_s30 = smov 0  }
   0x6   :  { %s22109_s15 = smov 0   ;;  %s22111_s16 = smov 0  }
   0x7 LB: > { %26311 = sst [smem:[#allocation5_spill]] %s21994_s15  ;;  %s22126_s17 = sadd.s32 4294967295, %s21998_s16   ;;  %s21998_s16 = sphi %s22111_s16, %s26349_s16   ;;  %s21994_s15 = sphi %s22109_s15, %s26351_s15   ;;  %s21990_s30 = sphi %s22107_s30, %s26353_s30   ;;  %s21986_s29 = sphi %s22105_s29, %s26352_s29  }
   0x8   : > { %s19395_s18 = sadd.s32 4294967294, %s21998_s16   ;;  %s22130_s19 = sadd.s32 1, %s21998_s16  }
   0x9   : > { %26312 = sst [smem:[#allocation6_spill]] %s22130_s19  ;;  %s333_s20 = sadd.s32 1, %s21994_s15 }
   0xa   : > { %s330_s21 = ssub.s32 %s21998_s16, %s22130_s19  ;;  %p343_p0 = scmp.ne.s32.totalorder %s21994_s15, %s21990_s30 }
   0xb   : > { %p331_p1 = scmp.eq.s32.totalorder %s330_s21, 0  ;;  %p344_p2 = scmp.eq.s32.totalorder %s22126_s17, 1 }
   0xc   : > { %p349_p3 = scmp.ne.s32.totalorder %s21990_s30, %s21986_s29  ;;  %p350_p4 = scmp.eq.s32.totalorder %s19395_s18, 1 }
   0xd   : > { %s22141_s22 = scalar_select %p331_p1, %s21994_s15, %s333_s20  }
   0xe   : > { %p22143_p5 = por %p344_p2, %p343_p0  ;;  %p22147_p6 = por %p350_p4, %p349_p3 }
   0xf   : > { %26313 = sst [smem:[#allocation7_spill]] %s22141_s22  ;;  %p19398_p7 = scmp.ge.s32.totalorder %s21998_s16, 1 }
  0x10   : > { %p415_p8 = scmp.lt.s32.totalorder %s21998_s16, 3 }
  0x12   : > { %p416_p9 = pnand %p19398_p7, %p415_p8 }
  0x14   : > { %419 = sbr.rel (%p416_p9) target bundleno = 3155 (0xc53), region = 76 }
  0x1b   : > { %p460_p10 = scmp.lt.s32.totalorder %s22126_s17, 1  ;;  %v26297_v0 = vmov 0.0   ;;  %s26316_s0 = sld [smem:[#allocation16_spill]]  ;;  %vm493_vm0 = vcmask 1039360   ;;  %vm504_vm1 = vcmask 1042432   ;;  %vm500_vm2 = vcmask 23552  }
  0x1c   : > { %654 = vmatprep.mubr.f32.mxu1 %v26297_v0  ;;  %583 = vmatprep.mubr.f32.mxu0 %v26297_v0  ;;  %s22001_s20 = smov 127   ;;  %s26288_s21 = smov 126   ;;  %vm22010_vm3 = vmmov 0   ;;  %vm1118_vm4 = vcmask 1031168   ;;  %vm1448_vm5 = vcmask 1022976   ;;  %vm1778_vm6 = vcmask 1014784  }
  0x1d   : > { %s461_s25 = scalar_select %p460_p10, %s22126_s17, 1  ;;  %vm2111_vm7 = vcmask 785408   ;;  %vm2444_vm8 = vcmask 777216   ;;  %vm2777_vm9 = vcmask 769024   ;;  %vm3110_vm10 = vcmask 760832  }
  0x1e   : > { %s26274_s27 = smov 96   ;;  %s22006_s28 = smov 95   ;;  %vm3443_vm11 = vcmask 752640   ;;  %vm3776_vm12 = vcmask 523264   ;;  %vm4109_vm13 = vcmask 515072   ;;  %vm4442_vm14 = vcmask 506880  }
  0x1f   : > { %s20369_s26 = sshll.u32 %s461_s25, 5  ;;  %s26273_s25 = smov 125   ;;  %vm4775_vm15 = vcmask 498688  }
  0x20   : > { %s26317_s1 = sld [smem:[#allocation17_spill]]  ;;  %s26320_s2 = sld [smem:[#allocation18_spill]] }
  0x21   : > { %s22160_s18 = scalar_lea.vmem %s26316_s0, %s20369_s26  ;;  %s26276_s26 = smov 124  }
  0x22   : > { %v22163_v1 = vld [vmem:[%s22160_s18 + $0x8] sm:$0x77]  ;;  %v22166_v2 = vld [vmem:[%s22160_s18] sm:$0x77]  ;;  %v22177_v4 = vld [vmem:[%s22160_s18 + $0x10] sm:$0x77] }
  0x23   : > { %483 = vrot.lane.b32.xlu0 %v22163_v1, %s22001_s20  ;;  %479 = vrot.lane.b32.xlu1 %v22166_v2, %s22001_s20  ;;  %v22174_v3 = vcombine.high %v22163_v1, %v22163_v1  ;;  %v22185_v5 = vcombine.high %v22177_v4, %v22177_v4  ;;  %v22189_v6 = vcombine.high %v22166_v2, %v22166_v2  ;;  %v22196_v7 = vld [vmem:[%s22160_s18 + $0x18] sm:$0x77]  ;;  %s26327_s0 = smov 58  }
  0x24   : > { %v22256_v8 = vcombine.high %v22196_v7, %v22196_v7 }
  0x26   : > { %v19401_v15 = vld [vmem:[%s26317_s1 + $0x8] sm:$0x3f]  ;;  %v469_v26 = vld [vmem:[%s26317_s1] sm:$0x3f]  ;;  %v19424_v35 = vld [vmem:[%s26317_s1 + $0x10] sm:$0x3f] }
  0x27   : > { %487 = vrot.lane.b32.xlu0 %v22177_v4, %s22001_s20  ;;  %485 = vrot.lane.b32.xlu1 %v22174_v3, %s22001_s20  ;;  %v19436_v47 = vld [vmem:[%s26317_s1 + $0x18] sm:$0x3f]  ;;  %v19448_v61 = vld [vmem:[%s26317_s1 + $0x20] sm:$0x3f] }
  0x2b   : > { %489 = vrot.lane.b32.xlu1 %v22185_v5, %s22001_s20  ;;  %481 = vrot.lane.b32.xlu0 %v22189_v6, %s22001_s20 }
  0x2f   : > { %1106 = vrot.lane.b32.xlu1 %v22189_v6, %s26288_s21  ;;  %491 = vrot.lane.b32.xlu0 %v22196_v7, %s22001_s20 }
  0x33   : > { %1104 = vrot.lane.b32.xlu1 %v22166_v2, %s26288_s21  ;;  %1108 = vrot.lane.b32.xlu0 %v22163_v1, %s26288_s21 }
  0x37   : > { %1112 = vrot.lane.b32.xlu1 %v22177_v4, %s26288_s21  ;;  %1110 = vrot.lane.b32.xlu0 %v22174_v3, %s26288_s21 }
  0x3b   : > { %1116 = vrot.lane.b32.xlu1 %v22196_v7, %s26288_s21  ;;  %1114 = vrot.lane.b32.xlu0 %v22185_v5, %s26288_s21 }
  0x3f   : > { %1438 = vrot.lane.b32.xlu1 %v22163_v1, %s26273_s25  ;;  %1436 = vrot.lane.b32.xlu0 %v22189_v6, %s26273_s25 }
  0x43   : > { %1440 = vrot.lane.b32.xlu1 %v22174_v3, %s26273_s25  ;;  %1434 = vrot.lane.b32.xlu0 %v22166_v2, %s26273_s25 }
  0x47   : > { %1444 = vrot.lane.b32.xlu1 %v22185_v5, %s26273_s25  ;;  %1442 = vrot.lane.b32.xlu0 %v22177_v4, %s26273_s25 }
  0x4b   : > { %1766 = vrot.lane.b32.xlu1 %v22189_v6, %s26276_s26  ;;  %1446 = vrot.lane.b32.xlu0 %v22196_v7, %s26273_s25  ;;  %s22007_s25 = smov 94  }
  0x4f   : > { %1764 = vrot.lane.b32.xlu1 %v22166_v2, %s26276_s26  ;;  %1768 = vrot.lane.b32.xlu0 %v22163_v1, %s26276_s26 }
  0x53   : > { %1772 = vrot.lane.b32.xlu1 %v22177_v4, %s26276_s26  ;;  %1770 = vrot.lane.b32.xlu0 %v22174_v3, %s26276_s26 }
  0x57   : > { %1776 = vrot.lane.b32.xlu1 %v22196_v7, %s26276_s26  ;;  %1774 = vrot.lane.b32.xlu0 %v22185_v5, %s26276_s26  ;;  %s22009_s26 = smov 92  }
  0x5b   : > { %2099 = vrot.lane.b32.xlu1 %v22163_v1, %s26274_s27  ;;  %2097 = vrot.lane.b32.xlu0 %v22189_v6, %s26274_s27 }
  0x5f   : > { %2101 = vrot.lane.b32.xlu1 %v22174_v3, %s26274_s27  ;;  %2095 = vrot.lane.b32.xlu0 %v22166_v2, %s26274_s27 }
  0x63   : > { %2105 = vrot.lane.b32.xlu1 %v22185_v5, %s26274_s27  ;;  %2103 = vrot.lane.b32.xlu0 %v22177_v4, %s26274_s27 }
  0x67   : > { %2109 = vrot.lane.b32.xlu1 %v22256_v8, %s26274_s27  ;;  %2107 = vrot.lane.b32.xlu0 %v22196_v7, %s26274_s27  ;;  %s22008_s27 = smov 93  }
  0x6b   : > { %2432 = vrot.lane.b32.xlu1 %v22163_v1, %s22006_s28  ;;  %2430 = vrot.lane.b32.xlu0 %v22189_v6, %s22006_s28 }
  0x6f   : > { %2434 = vrot.lane.b32.xlu1 %v22174_v3, %s22006_s28  ;;  %2428 = vrot.lane.b32.xlu0 %v22166_v2, %s22006_s28 }
  0x73   : > { %2438 = vrot.lane.b32.xlu1 %v22185_v5, %s22006_s28  ;;  %2436 = vrot.lane.b32.xlu0 %v22177_v4, %s22006_s28 }
  0x77   : > { %2442 = vrot.lane.b32.xlu1 %v22256_v8, %s22006_s28  ;;  %2440 = vrot.lane.b32.xlu0 %v22196_v7, %s22006_s28  ;;  %s26321_s28 = smov 96  }
  0x7b   : > { %2765 = vrot.lane.b32.xlu1 %v22163_v1, %s22007_s25  ;;  %2763 = vrot.lane.b32.xlu0 %v22189_v6, %s22007_s25 }
  0x7f   : > { %2767 = vrot.lane.b32.xlu1 %v22174_v3, %s22007_s25  ;;  %2761 = vrot.lane.b32.xlu0 %v22166_v2, %s22007_s25 }
  0x83   : > { %2771 = vrot.lane.b32.xlu1 %v22185_v5, %s22007_s25  ;;  %2769 = vrot.lane.b32.xlu0 %v22177_v4, %s22007_s25 }
  0x87   : > { %2775 = vrot.lane.b32.xlu1 %v22256_v8, %s22007_s25  ;;  %2773 = vrot.lane.b32.xlu0 %v22196_v7, %s22007_s25  ;;  %s26278_s25 = smov 62  }
  0x8b   : > { %3098 = vrot.lane.b32.xlu1 %v22163_v1, %s22008_s27  ;;  %3096 = vrot.lane.b32.xlu0 %v22189_v6, %s22008_s27 }
  0x8f   : > { %3100 = vrot.lane.b32.xlu1 %v22174_v3, %s22008_s27  ;;  %3094 = vrot.lane.b32.xlu0 %v22166_v2, %s22008_s27 }
  0x93   : > { %3104 = vrot.lane.b32.xlu1 %v22185_v5, %s22008_s27  ;;  %3102 = vrot.lane.b32.xlu0 %v22177_v4, %s22008_s27 }
  0x95   : > { %v484_v9 = vpop.permute.xlu0 %483  ;;  %v480_v10 = vpop.permute.xlu1 %479 }
  0x97   : > { %3108 = vrot.lane.b32.xlu1 %v22256_v8, %s22008_s27  ;;  %3106 = vrot.lane.b32.xlu0 %v22196_v7, %s22008_s27  ;;  %s22012_s27 = smov 63  }
  0x99   : > { %v488_v11 = vpop.permute.xlu0 %487  ;;  %v486_v12 = vpop.permute.xlu1 %485 }
  0x9a   : > { %v22287_v13 = vsel %vm493_vm0, %v486_v12, %v488_v11  ;;  %v22290_v14 = vsel %vm493_vm0, %v484_v9, %v486_v12 }
  0x9b   : > { %19405 = vmatprep.subr.msk.mxu1 %vm504_vm1, %v22287_v13  ;;  %3431 = vrot.lane.b32.xlu1 %v22163_v1, %s22009_s26 }
  0x9c   : > { %3429 = vrot.lane.b32.xlu0 %v22189_v6, %s22009_s26  ;;  %19406 = vmatpush1.msk.msra.mxu1 %vm504_vm1, %v22290_v14 }
  0x9d   : > { %v490_v16 = vpop.permute.xlu1 %489  ;;  %v482_v17 = vpop.permute.xlu0 %481  ;;  %19407 = vmatmul.mubr.msk.f32.vlgmr.msra.gmra.mrb[0].mxu1 %vm500_vm2, %v19401_v15  ;;  %20639 = vmatprep.subr.mxu1 %v26297_v0 }
  0x9e   : > { %v22306_v18 = vsel %vm493_vm0, %v482_v17, %v484_v9  ;;  %v494_v19 = vsel %vm493_vm0, %v480_v10, %v482_v17  ;;  %20641 = vmatprep.mubr.msk.f32.mxu1 %vm22010_vm3, %v26297_v0  ;;  %v22333_v23 = vsel %vm493_vm0, %v488_v11, %v490_v16 }
  0x9f   : > { %3433 = vrot.lane.b32.xlu1 %v22174_v3, %s22009_s26  ;;  %19402 = vmatprep.subr.msk.mxu0 %vm504_vm1, %v22306_v18 }
  0xa0   : > { %3427 = vrot.lane.b32.xlu0 %v22166_v2, %s22009_s26  ;;  %19403 = vmatpush1.msk.msra.mxu0 %vm504_vm1, %v494_v19  ;;  %v19460_v19 = vld [vmem:[%s26317_s1 + $0x28] sm:$0x3f] }
  0xa1   : > { %v1107_v20 = vpop.permute.xlu1 %1106  ;;  %19404 = vmatmul.mubr.msk.f32.vlgmr.msra.gmra.mrb[0].mxu0 %vm500_vm2, %v19401_v15  ;;  %v22319_v21 = vpop.permute.xlu0 %491 }
  0xa2   : > { %20640 = vmatpush3.msk.msra.mxu1 %vm504_vm1, %v22319_v21  ;;  %v22325_v22 = vsel %vm493_vm0, %v490_v16, %v22319_v21  ;;  %725 = vmatprep.mubr.f32.mxu0 %v26297_v0 }
  0xa3   : > { %3437 = vrot.lane.b32.xlu1 %v22185_v5, %s22009_s26  ;;  %19408 = vmatprep.subr.msk.mxu0 %vm504_vm1, %v22325_v22 }
  0xa4   : > { %3435 = vrot.lane.b32.xlu0 %v22177_v4, %s22009_s26  ;;  %20642 = vmatmul.mubr.msk.f32.vlgmr.msra.gmra.mrb[2].mxu1 %vm500_vm2, %v19401_v15 }
  0xa5   : > { %19409 = vmatpush1.msk.msra.mxu0 %vm504_vm1, %v22333_v23  ;;  %v1105_v24 = vpop.permute.xlu1 %1104  ;;  %19416 = vmatprep.subr.msk.mxu1 %vm504_vm1, %v22174_v3  ;;  %v1109_v25 = vpop.permute.xlu0 %1108 }
  0xa6   : > { %19410 = vmatmul.mubr.msk.f32.vlgmr.msra.gmra.mrb[2].mxu0 %vm500_vm2, %v19401_v15  ;;  %19413 = vmatprep.subr.msk.mxu0 %vm504_vm1, %v22189_v6  ;;  %v22368_v29 = vsel %vm1118_vm4, %v1107_v20, %v1109_v25  ;;  %v1119_v34 = vsel %vm1118_vm4, %v1105_v24, %v1107_v20 }
  0xa7   : > { %19417 = vmatpush1.msk.msra.mxu1 %vm504_vm1, %v22163_v1  ;;  %954 = vmatprep.mubr.f32.mxu1 %v26297_v0 }
  0xa8   : > { %3441 = vrot.lane.b32.xlu1 %v22256_v8, %s22009_s26  ;;  %3439 = vrot.lane.b32.xlu0 %v22196_v7, %s22009_s26  ;;  %s26282_s26 = smov 64  }
  0xa9   : > { %19414 = vmatpush1.msk.msra.mxu0 %vm504_vm1, %v22166_v2  ;;  %19418 = vmatmul.mubr.msk.f32.vlgmr.msra.gmra.mrb[0].mxu1 %vm500_vm2, %v469_v26  ;;  %v1113_v27 = vpop.permute.xlu1 %1112  ;;  %v1111_v28 = vpop.permute.xlu0 %1110 }
  0xaa   : > { %883 = vmatprep.mubr.f32.mxu0 %v26297_v0  ;;  %19419 = vmatprep.subr.msk.mxu0 %vm504_vm1, %v22185_v5  ;;  %v22371_v30 = vsel %vm1118_vm4, %v1111_v28, %v1113_v27  ;;  %v22374_v31 = vsel %vm1118_vm4, %v1109_v25, %v1111_v28 }
  0xab   : > { %19415 = vmatmul.mubr.msk.f32.vlgmr.msra.gmra.mrb[0].mxu0 %vm500_vm2, %v469_v26  ;;  %20644 = vmatprep.subr.mxu1 %v26297_v0 }
  0xac   : > { %19420 = vmatpush1.msk.msra.mxu0 %vm504_vm1, %v22177_v4  ;;  %20645 = vmatpush3.msk.msra.mxu1 %vm504_vm1, %v22196_v7 }
  0xad   : > { %20646 = vmatprep.mubr.msk.f32.mxu1 %vm22010_vm3, %v26297_v0  ;;  %19425 = vmatprep.subr.msk.mxu0 %vm504_vm1, %v22368_v29  ;;  %v22380_v32 = vpop.permute.xlu1 %1116  ;;  %v1115_v33 = vpop.permute.xlu0 %1114 }
  0xae   : > { %3764 = vrot.lane.b32.xlu1 %v22163_v1, %s26282_s26  ;;  %3762 = vrot.lane.b32.xlu0 %v22189_v6, %s26282_s26  ;;  %v22400_v36 = vsel %vm1118_vm4, %v1115_v33, %v22380_v32  ;;  %v22418_v42 = vsel %vm1118_vm4, %v1113_v27, %v1115_v33 }
  0xaf   : > { %20647 = vmatmul.mubr.msk.f32.vlgmr.msra.gmra.mrb[4].mxu1 %vm500_vm2, %v469_v26  ;;  %19428 = vmatprep.subr.msk.mxu1 %vm504_vm1, %v22371_v30 }
  0xb0   : > { %1025 = vmatprep.mubr.f32.mxu0 %v26297_v0  ;;  %19429 = vmatpush1.msk.msra.mxu1 %vm504_vm1, %v22374_v31 }
  0xb1   : > { %19421 = vmatmul.mubr.msk.f32.vlgmr.msra.gmra.mrb[2].mxu0 %vm500_vm2, %v469_v26  ;;  %1277 = vmatprep.mubr.f32.mxu1 %v26297_v0  ;;  %v1439_v37 = vpop.permute.xlu1 %1438  ;;  %v1437_v38 = vpop.permute.xlu0 %1436 }
  0xb2   : > { %19426 = vmatpush1.msk.msra.mxu0 %vm504_vm1, %v1119_v34  ;;  %20649 = vmatprep.subr.mxu1 %v26297_v0  ;;  %v22415_v39 = vsel %vm1448_vm5, %v1437_v38, %v1439_v37 }
  0xb3   : > { %3766 = vrot.lane.b32.xlu1 %v22174_v3, %s26282_s26  ;;  %3760 = vrot.lane.b32.xlu0 %v22166_v2, %s26282_s26 }
  0xb4   : > { %19430 = vmatmul.mubr.msk.f32.vlgmr.msra.gmra.mrb[0].mxu1 %vm500_vm2, %v19424_v35  ;;  %19431 = vmatprep.subr.msk.mxu0 %vm504_vm1, %v22400_v36 }
  0xb5   : > { %20650 = vmatpush3.msk.msra.mxu1 %vm504_vm1, %v22380_v32  ;;  %1206 = vmatprep.mubr.f32.mxu0 %v26297_v0  ;;  %v1441_v40 = vpop.permute.xlu1 %1440  ;;  %v1435_v41 = vpop.permute.xlu0 %1434 }
  0xb6   : > { %19427 = vmatmul.mubr.msk.f32.vlgmr.msra.gmra.mrb[0].mxu0 %vm500_vm2, %v19424_v35  ;;  %20651 = vmatprep.mubr.msk.f32.mxu1 %vm22010_vm3, %v26297_v0  ;;  %v1449_v43 = vsel %vm1448_vm5, %v1435_v41, %v1437_v38  ;;  %v22446_v48 = vsel %vm1448_vm5, %v1439_v37, %v1441_v40 }
  0xb7   : > { %19432 = vmatpush1.msk.msra.mxu0 %vm504_vm1, %v22418_v42  ;;  %3770 = vrot.lane.b32.xlu1 %v22185_v5, %s26282_s26 }
  0xb8   : > { %3768 = vrot.lane.b32.xlu0 %v22177_v4, %s26282_s26  ;;  %19437 = vmatprep.subr.msk.mxu0 %vm504_vm1, %v22415_v39 }
  0xb9   : > { %1348 = vmatprep.mubr.f32.mxu0 %v26297_v0  ;;  %v1445_v44 = vpop.permute.xlu1 %1444  ;;  %v1443_v45 = vpop.permute.xlu0 %1442  ;;  %20652 = vmatmul.mubr.msk.f32.vlgmr.msra.gmra.mrb[6].mxu1 %vm500_vm2, %v19424_v35 }
  0xba   : > { %19433 = vmatmul.mubr.msk.f32.vlgmr.msra.gmra.mrb[2].mxu0 %vm500_vm2, %v19424_v35  ;;  %v22436_v46 = vsel %vm1448_vm5, %v1441_v40, %v1443_v45  ;;  %1607 = vmatprep.mubr.f32.mxu1 %v26297_v0  ;;  %v22472_v52 = vsel %vm1448_vm5, %v1443_v45, %v1445_v44  ;;  %v19472_v45 = vld [vmem:[%s26317_s1 + $0x30] sm:$0x3f] }
  0xbb   : > { %3774 = vrot.lane.b32.xlu1 %v22256_v8, %s26282_s26  ;;  %19438 = vmatpush1.msk.msra.mxu0 %vm504_vm1, %v1449_v43 }
  0xbc   : > { %3772 = vrot.lane.b32.xlu0 %v22196_v7, %s26282_s26  ;;  %19440 = vmatprep.subr.msk.mxu1 %vm504_vm1, %v22436_v46  ;;  %s26323_s26 = smov 64  }
  0xbd   : > { %19441 = vmatpush1.msk.msra.mxu1 %vm504_vm1, %v22446_v48  ;;  %v1767_v49 = vpop.permute.xlu1 %1766  ;;  %v22454_v50 = vpop.permute.xlu0 %1446  ;;  %1536 = vmatprep.mubr.f32.mxu0 %v26297_v0 }
  0xbe   : > { %20654 = vmatprep.subr.mxu1 %v26297_v0  ;;  %19442 = vmatmul.mubr.msk.f32.vlgmr.msra.gmra.mrb[0].mxu1 %vm500_vm2, %v19436_v47  ;;  %v22461_v51 = vsel %vm1448_vm5, %v1445_v44, %v22454_v50 }
  0xbf   : > { %4097 = vrot.lane.b32.xlu1 %v22163_v1, %s22012_s27  ;;  %20655 = vmatpush3.msk.msra.mxu1 %vm504_vm1, %v22454_v50 }
  0xc0   : > { %4095 = vrot.lane.b32.xlu0 %v22189_v6, %s22012_s27  ;;  %19443 = vmatprep.subr.msk.mxu0 %vm504_vm1, %v22461_v51 }
  0xc1   : > { %19439 = vmatmul.mubr.msk.f32.vlgmr.msra.gmra.mrb[0].mxu0 %vm500_vm2, %v19436_v47  ;;  %v1765_v53 = vpop.permute.xlu1 %1764  ;;  %v1769_v54 = vpop.permute.xlu0 %1768  ;;  %20656 = vmatprep.mubr.msk.f32.mxu1 %vm22010_vm3, %v26297_v0 }
  0xc2   : > { %19444 = vmatpush1.msk.msra.mxu0 %vm504_vm1, %v22472_v52  ;;  %1678 = vmatprep.mubr.f32.mxu0 %v26297_v0  ;;  %v22481_v55 = vsel %vm1778_vm6, %v1767_v49, %v1769_v54  ;;  %v1779_v56 = vsel %vm1778_vm6, %v1765_v53, %v1767_v49 }
  0xc3   : > { %4099 = vrot.lane.b32.xlu1 %v22174_v3, %s22012_s27  ;;  %19449 = vmatprep.subr.msk.mxu0 %vm504_vm1, %v22481_v55 }
  0xc4   : > { %4093 = vrot.lane.b32.xlu0 %v22166_v2, %s22012_s27  ;;  %20657 = vmatmul.mubr.msk.f32.vlgmr.msra.gmra.mrb[8].mxu1 %vm500_vm2, %v19436_v47 }
  0xc5   : > { %19445 = vmatmul.mubr.msk.f32.vlgmr.msra.gmra.mrb[2].mxu0 %vm500_vm2, %v19436_v47  ;;  %v1773_v57 = vpop.permute.xlu1 %1772  ;;  %v1771_v58 = vpop.permute.xlu0 %1770  ;;  %1937 = vmatprep.mubr.f32.mxu1 %v26297_v0 }
  0xc6   : > { %19450 = vmatpush1.msk.msra.mxu0 %vm504_vm1, %v1779_v56  ;;  %v22495_v59 = vsel %vm1778_vm6, %v1769_v54, %v1771_v58  ;;  %v22498_v60 = vsel %vm1778_vm6, %v1771_v58, %v1773_v57  ;;  %1866 = vmatprep.mubr.f32.mxu0 %v26297_v0 }
  0xc7   : > { %4103 = vrot.lane.b32.xlu1 %v22185_v5, %s22012_s27  ;;  %19452 = vmatprep.subr.msk.mxu1 %vm504_vm1, %v22498_v60 }
  0xc8   : > { %4101 = vrot.lane.b32.xlu0 %v22177_v4, %s22012_s27  ;;  %19453 = vmatpush1.msk.msra.mxu1 %vm504_vm1, %v22495_v59 }
  0xc9   : > { %v22512_v62 = vpop.permute.xlu1 %1776  ;;  %v1775_v63 = vpop.permute.xlu0 %1774  ;;  %20659 = vmatprep.subr.mxu1 %v26297_v0  ;;  %19454 = vmatmul.mubr.msk.f32.vlgmr.msra.gmra.mrb[0].mxu1 %vm500_vm2, %v19448_v61 }
  0xca   : > { %v22517_v9 = vsel %vm1778_vm6, %v1773_v57, %v1775_v63  ;;  %v22521_v10 = vsel %vm1778_vm6, %v1775_v63, %v22512_v62  ;;  %20660 = vmatpush3.msk.msra.mxu1 %vm504_vm1, %v22512_v62  ;;  %19451 = vmatmul.mubr.msk.f32.vlgmr.msra.gmra.mrb[0].mxu0 %vm500_vm2, %v19448_v61 }
  0xcb   : > { %4107 = vrot.lane.b32.xlu1 %v22256_v8, %s22012_s27  ;;  %19455 = vmatprep.subr.msk.mxu0 %vm504_vm1, %v22521_v10 }
  0xcc   : > { %4105 = vrot.lane.b32.xlu0 %v22196_v7, %s22012_s27  ;;  %19456 = vmatpush1.msk.msra.mxu0 %vm504_vm1, %v22517_v9  ;;  %s22014_s27 = smov 61  }
  0xcd   : > { %v2100_v11 = vpop.permute.xlu1 %2099  ;;  %v2098_v12 = vpop.permute.xlu0 %2097  ;;  %2008 = vmatprep.mubr.f32.mxu0 %v26297_v0  ;;  %20661 = vmatprep.mubr.msk.f32.mxu1 %vm22010_vm3, %v26297_v0 }
  0xce   : > { %v2113_v15 = vsel %vm2111_vm7, %v2098_v12, %v2100_v11  ;;  %19457 = vmatmul.mubr.msk.f32.vlgmr.msra.gmra.mrb[2].mxu0 %vm500_vm2, %v19448_v61  ;;  %20662 = vmatmul.mubr.msk.f32.vlgmr.msra.gmra.mrb[10].mxu1 %vm500_vm2, %v19448_v61 }
  0xcf   : > { %4430 = vrot.lane.b32.xlu1 %v22163_v1, %s26278_s25  ;;  %19461 = vmatprep.subr.msk.mxu0 %vm504_vm1, %v2113_v15 }
  0xd0   : > { %4428 = vrot.lane.b32.xlu0 %v22189_v6, %s26278_s25  ;;  %2271 = vmatprep.mubr.f32.mxu1 %v26297_v0 }
  0xd1   : > { %v2102_v16 = vpop.permute.xlu1 %2101  ;;  %v2096_v17 = vpop.permute.xlu0 %2095  ;;  %2200 = vmatprep.mubr.f32.mxu0 %v26297_v0 }
  0xd2   : > { %v2112_v20 = vsel %vm2111_vm7, %v2096_v17, %v2098_v12  ;;  %v2114_v27 = vsel %vm2111_vm7, %v2100_v11, %v2102_v16 }
  0xd3   : > { %4432 = vrot.lane.b32.xlu1 %v22174_v3, %s26278_s25  ;;  %19462 = vmatpush1.msk.msra.mxu0 %vm504_vm1, %v2112_v20  ;;  %v19484_v20 = vld [vmem:[%s26317_s1 + $0x38] sm:$0x3f] }
  0xd4   : > { %4426 = vrot.lane.b32.xlu0 %v22166_v2, %s26278_s25  ;;  %19463 = vmatmul.mubr.msk.f32.vlgmr.msra.gmra.mrb[0].mxu0 %vm500_vm2, %v19460_v19 }
  0xd5   : > { %v2106_v24 = vpop.permute.xlu1 %2105  ;;  %v2104_v25 = vpop.permute.xlu0 %2103  ;;  %2342 = vmatprep.mubr.f32.mxu0 %v26297_v0 }
  0xd6   : > { %v2115_v26 = vsel %vm2111_vm7, %v2102_v16, %v2104_v25  ;;  %v2116_v37 = vsel %vm2111_vm7, %v2104_v25, %v2106_v24 }
  0xd7   : > { %4436 = vrot.lane.b32.xlu1 %v22185_v5, %s26278_s25  ;;  %19464 = vmatprep.subr.msk.mxu1 %vm504_vm1, %v2115_v26 }
  0xd8   : > { %4434 = vrot.lane.b32.xlu0 %v22177_v4, %s26278_s25  ;;  %19465 = vmatpush1.msk.msra.mxu1 %vm504_vm1, %v2114_v27 }
  0xd9   : > { %v2110_v28 = vpop.permute.xlu1 %2109  ;;  %v2108_v33 = vpop.permute.xlu0 %2107  ;;  %20664 = vmatprep.subr.mxu1 %v26297_v0  ;;  %19466 = vmatmul.mubr.msk.f32.vlgmr.msra.gmra.mrb[0].mxu1 %vm500_vm2, %v19460_v19 }
  0xda   : > { %v2118_v34 = vsel %vm2111_vm7, %v2108_v33, %v2110_v28  ;;  %v2117_v35 = vsel %vm2111_vm7, %v2106_v24, %v2108_v33  ;;  %20666 = vmatprep.mubr.msk.f32.mxu1 %vm22010_vm3, %v26297_v0 }
  0xdb   : > { %4440 = vrot.lane.b32.xlu1 %v22256_v8, %s26278_s25  ;;  %19467 = vmatprep.subr.msk.mxu0 %vm504_vm1, %v2117_v35 }
  0xdc   : > { %4438 = vrot.lane.b32.xlu0 %v22196_v7, %s26278_s25  ;;  %20665 = vmatpush3.msk.msra.mxu1 %vm504_vm1, %v2118_v34  ;;  %s26280_s25 = smov 60  }
  0xdd   : > { %19468 = vmatpush1.msk.msra.mxu0 %vm504_vm1, %v2116_v37  ;;  %v2433_v38 = vpop.permute.xlu1 %2432  ;;  %v2431_v40 = vpop.permute.xlu0 %2430  ;;  %20667 = vmatmul.mubr.msk.f32.vlgmr.msra.gmra.mrb[12].mxu1 %vm500_vm2, %v19460_v19 }
  0xde   : > { %v2446_v41 = vsel %vm2444_vm8, %v2431_v40, %v2433_v38  ;;  %19469 = vmatmul.mubr.msk.f32.vlgmr.msra.gmra.mrb[2].mxu0 %vm500_vm2, %v19460_v19  ;;  %2604 = vmatprep.mubr.f32.mxu1 %v26297_v0 }
  0xdf   : > { %4763 = vrot.lane.b32.xlu1 %v22163_v1, %s22014_s27  ;;  %19473 = vmatprep.subr.msk.mxu0 %vm504_vm1, %v2446_v41 }
  0xe0   : > { %4761 = vrot.lane.b32.xlu0 %v22189_v6, %s22014_s27  ;;  %2533 = vmatprep.mubr.f32.mxu0 %v26297_v0 }
  0xe1   : > { %v2435_v43 = vpop.permute.xlu1 %2434  ;;  %v2429_v44 = vpop.permute.xlu0 %2428 }
  0xe2   : > { %v2445_v47 = vsel %vm2444_vm8, %v2429_v44, %v2431_v40  ;;  %v2447_v56 = vsel %vm2444_vm8, %v2433_v38, %v2435_v43 }
  0xe3   : > { %4765 = vrot.lane.b32.xlu1 %v22174_v3, %s22014_s27  ;;  %19474 = vmatpush1.msk.msra.mxu0 %vm504_vm1, %v2445_v47  ;;  %v19496_v47 = vld [vmem:[%s26317_s1 + $0x40] sm:$0x3f] }
  0xe4   : > { %4759 = vrot.lane.b32.xlu0 %v22166_v2, %s22014_s27  ;;  %19475 = vmatmul.mubr.msk.f32.vlgmr.msra.gmra.mrb[0].mxu0 %vm500_vm2, %v19472_v45 }
  0xe5   : > { %v2439_v49 = vpop.permute.xlu1 %2438  ;;  %v2437_v53 = vpop.permute.xlu0 %2436  ;;  %2675 = vmatprep.mubr.f32.mxu0 %v26297_v0 }
  0xe6   : > { %v2448_v54 = vsel %vm2444_vm8, %v2435_v43, %v2437_v53  ;;  %v2449_v11 = vsel %vm2444_vm8, %v2437_v53, %v2439_v49 }
  0xe7   : > { %4769 = vrot.lane.b32.xlu1 %v22185_v5, %s22014_s27  ;;  %19476 = vmatprep.subr.msk.mxu1 %vm504_vm1, %v2448_v54 }
  0xe8   : > { %4767 = vrot.lane.b32.xlu0 %v22177_v4, %s22014_s27  ;;  %19477 = vmatpush1.msk.msra.mxu1 %vm504_vm1, %v2447_v56 }
  0xe9   : > { %v2443_v57 = vpop.permute.xlu1 %2442  ;;  %v2441_v58 = vpop.permute.xlu0 %2440  ;;  %20669 = vmatprep.subr.mxu1 %v26297_v0  ;;  %19478 = vmatmul.mubr.msk.f32.vlgmr.msra.gmra.mrb[0].mxu1 %vm500_vm2, %v19472_v45 }
  0xea   : > { %v2451_v61 = vsel %vm2444_vm8, %v2441_v58, %v2443_v57  ;;  %v2450_v63 = vsel %vm2444_vm8, %v2439_v49, %v2441_v58  ;;  %20671 = vmatprep.mubr.msk.f32.mxu1 %vm22010_vm3, %v26297_v0  ;;  %vm5108_vm8 = vcmask 490496  }
  0xeb   : > { %4773 = vrot.lane.b32.xlu1 %v22256_v8, %s22014_s27  ;;  %19479 = vmatprep.subr.msk.mxu0 %vm504_vm1, %v2450_v63 }
  0xec   : > { %4771 = vrot.lane.b32.xlu0 %v22196_v7, %s22014_s27  ;;  %20670 = vmatpush3.msk.msra.mxu1 %vm504_vm1, %v2451_v61  ;;  %s22016_s27 = smov 32  }
  0xed   : > { %19480 = vmatpush1.msk.msra.mxu0 %vm504_vm1, %v2449_v11  ;;  %v2766_v12 = vpop.permute.xlu1 %2765  ;;  %v2764_v15 = vpop.permute.xlu0 %2763  ;;  %20672 = vmatmul.mubr.msk.f32.vlgmr.msra.gmra.mrb[14].mxu1 %vm500_vm2, %v19472_v45 }
  0xee   : > { %v2779_v16 = vsel %vm2777_vm9, %v2764_v15, %v2766_v12  ;;  %19481 = vmatmul.mubr.msk.f32.vlgmr.msra.gmra.mrb[2].mxu0 %vm500_vm2, %v19472_v45  ;;  %2937 = vmatprep.mubr.f32.mxu1 %v26297_v0 }
  0xef   : > { %5096 = vrot.lane.b32.xlu1 %v22163_v1, %s26280_s25  ;;  %19485 = vmatprep.subr.msk.mxu0 %vm504_vm1, %v2779_v16 }
  0xf0   : > { %5094 = vrot.lane.b32.xlu0 %v22189_v6, %s26280_s25  ;;  %2866 = vmatprep.mubr.f32.mxu0 %v26297_v0 }
  0xf1   : > { %v2768_v17 = vpop.permute.xlu1 %2767  ;;  %v2762_v19 = vpop.permute.xlu0 %2761 }
  0xf2   : > { %v2778_v24 = vsel %vm2777_vm9, %v2762_v19, %v2764_v15  ;;  %v2780_v28 = vsel %vm2777_vm9, %v2766_v12, %v2768_v17 }
  0xf3   : > { %5098 = vrot.lane.b32.xlu1 %v22174_v3, %s26280_s25  ;;  %19486 = vmatpush1.msk.msra.mxu0 %vm504_vm1, %v2778_v24  ;;  %v19508_v24 = vld [vmem:[%s26317_s1 + $0x48] sm:$0x3f] }
  0xf4   : > { %5092 = vrot.lane.b32.xlu0 %v22166_v2, %s26280_s25  ;;  %19487 = vmatmul.mubr.msk.f32.vlgmr.msra.gmra.mrb[0].mxu0 %vm500_vm2, %v19484_v20 }
  0xf5   : > { %v2772_v25 = vpop.permute.xlu1 %2771  ;;  %v2770_v26 = vpop.permute.xlu0 %2769  ;;  %3008 = vmatprep.mubr.f32.mxu0 %v26297_v0 }
  0xf6   : > { %v2781_v27 = vsel %vm2777_vm9, %v2768_v17, %v2770_v26  ;;  %v2782_v38 = vsel %vm2777_vm9, %v2770_v26, %v2772_v25 }
  0xf7   : > { %5102 = vrot.lane.b32.xlu1 %v22185_v5, %s26280_s25  ;;  %19488 = vmatprep.subr.msk.mxu1 %vm504_vm1, %v2781_v27 }
  0xf8   : > { %5100 = vrot.lane.b32.xlu0 %v22177_v4, %s26280_s25  ;;  %19489 = vmatpush1.msk.msra.mxu1 %vm504_vm1, %v2780_v28 }
  0xf9   : > { %v2776_v33 = vpop.permute.xlu1 %2775  ;;  %v2774_v34 = vpop.permute.xlu0 %2773  ;;  %20674 = vmatprep.subr.mxu1 %v26297_v0  ;;  %19490 = vmatmul.mubr.msk.f32.vlgmr.msra.gmra.mrb[0].mxu1 %vm500_vm2, %v19484_v20 }
  0xfa   : > { %v2784_v35 = vsel %vm2777_vm9, %v2774_v34, %v2776_v33  ;;  %v2783_v37 = vsel %vm2777_vm9, %v2772_v25, %v2774_v34  ;;  %20676 = vmatprep.mubr.msk.f32.mxu1 %vm22010_vm3, %v26297_v0  ;;  %vm5441_vm9 = vcmask 261120  }
  0xfb   : > { %5106 = vrot.lane.b32.xlu1 %v22256_v8, %s26280_s25  ;;  %19491 = vmatprep.subr.msk.mxu0 %vm504_vm1, %v2783_v37 }
  0xfc   : > { %5104 = vrot.lane.b32.xlu0 %v22196_v7, %s26280_s25  ;;  %20675 = vmatpush3.msk.msra.mxu1 %vm504_vm1, %v2784_v35  ;;  %s22017_s25 = smov 31  }
  0xfd   : > { %19492 = vmatpush1.msk.msra.mxu0 %vm504_vm1, %v2782_v38  ;;  %v3099_v40 = vpop.permute.xlu1 %3098  ;;  %v3097_v41 = vpop.permute.xlu0 %3096  ;;  %20677 = vmatmul.mubr.msk.f32.vlgmr.msra.gmra.mrb[16].mxu1 %vm500_vm2, %v19484_v20 }
  0xfe   : > { %v3112_v43 = vsel %vm3110_vm10, %v3097_v41, %v3099_v40  ;;  %19493 = vmatmul.mubr.msk.f32.vlgmr.msra.gmra.mrb[2].mxu0 %vm500_vm2, %v19484_v20  ;;  %3270 = vmatprep.mubr.f32.mxu1 %v26297_v0 }
  0xff   : > { %5429 = vrot.lane.b32.xlu1 %v22163_v1, %s22016_s27  ;;  %19497 = vmatprep.subr.msk.mxu0 %vm504_vm1, %v3112_v43 }
 0x100   : > { %5427 = vrot.lane.b32.xlu0 %v22189_v6, %s22016_s27  ;;  %3199 = vmatprep.mubr.f32.mxu0 %v26297_v0 }
 0x101   : > { %v3101_v44 = vpop.permute.xlu1 %3100  ;;  %v3095_v45 = vpop.permute.xlu0 %3094 }
 0x102   : > { %v3111_v49 = vsel %vm3110_vm10, %v3095_v45, %v3097_v41  ;;  %v3113_v57 = vsel %vm3110_vm10, %v3099_v40, %v3101_v44 }
 0x103   : > { %5431 = vrot.lane.b32.xlu1 %v22174_v3, %s22016_s27  ;;  %19498 = vmatpush1.msk.msra.mxu0 %vm504_vm1, %v3111_v49  ;;  %v19520_v49 = vld [vmem:[%s26317_s1 + $0x50] sm:$0x3f] }
 0x104   : > { %5425 = vrot.lane.b32.xlu0 %v22166_v2, %s22016_s27  ;;  %19499 = vmatmul.mubr.msk.f32.vlgmr.msra.gmra.mrb[0].mxu0 %vm500_vm2, %v19496_v47 }
 0x105   : > { %v3105_v53 = vpop.permute.xlu1 %3104  ;;  %v3103_v54 = vpop.permute.xlu0 %3102  ;;  %3341 = vmatprep.mubr.f32.mxu0 %v26297_v0 }
 0x106   : > { %v3114_v56 = vsel %vm3110_vm10, %v3101_v44, %v3103_v54  ;;  %v3115_v12 = vsel %vm3110_vm10, %v3103_v54, %v3105_v53 }
 0x107   : > { %5435 = vrot.lane.b32.xlu1 %v22185_v5, %s22016_s27  ;;  %19500 = vmatprep.subr.msk.mxu1 %vm504_vm1, %v3114_v56 }
 0x108   : > { %5433 = vrot.lane.b32.xlu0 %v22177_v4, %s22016_s27  ;;  %19501 = vmatpush1.msk.msra.mxu1 %vm504_vm1, %v3113_v57 }
 0x109   : > { %v3109_v58 = vpop.permute.xlu1 %3108  ;;  %v3107_v61 = vpop.permute.xlu0 %3106  ;;  %20679 = vmatprep.subr.mxu1 %v26297_v0  ;;  %19502 = vmatmul.mubr.msk.f32.vlgmr.msra.gmra.mrb[0].mxu1 %vm500_vm2, %v19496_v47 }
 0x10a   : > { %v3117_v63 = vsel %vm3110_vm10, %v3107_v61, %v3109_v58  ;;  %v3116_v11 = vsel %vm3110_vm10, %v3105_v53, %v3107_v61  ;;  %20681 = vmatprep.mubr.msk.f32.mxu1 %vm22010_vm3, %v26297_v0  ;;  %vm5774_vm10 = vcmask 252928  }
 0x10b   : > { %5439 = vrot.lane.b32.xlu1 %v22256_v8, %s22016_s27  ;;  %19503 = vmatprep.subr.msk.mxu0 %vm504_vm1, %v3116_v11 }
 0x10c   : > { %5437 = vrot.lane.b32.xlu0 %v22196_v7, %s22016_s27  ;;  %20680 = vmatpush3.msk.msra.mxu1 %vm504_vm1, %v3117_v63  ;;  %s22018_s27 = smov 30  }
 0x10d   : > { %19504 = vmatpush1.msk.msra.mxu0 %vm504_vm1, %v3115_v12  ;;  %v3432_v15 = vpop.permute.xlu1 %3431  ;;  %20682 = vmatmul.mubr.msk.f32.vlgmr.msra.gmra.mrb[18].mxu1 %vm500_vm2, %v19496_v47 }
 0x10e   : > { %v3430_v16 = vpop.permute.xlu0 %3429  ;;  %19505 = vmatmul.mubr.msk.f32.vlgmr.msra.gmra.mrb[2].mxu0 %vm500_vm2, %v19496_v47  ;;  %3603 = vmatprep.mubr.f32.mxu1 %v26297_v0 }
 0x10f   : > { %5762 = vrot.lane.b32.xlu1 %v22163_v1, %s22017_s25  ;;  %v3445_v17 = vsel %vm3443_vm11, %v3430_v16, %v3432_v15  ;;  %3532 = vmatprep.mubr.f32.mxu0 %v26297_v0 }
 0x110   : > { %5760 = vrot.lane.b32.xlu0 %v22189_v6, %s22017_s25  ;;  %19509 = vmatprep.subr.msk.mxu0 %vm504_vm1, %v3445_v17 }
 0x111   : > { %v3434_v19 = vpop.permute.xlu1 %3433 }
 0x112   : > { %v3428_v20 = vpop.permute.xlu0 %3427  ;;  %v3446_v33 = vsel %vm3443_vm11, %v3432_v15, %v3434_v19 }
 0x113   : > { %5764 = vrot.lane.b32.xlu1 %v22174_v3, %s22017_s25  ;;  %v3444_v25 = vsel %vm3443_vm11, %v3428_v20, %v3430_v16 }
 0x114   : > { %5758 = vrot.lane.b32.xlu0 %v22166_v2, %s22017_s25  ;;  %19510 = vmatpush1.msk.msra.mxu0 %vm504_vm1, %v3444_v25 }
 0x115   : > { %v3438_v26 = vpop.permute.xlu1 %3437  ;;  %19511 = vmatmul.mubr.msk.f32.vlgmr.msra.gmra.mrb[0].mxu0 %vm500_vm2, %v19508_v24 }
 0x116   : > { %v3436_v27 = vpop.permute.xlu0 %3435  ;;  %3674 = vmatprep.mubr.f32.mxu0 %v26297_v0 }
 0x117   : > { %5768 = vrot.lane.b32.xlu1 %v22185_v5, %s22017_s25  ;;  %v3447_v28 = vsel %vm3443_vm11, %v3434_v19, %v3436_v27  ;;  %v3448_v40 = vsel %vm3443_vm11, %v3436_v27, %v3438_v26 }
 0x118   : > { %5766 = vrot.lane.b32.xlu0 %v22177_v4, %s22017_s25  ;;  %19512 = vmatprep.subr.msk.mxu1 %vm504_vm1, %v3447_v28 }
 0x119   : > { %19513 = vmatpush1.msk.msra.mxu1 %vm504_vm1, %v3446_v33 }
 0x11a   : > { %v3442_v34 = vpop.permute.xlu1 %3441  ;;  %v3440_v35 = vpop.permute.xlu0 %3439  ;;  %20684 = vmatprep.subr.mxu1 %v26297_v0  ;;  %19514 = vmatmul.mubr.msk.f32.vlgmr.msra.gmra.mrb[0].mxu1 %vm500_vm2, %v19508_v24 }
 0x11b   : > { %5772 = vrot.lane.b32.xlu1 %v22256_v8, %s22017_s25  ;;  %v3450_v37 = vsel %vm3443_vm11, %v3440_v35, %v3442_v34  ;;  %v3449_v38 = vsel %vm3443_vm11, %v3438_v26, %v3440_v35  ;;  %20686 = vmatprep.mubr.msk.f32.mxu1 %vm22010_vm3, %v26297_v0  ;;  %v22824_v35 = vld [vmem:[%s22160_s18 + $0x8] sm:$0x77]  ;;  %vm6107_vm11 = vcmask 244736  }
 0x11c   : > { %5770 = vrot.lane.b32.xlu0 %v22196_v7, %s22017_s25  ;;  %19515 = vmatprep.subr.msk.mxu0 %vm504_vm1, %v3449_v38  ;;  %s22019_s25 = smov 29  }
 0x11d   : > { %20685 = vmatpush3.msk.msra.mxu1 %vm504_vm1, %v3450_v37  ;;  %19516 = vmatpush1.msk.msra.mxu0 %vm504_vm1, %v3448_v40 }
 0x11e   : > { %19517 = vmatmul.mubr.msk.f32.vlgmr.msra.gmra.mrb[2].mxu0 %vm500_vm2, %v19508_v24  ;;  %20687 = vmatmul.mubr.msk.f32.vlgmr.msra.gmra.mrb[20].mxu1 %vm500_vm2, %v19508_v24 }
 0x11f   : > { %6095 = vrot.lane.b32.xlu1 %v22163_v1, %s22018_s27  ;;  %3936 = vmatprep.mubr.f32.mxu1 %v26297_v0 }
 0x120   : > { %6093 = vrot.lane.b32.xlu0 %v22189_v6, %s22018_s27  ;;  %v3765_v41 = vpop.permute.xlu1 %3764  ;;  %v3763_v43 = vpop.permute.xlu0 %3762  ;;  %3865 = vmatprep.mubr.f32.mxu0 %v26297_v0 }
 0x121   : > { %v3778_v44 = vsel %vm3776_vm12, %v3763_v43, %v3765_v41 }
 0x122   : > { %19521 = vmatprep.subr.msk.mxu0 %vm504_vm1, %v3778_v44 }
 0x123   : > { %6097 = vrot.lane.b32.xlu1 %v22174_v3, %s22018_s27 }
 0x124   : > { %6091 = vrot.lane.b32.xlu0 %v22166_v2, %s22018_s27 }
 0x125   : > { %v3767_v45 = vpop.permute.xlu1 %3766  ;;  %v3761_v47 = vpop.permute.xlu0 %3760 }
 0x126   : > { %v3777_v53 = vsel %vm3776_vm12, %v3761_v47, %v3763_v43  ;;  %v3779_v58 = vsel %vm3776_vm12, %v3765_v41, %v3767_v45  ;;  %v21933_v43 = vld [vmem:[%s22160_s18] sm:$0x77] }
 0x127   : > { %6101 = vrot.lane.b32.xlu1 %v22185_v5, %s22018_s27  ;;  %19522 = vmatpush1.msk.msra.mxu0 %vm504_vm1, %v3777_v53  ;;  %v19544_v53 = vld [vmem:[%s26317_s1 + $0x60] sm:$0x3f] }
 0x128   : > { %6099 = vrot.lane.b32.xlu0 %v22177_v4, %s22018_s27  ;;  %19523 = vmatmul.mubr.msk.f32.vlgmr.msra.gmra.mrb[0].mxu0 %vm500_vm2, %v19520_v49 }
 0x129   : > { %v3771_v54 = vpop.permute.xlu1 %3770  ;;  %4007 = vmatprep.mubr.f32.mxu0 %v26297_v0 }
 0x12a   : > { %v3769_v56 = vpop.permute.xlu0 %3768 }
 0x12b   : > { %6105 = vrot.lane.b32.xlu1 %v22256_v8, %s22018_s27  ;;  %v3780_v57 = vsel %vm3776_vm12, %v3767_v45, %v3769_v56  ;;  %v3781_v15 = vsel %vm3776_vm12, %v3769_v56, %v3771_v54 }
 0x12c   : > { %6103 = vrot.lane.b32.xlu0 %v22196_v7, %s22018_s27  ;;  %19524 = vmatprep.subr.msk.mxu1 %vm504_vm1, %v3780_v57  ;;  %s22020_s27 = smov 28  }
 0x12d   : > { %19525 = vmatpush1.msk.msra.mxu1 %vm504_vm1, %v3779_v58  ;;  %v3775_v61 = vpop.permute.xlu1 %3774 }
 0x12e   : > { %v3773_v63 = vpop.permute.xlu0 %3772  ;;  %20689 = vmatprep.subr.mxu1 %v26297_v0  ;;  %19526 = vmatmul.mubr.msk.f32.vlgmr.msra.gmra.mrb[0].mxu1 %vm500_vm2, %v19520_v49 }
 0x12f   : > { %v3783_v11 = vsel %vm3776_vm12, %v3773_v63, %v3775_v61  ;;  %6428 = vrot.lane.b32.xlu1 %v22163_v1, %s22019_s25  ;;  %v3782_v12 = vsel %vm3776_vm12, %v3771_v54, %v3773_v63  ;;  %20691 = vmatprep.mubr.msk.f32.mxu1 %vm22010_vm3, %v26297_v0  ;;  %v22866_v61 = vld [vmem:[%s22160_s18 + $0x18] sm:$0x77] }
 0x130   : > { %6426 = vrot.lane.b32.xlu0 %v22189_v6, %s22019_s25  ;;  %19527 = vmatprep.subr.msk.mxu0 %vm504_vm1, %v3782_v12 }
 0x131   : > { %20690 = vmatpush3.msk.msra.mxu1 %vm504_vm1, %v3783_v11  ;;  %19528 = vmatpush1.msk.msra.mxu0 %vm504_vm1, %v3781_v15  ;;  %v4098_v16 = vpop.permute.xlu1 %4097 }
 0x132   : > { %v4096_v17 = vpop.permute.xlu0 %4095  ;;  %19529 = vmatmul.mubr.msk.f32.vlgmr.msra.gmra.mrb[2].mxu0 %vm500_vm2, %v19520_v49  ;;  %20692 = vmatmul.mubr.msk.f32.vlgmr.msra.gmra.mrb[22].mxu1 %vm500_vm2, %v19520_v49  ;;  %v22851_v49 = vld [vmem:[%s22160_s18 + $0x10] sm:$0x77]  ;;  %s26318_s18 = smov 124  }
 0x133   : > { %6430 = vrot.lane.b32.xlu1 %v22174_v3, %s22019_s25  ;;  %v4111_v1 = vsel %vm4109_vm13, %v4096_v17, %v4098_v16  ;;  %4269 = vmatprep.mubr.f32.mxu1 %v26297_v0 }
 0x134   : > { %6424 = vrot.lane.b32.xlu0 %v22166_v2, %s22019_s25  ;;  %19533 = vmatprep.subr.msk.mxu0 %vm504_vm1, %v4111_v1  ;;  %v19532_v2 = vld [vmem:[%s26317_s1 + $0x58] sm:$0x3f] }
 0x135   : > { %v4100_v19 = vpop.permute.xlu1 %4099  ;;  %4198 = vmatprep.mubr.f32.mxu0 %v26297_v0 }
 0x136   : > { %v4094_v20 = vpop.permute.xlu0 %4093 }
 0x137   : > { %v4110_v24 = vsel %vm4109_vm13, %v4094_v20, %v4096_v17  ;;  %6434 = vrot.lane.b32.xlu1 %v22185_v5, %s22019_s25 }
 0x138   : > { %6432 = vrot.lane.b32.xlu0 %v22177_v4, %s22019_s25  ;;  %19534 = vmatpush1.msk.msra.mxu0 %vm504_vm1, %v4110_v24  ;;  %v4112_v4 = vsel %vm4109_vm13, %v4098_v16, %v4100_v19 }
 0x139   : > { %v4104_v25 = vpop.permute.xlu1 %4103  ;;  %19535 = vmatmul.mubr.msk.f32.vlgmr.msra.gmra.mrb[0].mxu0 %vm500_vm2, %v19532_v2 }
 0x13a   : > { %v4102_v26 = vpop.permute.xlu0 %4101  ;;  %4340 = vmatprep.mubr.f32.mxu0 %v26297_v0 }
 0x13b   : > { %6438 = vrot.lane.b32.xlu1 %v22256_v8, %s22019_s25  ;;  %v4113_v27 = vsel %vm4109_vm13, %v4100_v19, %v4102_v26  ;;  %v4114_v37 = vsel %vm4109_vm13, %v4102_v26, %v4104_v25 }
 0x13c   : > { %6436 = vrot.lane.b32.xlu0 %v22196_v7, %s22019_s25  ;;  %19536 = vmatprep.subr.msk.mxu1 %vm504_vm1, %v4113_v27  ;;  %s26324_s25 = smov 62  }
 0x13d   : > { %19537 = vmatpush1.msk.msra.mxu1 %vm504_vm1, %v4112_v4  ;;  %v4108_v28 = vpop.permute.xlu1 %4107 }
 0x13e   : > { %19538 = vmatmul.mubr.msk.f32.vlgmr.msra.gmra.mrb[0].mxu1 %vm500_vm2, %v19532_v2  ;;  %v4106_v33 = vpop.permute.xlu0 %4105  ;;  %20694 = vmatprep.subr.mxu1 %v26297_v0 }
 0x13f   : > { %v4116_v34 = vsel %vm4109_vm13, %v4106_v33, %v4108_v28  ;;  %6761 = vrot.lane.b32.xlu1 %v22824_v35, %s22020_s27  ;;  %v4115_v7 = vsel %vm4109_vm13, %v4104_v25, %v4106_v33  ;;  %20696 = vmatprep.mubr.msk.f32.mxu1 %vm22010_vm3, %v26297_v0  ;;  %v19556_v25 = vld [vmem:[%s26317_s1 + $0x68] sm:$0x3f]  ;;  %vm6440_vm13 = vcmask 236544  }
 0x140   : > { %6759 = vrot.lane.b32.xlu0 %v22189_v6, %s22020_s27  ;;  %19539 = vmatprep.subr.msk.mxu0 %vm504_vm1, %v4115_v7 }
 0x141   : > { %20695 = vmatpush3.msk.msra.mxu1 %vm504_vm1, %v4116_v34  ;;  %19540 = vmatpush1.msk.msra.mxu0 %vm504_vm1, %v4114_v37  ;;  %v4431_v38 = vpop.permute.xlu1 %4430 }
 0x142   : > { %20697 = vmatmul.mubr.msk.f32.vlgmr.msra.gmra.mrb[24].mxu1 %vm500_vm2, %v19532_v2  ;;  %v4429_v40 = vpop.permute.xlu0 %4428  ;;  %19541 = vmatmul.mubr.msk.f32.vlgmr.msra.gmra.mrb[2].mxu0 %vm500_vm2, %v19532_v2 }
 0x143   : > { %6763 = vrot.lane.b32.xlu1 %v22174_v3, %s22020_s27  ;;  %v4444_v41 = vsel %vm4442_vm14, %v4429_v40, %v4431_v38  ;;  %4602 = vmatprep.mubr.f32.mxu1 %v26297_v0 }
 0x144   : > { %6757 = vrot.lane.b32.xlu0 %v21933_v43, %s22020_s27  ;;  %19545 = vmatprep.subr.msk.mxu0 %vm504_vm1, %v4444_v41 }
 0x145   : > { %v4433_v44 = vpop.permute.xlu1 %4432  ;;  %4531 = vmatprep.mubr.f32.mxu0 %v26297_v0 }
 0x146   : > { %v4427_v45 = vpop.permute.xlu0 %4426  ;;  %v4445_v58 = vsel %vm4442_vm14, %v4431_v38, %v4433_v44 }
 0x147   : > { %v4443_v47 = vsel %vm4442_vm14, %v4427_v45, %v4429_v40  ;;  %6767 = vrot.lane.b32.xlu1 %v22185_v5, %s22020_s27 }
 0x148   : > { %6765 = vrot.lane.b32.xlu0 %v22851_v49, %s22020_s27  ;;  %19546 = vmatpush1.msk.msra.mxu0 %vm504_vm1, %v4443_v47 }
 0x149   : > { %v4437_v54 = vpop.permute.xlu1 %4436  ;;  %19547 = vmatmul.mubr.msk.f32.vlgmr.msra.gmra.mrb[0].mxu0 %vm500_vm2, %v19544_v53 }
 0x14a   : > { %v4435_v56 = vpop.permute.xlu0 %4434  ;;  %4673 = vmatprep.mubr.f32.mxu0 %v26297_v0 }
 0x14b   : > { %6771 = vrot.lane.b32.xlu1 %v22256_v8, %s22020_s27  ;;  %v4446_v57 = vsel %vm4442_vm14, %v4433_v44, %v4435_v56  ;;  %v4447_v16 = vsel %vm4442_vm14, %v4435_v56, %v4437_v54 }
 0x14c   : > { %6769 = vrot.lane.b32.xlu0 %v22866_v61, %s22020_s27  ;;  %19548 = vmatprep.subr.msk.mxu1 %vm504_vm1, %v4446_v57  ;;  %s26319_s27 = smov 125  }
 0x14d   : > { %19549 = vmatpush1.msk.msra.mxu1 %vm504_vm1, %v4445_v58  ;;  %v4441_v63 = vpop.permute.xlu1 %4440 }
 0x14e   : > { %19550 = vmatmul.mubr.msk.f32.vlgmr.msra.gmra.mrb[0].mxu1 %vm500_vm2, %v19544_v53  ;;  %v4439_v11 = vpop.permute.xlu0 %4438  ;;  %20699 = vmatprep.subr.mxu1 %v26297_v0 }
 0x14f   : > { %v4449_v12 = vsel %vm4442_vm14, %v4439_v11, %v4441_v63  ;;  %7689 = vrot.lane.b32.xlu1 %v22256_v8, %s26288_s21  ;;  %v4448_v15 = vsel %vm4442_vm14, %v4437_v54, %v4439_v11  ;;  %20701 = vmatprep.mubr.msk.f32.mxu1 %vm22010_vm3, %v26297_v0 }
 0x150   : > { %7387 = vrot.lane.b32.xlu0 %v22256_v8, %s22001_s20  ;;  %19551 = vmatprep.subr.msk.mxu0 %vm504_vm1, %v4448_v15 }
 0x151   : > { %20700 = vmatpush3.msk.msra.mxu1 %vm504_vm1, %v4449_v12  ;;  %19552 = vmatpush1.msk.msra.mxu0 %vm504_vm1, %v4447_v16  ;;  %v4764_v17 = vpop.permute.xlu1 %4763 }
 0x152   : > { %20702 = vmatmul.mubr.msk.f32.vlgmr.msra.gmra.mrb[26].mxu1 %vm500_vm2, %v19544_v53  ;;  %v4762_v1 = vpop.permute.xlu0 %4761  ;;  %19553 = vmatmul.mubr.msk.f32.vlgmr.msra.gmra.mrb[2].mxu0 %vm500_vm2, %v19544_v53  ;;  %v19568_v53 = vld [vmem:[%s26317_s1 + $0x70] sm:$0x3f] }
 0x153   : > { %8293 = vrot.lane.b32.xlu1 %v22256_v8, %s26318_s18  ;;  %v4777_v19 = vsel %vm4775_vm15, %v4762_v1, %v4764_v17  ;;  %4935 = vmatprep.mubr.f32.mxu1 %v26297_v0 }
 0x154   : > { %7991 = vrot.lane.b32.xlu0 %v22256_v8, %s26319_s27  ;;  %19557 = vmatprep.subr.msk.mxu0 %vm504_vm1, %v4777_v19  ;;  %s26284_s27 = smov 120  }
 0x155   : > { %v4766_v20 = vpop.permute.xlu1 %4765  ;;  %4864 = vmatprep.mubr.f32.mxu0 %v26297_v0 }
 0x156   : > { %v4760_v24 = vpop.permute.xlu0 %4759  ;;  %v4778_v28 = vsel %vm4775_vm15, %v4764_v17, %v4766_v20 }
 0x157   : > { %v4776_v2 = vsel %vm4775_vm15, %v4760_v24, %v4762_v1 }
 0x158   : > { %19558 = vmatpush1.msk.msra.mxu0 %vm504_vm1, %v4776_v2 }
 0x159   : > { %v4770_v26 = vpop.permute.xlu1 %4769  ;;  %19559 = vmatmul.mubr.msk.f32.vlgmr.msra.gmra.mrb[0].mxu0 %vm500_vm2, %v19556_v25 }
 0x15a   : > { %v4768_v27 = vpop.permute.xlu0 %4767  ;;  %5006 = vmatprep.mubr.f32.mxu0 %v26297_v0 }
 0x15b   : > { %v4779_v4 = vsel %vm4775_vm15, %v4766_v20, %v4768_v27  ;;  %v4780_v38 = vsel %vm4775_vm15, %v4768_v27, %v4770_v26 }
 0x15c   : > { %19560 = vmatprep.subr.msk.mxu1 %vm504_vm1, %v4779_v4 }
 0x15d   : > { %19561 = vmatpush1.msk.msra.mxu1 %vm504_vm1, %v4778_v28  ;;  %v4774_v33 = vpop.permute.xlu1 %4773 }
 0x15e   : > { %19562 = vmatmul.mubr.msk.f32.vlgmr.msra.gmra.mrb[0].mxu1 %vm500_vm2, %v19556_v25  ;;  %v4772_v34 = vpop.permute.xlu0 %4771  ;;  %20704 = vmatprep.subr.mxu1 %v26297_v0 }
 0x15f   : > { %v4782_v7 = vsel %vm4775_vm15, %v4772_v34, %v4774_v33  ;;  %v4781_v37 = vsel %vm4775_vm15, %v4770_v26, %v4772_v34  ;;  %20706 = vmatprep.mubr.msk.f32.mxu1 %vm22010_vm3, %v26297_v0  ;;  %v19580_v26 = vld [vmem:[%s26317_s1 + $0x78] sm:$0x3f]  ;;  %vm6773_vm15 = vcmask 228352  }
 0x160   : > { %19563 = vmatprep.subr.msk.mxu0 %vm504_vm1, %v4781_v37  ;;  %20705 = vmatpush3.msk.msra.mxu1 %vm504_vm1, %v4782_v7 }
 0x161   : > { %19564 = vmatpush1.msk.msra.mxu0 %vm504_vm1, %v4780_v38  ;;  %v5097_v40 = vpop.permute.xlu1 %5096 }
 0x162   : > { %20707 = vmatmul.mubr.msk.f32.vlgmr.msra.gmra.mrb[28].mxu1 %vm500_vm2, %v19556_v25  ;;  %v5095_v41 = vpop.permute.xlu0 %5094  ;;  %19565 = vmatmul.mubr.msk.f32.vlgmr.msra.gmra.mrb[2].mxu0 %vm500_vm2, %v19556_v25 }
 0x163   : > { %v5110_v43 = vsel %vm5108_vm8, %v5095_v41, %v5097_v40  ;;  %5268 = vmatprep.mubr.f32.mxu1 %v26297_v0  ;;  %5197 = vmatprep.mubr.f32.mxu0 %v26297_v0 }
 0x164   : > { %19569 = vmatprep.subr.msk.mxu0 %vm504_vm1, %v5110_v43 }
 0x165   : > { %v5099_v44 = vpop.permute.xlu1 %5098 }
 0x166   : > { %v5093_v45 = vpop.permute.xlu0 %5092  ;;  %v5111_v58 = vsel %vm5108_vm8, %v5097_v40, %v5099_v44 }
 0x167   : > { %v5109_v47 = vsel %vm5108_vm8, %v5093_v45, %v5095_v41 }
 0x168   : > { %19570 = vmatpush1.msk.msra.mxu0 %vm504_vm1, %v5109_v47 }
 0x169   : > { %v5103_v54 = vpop.permute.xlu1 %5102  ;;  %19571 = vmatmul.mubr.msk.f32.vlgmr.msra.gmra.mrb[0].mxu0 %vm500_vm2, %v19568_v53 }
 0x16a   : > { %v5101_v56 = vpop.permute.xlu0 %5100  ;;  %5339 = vmatprep.mubr.f32.mxu0 %v26297_v0 }
 0x16b   : > { %v5112_v57 = vsel %vm5108_vm8, %v5099_v44, %v5101_v56  ;;  %v5113_v16 = vsel %vm5108_vm8, %v5101_v56, %v5103_v54 }
 0x16c   : > { %19572 = vmatprep.subr.msk.mxu1 %vm504_vm1, %v5112_v57 }
 0x16d   : > { %19573 = vmatpush1.msk.msra.mxu1 %vm504_vm1, %v5111_v58  ;;  %v5107_v63 = vpop.permute.xlu1 %5106 }
 0x16e   : > { %19574 = vmatmul.mubr.msk.f32.vlgmr.msra.gmra.mrb[0].mxu1 %vm500_vm2, %v19568_v53  ;;  %v5105_v11 = vpop.permute.xlu0 %5104  ;;  %20709 = vmatprep.subr.mxu1 %v26297_v0 }
 0x16f   : > { %v5115_v12 = vsel %vm5108_vm8, %v5105_v11, %v5107_v63  ;;  %v5114_v15 = vsel %vm5108_vm8, %v5103_v54, %v5105_v11  ;;  %20711 = vmatprep.mubr.msk.f32.mxu1 %vm22010_vm3, %v26297_v0  ;;  %v19592_v63 = vld [vmem:[%s26317_s1 + $0x80] sm:$0x3f] }
 0x170   : > { %19575 = vmatprep.subr.msk.mxu0 %vm504_vm1, %v5114_v15  ;;  %20710 = vmatpush3.msk.msra.mxu1 %vm504_vm1, %v5115_v12 }
 0x171   : > { %19576 = vmatpush1.msk.msra.mxu0 %vm504_vm1, %v5113_v16  ;;  %v5430_v17 = vpop.permute.xlu1 %5429 }
 0x172   : > { %20712 = vmatmul.mubr.msk.f32.vlgmr.msra.gmra.mrb[30].mxu1 %vm500_vm2, %v19568_v53  ;;  %v5428_v1 = vpop.permute.xlu0 %5427  ;;  %19577 = vmatmul.mubr.msk.f32.vlgmr.msra.gmra.mrb[2].mxu0 %vm500_vm2, %v19568_v53 }
 0x173   : > { %v5443_v19 = vsel %vm5441_vm9, %v5428_v1, %v5430_v17  ;;  %5601 = vmatprep.mubr.f32.mxu1 %v26297_v0  ;;  %5530 = vmatprep.mubr.f32.mxu0 %v26297_v0 }
 0x174   : > { %19581 = vmatprep.subr.msk.mxu0 %vm504_vm1, %v5443_v19 }
 0x175   : > { %v5432_v20 = vpop.permute.xlu1 %5431 }
 0x176   : > { %v5426_v24 = vpop.permute.xlu0 %5425  ;;  %v5444_v34 = vsel %vm5441_vm9, %v5430_v17, %v5432_v20 }
 0x177   : > { %v5442_v2 = vsel %vm5441_vm9, %v5426_v24, %v5428_v1  ;;  %v798_v25 = vpop.f32.mrb[2].mxu1 }
 0x178   : > { %19582 = vmatpush1.msk.msra.mxu0 %vm504_vm1, %v5442_v2  ;;  %v20643_v27 = vpop.f32.mrb[3].mxu1 }
 0x179   : > { %v5436_v4 = vpop.permute.xlu1 %5435  ;;  %19583 = vmatmul.mubr.msk.f32.vlgmr.msra.gmra.mrb[0].mxu0 %vm500_vm2, %v19580_v26 }
 0x17a   : > { %v5434_v28 = vpop.permute.xlu0 %5433  ;;  %5672 = vmatprep.mubr.f32.mxu0 %v26297_v0 }
 0x17b   : > { %v5445_v33 = vsel %vm5441_vm9, %v5432_v20, %v5434_v28  ;;  %v5446_v41 = vsel %vm5441_vm9, %v5434_v28, %v5436_v4 }
 0x17c   : > { %19584 = vmatprep.subr.msk.mxu1 %vm504_vm1, %v5445_v33 }
 0x17d   : > { %19585 = vmatpush1.msk.msra.mxu1 %vm504_vm1, %v5444_v34  ;;  %v5440_v7 = vpop.permute.xlu1 %5439 }
 0x17e   : > { %19586 = vmatmul.mubr.msk.f32.vlgmr.msra.gmra.mrb[0].mxu1 %vm500_vm2, %v19580_v26  ;;  %v5438_v37 = vpop.permute.xlu0 %5437  ;;  %20714 = vmatprep.subr.mxu1 %v26297_v0 }
 0x17f   : > { %v5448_v38 = vsel %vm5441_vm9, %v5438_v37, %v5440_v7  ;;  %v5447_v40 = vsel %vm5441_vm9, %v5436_v4, %v5438_v37  ;;  %20716 = vmatprep.mubr.msk.f32.mxu1 %vm22010_vm3, %v26297_v0  ;;  %vm11146_vm9 = vcmask 457728  }
 0x180   : > { %19587 = vmatprep.subr.msk.mxu0 %vm504_vm1, %v5447_v40  ;;  %20715 = vmatpush3.msk.msra.mxu1 %vm504_vm1, %v5448_v38  ;;  %v19604_v38 = vld [vmem:[%s26317_s1 + $0x88] sm:$0x3f] }
 0x181   : > { %19588 = vmatpush1.msk.msra.mxu0 %vm504_vm1, %v5446_v41  ;;  %v5763_v43 = vpop.permute.xlu1 %5762 }
 0x182   : > { %20717 = vmatmul.mubr.msk.f32.vlgmr.msra.gmra.mrb[32].mxu1 %vm500_vm2, %v19580_v26  ;;  %v5761_v44 = vpop.permute.xlu0 %5760  ;;  %19589 = vmatmul.mubr.msk.f32.vlgmr.msra.gmra.mrb[2].mxu0 %vm500_vm2, %v19580_v26  ;;  %v1098_v45 = vpop.f32.mrb[4].mxu1 }
 0x183   : > { %v5776_v47 = vsel %vm5774_vm10, %v5761_v44, %v5763_v43  ;;  %5934 = vmatprep.mubr.f32.mxu1 %v26297_v0  ;;  %5863 = vmatprep.mubr.f32.mxu0 %v26297_v0  ;;  %v1099_v53 = vadd.f32 %v1098_v45, %v798_v25  ;;  %v20648_v54 = vpop.f32.mrb[5].mxu1 }
 0x184   : > { %19593 = vmatprep.subr.msk.mxu0 %vm504_vm1, %v5776_v47 }
 0x185   : > { %v5765_v56 = vpop.permute.xlu1 %5764 }
 0x186   : > { %v5759_v57 = vpop.permute.xlu0 %5758  ;;  %v5777_v16 = vsel %vm5774_vm10, %v5763_v43, %v5765_v56 }
 0x187   : > { %v5775_v58 = vsel %vm5774_vm10, %v5759_v57, %v5761_v44 }
 0x188   : > { %19594 = vmatpush1.msk.msra.mxu0 %vm504_vm1, %v5775_v58 }
 0x189   : > { %v5769_v11 = vpop.permute.xlu1 %5768  ;;  %19595 = vmatmul.mubr.msk.f32.vlgmr.msra.gmra.mrb[0].mxu0 %vm500_vm2, %v19592_v63 }
 0x18a   : > { %v5767_v12 = vpop.permute.xlu0 %5766  ;;  %6005 = vmatprep.mubr.f32.mxu0 %v26297_v0 }
 0x18b   : > { %v5778_v15 = vsel %vm5774_vm10, %v5765_v56, %v5767_v12  ;;  %v5779_v26 = vsel %vm5774_vm10, %v5767_v12, %v5769_v11 }
 0x18c   : > { %19596 = vmatprep.subr.msk.mxu1 %vm504_vm1, %v5778_v15  ;;  %v1421_v17 = vpop.f32.mrb[6].mxu1 }
 0x18d   : > { %19597 = vmatpush1.msk.msra.mxu1 %vm504_vm1, %v5777_v16  ;;  %v5773_v1 = vpop.permute.xlu1 %5772  ;;  %v1431_v19 = vadd.f32 %v1421_v17, %v1099_v53  ;;  %v20653_v20 = vpop.f32.mrb[7].mxu1 }
 0x18e   : > { %19598 = vmatmul.mubr.msk.f32.vlgmr.msra.gmra.mrb[0].mxu1 %vm500_vm2, %v19592_v63  ;;  %v5771_v24 = vpop.permute.xlu0 %5770  ;;  %20719 = vmatprep.subr.mxu1 %v26297_v0 }
 0x18f   : > { %v5781_v2 = vsel %vm5774_vm10, %v5771_v24, %v5773_v1  ;;  %v5780_v25 = vsel %vm5774_vm10, %v5769_v11, %v5771_v24  ;;  %20721 = vmatprep.mubr.msk.f32.mxu1 %vm22010_vm3, %v26297_v0  ;;  %v19616_v24 = vld [vmem:[%s26317_s1 + $0x90] sm:$0x3f]  ;;  %vm19001_vm10 = vcmask 130048  }
 0x190   : > { %19599 = vmatprep.subr.msk.mxu0 %vm504_vm1, %v5780_v25  ;;  %20720 = vmatpush3.msk.msra.mxu1 %vm504_vm1, %v5781_v2 }
 0x191   : > { %19600 = vmatpush1.msk.msra.mxu0 %vm504_vm1, %v5779_v26  ;;  %v6096_v27 = vpop.permute.xlu1 %6095 }
 0x192   : > { %20722 = vmatmul.mubr.msk.f32.vlgmr.msra.gmra.mrb[34].mxu1 %vm500_vm2, %v19592_v63  ;;  %v6094_v4 = vpop.permute.xlu0 %6093  ;;  %19601 = vmatmul.mubr.msk.f32.vlgmr.msra.gmra.mrb[2].mxu0 %vm500_vm2, %v19592_v63 }
 0x193   : > { %v6109_v28 = vsel %vm6107_vm11, %v6094_v4, %v6096_v27  ;;  %6267 = vmatprep.mubr.f32.mxu1 %v26297_v0  ;;  %6196 = vmatprep.mubr.f32.mxu0 %v26297_v0 }
 0x194   : > { %19605 = vmatprep.subr.msk.mxu0 %vm504_vm1, %v6109_v28 }
 0x195   : > { %v6098_v33 = vpop.permute.xlu1 %6097 }
 0x196   : > { %v6092_v34 = vpop.permute.xlu0 %6091  ;;  %v6110_v47 = vsel %vm6107_vm11, %v6096_v27, %v6098_v33 }
 0x197   : > { %v6108_v7 = vsel %vm6107_vm11, %v6092_v34, %v6094_v4  ;;  %v1751_v37 = vpop.f32.mrb[8].mxu1 }
 0x198   : > { %19606 = vmatpush1.msk.msra.mxu0 %vm504_vm1, %v6108_v7  ;;  %v1761_v40 = vadd.f32 %v1751_v37, %v1431_v19  ;;  %v20658_v41 = vpop.f32.mrb[9].mxu1 }
 0x199   : > { %v6102_v43 = vpop.permute.xlu1 %6101  ;;  %19607 = vmatmul.mubr.msk.f32.vlgmr.msra.gmra.mrb[0].mxu0 %vm500_vm2, %v19604_v38 }
 0x19a   : > { %v6100_v44 = vpop.permute.xlu0 %6099  ;;  %6338 = vmatprep.mubr.f32.mxu0 %v26297_v0 }
 0x19b   : > { %v6111_v45 = vsel %vm6107_vm11, %v6098_v33, %v6100_v44  ;;  %v6112_v58 = vsel %vm6107_vm11, %v6100_v44, %v6102_v43 }
 0x19c   : > { %19608 = vmatprep.subr.msk.mxu1 %vm504_vm1, %v6111_v45 }
 0x19d   : > { %19609 = vmatpush1.msk.msra.mxu1 %vm504_vm1, %v6110_v47  ;;  %v6106_v53 = vpop.permute.xlu1 %6105 }
 0x19e   : > { %19610 = vmatmul.mubr.msk.f32.vlgmr.msra.gmra.mrb[0].mxu1 %vm500_vm2, %v19604_v38  ;;  %v6104_v54 = vpop.permute.xlu0 %6103  ;;  %20724 = vmatprep.subr.mxu1 %v26297_v0 }
 0x19f   : > { %v6114_v56 = vsel %vm6107_vm11, %v6104_v54, %v6106_v53  ;;  %v6113_v57 = vsel %vm6107_vm11, %v6102_v43, %v6104_v54  ;;  %20726 = vmatprep.mubr.msk.f32.mxu1 %vm22010_vm3, %v26297_v0  ;;  %v19628_v53 = vld [vmem:[%s26317_s1 + $0x98] sm:$0x3f]  ;;  %v8593_v54 = vld [vmem:[%s26320_s2] sm:$0x3f]  ;;  %s26330_s2 = smov 120   ;;  %vm19247_vm11 = vcmask 687104  }
 0x1a0   : > { %19611 = vmatprep.subr.msk.mxu0 %vm504_vm1, %v6113_v57  ;;  %20725 = vmatpush3.msk.msra.mxu1 %vm504_vm1, %v6114_v56  ;;  %v22021_v57 = vmov 0  }
 0x1a1   : > { %19612 = vmatpush1.msk.msra.mxu0 %vm504_vm1, %v6112_v58  ;;  %v6429_v63 = vpop.permute.xlu1 %6428  ;;  %v2081_v11 = vpop.f32.mrb[10].mxu1  ;;  %21891 = vset.pattern.permute.xlu0 %v22021_v57 }
 0x1a2   : > { %20727 = vmatmul.mubr.msk.f32.vlgmr.msra.gmra.mrb[36].mxu1 %vm500_vm2, %v19604_v38  ;;  %v6427_v12 = vpop.permute.xlu0 %6426  ;;  %19613 = vmatmul.mubr.msk.f32.vlgmr.msra.gmra.mrb[2].mxu0 %vm500_vm2, %v19604_v38  ;;  %v2091_v15 = vadd.f32 %v2081_v11, %v1761_v40  ;;  %v20663_v16 = vpop.f32.mrb[11].mxu1 }
 0x1a3   : > { %v6442_v17 = vsel %vm6440_vm13, %v6427_v12, %v6429_v63  ;;  %6600 = vmatprep.mubr.f32.mxu1 %v26297_v0  ;;  %6529 = vmatprep.mubr.f32.mxu0 %v26297_v0 }
 0x1a4   : > { %19617 = vmatprep.subr.msk.mxu0 %vm504_vm1, %v6442_v17  ;;  %21892 = vset.pattern.permute.xlu1 %v22021_v57 }
 0x1a5   : > { %v6431_v1 = vpop.permute.xlu1 %6430  ;;  %8596 = vperm.xlu0 %21891, %v8593_v54  }
 0x1a6   : > { %v6425_v19 = vpop.permute.xlu0 %6424  ;;  %v6443_v27 = vsel %vm6440_vm13, %v6429_v63, %v6431_v1 }
 0x1a7   : > { %v6441_v20 = vsel %vm6440_vm13, %v6425_v19, %v6427_v12 }
 0x1a8   : > { %19618 = vmatpush1.msk.msra.mxu0 %vm504_vm1, %v6441_v20 }
 0x1a9   : > { %v6435_v2 = vpop.permute.xlu1 %6434  ;;  %19619 = vmatmul.mubr.msk.f32.vlgmr.msra.gmra.mrb[0].mxu0 %vm500_vm2, %v19616_v24 }
 0x1aa   : > { %v6433_v25 = vpop.permute.xlu0 %6432  ;;  %6671 = vmatprep.mubr.f32.mxu0 %v26297_v0 }
 0x1ab   : > { %v6444_v26 = vsel %vm6440_vm13, %v6431_v1, %v6433_v25  ;;  %v6445_v7 = vsel %vm6440_vm13, %v6433_v25, %v6435_v2  ;;  %v19640_v25 = vld [vmem:[%s26317_s1 + $0xa0] sm:$0x3f] }
 0x1ac   : > { %19620 = vmatprep.subr.msk.mxu1 %vm504_vm1, %v6444_v26 }
 0x1ad   : > { %19621 = vmatpush1.msk.msra.mxu1 %vm504_vm1, %v6443_v27  ;;  %v6439_v4 = vpop.permute.xlu1 %6438 }
 0x1ae   : > { %19622 = vmatmul.mubr.msk.f32.vlgmr.msra.gmra.mrb[0].mxu1 %vm500_vm2, %v19616_v24  ;;  %v6437_v28 = vpop.permute.xlu0 %6436  ;;  %20729 = vmatprep.subr.mxu1 %v26297_v0 }
 0x1af   : > { %v6447_v33 = vsel %vm6440_vm13, %v6437_v28, %v6439_v4  ;;  %v6446_v34 = vsel %vm6440_vm13, %v6435_v2, %v6437_v28  ;;  %20731 = vmatprep.mubr.msk.f32.mxu1 %vm22010_vm3, %v26297_v0  ;;  %vm19325_vm13 = vcmask 73728  }
 0x1b0   : > { %19623 = vmatprep.subr.msk.mxu0 %vm504_vm1, %v6446_v34  ;;  %20730 = vmatpush3.msk.msra.mxu1 %vm504_vm1, %v6447_v33  ;;  %v2415_v37 = vpop.f32.mrb[12].mxu1 }
 0x1b1   : > { %19624 = vmatpush1.msk.msra.mxu0 %vm504_vm1, %v6445_v7  ;;  %v6762_v38 = vpop.permute.xlu1 %6761  ;;  %v2425_v40 = vadd.f32 %v2415_v37, %v2091_v15  ;;  %v20668_v41 = vpop.f32.mrb[13].mxu1 }
 0x1b2   : > { %20732 = vmatmul.mubr.msk.f32.vlgmr.msra.gmra.mrb[38].mxu1 %vm500_vm2, %v19616_v24  ;;  %v6760_v43 = vpop.permute.xlu0 %6759  ;;  %19625 = vmatmul.mubr.msk.f32.vlgmr.msra.gmra.mrb[2].mxu0 %vm500_vm2, %v19616_v24 }
 0x1b3   : > { %v6775_v44 = vsel %vm6773_vm15, %v6760_v43, %v6762_v38  ;;  %6862 = vmatprep.mubr.f32.mxu0 %v26297_v0  ;;  %6933 = vmatprep.mubr.f32.mxu1 %v26297_v0 }
 0x1b4   : > { %19629 = vmatprep.subr.msk.mxu0 %vm504_vm1, %v6775_v44 }
 0x1b5   : > { %v6764_v45 = vpop.permute.xlu1 %6763 }
 0x1b6   : > { %v6758_v47 = vpop.permute.xlu0 %6757  ;;  %v6776_v12 = vsel %vm6773_vm15, %v6762_v38, %v6764_v45 }
 0x1b7   : > { %v6774_v56 = vsel %vm6773_vm15, %v6758_v47, %v6760_v43 }
 0x1b8   : > { %19630 = vmatpush1.msk.msra.mxu0 %vm504_vm1, %v6774_v56 }
 0x1b9   : > { %v6768_v58 = vpop.permute.xlu1 %6767  ;;  %19631 = vmatmul.mubr.msk.f32.vlgmr.msra.gmra.mrb[0].mxu0 %vm500_vm2, %v19628_v53 }
 0x1ba   : > { %v6766_v63 = vpop.permute.xlu0 %6765  ;;  %7004 = vmatprep.mubr.f32.mxu0 %v26297_v0 }
 0x1bb   : > { %v6777_v11 = vsel %vm6773_vm15, %v6764_v45, %v6766_v63  ;;  %v6778_v19 = vsel %vm6773_vm15, %v6766_v63, %v6768_v58 }
 0x1bc   : > { %19632 = vmatprep.subr.msk.mxu1 %vm504_vm1, %v6777_v11 }
 0x1bd   : > { %19633 = vmatpush1.msk.msra.mxu1 %vm504_vm1, %v6776_v12  ;;  %v6772_v15 = vpop.permute.xlu1 %6771 }
 0x1be   : > { %19634 = vmatmul.mubr.msk.f32.vlgmr.msra.gmra.mrb[0].mxu1 %vm500_vm2, %v19628_v53  ;;  %v6770_v16 = vpop.permute.xlu0 %6769  ;;  %20734 = vmatprep.subr.mxu1 %v26297_v0 }
 0x1bf   : > { %v6779_v17 = vsel %vm6773_vm15, %v6768_v58, %v6770_v16  ;;  %v6780_v1 = vsel %vm6773_vm15, %v6770_v16, %v6772_v15  ;;  %20736 = vmatprep.mubr.msk.f32.mxu1 %vm22010_vm3, %v26297_v0 }
 0x1c0   : > { %19635 = vmatprep.subr.msk.mxu0 %vm504_vm1, %v6779_v17  ;;  %20735 = vmatpush3.msk.msra.mxu1 %vm504_vm1, %v6780_v1  ;;  %v2748_v20 = vpop.f32.mrb[14].mxu1 }
 0x1c1   : > { %19636 = vmatpush1.msk.msra.mxu0 %vm504_vm1, %v6778_v19  ;;  %19644 = vmatprep.subr.msk.mxu1 %vm504_vm1, %v22851_v49  ;;  %v2758_v24 = vadd.f32 %v2748_v20, %v2425_v40  ;;  %v20673_v2 = vpop.f32.mrb[15].mxu1 }
 0x1c2   : > { %19637 = vmatmul.mubr.msk.f32.vlgmr.msra.gmra.mrb[2].mxu0 %vm500_vm2, %v19628_v53  ;;  %20737 = vmatmul.mubr.msk.f32.vlgmr.msra.gmra.mrb[40].mxu1 %vm500_vm2, %v19628_v53 }
 0x1c3   : > { %19641 = vmatprep.subr.msk.mxu0 %vm504_vm1, %v22824_v35  ;;  %19645 = vmatpush1.msk.msra.mxu1 %vm504_vm1, %v22174_v3  ;;  %v7388_v3 = vpop.permute.xlu0 %7387 }
 0x1c4   : > { %19642 = vmatpush1.msk.msra.mxu0 %vm504_vm1, %v22189_v6  ;;  %7159 = vmatprep.mubr.f32.mxu0 %v26297_v0  ;;  %v19652_v6 = vld [vmem:[%s26317_s1 + $0xa8] sm:$0x3f] }
 0x1c5   : > { %7230 = vmatprep.mubr.f32.mxu1 %v26297_v0  ;;  %19647 = vmatprep.subr.msk.mxu0 %vm504_vm1, %v22866_v61 }
 0x1c6   : > { %20739 = vmatprep.subr.mxu1 %v26297_v0  ;;  %19643 = vmatmul.mubr.msk.f32.vlgmr.msra.gmra.mrb[0].mxu0 %vm500_vm2, %v19640_v25 }
 0x1c7   : > { %19646 = vmatmul.mubr.msk.f32.vlgmr.msra.gmra.mrb[0].mxu1 %vm500_vm2, %v19640_v25  ;;  %19648 = vmatpush1.msk.msra.mxu0 %vm504_vm1, %v22185_v5  ;;  %v7389_v5 = vsel %vm493_vm0, %v22319_v21, %v7388_v3 }
 0x1c8   : > { %20740 = vmatpush3.msk.msra.mxu1 %vm504_vm1, %v22256_v8  ;;  %19653 = vmatprep.subr.msk.mxu0 %vm504_vm1, %v22290_v14  ;;  %v7690_v8 = vpop.permute.xlu1 %7689 }
 0x1c9   : > { %19656 = vmatprep.subr.msk.mxu1 %vm504_vm1, %v22333_v23  ;;  %7301 = vmatprep.mubr.f32.mxu0 %v26297_v0  ;;  %v7691_v21 = vsel %vm1118_vm4, %v22380_v32, %v7690_v8  ;;  %v7992_v23 = vpop.permute.xlu0 %7991 }
 0x1ca   : > { %20741 = vmatprep.mubr.msk.f32.mxu1 %vm22010_vm3, %v26297_v0  ;;  %19649 = vmatmul.mubr.msk.f32.vlgmr.msra.gmra.mrb[2].mxu0 %vm500_vm2, %v19640_v25 }
 0x1cb   : > { %20742 = vmatmul.mubr.msk.f32.vlgmr.msra.gmra.mrb[42].mxu1 %vm500_vm2, %v19640_v25  ;;  %19654 = vmatpush1.msk.msra.mxu0 %vm504_vm1, %v22306_v18 }
 0x1cc   : > { %19657 = vmatpush1.msk.msra.mxu1 %vm504_vm1, %v22287_v13  ;;  %19659 = vmatprep.subr.msk.mxu0 %vm504_vm1, %v7389_v5 }
 0x1cd   : > { %7461 = vmatprep.mubr.f32.mxu0 %v26297_v0  ;;  %7532 = vmatprep.mubr.f32.mxu1 %v26297_v0 }
 0x1ce   : > { %20744 = vmatprep.subr.mxu1 %v26297_v0  ;;  %19655 = vmatmul.mubr.msk.f32.vlgmr.msra.gmra.mrb[0].mxu0 %vm500_vm2, %v19652_v6 }
 0x1cf   : > { %19658 = vmatmul.mubr.msk.f32.vlgmr.msra.gmra.mrb[0].mxu1 %vm500_vm2, %v19652_v6  ;;  %19660 = vmatpush1.msk.msra.mxu0 %vm504_vm1, %v22325_v22  ;;  %v19664_v22 = vld [vmem:[%s26317_s1 + $0xb0] sm:$0x3f] }
 0x1d0   : > { %20745 = vmatpush3.msk.msra.mxu1 %vm504_vm1, %v7388_v3  ;;  %19665 = vmatprep.subr.msk.mxu0 %vm504_vm1, %v22374_v31  ;;  %v3081_v13 = vpop.f32.mrb[16].mxu1  ;;  %v8294_v31 = vpop.permute.xlu1 %8293 }
 0x1d1   : > { %19668 = vmatprep.subr.msk.mxu1 %vm504_vm1, %v22418_v42  ;;  %7603 = vmatprep.mubr.f32.mxu0 %v26297_v0  ;;  %v3091_v14 = vadd.f32 %v3081_v13, %v2758_v24  ;;  %v20678_v18 = vpop.f32.mrb[17].mxu1  ;;  %v8295_v42 = vsel %vm1778_vm6, %v22512_v62, %v8294_v31 }
 0x1d2   : > { %20746 = vmatprep.mubr.msk.f32.mxu1 %vm22010_vm3, %v26297_v0  ;;  %19661 = vmatmul.mubr.msk.f32.vlgmr.msra.gmra.mrb[2].mxu0 %vm500_vm2, %v19652_v6 }
 0x1d3   : > { %20747 = vmatmul.mubr.msk.f32.vlgmr.msra.gmra.mrb[44].mxu1 %vm500_vm2, %v19652_v6  ;;  %19666 = vmatpush1.msk.msra.mxu0 %vm504_vm1, %v22368_v29  ;;  %v7993_v29 = vsel %vm1448_vm5, %v22454_v50, %v7992_v23  ;;  %vm9769_vm5 = vcmask 982016  }
 0x1d4   : > { %19669 = vmatpush1.msk.msra.mxu1 %vm504_vm1, %v22371_v30  ;;  %19671 = vmatprep.subr.msk.mxu0 %vm504_vm1, %v7691_v21  ;;  %v19676_v30 = vld [vmem:[%s26317_s1 + $0xb8] sm:$0x3f] }
 0x1d5   : > { %7763 = vmatprep.mubr.f32.mxu0 %v26297_v0  ;;  %7834 = vmatprep.mubr.f32.mxu1 %v26297_v0 }
 0x1d6   : > { %20749 = vmatprep.subr.mxu1 %v26297_v0  ;;  %19667 = vmatmul.mubr.msk.f32.vlgmr.msra.gmra.mrb[0].mxu0 %vm500_vm2, %v19664_v22 }
 0x1d7   : > { %19670 = vmatmul.mubr.msk.f32.vlgmr.msra.gmra.mrb[0].mxu1 %vm500_vm2, %v19664_v22  ;;  %19672 = vmatpush1.msk.msra.mxu0 %vm504_vm1, %v22400_v36 }
 0x1d8   : > { %20750 = vmatpush3.msk.msra.mxu1 %vm504_vm1, %v7690_v8  ;;  %19677 = vmatprep.subr.msk.mxu0 %vm504_vm1, %v22446_v48 }
 0x1d9   : > { %19680 = vmatprep.subr.msk.mxu1 %vm504_vm1, %v22472_v52  ;;  %7905 = vmatprep.mubr.f32.mxu0 %v26297_v0 }
 0x1da   : > { %20751 = vmatprep.mubr.msk.f32.mxu1 %vm22010_vm3, %v26297_v0  ;;  %19673 = vmatmul.mubr.msk.f32.vlgmr.msra.gmra.mrb[2].mxu0 %vm500_vm2, %v19664_v22 }
 0x1db   : > { %20752 = vmatmul.mubr.msk.f32.vlgmr.msra.gmra.mrb[46].mxu1 %vm500_vm2, %v19664_v22  ;;  %19678 = vmatpush1.msk.msra.mxu0 %vm504_vm1, %v22415_v39 }
 0x1dc   : > { %19681 = vmatpush1.msk.msra.mxu1 %vm504_vm1, %v22436_v46  ;;  %19683 = vmatprep.subr.msk.mxu0 %vm504_vm1, %v7993_v29  ;;  %v19688_v46 = vld [vmem:[%s26317_s1 + $0xc0] sm:$0x3f]  ;;  %s26329_s1 = smov 56  }
 0x1dd   : > { %8065 = vmatprep.mubr.f32.mxu0 %v26297_v0  ;;  %8136 = vmatprep.mubr.f32.mxu1 %v26297_v0 }
 0x1de   : > { %20754 = vmatprep.subr.mxu1 %v26297_v0  ;;  %19679 = vmatmul.mubr.msk.f32.vlgmr.msra.gmra.mrb[0].mxu0 %vm500_vm2, %v19676_v30 }
 0x1df   : > { %19682 = vmatmul.mubr.msk.f32.vlgmr.msra.gmra.mrb[0].mxu1 %vm500_vm2, %v19676_v30  ;;  %19684 = vmatpush1.msk.msra.mxu0 %vm504_vm1, %v22461_v51 }
 0x1e0   : > { %20755 = vmatpush3.msk.msra.mxu1 %vm504_vm1, %v7992_v23  ;;  %19689 = vmatprep.subr.msk.mxu0 %vm504_vm1, %v22495_v59  ;;  %v3414_v32 = vpop.f32.mrb[18].mxu1 }
 0x1e1   : > { %19692 = vmatprep.subr.msk.mxu1 %vm504_vm1, %v22517_v9  ;;  %8207 = vmatprep.mubr.f32.mxu0 %v26297_v0  ;;  %v3424_v36 = vadd.f32 %v3414_v32, %v3091_v14  ;;  %v20683_v39 = vpop.f32.mrb[19].mxu1 }
 0x1e2   : > { %20756 = vmatprep.mubr.msk.f32.mxu1 %vm22010_vm3, %v26297_v0  ;;  %19685 = vmatmul.mubr.msk.f32.vlgmr.msra.gmra.mrb[2].mxu0 %vm500_vm2, %v19676_v30 }
 0x1e3   : > { %20757 = vmatmul.mubr.msk.f32.vlgmr.msra.gmra.mrb[48].mxu1 %vm500_vm2, %v19676_v30  ;;  %19690 = vmatpush1.msk.msra.mxu0 %vm504_vm1, %v22481_v55 }
 0x1e4   : > { %19693 = vmatpush1.msk.msra.mxu1 %vm504_vm1, %v22498_v60  ;;  %19695 = vmatprep.subr.msk.mxu0 %vm504_vm1, %v8295_v42 }
 0x1e5   : > { %8367 = vmatprep.mubr.f32.mxu0 %v26297_v0  ;;  %8438 = vmatprep.mubr.f32.mxu1 %v26297_v0 }
 0x1e6   : > { %19691 = vmatmul.mubr.msk.f32.vlgmr.msra.gmra.mrb[0].mxu0 %vm500_vm2, %v19688_v46  ;;  %20759 = vmatprep.subr.mxu1 %v26297_v0 }
 0x1e7   : > { %19694 = vmatmul.mubr.msk.f32.vlgmr.msra.gmra.mrb[0].mxu1 %vm500_vm2, %v19688_v46  ;;  %19696 = vmatpush1.msk.msra.mxu0 %vm504_vm1, %v22521_v10 }
 0x1e8   : > { %8509 = vmatprep.mubr.f32.mxu0 %v26297_v0  ;;  %20760 = vmatpush3.msk.msra.mxu1 %vm504_vm1, %v8294_v31  ;;  %vm8719_vm1 = vcmask 48128  }
 0x1e9   : > { %20761 = vmatprep.mubr.msk.f32.mxu1 %vm22010_vm3, %v26297_v0 }
 0x1ea   : > { %19697 = vmatmul.mubr.msk.f32.vlgmr.msra.gmra.mrb[2].mxu0 %vm500_vm2, %v19688_v46 }
 0x1eb   : > { %20762 = vmatmul.mubr.msk.f32.vlgmr.msra.gmra.mrb[50].mxu1 %vm500_vm2, %v19688_v46  ;;  %8801 = vmatprep.mubr.f32.mxu0 %v26297_v0  ;;  %vm9496_vm2 = vcmask 998400  }
 0x1ec   : > { %8878 = vmatprep.mubr.f32.mxu1 %v26297_v0 }
 0x1f1   : > { %v3747_v48 = vpop.f32.mrb[20].mxu1 }
 0x1f2   : > { %v3757_v50 = vadd.f32 %v3747_v48, %v3424_v36  ;;  %v20688_v51 = vpop.f32.mrb[21].mxu1 }
 0x205   : > { %v4080_v52 = vpop.f32.mrb[22].mxu1 }
 0x206   : > { %v4090_v55 = vadd.f32 %v4080_v52, %v3757_v50  ;;  %v20693_v59 = vpop.f32.mrb[23].mxu1 }
 0x215   : > { %v4413_v60 = vpop.f32.mrb[24].mxu1 }
 0x216   : > { %v4423_v62 = vadd.f32 %v4413_v60, %v4090_v55  ;;  %v20698_v9 = vpop.f32.mrb[25].mxu1 }
 0x224   : > { %v8597_v3 = vpop.permute.xlu0 %8596 }
 0x225   : > { %v4746_v10 = vpop.f32.mrb[26].mxu1 }
 0x226   : > { %v4756_v35 = vadd.f32 %v4746_v10, %v4423_v62  ;;  %v20703_v49 = vpop.f32.mrb[27].mxu1 }
 0x235   : > { %v5079_v61 = vpop.f32.mrb[28].mxu1 }
 0x236   : > { %v5089_v26 = vadd.f32 %v5079_v61, %v4756_v35  ;;  %v20708_v27 = vpop.f32.mrb[29].mxu1 }
 0x245   : > { %v5412_v4 = vpop.f32.mrb[30].mxu1 }
 0x246   : > { %v5422_v28 = vadd.f32 %v5412_v4, %v5089_v26  ;;  %v20713_v33 = vpop.f32.mrb[31].mxu1 }
 0x255   : > { %v5745_v34 = vpop.f32.mrb[32].mxu1 }
 0x256   : > { %v5755_v7 = vadd.f32 %v5745_v34, %v5422_v28  ;;  %v20718_v37 = vpop.f32.mrb[33].mxu1 }
 0x265   : > { %v6078_v38 = vpop.f32.mrb[34].mxu1 }
 0x266   : > { %v6088_v40 = vadd.f32 %v6078_v38, %v5755_v7  ;;  %v20723_v41 = vpop.f32.mrb[35].mxu1 }
 0x275   : > { %v6411_v43 = vpop.f32.mrb[36].mxu1 }
 0x276   : > { %v6421_v44 = vadd.f32 %v6411_v43, %v6088_v40  ;;  %v20728_v45 = vpop.f32.mrb[37].mxu1 }
 0x285   : > { %v6744_v47 = vpop.f32.mrb[38].mxu1 }
 0x286   : > { %v6754_v53 = vadd.f32 %v6744_v47, %v6421_v44  ;;  %v20733_v54 = vpop.f32.mrb[39].mxu1 }
 0x295   : > { %v7077_v56 = vpop.f32.mrb[40].mxu1 }
 0x296   : > { %v7087_v57 = vadd.f32 %v7077_v56, %v6754_v53  ;;  %v20738_v58 = vpop.f32.mrb[41].mxu1 }
 0x29e   : > { %v7374_v63 = vpop.f32.mrb[42].mxu1 }
 0x29f   : > { %v7384_v11 = vadd.f32 %v7374_v63, %v7087_v57  ;;  %v20743_v12 = vpop.f32.mrb[43].mxu1 }
 0x2a6   : > { %v7676_v15 = vpop.f32.mrb[44].mxu1 }
 0x2a7   : > { %v7686_v16 = vadd.f32 %v7676_v15, %v7384_v11  ;;  %v20748_v17 = vpop.f32.mrb[45].mxu1 }
 0x2ae   : > { %v7978_v1 = vpop.f32.mrb[46].mxu1 }
 0x2af   : > { %v7988_v19 = vadd.f32 %v7978_v1, %v7686_v16  ;;  %v20753_v20 = vpop.f32.mrb[47].mxu1 }
 0x2b6   : > { %v8280_v24 = vpop.f32.mrb[48].mxu1 }
 0x2b7   : > { %v8290_v2 = vadd.f32 %v8280_v24, %v7988_v19  ;;  %v20758_v25 = vpop.f32.mrb[49].mxu1 }
 0x2b9   : > { %v8369_v5 = vpop.f32.mrb[0].mxu0 }
 0x2ba   : > { %v8440_v6 = vpop.f32.mrb[0].mxu1  ;;  %v8371_v8 = vpop.f32.mrb[1].mxu0  ;;  %v8599_v32 = vadd.f32 %v8597_v3, %v8369_v5 }
 0x2bb   : > { %v8442_v13 = vpop.f32.mrb[1].mxu1  ;;  %v8601_v14 = vadd.f32 %v8597_v3, %v8440_v6  ;;  %v8600_v21 = vadd.f32 %v8597_v3, %v8371_v8 }
 0x2bc   : > { %v8602_v18 = vadd.f32 %v8597_v3, %v8442_v13  ;;  %v8606_v50 = vmax.f32 %v8599_v32, 0.0  ;;  %v23332_v13 = vld [vmem:[%s26261_s3 + $0x18] sm:$0xff] }
 0x2bd   : > { %v8511_v22 = vpop.f32.mrb[2].mxu0  ;;  %v8608_v23 = vmax.f32 %v8601_v14, 0.0  ;;  %v8607_v42 = vmax.f32 %v8600_v21, 0.0  ;;  %v23360_v21 = vld [vmem:[%s26261_s3] sm:$0xff] }
 0x2be   : > { %v8609_v29 = vmax.f32 %v8602_v18, 0.0  ;;  %v8582_v30 = vpop.f32.mrb[50].mxu1  ;;  %v8513_v31 = vpop.f32.mrb[3].mxu0  ;;  %v8603_v46 = vadd.f32 %v8597_v3, %v8511_v22 }
 0x2bf   : > { %v8592_v36 = vadd.f32 %v8582_v30, %v8290_v2  ;;  %8624 = vrot.lane.b32.xlu1 %v8608_v23, %s22001_s20  ;;  %v20763_v39 = vpop.f32.mrb[51].mxu1  ;;  %v8604_v52 = vadd.f32 %v8597_v3, %v8513_v31  ;;  %v23385_v31 = vld [vmem:[%s26261_s3 + $0x8] sm:$0xff] }
 0x2c0   : > { %8626 = vrot.lane.b32.xlu0 %v8609_v29, %s22001_s20  ;;  %v8610_v51 = vmax.f32 %v8603_v46, 0.0 }
 0x2c1   : > { %v8605_v48 = vadd.f32 %v8597_v3, %v8592_v36  ;;  %v8611_v59 = vmax.f32 %v8604_v52, 0.0  ;;  %v23313_v3 = vld [vmem:[%s26261_s3 + $0x10] sm:$0xff] }
 0x2c3   : > { %8622 = vrot.lane.b32.xlu1 %v8607_v42, %s22001_s20  ;;  %v8612_v55 = vmax.f32 %v8605_v48, 0.0 }
 0x2c4   : > { %8620 = vrot.lane.b32.xlu0 %v8606_v50, %s22001_s20 }
 0x2c7   : > { %8628 = vrot.lane.b32.xlu1 %v8610_v51, %s22001_s20 }
 0x2c8   : > { %8632 = vrot.lane.b32.xlu0 %v8612_v55, %s22001_s20 }
 0x2cb   : > { %8630 = vrot.lane.b32.xlu1 %v8611_v59, %s22001_s20  ;;  %s26286_s20 = smov 122  }
 0x331   : > { %v8625_v60 = vpop.permute.xlu1 %8624 }
 0x332   : > { %v8627_v62 = vpop.permute.xlu0 %8626 }
 0x333   : > { %v8636_v9 = vsel %vm493_vm0, %v8625_v60, %v8627_v62 }
 0x334   : > { %v8649_v10 = vmax.f32 %v8608_v23, %v8636_v9 }
 0x335   : > { %v8623_v35 = vpop.permute.xlu1 %8622 }
 0x336   : > { %v8635_v49 = vsel %vm493_vm0, %v8623_v35, %v8625_v60  ;;  %8665 = vrot.lane.b32.xlu0 %v8649_v10, %s26321_s28  ;;  %v8621_v61 = vpop.permute.xlu0 %8620  ;;  %v23459_v60 = vld [vmem:[%s26261_s3 + $0x30] sm:$0xff] }
 0x337   : > { %v8648_v26 = vmax.f32 %v8607_v42, %v8635_v49  ;;  %v8634_v27 = vsel %vm493_vm0, %v8621_v61, %v8623_v35  ;;  %v23411_v42 = vld [vmem:[%s26261_s3 + $0x20] sm:$0xff]  ;;  %v23481_v35 = vld [vmem:[%s26261_s3 + $0x38] sm:$0xff] }
 0x338   : > { %v8647_v4 = vmax.f32 %v8606_v50, %v8634_v27  ;;  %v23507_v27 = vld [vmem:[%s26261_s3 + $0x40] sm:$0xff] }
 0x339   : > { %8663 = vrot.lane.b32.xlu1 %v8648_v26, %s26321_s28  ;;  %v8629_v28 = vpop.permute.xlu1 %8628 }
 0x33a   : > { %v8637_v33 = vsel %vm493_vm0, %v8627_v62, %v8629_v28  ;;  %8661 = vrot.lane.b32.xlu0 %v8647_v4, %s26321_s28  ;;  %v8633_v7 = vpop.permute.xlu0 %8632 }
 0x33b   : > { %v23235_v34 = vmax.f32 %v8609_v29, %v8637_v33  ;;  %v23259_v17 = vmax.f32 %v8612_v55, %v8633_v7 }
 0x33d   : > { %8667 = vrot.lane.b32.xlu1 %v23235_v34, %s26321_s28  ;;  %v8631_v37 = vpop.permute.xlu1 %8630 }
 0x33e   : > { %v8638_v38 = vsel %vm493_vm0, %v8629_v28, %v8631_v37  ;;  %v8639_v40 = vsel %vm493_vm0, %v8631_v37, %v8633_v7  ;;  %vm8726_vm0 = vcmask 1045504  }
 0x33f   : > { %v8651_v41 = vmax.f32 %v8610_v51, %v8638_v38  ;;  %v8652_v43 = vmax.f32 %v8611_v59, %v8639_v40  ;;  %v23433_v51 = vld [vmem:[%s26261_s3 + $0x28] sm:$0xff]  ;;  %v23553_v38 = vld [vmem:[%s26261_s3 + $0x50] sm:$0xff]  ;;  %v23566_v40 = vld [vmem:[%s26261_s3 + $0x58] sm:$0xff] }
 0x341   : > { %8669 = vrot.lane.b32.xlu1 %v8651_v41, %s26321_s28  ;;  %8671 = vrot.lane.b32.xlu0 %v8652_v43, %s26321_s28 }
 0x3a8   : > { %v8666_v44 = vpop.permute.xlu0 %8665 }
 0x3ab   : > { %v8664_v45 = vpop.permute.xlu1 %8663 }
 0x3ac   : > { %v8676_v47 = vsel %vm2111_vm7, %v8664_v45, %v8666_v44  ;;  %v8662_v53 = vpop.permute.xlu0 %8661 }
 0x3ad   : > { %v23244_v54 = vmax.f32 %v8648_v26, %v8676_v47  ;;  %v8675_v56 = vsel %vm2111_vm7, %v8662_v53, %v8664_v45 }
 0x3ae   : > { %v23250_v63 = vmax.f32 %v8647_v4, %v8675_v56 }
 0x3af   : > { %v8668_v57 = vpop.permute.xlu1 %8667  ;;  %8707 = vrot.lane.b32.xlu1 %v23244_v54, %s26288_s21 }
 0x3b0   : > { %v8677_v58 = vsel %vm2111_vm7, %v8666_v44, %v8668_v57 }
 0x3b1   : > { %v23252_v11 = vmax.f32 %v8649_v10, %v8677_v58 }
 0x3b3   : > { %26322 = vst [vmem:[#allocation8_spill] sm:$0xff] %v23252_v11  ;;  %v8670_v12 = vpop.permute.xlu1 %8669  ;;  %8709 = vrot.lane.b32.xlu0 %v23252_v11, %s26288_s21  ;;  %8705 = vrot.lane.b32.xlu1 %v23250_v63, %s26288_s21  ;;  %v8672_v15 = vpop.permute.xlu0 %8671 }
 0x3b4   : > { %v8679_v16 = vsel %vm2111_vm7, %v8670_v12, %v8672_v15  ;;  %v8678_v18 = vsel %vm2111_vm7, %v8668_v57, %v8670_v12 }
 0x3b5   : > { %v23261_v1 = vmax.f32 %v8651_v41, %v8679_v16  ;;  %v23363_v22 = vmax.f32 %v23235_v34, %v8678_v18  ;;  %v23529_v34 = vld [vmem:[%s26261_s3 + $0x48] sm:$0xff] }
 0x3b7   : > { %8673 = vrot.lane.b32.xlu0 %v23259_v17, %s26321_s28  ;;  %8713 = vrot.lane.b32.xlu1 %v23261_v1, %s26288_s21  ;;  %s20366_s28 = sshll.u32 %s22126_s17, 4  ;;  %s22029_s17 = smov [#allocation2]  }
 0x3bb   : > { %9216 = vrot.lane.b32.xlu0 %v23244_v54, %s26318_s18  ;;  %9218 = vrot.lane.b32.xlu1 %v23252_v11, %s26318_s18 }
 0x3bf   : > { %9214 = vrot.lane.b32.xlu0 %v23250_v63, %s26318_s18  ;;  %9222 = vrot.lane.b32.xlu1 %v23261_v1, %s26318_s18 }
 0x3c3   : > { %9488 = vrot.lane.b32.xlu0 %v23244_v54, %s26286_s20  ;;  %9490 = vrot.lane.b32.xlu1 %v23252_v11, %s26286_s20 }
 0x3c7   : > { %9486 = vrot.lane.b32.xlu0 %v23250_v63, %s26286_s20  ;;  %9494 = vrot.lane.b32.xlu1 %v23261_v1, %s26286_s20  ;;  %s26290_s20 = smov 58  }
 0x3cb   : > { %9761 = vrot.lane.b32.xlu0 %v23244_v54, %s26284_s27  ;;  %9763 = vrot.lane.b32.xlu1 %v23252_v11, %s26284_s27 }
 0x3cf   : > { %9759 = vrot.lane.b32.xlu0 %v23250_v63, %s26284_s27  ;;  %9767 = vrot.lane.b32.xlu1 %v23261_v1, %s26284_s27  ;;  %s26326_s27 = smov 60  }
 0x3d3   : > { %10035 = vrot.lane.b32.xlu0 %v23244_v54, %s26323_s26  ;;  %10037 = vrot.lane.b32.xlu1 %v23252_v11, %s26323_s26 }
 0x3d7   : > { %10033 = vrot.lane.b32.xlu0 %v23250_v63, %s26323_s26  ;;  %10041 = vrot.lane.b32.xlu1 %v23261_v1, %s26323_s26 }
 0x3db   : > { %10310 = vrot.lane.b32.xlu1 %v23244_v54, %s26324_s25 }
 0x3df   : > { %10308 = vrot.lane.b32.xlu1 %v23250_v63, %s26324_s25 }
 0x421   : > { %v8708_v19 = vpop.permute.xlu1 %8707 }
 0x425   : > { %v8706_v20 = vpop.permute.xlu1 %8705  ;;  %v23303_v24 = vpop.permute.xlu0 %8709 }
 0x426   : > { %v8715_v2 = vsel %vm1118_vm4, %v8706_v20, %v8708_v19  ;;  %v23308_v25 = vsel %vm1118_vm4, %v8708_v19, %v23303_v24 }
 0x427   : > { %19702 = vmatprep.subr.msk.mxu0 %vm8726_vm0, %v23308_v25 }
 0x428   : > { %19703 = vmatpush1.msk.msra.mxu0 %vm8726_vm0, %v8715_v2 }
 0x429   : > { %v23318_v5 = vpop.permute.xlu1 %8713  ;;  %19704 = vmatmul.mubr.msk.f32.vlgmr.msra.gmra.mrb[4].mxu0 %vm8719_vm1, %v23313_v3  ;;  %v23322_v6 = vpop.permute.xlu0 %8673 }
 0x42a   : > { %v8680_v8 = vsel %vm2111_vm7, %v8672_v15, %v23322_v6  ;;  %20764 = vmatprep.subr.msk.mxu0 %vm8726_vm0, %v23318_v5  ;;  %8807 = vmatprep.mubr.f32.mxu0 %v26297_v0  ;;  %v23570_v41 = vmax.f32 %v23259_v17, %v23322_v6  ;;  %v23630_v15 = vld [vmem:[%s26261_s3 + $0x60] sm:$0xff]  ;;  %vm10870_vm7 = vcmask 474112  }
 0x42b   : > { %v23334_v14 = vmax.f32 %v8652_v43, %v8680_v8  ;;  %20765 = vmatpush3.msk.msra.mxu0 %vm8726_vm0, %v23318_v5  ;;  %v15214_v43 = vld [vmem:[%s26262_s4 + $0x8] sm:$0xff] }
 0x42c   : > { %19713 = vmatprep.subr.msk.mxu0 %vm8726_vm0, %v23244_v54  ;;  %26332 = vst [vmem:[#allocation10_spill] sm:$0xff] %v23570_v41 }
 0x42d   : > { %26325 = vst [vmem:[#allocation9_spill] sm:$0xff] %v23334_v14  ;;  %19705 = vmatmul.mubr.msk.f32.gmra.mrb[6].mxu0 %vm8719_vm1, %v23332_v13  ;;  %10318 = vrot.lane.b32.xlu1 %v23334_v14, %s26324_s25  ;;  %v23365_v23 = vpop.permute.xlu1 %9218  ;;  %v9217_v29 = vpop.permute.xlu0 %9216 }
 0x42e   : > { %10043 = vrot.lane.b32.xlu0 %v23334_v14, %s26323_s26  ;;  %20766 = vmatprep.mubr.msk.f32.mxu0 %vm8719_vm1, %v23313_v3  ;;  %v23376_v30 = vsel %vm1778_vm6, %v9217_v29, %v23365_v23 }
 0x431   : > { %20767 = vmatmul.mubr.msk.f32.vlgmr.msra.gmra.mrb[8].mxu0 %vm8719_vm1, %v23332_v13  ;;  %10587 = vrot.lane.b32.xlu1 %v23252_v11, %s26326_s27  ;;  %v23390_v32 = vpop.permute.xlu1 %9222  ;;  %v9215_v36 = vpop.permute.xlu0 %9214 }
 0x432   : > { %19714 = vmatpush1.msk.msra.mxu0 %vm8726_vm0, %v23250_v63  ;;  %10312 = vrot.lane.b32.xlu0 %v23252_v11, %s26324_s25  ;;  %v9224_v39 = vsel %vm1778_vm6, %v9215_v36, %v9217_v29 }
 0x433   : > { %20769 = vmatprep.subr.msk.mxu0 %vm8726_vm0, %v23261_v1  ;;  %9046 = vmatprep.mubr.f32.mxu0 %v26297_v0 }
 0x435   : > { %19715 = vmatmul.mubr.msk.f32.vlgmr.msra.gmra.mrb[4].mxu0 %vm8719_vm1, %v23360_v21  ;;  %8711 = vrot.lane.b32.xlu1 %v23363_v22, %s26288_s21  ;;  %v23413_v46 = vpop.permute.xlu1 %9490  ;;  %v9489_v48 = vpop.permute.xlu0 %9488  ;;  %s26331_s21 = smov 126  }
 0x436   : > { %20770 = vmatpush3.msk.msra.mxu0 %vm8726_vm0, %v23261_v1  ;;  %10316 = vrot.lane.b32.xlu0 %v23261_v1, %s26324_s25  ;;  %v23424_v50 = vsel %vm9496_vm2, %v9489_v48, %v23413_v46 }
 0x437   : > { %19726 = vmatprep.subr.msk.mxu0 %vm8726_vm0, %v23376_v30  ;;  %9052 = vmatprep.mubr.f32.mxu0 %v26297_v0 }
 0x439   : > { %19716 = vmatmul.mubr.msk.f32.gmra.mrb[6].mxu0 %vm8719_vm1, %v23385_v31  ;;  %10591 = vrot.lane.b32.xlu1 %v23261_v1, %s26326_s27  ;;  %v23438_v52 = vpop.permute.xlu1 %9494  ;;  %v9487_v55 = vpop.permute.xlu0 %9486 }
 0x43a   : > { %10585 = vrot.lane.b32.xlu0 %v23244_v54, %s26326_s27  ;;  %20771 = vmatprep.mubr.msk.f32.mxu0 %vm8719_vm1, %v23360_v21  ;;  %v9497_v59 = vsel %vm9496_vm2, %v9487_v55, %v9489_v48  ;;  %v23697_v48 = vld [vmem:[%s26261_s3 + $0x70] sm:$0xff] }
 0x43d   : > { %20772 = vmatmul.mubr.msk.f32.vlgmr.msra.gmra.mrb[8].mxu0 %vm8719_vm1, %v23385_v31  ;;  %10862 = vrot.lane.b32.xlu1 %v23252_v11, %s26290_s20  ;;  %v23461_v62 = vpop.permute.xlu1 %9763  ;;  %v9762_v9 = vpop.permute.xlu0 %9761 }
 0x43e   : > { %10583 = vrot.lane.b32.xlu0 %v23250_v63, %s26326_s27  ;;  %19727 = vmatpush1.msk.msra.mxu0 %vm8726_vm0, %v9224_v39  ;;  %v23472_v10 = vsel %vm9769_vm5, %v9762_v9, %v23461_v62 }
 0x43f   : > { %20774 = vmatprep.subr.msk.mxu0 %vm8726_vm0, %v23390_v32  ;;  %9308 = vmatprep.mubr.f32.mxu0 %v26297_v0 }
 0x441   : > { %10866 = vrot.lane.b32.xlu1 %v23261_v1, %s26290_s20  ;;  %19728 = vmatmul.mubr.msk.f32.vlgmr.msra.gmra.mrb[4].mxu0 %vm8719_vm1, %v23411_v42  ;;  %s26292_s20 = smov 56   ;;  %v23486_v49 = vpop.permute.xlu1 %9767  ;;  %v9760_v61 = vpop.permute.xlu0 %9759 }
 0x442   : > { %10593 = vrot.lane.b32.xlu0 %v23334_v14, %s26326_s27  ;;  %20775 = vmatpush3.msk.msra.mxu0 %vm8726_vm0, %v23390_v32  ;;  %v9770_v26 = vsel %vm9769_vm5, %v9760_v61, %v9762_v9  ;;  %v23718_v9 = vld [vmem:[%s26261_s3 + $0x78] sm:$0xff] }
 0x443   : > { %19739 = vmatprep.subr.msk.mxu0 %vm8726_vm0, %v23424_v50  ;;  %9314 = vmatprep.mubr.f32.mxu0 %v26297_v0 }
 0x445   : > { %11136 = vrot.lane.b32.xlu1 %v23244_v54, %s26292_s20  ;;  %19729 = vmatmul.mubr.msk.f32.gmra.mrb[6].mxu0 %vm8719_vm1, %v23433_v51  ;;  %v23509_v4 = vpop.permute.xlu1 %10037  ;;  %v10036_v28 = vpop.permute.xlu0 %10035 }
 0x446   : > { %10860 = vrot.lane.b32.xlu0 %v23244_v54, %s26327_s0  ;;  %20776 = vmatprep.mubr.msk.f32.mxu0 %vm8719_vm1, %v23411_v42  ;;  %v23520_v33 = vsel %vm3776_vm12, %v10036_v28, %v23509_v4 }
 0x449   : > { %11134 = vrot.lane.b32.xlu1 %v23250_v63, %s26292_s20  ;;  %20777 = vmatmul.mubr.msk.f32.vlgmr.msra.gmra.mrb[8].mxu0 %vm8719_vm1, %v23433_v51  ;;  %v10034_v7 = vpop.permute.xlu0 %10033  ;;  %v23601_v44 = vpop.permute.xlu1 %10041 }
 0x44a   : > { %10858 = vrot.lane.b32.xlu0 %v23250_v63, %s26327_s0  ;;  %19740 = vmatpush1.msk.msra.mxu0 %vm8726_vm0, %v9497_v59  ;;  %v10045_v37 = vsel %vm3776_vm12, %v10034_v7, %v10036_v28 }
 0x44b   : > { %20779 = vmatprep.subr.msk.mxu0 %vm8726_vm0, %v23438_v52  ;;  %9581 = vmatprep.mubr.f32.mxu0 %v26297_v0 }
 0x44d   : > { %11142 = vrot.lane.b32.xlu1 %v23261_v1, %s26292_s20  ;;  %19741 = vmatmul.mubr.msk.f32.vlgmr.msra.gmra.mrb[4].mxu0 %vm8719_vm1, %v23459_v60  ;;  %s26328_s20 = smov 122   ;;  %v10311_v45 = vpop.permute.xlu1 %10310 }
 0x44e   : > { %10868 = vrot.lane.b32.xlu0 %v23334_v14, %s26327_s0  ;;  %20780 = vmatpush3.msk.msra.mxu0 %vm8726_vm0, %v23438_v52 }
 0x44f   : > { %19752 = vmatprep.subr.msk.mxu0 %vm8726_vm0, %v23472_v10  ;;  %9587 = vmatprep.mubr.f32.mxu0 %v26297_v0 }
 0x451   : > { %9492 = vrot.lane.b32.xlu1 %v23363_v22, %s26328_s20  ;;  %19742 = vmatmul.mubr.msk.f32.gmra.mrb[6].mxu0 %vm8719_vm1, %v23481_v35  ;;  %v10309_v47 = vpop.permute.xlu1 %10308 }
 0x452   : > { %11138 = vrot.lane.b32.xlu0 %v23252_v11, %s26329_s1  ;;  %20781 = vmatprep.mubr.msk.f32.mxu0 %vm8719_vm1, %v23459_v60  ;;  %v10320_v16 = vsel %vm4442_vm14, %v10309_v47, %v10311_v45 }
 0x455   : > { %10039 = vrot.lane.b32.xlu1 %v23363_v22, %s26323_s26  ;;  %20782 = vmatmul.mubr.msk.f32.vlgmr.msra.gmra.mrb[8].mxu0 %vm8719_vm1, %v23481_v35 }
 0x456   : > { %9220 = vrot.lane.b32.xlu0 %v23363_v22, %s26318_s18  ;;  %19753 = vmatpush1.msk.msra.mxu0 %vm8726_vm0, %v9770_v26 }
 0x457   : > { %20784 = vmatprep.subr.msk.mxu0 %vm8726_vm0, %v23486_v49  ;;  %9854 = vmatprep.mubr.f32.mxu0 %v26297_v0 }
 0x459   : > { %10314 = vrot.lane.b32.xlu1 %v23363_v22, %s26324_s25  ;;  %19754 = vmatmul.mubr.msk.f32.vlgmr.msra.gmra.mrb[4].mxu0 %vm8719_vm1, %v23507_v27 }
 0x45a   : > { %11144 = vrot.lane.b32.xlu0 %v23334_v14, %s26329_s1  ;;  %20785 = vmatpush3.msk.msra.mxu0 %vm8726_vm0, %v23486_v49 }
 0x45b   : > { %19765 = vmatprep.subr.msk.mxu0 %vm8726_vm0, %v23520_v33  ;;  %9860 = vmatprep.mubr.f32.mxu0 %v26297_v0 }
 0x45d   : > { %11915 = vrot.lane.b32.xlu1 %v23334_v14, %s26318_s18  ;;  %19755 = vmatmul.mubr.msk.f32.gmra.mrb[6].mxu0 %vm8719_vm1, %v23529_v34 }
 0x45e   : > { %9765 = vrot.lane.b32.xlu0 %v23363_v22, %s26330_s2  ;;  %20786 = vmatprep.mubr.msk.f32.mxu0 %vm8719_vm1, %v23507_v27 }
 0x461   : > { %12170 = vrot.lane.b32.xlu1 %v23334_v14, %s26328_s20  ;;  %20787 = vmatmul.mubr.msk.f32.vlgmr.msra.gmra.mrb[8].mxu0 %vm8719_vm1, %v23529_v34 }
 0x462   : > { %11660 = vrot.lane.b32.xlu0 %v23334_v14, %s26331_s21  ;;  %19766 = vmatpush1.msk.msra.mxu0 %vm8726_vm0, %v10045_v37 }
 0x463   : > { %10130 = vmatprep.mubr.f32.mxu0 %v26297_v0 }
 0x465   : > { %12425 = vrot.lane.b32.xlu1 %v23334_v14, %s26330_s2  ;;  %19767 = vmatmul.mubr.msk.f32.vlgmr.msra.gmra.mrb[4].mxu0 %vm8719_vm1, %v23553_v38 }
 0x466   : > { %10589 = vrot.lane.b32.xlu0 %v23363_v22, %s26326_s27  ;;  %10136 = vmatprep.mubr.f32.mxu0 %v26297_v0 }
 0x469   : > { %12934 = vrot.lane.b32.xlu1 %v23570_v41, %s26324_s25  ;;  %19768 = vmatmul.mubr.msk.f32.gmra.mrb[6].mxu0 %vm8719_vm1, %v23566_v40  ;;  %s458_s25 = sand.u32 1, %s21990_s30  }
 0x46a   : > { %10864 = vrot.lane.b32.xlu0 %v23363_v22, %s26327_s0  ;;  %20791 = vmatprep.mubr.msk.f32.mxu0 %vm8719_vm1, %v23553_v38  ;;  %s19328_s19 = scalar_lea.sflag [#allocation3], %s458_s25 }
 0x46d   : > { %13440 = vrot.lane.b32.xlu1 %v23570_v41, %s26327_s0  ;;  %s459_s0 = scalar_lea.vmem [#allocation2], %s458_s25 }
 0x46e   : > { %11140 = vrot.lane.b32.xlu0 %v23363_v22, %s26329_s1 }
 0x471   : > { %14196 = vrot.lane.b32.xlu1 %v23570_v41, %s26331_s21 }
 0x472   : > { %12681 = vrot.lane.b32.xlu0 %v23570_v41, %s26323_s26 }
 0x475   : > { %14706 = vrot.lane.b32.xlu1 %v23570_v41, %s26328_s20 }
 0x476   : > { %13187 = vrot.lane.b32.xlu0 %v23570_v41, %s26326_s27 }
 0x47a   : > { %13693 = vrot.lane.b32.xlu0 %v23570_v41, %s26329_s1 }
 0x47e   : > { %14451 = vrot.lane.b32.xlu0 %v23570_v41, %s26318_s18 }
 0x482   : > { %14961 = vrot.lane.b32.xlu0 %v23570_v41, %s26330_s2  ;;  %v26337_v41 = vmov 0.0   ;;  %s26216_s2 = scalar_lea.hbm %s26272_s14, %s20366_s28 }
 0x486   : > { %15222 = vperm.xlu0 %21891, %v15214_v43  }
 0x49f   : > { %v23603_v53 = vpop.permute.xlu1 %10318 }
 0x4a0   : > { %v23605_v56 = vpop.permute.xlu0 %10043 }
 0x4a1   : > { %v23610_v57 = vsel %vm3776_vm12, %v23601_v44, %v23605_v56 }
 0x4a2   : > { %20789 = vmatprep.subr.msk.mxu0 %vm8726_vm0, %v23610_v57 }
 0x4a3   : > { %20790 = vmatpush3.msk.msra.mxu0 %vm8726_vm0, %v23610_v57  ;;  %v23616_v58 = vpop.permute.xlu1 %10587 }
 0x4a4   : > { %20792 = vmatmul.mubr.msk.f32.vlgmr.msra.gmra.mrb[8].mxu0 %vm8719_vm1, %v23566_v40  ;;  %v23620_v63 = vpop.permute.xlu0 %10312 }
 0x4a5   : > { %v23624_v12 = vsel %vm4442_vm14, %v10311_v45, %v23620_v63  ;;  %10405 = vmatprep.mubr.f32.mxu0 %v26297_v0 }
 0x4a6   : > { %19778 = vmatprep.subr.msk.mxu0 %vm8726_vm0, %v23624_v12 }
 0x4a7   : > { %19779 = vmatpush1.msk.msra.mxu0 %vm8726_vm0, %v10320_v16  ;;  %v8712_v17 = vpop.permute.xlu1 %8711  ;;  %v23763_v16 = vld [vmem:[%s26261_s3 + $0x88] sm:$0xff] }
 0x4a8   : > { %v23638_v19 = vsel %vm1118_vm4, %v23303_v24, %v8712_v17  ;;  %v23642_v20 = vsel %vm1118_vm4, %v8712_v17, %v23318_v5  ;;  %19780 = vmatmul.mubr.msk.f32.vlgmr.msra.gmra.mrb[4].mxu0 %vm8719_vm1, %v23630_v15  ;;  %v23646_v2 = vpop.permute.xlu0 %10316  ;;  %v23659_v24 = vld [vmem:[%s26261_s3 + $0x68] sm:$0xff] }
 0x4a9   : > { %v23651_v6 = vsel %vm4442_vm14, %v23646_v2, %v23603_v53  ;;  %19706 = vmatprep.subr.msk.mxu1 %vm8726_vm0, %v23642_v20  ;;  %10411 = vmatprep.mubr.f32.mxu0 %v26297_v0 }
 0x4aa   : > { %20794 = vmatprep.subr.msk.mxu0 %vm8726_vm0, %v23651_v6  ;;  %19707 = vmatpush1.msk.msra.mxu1 %vm8726_vm0, %v23638_v19 }
 0x4ab   : > { %20795 = vmatpush3.msk.msra.mxu0 %vm8726_vm0, %v23651_v6  ;;  %19717 = vmatprep.subr.msk.mxu1 %vm8726_vm0, %v23363_v22  ;;  %v23669_v8 = vpop.permute.xlu1 %10591 }
 0x4ac   : > { %19781 = vmatmul.mubr.msk.f32.gmra.mrb[6].mxu0 %vm8719_vm1, %v23659_v24  ;;  %v10586_v18 = vpop.permute.xlu0 %10585  ;;  %19708 = vmatmul.mubr.msk.f32.vlgmr.msra.gmra.mrb[52].mxu1 %vm8719_vm1, %v23313_v3 }
 0x4ad   : > { %v23677_v29 = vsel %vm5108_vm8, %v10586_v18, %v23616_v58  ;;  %19718 = vmatpush1.msk.msra.mxu1 %vm8726_vm0, %v23252_v11  ;;  %20796 = vmatprep.mubr.msk.f32.mxu0 %vm8719_vm1, %v23630_v15 }
 0x4ae   : > { %19791 = vmatprep.subr.msk.mxu0 %vm8726_vm0, %v23677_v29  ;;  %8884 = vmatprep.mubr.f32.mxu1 %v26297_v0 }
 0x4af   : > { %v23686_v36 = vpop.permute.xlu1 %10862 }
 0x4b0   : > { %20797 = vmatmul.mubr.msk.f32.vlgmr.msra.gmra.mrb[8].mxu0 %vm8719_vm1, %v23659_v24  ;;  %v10584_v3 = vpop.permute.xlu0 %10583  ;;  %19709 = vmatmul.mubr.msk.f32.gmra.mrb[54].mxu1 %vm8719_vm1, %v23332_v13 }
 0x4b1   : > { %v10595_v39 = vsel %vm5108_vm8, %v10584_v3, %v10586_v18  ;;  %10680 = vmatprep.mubr.f32.mxu0 %v26297_v0  ;;  %9123 = vmatprep.mubr.f32.mxu1 %v26297_v0 }
 0x4b2   : > { %19792 = vmatpush1.msk.msra.mxu0 %vm8726_vm0, %v10595_v39 }
 0x4b3   : > { %v23701_v55 = vpop.permute.xlu1 %10866 }
 0x4b4   : > { %19793 = vmatmul.mubr.msk.f32.vlgmr.msra.gmra.mrb[4].mxu0 %vm8719_vm1, %v23697_v48  ;;  %v23705_v59 = vpop.permute.xlu0 %10593  ;;  %19719 = vmatmul.mubr.msk.f32.vlgmr.msra.gmra.mrb[52].mxu1 %vm8719_vm1, %v23360_v21 }
 0x4b5   : > { %v23712_v13 = vsel %vm5108_vm8, %v23669_v8, %v23705_v59  ;;  %10686 = vmatprep.mubr.f32.mxu0 %v26297_v0  ;;  %9129 = vmatprep.mubr.f32.mxu1 %v26297_v0 }
 0x4b6   : > { %26333 = vst [vmem:[#allocation11_spill] sm:$0xff] %v23712_v13  ;;  %20799 = vmatprep.subr.msk.mxu0 %vm8726_vm0, %v23712_v13 }
 0x4b7   : > { %20800 = vmatpush3.msk.msra.mxu0 %vm8726_vm0, %v23712_v13  ;;  %v11137_v21 = vpop.permute.xlu1 %11136 }
 0x4b8   : > { %19794 = vmatmul.mubr.msk.f32.gmra.mrb[6].mxu0 %vm8719_vm1, %v23718_v9  ;;  %v10861_v61 = vpop.permute.xlu0 %10860  ;;  %19720 = vmatmul.mubr.msk.f32.gmra.mrb[54].mxu1 %vm8719_vm1, %v23385_v31  ;;  %v23745_v31 = vld [vmem:[%s26261_s3 + $0x80] sm:$0xff] }
 0x4b9   : > { %v23731_v26 = vsel %vm10870_vm7, %v10861_v61, %v23686_v36  ;;  %20801 = vmatprep.mubr.msk.f32.mxu0 %vm8719_vm1, %v23697_v48  ;;  %9385 = vmatprep.mubr.f32.mxu1 %v26297_v0 }
 0x4ba   : > { %26334 = vst [vmem:[#allocation12_spill] sm:$0xff] %v23731_v26  ;;  %19804 = vmatprep.subr.msk.mxu0 %vm8726_vm0, %v23731_v26 }
 0x4bb   : > { %v11135_v28 = vpop.permute.xlu1 %11134 }
 0x4bc   : > { %20802 = vmatmul.mubr.msk.f32.vlgmr.msra.gmra.mrb[8].mxu0 %vm8719_vm1, %v23718_v9  ;;  %v10859_v7 = vpop.permute.xlu0 %10858 }
 0x4bd   : > { %v10871_v37 = vsel %vm10870_vm7, %v10859_v7, %v10861_v61  ;;  %10956 = vmatprep.mubr.f32.mxu0 %v26297_v0  ;;  %v11147_v61 = vsel %vm11146_vm9, %v11135_v28, %v11137_v21 }
 0x4be   : > { %19805 = vmatpush1.msk.msra.mxu0 %vm8726_vm0, %v10871_v37 }
 0x4bf   : > { %v23748_v43 = vpop.permute.xlu1 %11142 }
 0x4c0   : > { %19806 = vmatmul.mubr.msk.f32.vlgmr.msra.gmra.mrb[4].mxu0 %vm8719_vm1, %v23745_v31  ;;  %v23752_v45 = vpop.permute.xlu0 %10868 }
 0x4c1   : > { %v23757_v47 = vsel %vm10870_vm7, %v23701_v55, %v23752_v45  ;;  %10962 = vmatprep.mubr.f32.mxu0 %v26297_v0 }
 0x4c2   : > { %26335 = vst [vmem:[#allocation13_spill] sm:$0xff] %v23757_v47  ;;  %20804 = vmatprep.subr.msk.mxu0 %vm8726_vm0, %v23757_v47 }
 0x4c3   : > { %20805 = vmatpush3.msk.msra.mxu0 %vm8726_vm0, %v23757_v47  ;;  %v9493_v17 = vpop.permute.xlu1 %9492 }
 0x4c4   : > { %19807 = vmatmul.mubr.msk.f32.gmra.mrb[6].mxu0 %vm8719_vm1, %v23763_v16  ;;  %v23771_v18 = vpop.permute.xlu0 %11138  ;;  %v23803_v28 = vsel %vm9496_vm2, %v9493_v17, %v23438_v52 }
 0x4c5   : > { %v23775_v3 = vsel %vm11146_vm9, %v11137_v21, %v23771_v18  ;;  %20806 = vmatprep.mubr.msk.f32.mxu0 %vm8719_vm1, %v23745_v31  ;;  %v23799_v21 = vld [vmem:[%s26261_s3 + $0x90] sm:$0xff] }
 0x4c6   : > { %26336 = vst [vmem:[#allocation14_spill] sm:$0xff] %v23775_v3  ;;  %19817 = vmatprep.subr.msk.mxu0 %vm8726_vm0, %v23775_v3 }
 0x4c7   : > { %v10040_v39 = vpop.permute.xlu1 %10039 }
 0x4c8   : > { %20807 = vmatmul.mubr.msk.f32.vlgmr.msra.gmra.mrb[8].mxu0 %vm8719_vm1, %v23763_v16  ;;  %v9221_v7 = vpop.permute.xlu0 %9220  ;;  %v23868_v13 = vsel %vm3776_vm12, %v10040_v39, %v23601_v44  ;;  %v23900_v44 = vld [vmem:[%s26261_s3 + $0xa8] sm:$0xff] }
 0x4c9   : > { %19818 = vmatpush1.msk.msra.mxu0 %vm8726_vm0, %v11147_v61  ;;  %v23787_v37 = vsel %vm1778_vm6, %v23365_v23, %v9221_v7  ;;  %v23791_v0 = vsel %vm1778_vm6, %v9221_v7, %v23390_v32  ;;  %11232 = vmatprep.mubr.f32.mxu0 %v26337_v41  ;;  %v23811_v61 = vsel %vm9496_vm2, %v23413_v46, %v9493_v17 }
 0x4ca   : > { %19730 = vmatprep.subr.msk.mxu1 %vm8726_vm0, %v23791_v0 }
 0x4cb   : > { %19731 = vmatpush1.msk.msra.mxu1 %vm8726_vm0, %v23787_v37  ;;  %v23807_v23 = vpop.permute.xlu1 %10314 }
 0x4cc   : > { %19732 = vmatmul.mubr.msk.f32.vlgmr.msra.gmra.mrb[52].mxu1 %vm8719_vm1, %v23411_v42  ;;  %19743 = vmatprep.subr.msk.mxu1 %vm8726_vm0, %v23803_v28  ;;  %v23817_v7 = vpop.permute.xlu0 %11144  ;;  %v23834_v42 = vld [vmem:[%s26261_s3 + $0x98] sm:$0xff]  ;;  %v23915_v26 = vsel %vm4442_vm14, %v23807_v23, %v23646_v2 }
 0x4cd   : > { %19819 = vmatmul.mubr.msk.f32.vlgmr.msra.gmra.mrb[4].mxu0 %vm8719_vm1, %v23799_v21  ;;  %v23824_v3 = vsel %vm11146_vm9, %v23748_v43, %v23817_v7  ;;  %19744 = vmatpush1.msk.msra.mxu1 %vm8726_vm0, %v23811_v61 }
 0x4ce   : > { %26338 = vst [vmem:[#allocation15_spill] sm:$0xff] %v23824_v3  ;;  %20809 = vmatprep.subr.msk.mxu0 %vm8726_vm0, %v23824_v3  ;;  %9391 = vmatprep.mubr.f32.mxu1 %v26337_v41 }
 0x4cf   : > { %11238 = vmatprep.mubr.f32.mxu0 %v26337_v41  ;;  %20810 = vmatpush3.msk.msra.mxu0 %vm8726_vm0, %v23824_v3  ;;  %v23839_v46 = vpop.permute.xlu1 %11915 }
 0x4d0   : > { %19733 = vmatmul.mubr.msk.f32.gmra.mrb[54].mxu1 %vm8719_vm1, %v23433_v51  ;;  %19830 = vmatprep.subr.msk.mxu0 %vm8726_vm0, %v23252_v11  ;;  %v9766_v17 = vpop.permute.xlu0 %9765 }
 0x4d1   : > { %19820 = vmatmul.mubr.msk.f32.gmra.mrb[6].mxu0 %vm8719_vm1, %v23834_v42  ;;  %v23849_v47 = vsel %vm9769_vm5, %v9766_v17, %v23486_v49  ;;  %9658 = vmatprep.mubr.f32.mxu1 %v26337_v41  ;;  %v23860_v11 = vsel %vm9769_vm5, %v23461_v62, %v9766_v17  ;;  %v23908_v17 = vsel %vm3776_vm12, %v23509_v4, %v10040_v39  ;;  %v23941_v39 = vld [vmem:[%s26261_s3 + $0xb0] sm:$0xff] }
 0x4d2   : > { %19756 = vmatprep.subr.msk.mxu1 %vm8726_vm0, %v23849_v47  ;;  %20811 = vmatprep.mubr.msk.f32.mxu0 %vm8719_vm1, %v23799_v21 }
 0x4d3   : > { %v23856_v51 = vpop.permute.xlu1 %12170 }
 0x4d4   : > { %19745 = vmatmul.mubr.msk.f32.vlgmr.msra.gmra.mrb[52].mxu1 %vm8719_vm1, %v23459_v60  ;;  %v23864_v3 = vpop.permute.xlu0 %11660  ;;  %v23881_v60 = vld [vmem:[%s26261_s3 + $0xa0] sm:$0xff] }
 0x4d5   : > { %19757 = vmatpush1.msk.msra.mxu1 %vm8726_vm0, %v23860_v11  ;;  %20812 = vmatmul.mubr.msk.f32.vlgmr.msra.gmra.mrb[8].mxu0 %vm8719_vm1, %v23834_v42 }
 0x4d6   : > { %19831 = vmatpush1.msk.msra.mxu0 %vm8726_vm0, %v23244_v54  ;;  %19769 = vmatprep.subr.msk.mxu1 %vm8726_vm0, %v23868_v13 }
 0x4d7   : > { %20814 = vmatprep.subr.msk.mxu0 %vm8726_vm0, %v23334_v14  ;;  %9664 = vmatprep.mubr.f32.mxu1 %v26337_v41  ;;  %v23886_v62 = vpop.permute.xlu1 %12425 }
 0x4d8   : > { %11482 = vmatprep.mubr.f32.mxu0 %v26337_v41  ;;  %19746 = vmatmul.mubr.msk.f32.gmra.mrb[54].mxu1 %vm8719_vm1, %v23481_v35  ;;  %v10590_v54 = vpop.permute.xlu0 %10589 }
 0x4d9   : > { %19832 = vmatmul.mubr.msk.f32.vlgmr.msra.gmra.mrb[4].mxu0 %vm8719_vm1, %v23881_v60  ;;  %9931 = vmatprep.mubr.f32.mxu1 %v26337_v41 }
 0x4da   : > { %20815 = vmatpush3.msk.msra.mxu0 %vm8726_vm0, %v23334_v14  ;;  %11488 = vmatprep.mubr.f32.mxu0 %v26337_v41 }
 0x4db   : > { %19843 = vmatprep.subr.msk.mxu0 %vm8726_vm0, %v23638_v19  ;;  %v23904_v35 = vpop.permute.xlu1 %12934 }
 0x4dc   : > { %19758 = vmatmul.mubr.msk.f32.vlgmr.msra.gmra.mrb[52].mxu1 %vm8719_vm1, %v23507_v27  ;;  %v10865_v14 = vpop.permute.xlu0 %10864 }
 0x4dd   : > { %19770 = vmatpush1.msk.msra.mxu1 %vm8726_vm0, %v23908_v17  ;;  %19833 = vmatmul.mubr.msk.f32.gmra.mrb[6].mxu0 %vm8719_vm1, %v23900_v44 }
 0x4de   : > { %19782 = vmatprep.subr.msk.mxu1 %vm8726_vm0, %v23915_v26  ;;  %9937 = vmatprep.mubr.f32.mxu1 %v26337_v41 }
 0x4df   : > { %20816 = vmatprep.mubr.msk.f32.mxu0 %vm8719_vm1, %v23881_v60  ;;  %v13441_v27 = vpop.permute.xlu1 %13440 }
 0x4e0   : > { %v23928_v4 = vsel %vm10870_vm7, %v23752_v45, %v13441_v27  ;;  %19759 = vmatmul.mubr.msk.f32.gmra.mrb[54].mxu1 %vm8719_vm1, %v23529_v34  ;;  %v11141_v2 = vpop.permute.xlu0 %11140  ;;  %v23948_v34 = vsel %vm4442_vm14, %v23620_v63, %v23807_v23 }
 0x4e1   : > { %20817 = vmatmul.mubr.msk.f32.vlgmr.msra.gmra.mrb[8].mxu0 %vm8719_vm1, %v23900_v44  ;;  %10207 = vmatprep.mubr.f32.mxu1 %v26337_v41 }
 0x4e2   : > { %19844 = vmatpush1.msk.msra.mxu0 %vm8726_vm0, %v23308_v25  ;;  %11737 = vmatprep.mubr.f32.mxu0 %v26337_v41  ;;  %v23956_v25 = vsel %vm5108_vm8, %v10590_v54, %v23669_v8  ;;  %v23986_v8 = vsel %vm5108_vm8, %v23616_v58, %v10590_v54  ;;  %v24009_v58 = vld [vmem:[%s26261_s3 + $0xc0] sm:$0xff] }
 0x4e3   : > { %20819 = vmatprep.subr.msk.mxu0 %vm8726_vm0, %v23864_v3  ;;  %v19958_v54 = vld [vmem:[%s26261_s3 + $0x140] sm:$0xff] }
 0x4e4   : > { %19771 = vmatmul.mubr.msk.f32.vlgmr.msra.gmra.mrb[52].mxu1 %vm8719_vm1, %v23553_v38  ;;  %v23952_v45 = vpop.permute.xlu0 %12681  ;;  %v23969_v38 = vld [vmem:[%s26261_s3 + $0xb8] sm:$0xff] }
 0x4e5   : > { %19783 = vmatpush1.msk.msra.mxu1 %vm8726_vm0, %v23948_v34  ;;  %19845 = vmatmul.mubr.msk.f32.vlgmr.msra.gmra.mrb[4].mxu0 %vm8719_vm1, %v23941_v39 }
 0x4e6   : > { %20820 = vmatpush3.msk.msra.mxu0 %vm8726_vm0, %v23864_v3  ;;  %19795 = vmatprep.subr.msk.mxu1 %vm8726_vm0, %v23956_v25 }
 0x4e7   : > { %19856 = vmatprep.subr.msk.mxu0 %vm8726_vm0, %v23787_v37  ;;  %10213 = vmatprep.mubr.f32.mxu1 %v26337_v41 }
 0x4e8   : > { %11743 = vmatprep.mubr.f32.mxu0 %v26337_v41  ;;  %19772 = vmatmul.mubr.msk.f32.gmra.mrb[54].mxu1 %vm8719_vm1, %v23566_v40  ;;  %v23977_v63 = vpop.permute.xlu0 %13187  ;;  %v23992_v40 = vsel %vm10870_vm7, %v10865_v14, %v23701_v55  ;;  %v24112_v55 = vld [vmem:[%s26261_s3 + $0xe0] sm:$0xff] }
 0x4e9   : > { %19846 = vmatmul.mubr.msk.f32.gmra.mrb[6].mxu0 %vm8719_vm1, %v23969_v38  ;;  %10482 = vmatprep.mubr.f32.mxu1 %v26337_v41 }
 0x4ea   : > { %20821 = vmatprep.mubr.msk.f32.mxu0 %vm8719_vm1, %v23941_v39 }
 0x4ec   : > { %19784 = vmatmul.mubr.msk.f32.vlgmr.msra.gmra.mrb[52].mxu1 %vm8719_vm1, %v23630_v15  ;;  %v13694_v23 = vpop.permute.xlu0 %13693  ;;  %v24032_v15 = vsel %vm10870_vm7, %v23686_v36, %v10865_v14  ;;  %v24060_v14 = vld [vmem:[%s26261_s3 + $0xd0] sm:$0xff]  ;;  %v24066_v36 = vsel %vm11146_vm9, %v23771_v18, %v11141_v2 }
 0x4ed   : > { %19796 = vmatpush1.msk.msra.mxu1 %vm8726_vm0, %v23986_v8  ;;  %20822 = vmatmul.mubr.msk.f32.vlgmr.msra.gmra.mrb[8].mxu0 %vm8719_vm1, %v23969_v38  ;;  %v24000_v27 = vsel %vm11146_vm9, %v23817_v7, %v13694_v23  ;;  %v26342_v18 = vld [vmem:[#allocation14_spill] sm:$0xff]  ;;  %v26343_v7 = vld [vmem:[#allocation15_spill] sm:$0xff] }
 0x4ee   : > { %19857 = vmatpush1.msk.msra.mxu0 %vm8726_vm0, %v23376_v30  ;;  %19808 = vmatprep.subr.msk.mxu1 %vm8726_vm0, %v23992_v40  ;;  %v24026_v30 = vld [vmem:[%s26261_s3 + $0xc8] sm:$0xff] }
 0x4ef   : > { %20824 = vmatprep.subr.msk.mxu0 %vm8726_vm0, %v23839_v46  ;;  %10488 = vmatprep.mubr.f32.mxu1 %v26337_v41 }
 0x4f0   : > { %11992 = vmatprep.mubr.f32.mxu0 %v26337_v41  ;;  %19785 = vmatmul.mubr.msk.f32.gmra.mrb[54].mxu1 %vm8719_vm1, %v23659_v24  ;;  %v24038_v24 = vsel %vm11146_vm9, %v11141_v2, %v23748_v43  ;;  %v12936_v43 = vsel %vm4442_vm14, %v23603_v53, %v23904_v35  ;;  %v13189_v53 = vsel %vm5108_vm8, %v23705_v59, %v23977_v63  ;;  %v19932_v59 = vld [vmem:[%s26261_s3 + $0x120] sm:$0xff]  ;;  %v14197_v35 = vpop.permute.xlu1 %14196  ;;  %vm15681_vm8 = vcmask 203776  }
 0x4f1   : > { %19858 = vmatmul.mubr.msk.f32.vlgmr.msra.gmra.mrb[4].mxu0 %vm8719_vm1, %v24009_v58  ;;  %10757 = vmatprep.mubr.f32.mxu1 %v26337_v41  ;;  %v19984_v2 = vld [vmem:[%s26261_s3 + $0x160] sm:$0xff] }
 0x4f2   : > { %20825 = vmatpush3.msk.msra.mxu0 %vm8726_vm0, %v23839_v46  ;;  %11998 = vmatprep.mubr.f32.mxu0 %v26337_v41 }
 0x4f3   : > { %19869 = vmatprep.subr.msk.mxu0 %vm8726_vm0, %v23811_v61 }
 0x4f4   : > { %19797 = vmatmul.mubr.msk.f32.vlgmr.msra.gmra.mrb[52].mxu1 %vm8719_vm1, %v23697_v48  ;;  %v24103_v48 = vsel %vm1118_vm4, %v23318_v5, %v23864_v3  ;;  %v15213_v5 = vld [vmem:[%s26262_s4] sm:$0xff] }
 0x4f5   : > { %19809 = vmatpush1.msk.msra.mxu1 %vm8726_vm0, %v24032_v15  ;;  %19859 = vmatmul.mubr.msk.f32.gmra.mrb[6].mxu0 %vm8719_vm1, %v24026_v30 }
 0x4f6   : > { %19821 = vmatprep.subr.msk.mxu1 %vm8726_vm0, %v24038_v24  ;;  %10763 = vmatprep.mubr.f32.mxu1 %v26337_v41 }
 0x4f7   : > { %20826 = vmatprep.mubr.msk.f32.mxu0 %vm8719_vm1, %v24009_v58  ;;  %15217 = vperm.xlu1 %21892, %v15213_v5  }
 0x4f8   : > { %19798 = vmatmul.mubr.msk.f32.gmra.mrb[54].mxu1 %vm8719_vm1, %v23718_v9  ;;  %v24145_v9 = vsel %vm1778_vm6, %v23390_v32, %v23839_v46  ;;  %v12683_v32 = vsel %vm3776_vm12, %v23605_v56, %v23952_v45  ;;  %v19894_v56 = vld [vmem:[%s26261_s3 + $0xf8] sm:$0xff] }
 0x4f9   : > { %20827 = vmatmul.mubr.msk.f32.vlgmr.msra.gmra.mrb[8].mxu0 %vm8719_vm1, %v24026_v30  ;;  %11033 = vmatprep.mubr.f32.mxu1 %v26337_v41 }
 0x4fa   : > { %19870 = vmatpush1.msk.msra.mxu0 %vm8726_vm0, %v23424_v50  ;;  %12247 = vmatprep.mubr.f32.mxu0 %v26337_v41  ;;  %v24081_v50 = vld [vmem:[%s26261_s3 + $0xd8] sm:$0xff] }
 0x4fb   : > { %20829 = vmatprep.subr.msk.mxu0 %vm8726_vm0, %v23856_v51 }
 0x4fc   : > { %19810 = vmatmul.mubr.msk.f32.vlgmr.msra.gmra.mrb[52].mxu1 %vm8719_vm1, %v23745_v31  ;;  %v19893_v31 = vld [vmem:[%s26261_s3 + $0xf0] sm:$0xff] }
 0x4fd   : > { %19822 = vmatpush1.msk.msra.mxu1 %vm8726_vm0, %v24066_v36  ;;  %19871 = vmatmul.mubr.msk.f32.vlgmr.msra.gmra.mrb[4].mxu0 %vm8719_vm1, %v24060_v14 }
 0x4fe   : > { %20830 = vmatpush3.msk.msra.mxu0 %vm8726_vm0, %v23856_v51  ;;  %19834 = vmatprep.subr.msk.mxu1 %vm8726_vm0, %v23261_v1 }
 0x4ff   : > { %19882 = vmatprep.subr.msk.mxu0 %vm8726_vm0, %v23860_v11  ;;  %11039 = vmatprep.mubr.f32.mxu1 %v26337_v41 }
 0x500   : > { %12253 = vmatprep.mubr.f32.mxu0 %v26337_v41  ;;  %19811 = vmatmul.mubr.msk.f32.gmra.mrb[54].mxu1 %vm8719_vm1, %v23763_v16  ;;  %v19906_v16 = vld [vmem:[%s26261_s3 + $0x100] sm:$0xff] }
 0x501   : > { %19872 = vmatmul.mubr.msk.f32.gmra.mrb[6].mxu0 %vm8719_vm1, %v24081_v50  ;;  %11309 = vmatprep.mubr.f32.mxu1 %v26337_v41 }
 0x502   : > { %20831 = vmatprep.mubr.msk.f32.mxu0 %vm8719_vm1, %v24060_v14 }
 0x504   : > { %19823 = vmatmul.mubr.msk.f32.vlgmr.msra.gmra.mrb[52].mxu1 %vm8719_vm1, %v23799_v21  ;;  %v19945_v21 = vld [vmem:[%s26261_s3 + $0x130] sm:$0xff] }
 0x505   : > { %19835 = vmatpush1.msk.msra.mxu1 %vm8726_vm0, %v23363_v22  ;;  %20832 = vmatmul.mubr.msk.f32.vlgmr.msra.gmra.mrb[8].mxu0 %vm8719_vm1, %v24081_v50 }
 0x506   : > { %19883 = vmatpush1.msk.msra.mxu0 %vm8726_vm0, %v23472_v10  ;;  %19847 = vmatprep.subr.msk.mxu1 %vm8726_vm0, %v24103_v48  ;;  %v24132_v10 = vld [vmem:[%s26261_s3 + $0xe8] sm:$0xff] }
 0x507   : > { %20834 = vmatprep.subr.msk.mxu0 %vm8726_vm0, %v23886_v62  ;;  %11315 = vmatprep.mubr.f32.mxu1 %v26337_v41 }
 0x508   : > { %12502 = vmatprep.mubr.f32.mxu0 %v26337_v41  ;;  %19824 = vmatmul.mubr.msk.f32.gmra.mrb[54].mxu1 %vm8719_vm1, %v23834_v42  ;;  %v19946_v42 = vld [vmem:[%s26261_s3 + $0x138] sm:$0xff] }
 0x509   : > { %19884 = vmatmul.mubr.msk.f32.vlgmr.msra.gmra.mrb[4].mxu0 %vm8719_vm1, %v24112_v55  ;;  %11559 = vmatprep.mubr.f32.mxu1 %v26337_v41 }
 0x50a   : > { %20835 = vmatpush3.msk.msra.mxu0 %vm8726_vm0, %v23886_v62  ;;  %12508 = vmatprep.mubr.f32.mxu0 %v26337_v41 }
 0x50b   : > { %19895 = vmatprep.subr.msk.mxu0 %vm8726_vm0, %v23908_v17  ;;  %v19959_v17 = vld [vmem:[%s26261_s3 + $0x148] sm:$0xff] }
 0x50c   : > { %19836 = vmatmul.mubr.msk.f32.vlgmr.msra.gmra.mrb[52].mxu1 %vm8719_vm1, %v23881_v60  ;;  %v26345_v60 = vld [vmem:[#allocation9_spill] sm:$0xff] }
 0x50d   : > { %19848 = vmatpush1.msk.msra.mxu1 %vm8726_vm0, %v23642_v20  ;;  %19885 = vmatmul.mubr.msk.f32.gmra.mrb[6].mxu0 %vm8719_vm1, %v24132_v10 }
 0x50e   : > { %19860 = vmatprep.subr.msk.mxu1 %vm8726_vm0, %v24145_v9  ;;  %11565 = vmatprep.mubr.f32.mxu1 %v26337_v41 }
 0x50f   : > { %20836 = vmatprep.mubr.msk.f32.mxu0 %vm8719_vm1, %v24112_v55 }
 0x510   : > { %19837 = vmatmul.mubr.msk.f32.gmra.mrb[54].mxu1 %vm8719_vm1, %v23900_v44  ;;  %v26346_v44 = vld [vmem:[#allocation10_spill] sm:$0xff] }
 0x511   : > { %20837 = vmatmul.mubr.msk.f32.vlgmr.msra.gmra.mrb[8].mxu0 %vm8719_vm1, %v24132_v10  ;;  %11814 = vmatprep.mubr.f32.mxu1 %v26337_v41 }
 0x512   : > { %19896 = vmatpush1.msk.msra.mxu0 %vm8726_vm0, %v23520_v33  ;;  %12756 = vmatprep.mubr.f32.mxu0 %v26337_v41  ;;  %v24175_v33 = vsel %vm9496_vm2, %v23438_v52, %v23856_v51  ;;  %v24200_v52 = vsel %vm9769_vm5, %v23486_v49, %v23886_v62  ;;  %v19907_v49 = vld [vmem:[%s26261_s3 + $0x108] sm:$0xff] }
 0x513   : > { %20839 = vmatprep.subr.msk.mxu0 %vm8726_vm0, %v12683_v32 }
 0x514   : > { %19849 = vmatmul.mubr.msk.f32.vlgmr.msra.gmra.mrb[52].mxu1 %vm8719_vm1, %v23941_v39 }
 0x515   : > { %19861 = vmatpush1.msk.msra.mxu1 %vm8726_vm0, %v23791_v0  ;;  %19897 = vmatmul.mubr.msk.f32.vlgmr.msra.gmra.mrb[4].mxu0 %vm8719_vm1, %v19893_v31 }
 0x516   : > { %20840 = vmatpush3.msk.msra.mxu0 %vm8726_vm0, %v12683_v32  ;;  %19873 = vmatprep.subr.msk.mxu1 %vm8726_vm0, %v24175_v33 }
 0x517   : > { %19908 = vmatprep.subr.msk.mxu0 %vm8726_vm0, %v23948_v34  ;;  %11820 = vmatprep.mubr.f32.mxu1 %v26337_v41 }
 0x518   : > { %12762 = vmatprep.mubr.f32.mxu0 %v26337_v41  ;;  %19850 = vmatmul.mubr.msk.f32.gmra.mrb[54].mxu1 %vm8719_vm1, %v23969_v38 }
 0x519   : > { %19898 = vmatmul.mubr.msk.f32.gmra.mrb[6].mxu0 %vm8719_vm1, %v19894_v56  ;;  %12069 = vmatprep.mubr.f32.mxu1 %v26337_v41 }
 0x51a   : > { %20841 = vmatprep.mubr.msk.f32.mxu0 %vm8719_vm1, %v19893_v31 }
 0x51c   : > { %19862 = vmatmul.mubr.msk.f32.vlgmr.msra.gmra.mrb[52].mxu1 %vm8719_vm1, %v24009_v58 }
 0x51d   : > { %19874 = vmatpush1.msk.msra.mxu1 %vm8726_vm0, %v23803_v28  ;;  %20842 = vmatmul.mubr.msk.f32.vlgmr.msra.gmra.mrb[8].mxu0 %vm8719_vm1, %v19894_v56 }
 0x51e   : > { %19909 = vmatpush1.msk.msra.mxu0 %vm8726_vm0, %v23624_v12  ;;  %19886 = vmatprep.subr.msk.mxu1 %vm8726_vm0, %v24200_v52  ;;  %v19920_v12 = vld [vmem:[%s26261_s3 + $0x118] sm:$0xff] }
 0x51f   : > { %20844 = vmatprep.subr.msk.mxu0 %vm8726_vm0, %v12936_v43  ;;  %12075 = vmatprep.mubr.f32.mxu1 %v26337_v41 }
 0x520   : > { %13009 = vmatprep.mubr.f32.mxu0 %v26337_v41  ;;  %19863 = vmatmul.mubr.msk.f32.gmra.mrb[54].mxu1 %vm8719_vm1, %v24026_v30 }
 0x521   : > { %19910 = vmatmul.mubr.msk.f32.vlgmr.msra.gmra.mrb[4].mxu0 %vm8719_vm1, %v19906_v16  ;;  %12324 = vmatprep.mubr.f32.mxu1 %v26337_v41 }
 0x522   : > { %20845 = vmatpush3.msk.msra.mxu0 %vm8726_vm0, %v12936_v43  ;;  %13015 = vmatprep.mubr.f32.mxu0 %v26337_v41 }
 0x523   : > { %19921 = vmatprep.subr.msk.mxu0 %vm8726_vm0, %v23986_v8 }
 0x524   : > { %19875 = vmatmul.mubr.msk.f32.vlgmr.msra.gmra.mrb[52].mxu1 %vm8719_vm1, %v24060_v14 }
 0x525   : > { %19887 = vmatpush1.msk.msra.mxu1 %vm8726_vm0, %v23849_v47  ;;  %19911 = vmatmul.mubr.msk.f32.gmra.mrb[6].mxu0 %vm8719_vm1, %v19907_v49 }
 0x526   : > { %19899 = vmatprep.subr.msk.mxu1 %vm8726_vm0, %v23610_v57  ;;  %12330 = vmatprep.mubr.f32.mxu1 %v26337_v41  ;;  %v19919_v57 = vld [vmem:[%s26261_s3 + $0x110] sm:$0xff] }
 0x527   : > { %20846 = vmatprep.mubr.msk.f32.mxu0 %vm8719_vm1, %v19906_v16 }
 0x528   : > { %19876 = vmatmul.mubr.msk.f32.gmra.mrb[54].mxu1 %vm8719_vm1, %v24081_v50 }
 0x529   : > { %20847 = vmatmul.mubr.msk.f32.vlgmr.msra.gmra.mrb[8].mxu0 %vm8719_vm1, %v19907_v49  ;;  %12579 = vmatprep.mubr.f32.mxu1 %v26337_v41 }
 0x52a   : > { %19922 = vmatpush1.msk.msra.mxu0 %vm8726_vm0, %v23677_v29  ;;  %13262 = vmatprep.mubr.f32.mxu0 %v26337_v41  ;;  %v26340_v29 = vld [vmem:[#allocation11_spill] sm:$0xff] }
 0x52b   : > { %20849 = vmatprep.subr.msk.mxu0 %vm8726_vm0, %v13189_v53 }
 0x52c   : > { %19888 = vmatmul.mubr.msk.f32.vlgmr.msra.gmra.mrb[52].mxu1 %vm8719_vm1, %v24112_v55 }
 0x52d   : > { %19900 = vmatpush1.msk.msra.mxu1 %vm8726_vm0, %v23868_v13  ;;  %19923 = vmatmul.mubr.msk.f32.vlgmr.msra.gmra.mrb[4].mxu0 %vm8719_vm1, %v19919_v57  ;;  %v19933_v13 = vld [vmem:[%s26261_s3 + $0x128] sm:$0xff] }
 0x52e   : > { %20850 = vmatpush3.msk.msra.mxu0 %vm8726_vm0, %v13189_v53  ;;  %19912 = vmatprep.subr.msk.mxu1 %vm8726_vm0, %v23651_v6  ;;  %v26339_v6 = vld [vmem:[#allocation12_spill] sm:$0xff] }
 0x52f   : > { %19934 = vmatprep.subr.msk.mxu0 %vm8726_vm0, %v24032_v15  ;;  %12585 = vmatprep.mubr.f32.mxu1 %v26337_v41 }
 0x530   : > { %13268 = vmatprep.mubr.f32.mxu0 %v26337_v41  ;;  %19889 = vmatmul.mubr.msk.f32.gmra.mrb[54].mxu1 %vm8719_vm1, %v24132_v10 }
 0x531   : > { %19924 = vmatmul.mubr.msk.f32.gmra.mrb[6].mxu0 %vm8719_vm1, %v19920_v12  ;;  %12833 = vmatprep.mubr.f32.mxu1 %v26337_v41 }
 0x532   : > { %20851 = vmatprep.mubr.msk.f32.mxu0 %vm8719_vm1, %v19919_v57 }
 0x534   : > { %19901 = vmatmul.mubr.msk.f32.vlgmr.msra.gmra.mrb[52].mxu1 %vm8719_vm1, %v19893_v31 }
 0x535   : > { %19913 = vmatpush1.msk.msra.mxu1 %vm8726_vm0, %v23915_v26  ;;  %20852 = vmatmul.mubr.msk.f32.vlgmr.msra.gmra.mrb[8].mxu0 %vm8719_vm1, %v19920_v12  ;;  %v26341_v26 = vld [vmem:[#allocation13_spill] sm:$0xff] }
 0x536   : > { %19935 = vmatpush1.msk.msra.mxu0 %vm8726_vm0, %v26339_v6  ;;  %19925 = vmatprep.subr.msk.mxu1 %vm8726_vm0, %v26340_v29 }
 0x537   : > { %20854 = vmatprep.subr.msk.mxu0 %vm8726_vm0, %v23928_v4  ;;  %12839 = vmatprep.mubr.f32.mxu1 %v26337_v41 }
 0x538   : > { %13515 = vmatprep.mubr.f32.mxu0 %v26337_v41  ;;  %19902 = vmatmul.mubr.msk.f32.gmra.mrb[54].mxu1 %vm8719_vm1, %v19894_v56 }
 0x539   : > { %19936 = vmatmul.mubr.msk.f32.vlgmr.msra.gmra.mrb[4].mxu0 %vm8719_vm1, %v19932_v59  ;;  %13086 = vmatprep.mubr.f32.mxu1 %v26337_v41 }
 0x53a   : > { %20855 = vmatpush3.msk.msra.mxu0 %vm8726_vm0, %v23928_v4  ;;  %13521 = vmatprep.mubr.f32.mxu0 %v26337_v41  ;;  %v14198_v4 = vsel %vm1118_vm4, %v23864_v3, %v14197_v35 }
 0x53b   : > { %19947 = vmatprep.subr.msk.mxu0 %vm8726_vm0, %v24066_v36 }
 0x53c   : > { %19914 = vmatmul.mubr.msk.f32.vlgmr.msra.gmra.mrb[52].mxu1 %vm8719_vm1, %v19906_v16 }
 0x53d   : > { %19926 = vmatpush1.msk.msra.mxu1 %vm8726_vm0, %v23956_v25  ;;  %19937 = vmatmul.mubr.msk.f32.gmra.mrb[6].mxu0 %vm8719_vm1, %v19933_v13 }
 0x53e   : > { %19938 = vmatprep.subr.msk.mxu1 %vm8726_vm0, %v26341_v26  ;;  %13092 = vmatprep.mubr.f32.mxu1 %v26337_v41  ;;  %v15378_v26 = vld [vmem:[%s26263_s5 + $0x88] sm:$0xff] }
 0x53f   : > { %20856 = vmatprep.mubr.msk.f32.mxu0 %vm8719_vm1, %v19932_v59 }
 0x540   : > { %19915 = vmatmul.mubr.msk.f32.gmra.mrb[54].mxu1 %vm8719_vm1, %v19907_v49 }
 0x541   : > { %20857 = vmatmul.mubr.msk.f32.vlgmr.msra.gmra.mrb[8].mxu0 %vm8719_vm1, %v19933_v13  ;;  %13339 = vmatprep.mubr.f32.mxu1 %v26337_v41 }
 0x542   : > { %19948 = vmatpush1.msk.msra.mxu0 %vm8726_vm0, %v26342_v18  ;;  %13768 = vmatprep.mubr.f32.mxu0 %v26337_v41  ;;  %v15361_v18 = vld [vmem:[%s26263_s5] sm:$0xff] }
 0x543   : > { %20859 = vmatprep.subr.msk.mxu0 %vm8726_vm0, %v24000_v27 }
 0x544   : > { %19927 = vmatmul.mubr.msk.f32.vlgmr.msra.gmra.mrb[52].mxu1 %vm8719_vm1, %v19919_v57 }
 0x545   : > { %19939 = vmatpush1.msk.msra.mxu1 %vm8726_vm0, %v23992_v40  ;;  %19949 = vmatmul.mubr.msk.f32.vlgmr.msra.gmra.mrb[4].mxu0 %vm8719_vm1, %v19945_v21 }
 0x546   : > { %20860 = vmatpush3.msk.msra.mxu0 %vm8726_vm0, %v24000_v27  ;;  %19951 = vmatprep.subr.msk.mxu1 %vm8726_vm0, %v26343_v7  ;;  %v15362_v7 = vld [vmem:[%s26263_s5 + $0x8] sm:$0xff] }
 0x547   : > { %19960 = vmatprep.subr.msk.mxu0 %vm8726_vm0, %v23363_v22  ;;  %13345 = vmatprep.mubr.f32.mxu1 %v26337_v41  ;;  %v26344_v22 = vld [vmem:[#allocation8_spill] sm:$0xff] }
 0x548   : > { %13774 = vmatprep.mubr.f32.mxu0 %v26337_v41  ;;  %19928 = vmatmul.mubr.msk.f32.gmra.mrb[54].mxu1 %vm8719_vm1, %v19920_v12 }
 0x549   : > { %19950 = vmatmul.mubr.msk.f32.gmra.mrb[6].mxu0 %vm8719_vm1, %v19946_v42  ;;  %13592 = vmatprep.mubr.f32.mxu1 %v26337_v41 }
 0x54a   : > { %20861 = vmatprep.mubr.msk.f32.mxu0 %vm8719_vm1, %v19945_v21 }
 0x54c   : > { %19940 = vmatmul.mubr.msk.f32.vlgmr.msra.gmra.mrb[52].mxu1 %vm8719_vm1, %v19932_v59 }
 0x54d   : > { %19952 = vmatpush1.msk.msra.mxu1 %vm8726_vm0, %v24038_v24  ;;  %20862 = vmatmul.mubr.msk.f32.vlgmr.msra.gmra.mrb[8].mxu0 %vm8719_vm1, %v19946_v42 }
 0x54e   : > { %19961 = vmatpush1.msk.msra.mxu0 %vm8726_vm0, %v26344_v22  ;;  %19964 = vmatprep.subr.msk.mxu1 %vm8726_vm0, %v26345_v60  ;;  %v15380_v22 = vld [vmem:[%s26263_s5 + $0x98] sm:$0xff]  ;;  %v20958_v60 = vpack.c.bf16 %v15362_v7, %v15361_v18  ;;  %v15375_v18 = vld [vmem:[%s26263_s5 + $0x70] sm:$0xff] }
 0x54f   : > { %20864 = vmatprep.subr.msk.mxu0 %vm8726_vm0, %v26346_v44  ;;  %13598 = vmatprep.mubr.f32.mxu1 %v26337_v41 }
 0x550   : > { %14018 = vmatprep.mubr.f32.mxu0 %v26337_v41  ;;  %19941 = vmatmul.mubr.msk.f32.gmra.mrb[54].mxu1 %vm8719_vm1, %v19933_v13  ;;  %v15377_v13 = vld [vmem:[%s26263_s5 + $0x80] sm:$0xff] }
 0x551   : > { %19962 = vmatmul.mubr.msk.f32.vlgmr.msra.gmra.mrb[4].mxu0 %vm8719_vm1, %v19958_v54  ;;  %13845 = vmatprep.mubr.f32.mxu1 %v26337_v41 }
 0x552   : > { %20865 = vmatpush3.msk.msra.mxu0 %vm8726_vm0, %v26346_v44  ;;  %14024 = vmatprep.mubr.f32.mxu0 %v26337_v41  ;;  %v15363_v44 = vld [vmem:[%s26263_s5 + $0x10] sm:$0xff] }
 0x553   : > { %19973 = vmatprep.subr.msk.mxu0 %vm8726_vm0, %v23642_v20  ;;  %v14452_v20 = vpop.permute.xlu0 %14451 }
 0x554   : > { %19953 = vmatmul.mubr.msk.f32.vlgmr.msra.gmra.mrb[52].mxu1 %vm8719_vm1, %v19945_v21  ;;  %v14453_v3 = vsel %vm1778_vm6, %v23839_v46, %v14452_v20  ;;  %v14707_v46 = vpop.permute.xlu1 %14706  ;;  %v20956_v21 = vpack.c.bf16 %v15378_v26, %v15377_v13  ;;  %v15392_v13 = vld [vmem:[%s26263_s5 + $0xf8] sm:$0xff]  ;;  %vm15428_vm6 = vcmask 138240  }
 0x555   : > { %19963 = vmatmul.mubr.msk.f32.gmra.mrb[6].mxu0 %vm8719_vm1, %v19959_v17  ;;  %19965 = vmatpush1.msk.msra.mxu1 %vm8726_vm0, %v23261_v1  ;;  %v19971_v1 = vld [vmem:[%s26261_s3 + $0x150] sm:$0xff] }
 0x556   : > { %19977 = vmatprep.subr.msk.mxu1 %vm8726_vm0, %v14198_v4  ;;  %13851 = vmatprep.mubr.f32.mxu1 %v26337_v41  ;;  %v15382_v4 = vld [vmem:[%s26263_s5 + $0xa8] sm:$0xff] }
 0x557   : > { %20866 = vmatprep.mubr.msk.f32.mxu0 %vm8719_vm1, %v19958_v54 }
 0x558   : > { %19954 = vmatmul.mubr.msk.f32.gmra.mrb[54].mxu1 %vm8719_vm1, %v19946_v42  ;;  %v15379_v42 = vld [vmem:[%s26263_s5 + $0x90] sm:$0xff] }
 0x559   : > { %20867 = vmatmul.mubr.msk.f32.vlgmr.msra.gmra.mrb[8].mxu0 %vm8719_vm1, %v19959_v17  ;;  %14095 = vmatprep.mubr.f32.mxu1 %v26337_v41 }
 0x55a   : > { %19974 = vmatpush1.msk.msra.mxu0 %vm8726_vm0, %v23638_v19  ;;  %14273 = vmatprep.mubr.f32.mxu0 %v26337_v41  ;;  %v19972_v19 = vld [vmem:[%s26261_s3 + $0x158] sm:$0xff] }
 0x55b   : > { %20869 = vmatprep.subr.msk.mxu0 %vm8726_vm0, %v14197_v35 }
 0x55c   : > { %19966 = vmatmul.mubr.msk.f32.vlgmr.msra.gmra.mrb[52].mxu1 %vm8719_vm1, %v19958_v54  ;;  %v20960_v54 = vpack.c.bf16 %v15380_v22, %v15379_v42  ;;  %v15409_v42 = vld [vmem:[%s26263_s5 + $0x180] sm:$0xff]  ;;  %v15410_v22 = vld [vmem:[%s26263_s5 + $0x188] sm:$0xff] }
 0x55d   : > { %19975 = vmatmul.mubr.msk.f32.vlgmr.msra.gmra.mrb[4].mxu0 %vm8719_vm1, %v19971_v1  ;;  %19978 = vmatpush1.msk.msra.mxu1 %vm8726_vm0, %v24103_v48 }
 0x55e   : > { %20870 = vmatpush3.msk.msra.mxu0 %vm8726_vm0, %v14197_v35  ;;  %19990 = vmatprep.subr.msk.mxu1 %vm8726_vm0, %v14453_v3  ;;  %v15364_v35 = vld [vmem:[%s26263_s5 + $0x18] sm:$0xff]  ;;  %v15365_v3 = vld [vmem:[%s26263_s5 + $0x20] sm:$0xff] }
 0x55f   : > { %19986 = vmatprep.subr.msk.mxu0 %vm8726_vm0, %v23791_v0  ;;  %14101 = vmatprep.mubr.f32.mxu1 %v26337_v41  ;;  %v14708_v0 = vsel %vm9496_vm2, %v23856_v51, %v14707_v46  ;;  %v14962_v51 = vpop.permute.xlu0 %14961 }
 0x560   : > { %14279 = vmatprep.mubr.f32.mxu0 %v26337_v41  ;;  %19967 = vmatmul.mubr.msk.f32.gmra.mrb[54].mxu1 %vm8719_vm1, %v19959_v17  ;;  %v14963_v39 = vsel %vm9769_vm5, %v23886_v62, %v14962_v51  ;;  %v19998_v62 = vld [vmem:[%s26261_s3 + $0x178] sm:$0xff]  ;;  %v15381_v17 = vld [vmem:[%s26263_s5 + $0xa0] sm:$0xff] }
 0x561   : > { %19976 = vmatmul.mubr.msk.f32.gmra.mrb[6].mxu0 %vm8719_vm1, %v19972_v19  ;;  %14350 = vmatprep.mubr.f32.mxu1 %v26337_v41 }
 0x562   : > { %20871 = vmatprep.mubr.msk.f32.mxu0 %vm8719_vm1, %v19971_v1 }
 0x563   : > { %v15223_v58 = vpop.permute.xlu0 %15222 }
 0x564   : > { %19979 = vmatmul.mubr.msk.f32.vlgmr.msra.gmra.mrb[52].mxu1 %vm8719_vm1, %v19971_v1  ;;  %v20964_v1 = vpack.c.bf16 %v15382_v4, %v15381_v17 }
 0x565   : > { %20872 = vmatmul.mubr.msk.f32.vlgmr.msra.gmra.mrb[8].mxu0 %vm8719_vm1, %v19972_v19  ;;  %19991 = vmatpush1.msk.msra.mxu1 %vm8726_vm0, %v24145_v9 }
 0x566   : > { %19987 = vmatpush1.msk.msra.mxu0 %vm8726_vm0, %v23787_v37  ;;  %20003 = vmatprep.subr.msk.mxu1 %vm8726_vm0, %v14708_v0  ;;  %v19985_v37 = vld [vmem:[%s26261_s3 + $0x168] sm:$0xff]  ;;  %v15384_v0 = vld [vmem:[%s26263_s5 + $0xb8] sm:$0xff] }
 0x567   : > { %20874 = vmatprep.subr.msk.mxu0 %vm8726_vm0, %v14452_v20  ;;  %14356 = vmatprep.mubr.f32.mxu1 %v26337_v41 }
 0x568   : > { %14528 = vmatprep.mubr.f32.mxu0 %v26337_v41  ;;  %19980 = vmatmul.mubr.msk.f32.gmra.mrb[54].mxu1 %vm8719_vm1, %v19972_v19  ;;  %v15366_v19 = vld [vmem:[%s26263_s5 + $0x28] sm:$0xff] }
 0x569   : > { %19988 = vmatmul.mubr.msk.f32.vlgmr.msra.gmra.mrb[4].mxu0 %vm8719_vm1, %v19984_v2  ;;  %14605 = vmatprep.mubr.f32.mxu1 %v26337_v41 }
 0x56a   : > { %20875 = vmatpush3.msk.msra.mxu0 %vm8726_vm0, %v14452_v20  ;;  %14534 = vmatprep.mubr.f32.mxu0 %v26337_v41  ;;  %v20962_v20 = vpack.c.bf16 %v15364_v35, %v15363_v44 }
 0x56b   : > { %19999 = vmatprep.subr.msk.mxu0 %vm8726_vm0, %v23803_v28  ;;  %v19997_v28 = vld [vmem:[%s26261_s3 + $0x170] sm:$0xff] }
 0x56c   : > { %19992 = vmatmul.mubr.msk.f32.vlgmr.msra.gmra.mrb[52].mxu1 %vm8719_vm1, %v19984_v2 }
 0x56d   : > { %19989 = vmatmul.mubr.msk.f32.gmra.mrb[6].mxu0 %vm8719_vm1, %v19985_v37  ;;  %20004 = vmatpush1.msk.msra.mxu1 %vm8726_vm0, %v24175_v33 }
 0x56e   : > { %20016 = vmatprep.subr.msk.mxu1 %vm8726_vm0, %v14963_v39  ;;  %14611 = vmatprep.mubr.f32.mxu1 %v26337_v41  ;;  %v15368_v39 = vld [vmem:[%s26263_s5 + $0x38] sm:$0xff] }
 0x56f   : > { %20876 = vmatprep.mubr.msk.f32.mxu0 %vm8719_vm1, %v19984_v2  ;;  %v20966_v2 = vpack.c.bf16 %v15366_v19, %v15365_v3 }
 0x570   : > { %19993 = vmatmul.mubr.msk.f32.gmra.mrb[54].mxu1 %vm8719_vm1, %v19985_v37 }
 0x571   : > { %20877 = vmatmul.mubr.msk.f32.vlgmr.msra.gmra.mrb[8].mxu0 %vm8719_vm1, %v19985_v37  ;;  %14860 = vmatprep.mubr.f32.mxu1 %v26337_v41  ;;  %v15367_v37 = vld [vmem:[%s26263_s5 + $0x30] sm:$0xff] }
 0x572   : > { %20000 = vmatpush1.msk.msra.mxu0 %vm8726_vm0, %v23811_v61  ;;  %14783 = vmatprep.mubr.f32.mxu0 %v26337_v41  ;;  %v20010_v61 = vld [vmem:[%s26261_s3 + $0x180] sm:$0xff] }
 0x573   : > { %20879 = vmatprep.subr.msk.mxu0 %vm8726_vm0, %v14707_v46 }
 0x574   : > { %20005 = vmatmul.mubr.msk.f32.vlgmr.msra.gmra.mrb[52].mxu1 %vm8719_vm1, %v19997_v28 }
 0x575   : > { %20001 = vmatmul.mubr.msk.f32.vlgmr.msra.gmra.mrb[4].mxu0 %vm8719_vm1, %v19997_v28  ;;  %20017 = vmatpush1.msk.msra.mxu1 %vm8726_vm0, %v24200_v52 }
 0x576   : > { %20880 = vmatpush3.msk.msra.mxu0 %vm8726_vm0, %v14707_v46  ;;  %14789 = vmatprep.mubr.f32.mxu0 %v26337_v41  ;;  %v15218_v34 = vpop.permute.xlu1 %15217  ;;  %v15383_v46 = vld [vmem:[%s26263_s5 + $0xb0] sm:$0xff] }
 0x577   : > { %20012 = vmatprep.subr.msk.mxu0 %vm8726_vm0, %v23849_v47  ;;  %14866 = vmatprep.mubr.f32.mxu1 %v26337_v41  ;;  %v20011_v47 = vld [vmem:[%s26261_s3 + $0x188] sm:$0xff] }
 0x578   : > { %20006 = vmatmul.mubr.msk.f32.gmra.mrb[54].mxu1 %vm8719_vm1, %v19998_v62  ;;  %20957 = vmatprep.subr.bf16.mxu1 %v20956_v21  ;;  %v15376_v21 = vld [vmem:[%s26263_s5 + $0x78] sm:$0xff] }
 0x579   : > { %20002 = vmatmul.mubr.msk.f32.gmra.mrb[6].mxu0 %vm8719_vm1, %v19998_v62  ;;  %15115 = vmatprep.mubr.f32.mxu1 %v26337_v41  ;;  %v20986_v7 = vpack.c.bf16 %v15376_v21, %v15375_v18 }
 0x57a   : > { %20881 = vmatprep.mubr.msk.f32.mxu0 %vm8719_vm1, %v19997_v28  ;;  %v15385_v28 = vld [vmem:[%s26263_s5 + $0xc0] sm:$0xff] }
 0x57c   : > { %20018 = vmatmul.mubr.msk.f32.vlgmr.msra.gmra.mrb[52].mxu1 %vm8719_vm1, %v20010_v61 }
 0x57d   : > { %20882 = vmatmul.mubr.msk.f32.vlgmr.msra.gmra.mrb[8].mxu0 %vm8719_vm1, %v19998_v62  ;;  %15121 = vmatprep.mubr.f32.mxu1 %v26337_v41  ;;  %v15386_v62 = vld [vmem:[%s26263_s5 + $0xc8] sm:$0xff] }
 0x57e   : > { %20013 = vmatpush1.msk.msra.mxu0 %vm8726_vm0, %v23860_v11  ;;  %15038 = vmatprep.mubr.f32.mxu0 %v26337_v41 }
 0x57f   : > { %20884 = vmatprep.subr.msk.mxu0 %vm8726_vm0, %v14962_v51  ;;  %20959 = vmatpush3.bf16.msra.mxu1 %v20958_v60 }
 0x580   : > { %20019 = vmatmul.mubr.msk.f32.gmra.mrb[54].mxu1 %vm8719_vm1, %v20011_v47  ;;  %20961 = vmatprep.subr.bf16.mxu1 %v20960_v54  ;;  %v20988_v54 = vpack.c.bf16 %v15410_v22, %v15409_v42 }
 0x581   : > { %20014 = vmatmul.mubr.msk.f32.vlgmr.msra.gmra.mrb[4].mxu0 %vm8719_vm1, %v20010_v61 }
 0x582   : > { %20885 = vmatpush3.msk.msra.mxu0 %vm8726_vm0, %v14962_v51  ;;  %15044 = vmatprep.mubr.f32.mxu0 %v26337_v41  ;;  %v20968_v51 = vpack.c.bf16 %v15384_v0, %v15383_v46 }
 0x583   : > { %20963 = vmatpush3.bf16.msra.mxu1 %v20962_v20 }
 0x584   : > { %20965 = vmatprep.subr.bf16.mxu1 %v20964_v1 }
 0x585   : > { %20015 = vmatmul.mubr.msk.f32.gmra.mrb[6].mxu0 %vm8719_vm1, %v20011_v47 }
 0x586   : > { %20886 = vmatprep.mubr.msk.f32.mxu0 %vm8719_vm1, %v20010_v61  ;;  %v20970_v61 = vpack.c.bf16 %v15368_v39, %v15367_v37 }
 0x587   : > { %20967 = vmatpush3.bf16.msra.mxu1 %v20966_v2 }
 0x588   : > { %20969 = vmatprep.subr.bf16.mxu1 %v20968_v51 }
 0x589   : > { %20887 = vmatmul.mubr.msk.f32.vlgmr.msra.gmra.mrb[8].mxu0 %vm8719_vm1, %v20011_v47  ;;  %v20972_v47 = vpack.c.bf16 %v15386_v62, %v15385_v28 }
 0x58a   : > { %16169 = vmatprep.mubr.f32.mxu0 %v26337_v41 }
 0x58b   : > { %20971 = vmatpush3.bf16.msra.mxu1 %v20970_v61 }
 0x58c   : > { %20973 = vmatprep.subr.bf16.mxu1 %v20972_v47 }
 0x64f   : > { %v15117_v11 = vpop.f32.mrb[52].mxu1 }
 0x650   : > { %v15119_v45 = vpop.f32.mrb[53].mxu1  ;;  %v24480_v63 = vadd.f32 %v15218_v34, %v15117_v11  ;;  %v15369_v11 = vld [vmem:[%s26263_s5 + $0x40] sm:$0xff] }
 0x651   : > { %v24478_v25 = vadd.f32 %v15218_v34, %v15119_v45  ;;  %v15387_v45 = vld [vmem:[%s26263_s5 + $0xd0] sm:$0xff] }
 0x652   : > { %v15237_v36 = vmax.f32 %v24480_v63, 0.0 }
 0x653   : > { %v15123_v38 = vpop.f32.mrb[54].mxu1  ;;  %v15238_v15 = vmax.f32 %v24478_v25, 0.0 }
 0x654   : > { %v15040_v8 = vpop.f32.mrb[4].mxu0  ;;  %v15125_v23 = vpop.f32.mrb[55].mxu1  ;;  %v24491_v50 = vadd.f32 %v15223_v58, %v15123_v38  ;;  %v15388_v38 = vld [vmem:[%s26263_s5 + $0xd8] sm:$0xff] }
 0x655   : > { %v24482_v40 = vadd.f32 %v15218_v34, %v15040_v8  ;;  %v15042_v27 = vpop.f32.mrb[5].mxu0  ;;  %v24488_v14 = vadd.f32 %v15223_v58, %v15125_v23  ;;  %v20976_v23 = vpack.c.bf16 %v15388_v38, %v15387_v45 }
 0x656   : > { %v24484_v30 = vadd.f32 %v15218_v34, %v15042_v27  ;;  %v15242_v52 = vmax.f32 %v24491_v50, 0.0  ;;  %v15371_v27 = vld [vmem:[%s26263_s5 + $0x50] sm:$0xff] }
 0x657   : > { %v15235_v24 = vmax.f32 %v24482_v40, 0.0  ;;  %v15243_v33 = vmax.f32 %v24488_v14, 0.0 }
 0x658   : > { %v15236_v48 = vmax.f32 %v24484_v30, 0.0  ;;  %v15046_v55 = vpop.f32.mrb[6].mxu0 }
 0x659   : > { %v21898_v5 = vpack.i.bf16 %v15235_v24, %v15238_v15  ;;  %v24498_v10 = vadd.f32 %v15223_v58, %v15046_v55  ;;  %v15048_v9 = vpop.f32.mrb[7].mxu0  ;;  %v15389_v55 = vld [vmem:[%s26263_s5 + $0xe0] sm:$0xff] }
 0x65a   : > { %v21893_v32 = vpack.i.bf16 %v15237_v36, %v15236_v48  ;;  %v24504_v31 = vadd.f32 %v15223_v58, %v15048_v9 }
 0x65b   : > { %v15240_v56 = vmax.f32 %v24498_v10, 0.0  ;;  %21899 = vrot.lane.b32.xlu0 %v21898_v5, %s26331_s21  ;;  %v15390_v5 = vld [vmem:[%s26263_s5 + $0xe8] sm:$0xff] }
 0x65c   : > { %v15241_v43 = vmax.f32 %v24504_v31, 0.0  ;;  %v20888_v16 = vpop.f32.mrb[8].mxu0  ;;  %21894 = vrot.lane.b32.xlu1 %v21893_v32, %s26331_s21  ;;  %v20980_v32 = vpack.c.bf16 %v15390_v5, %v15389_v55 }
 0x65d   : > { %v21903_v49 = vpack.i.bf16 %v15240_v56, %v15243_v33  ;;  %v24516_v53 = vadd.f32 %v20888_v16, %v15223_v58  ;;  %v15194_v57 = vpop.f32.mrb[9].mxu0  ;;  %v15372_v58 = vld [vmem:[%s26263_s5 + $0x58] sm:$0xff]  ;;  %v15373_v16 = vld [vmem:[%s26263_s5 + $0x60] sm:$0xff] }
 0x65e   : > { %v21908_v12 = vpack.i.bf16 %v15242_v52, %v15241_v43  ;;  %v24522_v6 = vadd.f32 %v15218_v34, %v15194_v57  ;;  %v15370_v34 = vld [vmem:[%s26263_s5 + $0x48] sm:$0xff]  ;;  %v20978_v9 = vpack.c.bf16 %v15372_v58, %v15371_v27 }
 0x65f   : > { %21904 = vrot.lane.b32.xlu0 %v21903_v49, %s26331_s21  ;;  %v15244_v29 = vmax.f32 %v24516_v53, 0.0  ;;  %v20974_v8 = vpack.c.bf16 %v15370_v34, %v15369_v11  ;;  %v15374_v49 = vld [vmem:[%s26263_s5 + $0x68] sm:$0xff] }
 0x660   : > { %21909 = vrot.lane.b32.xlu1 %v21908_v12, %s26331_s21  ;;  %v15239_v59 = vmax.f32 %v24522_v6, 0.0  ;;  %v20982_v57 = vpack.c.bf16 %v15374_v49, %v15373_v16  ;;  %v15391_v12 = vld [vmem:[%s26263_s5 + $0xf0] sm:$0xff] }
 0x661   : > { %20975 = vmatpush3.bf16.msra.mxu1 %v20974_v8  ;;  %v20984_v26 = vpack.c.bf16 %v15392_v13, %v15391_v12  ;;  %v15411_v6 = vld [vmem:[%s26263_s5 + $0x190] sm:$0xff]  ;;  %v15413_v13 = vld [vmem:[%s26263_s5 + $0x1a0] sm:$0xff] }
 0x662   : > { %20977 = vmatprep.subr.bf16.mxu1 %v20976_v23  ;;  %v15395_v49 = vld [vmem:[%s26263_s5 + $0x110] sm:$0xff] }
 0x663   : > { %15273 = vrot.lane.b32.xlu0 %v15244_v29, %s26331_s21 }
 0x664   : > { %15263 = vrot.lane.b32.xlu1 %v15239_v59, %s26331_s21  ;;  %s19340_s21 = sshll.u32 %s459_s0, 4  ;;  %s26218_s21 = int_to_ptr.vmem [resolvable:$true] %s19340_s21 }
 0x665   : > { %20979 = vmatpush3.bf16.msra.mxu1 %v20978_v9  ;;  %s21936_s22 = scalar_lea.vmem %s26218_s21, 16 }
 0x666   : > { %20981 = vmatprep.subr.bf16.mxu1 %v20980_v32  ;;  %p21937_p11 = scmp.ne.s32.totalorder %s26218_s21, %s21936_s22 }
 0x668   : > { %p21938_p12 = pnand %p21937_p11, %p22143_p5 }
 0x669   : > { %20983 = vmatpush3.bf16.msra.mxu1 %v20982_v57  ;;  %v15396_v57 = vld [vmem:[%s26263_s5 + $0x118] sm:$0xff] }
 0x66a   : > { %20985 = vmatprep.subr.bf16.mxu1 %v20984_v26  ;;  %v15414_v26 = vld [vmem:[%s26263_s5 + $0x1a8] sm:$0xff]  ;;  %p21939_p13 = pneg %p21938_p12 }
 0x66d   : > { %20987 = vmatpush3.bf16.msra.mxu1 %v20986_v7 }
 0x66e   : > { %20989 = vmatprep.subr.bf16.mxu1 %v20988_v54 }
 0x6cd   : > { %v21900_v60 = vpop.permute.xlu0 %21899 }
 0x6ce   : > { %v21902_v44 = vunpack.i.h.bf16 %v21900_v60  ;;  %v21901_v35 = vunpack.i.l.bf16 %v21900_v60  ;;  %v21895_v17 = vpop.permute.xlu1 %21894  ;;  %v20994_v60 = vpack.c.bf16 %v15396_v57, %v15395_v49 }
 0x6cf   : > { %v21897_v4 = vunpack.i.h.bf16 %v21895_v17  ;;  %v21896_v20 = vunpack.i.l.bf16 %v21895_v17  ;;  %v15397_v17 = vld [vmem:[%s26263_s5 + $0x120] sm:$0xff] }
 0x6d1   : > { %v15275_v1 = vsel %vm1118_vm4, %v21902_v44, %v21896_v20  ;;  %v15276_v3 = vsel %vm1118_vm4, %v21896_v20, %v21897_v4  ;;  %v15277_v19 = vsel %vm1118_vm4, %v21897_v4, %v21901_v35  ;;  %v21905_v46 = vpop.permute.xlu0 %21904  ;;  %v15398_v4 = vld [vmem:[%s26263_s5 + $0x128] sm:$0xff] }
 0x6d2   : > { %v15293_v0 = vmax.f32 %v15235_v24, %v15275_v1  ;;  %v15294_v2 = vmax.f32 %v15236_v48, %v15276_v3  ;;  %v24645_v51 = vmax.f32 %v15237_v36, %v15277_v19  ;;  %v21907_v37 = vunpack.i.h.bf16 %v21905_v46  ;;  %v21910_v39 = vpop.permute.xlu1 %21909  ;;  %v15415_v3 = vld [vmem:[%s26263_s5 + $0x1b0] sm:$0xff]  ;;  %v15416_v19 = vld [vmem:[%s26263_s5 + $0x1b8] sm:$0xff] }
 0x6d3   : > { %v21906_v28 = vunpack.i.l.bf16 %v21905_v46  ;;  %v21912_v62 = vunpack.i.h.bf16 %v21910_v39  ;;  %v21911_v61 = vunpack.i.l.bf16 %v21910_v39  ;;  %v20998_v46 = vpack.c.bf16 %v15398_v4, %v15397_v17  ;;  %v15417_v39 = vld [vmem:[%s26263_s5 + $0x1c0] sm:$0xff]  ;;  %v15678_v17 = vld [vmem:[%s26264_s6 + $0x68] sm:$0x1] }
 0x6d4   : > { %15313 = vrot.lane.b32.xlu0 %v15293_v0, %s26323_s26  ;;  %v21913_v47 = vpack.i.bf16 %v24645_v51, %v15294_v2 }
 0x6d5   : > { %v15279_v11 = vsel %vm1118_vm4, %v21907_v37, %v21911_v61  ;;  %v15280_v40 = vsel %vm1118_vm4, %v21911_v61, %v21912_v62  ;;  %v15281_v30 = vsel %vm1118_vm4, %v21912_v62, %v21906_v28  ;;  %v15274_v34 = vpop.permute.xlu0 %15273  ;;  %v15400_v37 = vld [vmem:[%s26263_s5 + $0x138] sm:$0xff] }
 0x6d6   : > { %v15299_v63 = vmax.f32 %v15241_v43, %v15280_v40  ;;  %v24656_v24 = vmax.f32 %v15242_v52, %v15281_v30  ;;  %v15264_v36 = vpop.permute.xlu1 %15263  ;;  %21914 = vrot.lane.b32.xlu1 %v21913_v47, %s26323_s26  ;;  %v15298_v38 = vmax.f32 %v15240_v56, %v15279_v11  ;;  %v15282_v50 = vsel %vm1118_vm4, %v21906_v28, %v15274_v34  ;;  %v15394_v43 = vld [vmem:[%s26263_s5 + $0x108] sm:$0xff]  ;;  %v15401_v47 = vld [vmem:[%s26263_s5 + $0x140] sm:$0xff]  ;;  %v15419_v40 = vld [vmem:[%s26263_s5 + $0x1d0] sm:$0xff] }
 0x6d7   : > { %v15278_v48 = vsel %vm1118_vm4, %v21901_v35, %v15264_v36  ;;  %v24669_v52 = vmax.f32 %v15239_v59, %v15264_v36  ;;  %v24674_v25 = vmax.f32 %v15243_v33, %v15282_v50  ;;  %v15393_v33 = vld [vmem:[%s26263_s5 + $0x100] sm:$0xff]  ;;  %v20996_v35 = vpack.c.bf16 %v15414_v26, %v15413_v13  ;;  %v15418_v28 = vld [vmem:[%s26263_s5 + $0x1c8] sm:$0xff]  ;;  %v15420_v30 = vld [vmem:[%s26263_s5 + $0x1d8] sm:$0xff] }
 0x6d8   : > { %v15296_v45 = vmax.f32 %v15238_v15, %v15278_v48  ;;  %v21918_v8 = vpack.i.bf16 %v24656_v24, %v15299_v63  ;;  %v24680_v15 = vmax.f32 %v15244_v29, %v15274_v34  ;;  %v15412_v29 = vld [vmem:[%s26263_s5 + $0x198] sm:$0xff]  ;;  %v20990_v5 = vpack.c.bf16 %v15394_v43, %v15393_v33  ;;  %v15402_v11 = vld [vmem:[%s26263_s5 + $0x148] sm:$0xff]  ;;  %v15403_v48 = vld [vmem:[%s26263_s5 + $0x150] sm:$0xff] }
 0x6d9   : > { %v20992_v16 = vpack.c.bf16 %v15412_v29, %v15411_v6  ;;  %v21004_v61 = vpack.c.bf16 %v15418_v28, %v15417_v39  ;;  %v21008_v36 = vpack.c.bf16 %v15420_v30, %v15419_v40  ;;  %v15404_v34 = vld [vmem:[%s26263_s5 + $0x158] sm:$0xff]  ;;  %v15405_v50 = vld [vmem:[%s26263_s5 + $0x160] sm:$0xff]  ;;  %v15423_v33 = vld [vmem:[%s26263_s5 + $0x1f0] sm:$0xff]  ;;  %vm15435_vm4 = vcmask 1040384  }
 0x6da   : > { %v21923_v31 = vpack.i.bf16 %v15296_v45, %v15298_v38  ;;  %21919 = vrot.lane.b32.xlu1 %v21918_v8, %s26323_s26  ;;  %v21010_v8 = vpack.c.bf16 %v15404_v34, %v15403_v48  ;;  %v15424_v43 = vld [vmem:[%s26263_s5 + $0x1f8] sm:$0xff]  ;;  %v15407_v29 = vld [vmem:[%s26263_s5 + $0x170] sm:$0xff] }
 0x6db   : > { %v21016_v6 = vpack.c.bf16 %v15424_v43, %v15423_v33  ;;  %v15668_v28 = vld [vmem:[%s26264_s6 + $0x18] sm:$0xff] }
 0x6dc   : > { %21924 = vrot.lane.b32.xlu0 %v21923_v31, %s26323_s26 }
 0x6de   : > { %15321 = vrot.lane.b32.xlu1 %v24669_v52, %s26323_s26 }
 0x6e0   : > { %15329 = vrot.lane.b32.xlu0 %v24674_v25, %s26323_s26 }
 0x6e2   : > { %15331 = vrot.lane.b32.xlu1 %v24680_v15, %s26323_s26  ;;  %s21940_s26 = sshll.u32 %s22029_s17, 4  ;;  %s21941_s26 = int_to_ptr.vmem [resolvable:$false] %s21940_s26 }
 0x6e3   : > { %s21942_s18 = scalar_lea.vmem %s21941_s26, 32  ;;  %p21943_p0 = scmp.lt.s32.totalorder %s26218_s21, %s21941_s26 }
 0x6e4   : > { %p21944_p1 = scmp.lt.s32.totalorder %s21942_s18, %s21936_s22 }
 0x6e6   : > { %p21945_p2 = por %p21944_p1, %p21943_p0 }
 0x6e8   : > { %p21946_p3 = pnand %p21945_p2, %p21939_p13 }
 0x746   : > { %v15314_v53 = vpop.permute.xlu0 %15313 }
 0x748   : > { %v24686_v10 = vpop.permute.xlu1 %21914 }
 0x749   : > { %v21917_v56 = vunpack.i.h.bf16 %v24686_v10  ;;  %v21916_v14 = vunpack.i.l.bf16 %v24686_v10 }
 0x74b   : > { %v15333_v59 = vsel %vm3776_vm12, %v15314_v53, %v21916_v14  ;;  %v15334_v23 = vsel %vm3776_vm12, %v21916_v14, %v21917_v56  ;;  %v15406_v14 = vld [vmem:[%s26263_s5 + $0x168] sm:$0xff] }
 0x74c   : > { %v15351_v27 = vmax.f32 %v15293_v0, %v15333_v59  ;;  %v24706_v58 = vpop.permute.xlu1 %21919  ;;  %v15352_v55 = vmax.f32 %v15294_v2, %v15334_v23  ;;  %v21000_v0 = vpack.c.bf16 %v15416_v19, %v15415_v3  ;;  %v15399_v2 = vld [vmem:[%s26263_s5 + $0x130] sm:$0xff]  ;;  %v21014_v53 = vpack.c.bf16 %v15406_v14, %v15405_v50  ;;  %v15408_v59 = vld [vmem:[%s26263_s5 + $0x178] sm:$0xff]  ;;  %v15425_v23 = vld [vmem:[%s26263_s5 + $0x200] sm:$0xff] }
 0x74d   : > { %v21922_v9 = vunpack.i.h.bf16 %v24706_v58  ;;  %v21921_v32 = vunpack.i.l.bf16 %v24706_v58  ;;  %v21002_v62 = vpack.c.bf16 %v15400_v37, %v15399_v2  ;;  %v20063_v19 = vld [vmem:[%s26264_s6 + $0x148] sm:$0xff]  ;;  %v20062_v2 = vld [vmem:[%s26264_s6 + $0x140] sm:$0xff] }
 0x74e   : > { %v24716_v12 = vpop.permute.xlu0 %21924  ;;  %15503 = vmatprep.mubr.f32.mxu1 %v15352_v55  ;;  %v20066_v37 = vld [vmem:[%s26264_s6 + $0x160] sm:$0x1] }
 0x74f   : > { %v21927_v18 = vunpack.i.h.bf16 %v24716_v12  ;;  %v21926_v21 = vunpack.i.l.bf16 %v24716_v12  ;;  %15504 = vmatmul.mubr.f32.vlgmr.msra.gmra.mrb[56].mxu1 %v15351_v27  ;;  %v15338_v7 = vsel %vm3776_vm12, %v21921_v32, %v21922_v9  ;;  %v15426_v27 = vld [vmem:[%s26263_s5 + $0x208] sm:$0xff]  ;;  %v15427_v12 = vld [vmem:[%s26263_s5 + $0x210] sm:$0x1]  ;;  %v21071_v39 = vpack.c.bf16 %v20066_v37, %v20062_v2  ;;  %v20040_v2 = vld [vmem:[%s26264_s6 + $0xc0] sm:$0xff] }
 0x750   : > { %20991 = vmatpush3.bf16.msra.mxu1 %v20990_v5  ;;  %v24729_v42 = vpop.permute.xlu1 %15321  ;;  %v15357_v22 = vmax.f32 %v15299_v63, %v15338_v7  ;;  %v21006_v63 = vpack.c.bf16 %v15402_v11, %v15401_v47  ;;  %v21018_v5 = vpack.c.bf16 %v15408_v59, %v15407_v29  ;;  %v20059_v7 = vld [vmem:[%s26264_s6 + $0x128] sm:$0xff]  ;;  %v15676_v29 = vld [vmem:[%s26264_s6 + $0x58] sm:$0xff]  ;;  %v20044_v37 = vld [vmem:[%s26264_s6 + $0xe0] sm:$0x1] }
 0x751   : > { %v15336_v54 = vsel %vm3776_vm12, %v21927_v18, %v24729_v42  ;;  %20993 = vmatprep.subr.bf16.mxu1 %v20992_v16  ;;  %v15337_v44 = vsel %vm3776_vm12, %v21926_v21, %v21921_v32  ;;  %v21020_v32 = vpack.c.bf16 %v15426_v27, %v15425_v23  ;;  %v15335_v16 = vsel %vm3776_vm12, %v21917_v56, %v21927_v18  ;;  %v15666_v56 = vld [vmem:[%s26264_s6 + $0x8] sm:$0xff]  ;;  %v15680_v59 = vld [vmem:[%s26264_s6 + $0x78] sm:$0x1] }
 0x752   : > { %v15354_v20 = vmax.f32 %v15296_v45, %v15336_v54  ;;  %15508 = vmatprep.mubr.f32.mxu1 %v15357_v22  ;;  %v15356_v1 = vmax.f32 %v15298_v38, %v15337_v44  ;;  %v15421_v45 = vld [vmem:[%s26263_s5 + $0x1e0] sm:$0xff]  ;;  %v15422_v38 = vld [vmem:[%s26263_s5 + $0x1e8] sm:$0xff]  ;;  %v15330_v49 = vpop.permute.xlu0 %15329  ;;  %v15353_v13 = vmax.f32 %v24645_v51, %v15335_v16  ;;  %v15355_v51 = vmax.f32 %v24669_v52, %v24729_v42 }
 0x753   : > { %v21012_v31 = vpack.c.bf16 %v15422_v38, %v15421_v45  ;;  %v15339_v26 = vsel %vm3776_vm12, %v21922_v9, %v15330_v49  ;;  %v15665_v52 = vld [vmem:[%s26264_s6] sm:$0xff]  ;;  %v20055_v18 = vld [vmem:[%s26264_s6 + $0x108] sm:$0xff] }
 0x754   : > { %20995 = vmatpush3.bf16.msra.mxu1 %v20994_v60  ;;  %v15332_v55 = vpop.permute.xlu1 %15331  ;;  %v15358_v10 = vmax.f32 %v24656_v24, %v15339_v26  ;;  %v15670_v24 = vld [vmem:[%s26264_s6 + $0x28] sm:$0xff]  ;;  %v21064_v42 = vpack.c.bf16 %v20059_v7, %v20055_v18  ;;  %v20054_v22 = vld [vmem:[%s26264_s6 + $0x100] sm:$0xff] }
 0x755   : > { %15509 = vmatmul.mubr.f32.gmra.mrb[58].mxu1 %v15356_v1  ;;  %20997 = vmatprep.subr.bf16.mxu1 %v20996_v35  ;;  %v15340_v57 = vsel %vm3776_vm12, %v15330_v49, %v15332_v55  ;;  %v21024_v58 = vpack.c.bf16 %v15670_v24, %v15666_v56  ;;  %v20058_v60 = vld [vmem:[%s26264_s6 + $0x120] sm:$0xff]  ;;  %vm22026_vm12 = vmmov 1   ;;  %v15674_v35 = vld [vmem:[%s26264_s6 + $0x48] sm:$0xff] }
 0x756   : > { %15578 = vmatprep.mubr.f32.mxu1 %v15354_v20  ;;  %v15359_v21 = vmax.f32 %v24674_v25, %v15340_v57  ;;  %v15360_v25 = vmax.f32 %v24680_v15, %v15332_v55  ;;  %v15669_v15 = vld [vmem:[%s26264_s6 + $0x20] sm:$0xff]  ;;  %vm24854_vm14 = vmpackc.low %vm15435_vm4, %vm22026_vm12  ;;  %v21066_v44 = vpack.c.bf16 %v20058_v60, %v20054_v22  ;;  %21065 = vmatprep.subr.bf16.mxu0 %v21064_v42  ;;  %v20077_v47 = vld [vmem:[%s26264_s6 + $0x188] sm:$0xff] }
 0x757   : > { %v21026_v9 = vpack.c.bf16 %v15669_v15, %v15665_v52  ;;  %v21028_v4 = vpack.c.bf16 %v15678_v17, %v15674_v35  ;;  %v15673_v20 = vld [vmem:[%s26264_s6 + $0x40] sm:$0xff]  ;;  %v20081_v11 = vld [vmem:[%s26264_s6 + $0x1a8] sm:$0xff] }
 0x758   : > { %20999 = vmatpush3.bf16.msra.mxu1 %v20998_v46  ;;  %v15677_v1 = vld [vmem:[%s26264_s6 + $0x60] sm:$0x1]  ;;  %21067 = vmatpush1.bf16.msra.mxu0 %v21066_v44  ;;  %v20067_v46 = vld [vmem:[%s26264_s6 + $0x168] sm:$0x1]  ;;  %v21084_v40 = vpack.c.bf16 %v20081_v11, %v20077_v47 }
 0x759   : > { %21001 = vmatprep.subr.bf16.mxu1 %v21000_v0  ;;  %v21031_v3 = vpack.c.bf16 %v15677_v1, %v15673_v20  ;;  %v21068_v0 = vpack.c.bf16 %v20067_v46, %v20063_v19  ;;  %v20076_v55 = vld [vmem:[%s26264_s6 + $0x180] sm:$0xff]  ;;  %v20085_v49 = vld [vmem:[%s26264_s6 + $0x1c8] sm:$0xff] }
 0x75a   : > { %v20089_v57 = vld [vmem:[%s26264_s6 + $0x1e8] sm:$0x1]  ;;  %v20084_v52 = vld [vmem:[%s26264_s6 + $0x1c0] sm:$0xff] }
 0x75b   : > { %21070 = vmatprep.subr.msk.bf16.mxu0 %vm24854_vm14, %v21068_v0  ;;  %v20037_v56 = vld [vmem:[%s26264_s6 + $0xa8] sm:$0xff]  ;;  %v20088_v15 = vld [vmem:[%s26264_s6 + $0x1e0] sm:$0x1] }
 0x75c   : > { %21003 = vmatpush3.bf16.msra.mxu1 %v21002_v62  ;;  %v15672_v62 = vld [vmem:[%s26264_s6 + $0x38] sm:$0xff]  ;;  %21073 = vmatpush1.bf16.msk.msra.mxu0 %vm24854_vm14, %v21071_v39  ;;  %v20099_v18 = vld [vmem:[%s26264_s6 + $0x208] sm:$0xff]  ;;  %v20032_v22 = vld [vmem:[%s26264_s6 + $0x80] sm:$0xff]  ;;  %v21091_v44 = vpack.c.bf16 %v20088_v15, %v20084_v52 }
 0x75d   : > { %21005 = vmatprep.subr.bf16.mxu1 %v21004_v61  ;;  %v21034_v61 = vpack.c.bf16 %v15672_v62, %v15668_v28  ;;  %21085 = vmatprep.subr.bf16.mxu0 %v21084_v40  ;;  %v20103_v7 = vld [vmem:[%s26264_s6 + $0x228] sm:$0xff]  ;;  %v20036_v60 = vld [vmem:[%s26264_s6 + $0xa0] sm:$0xff]  ;;  %v20035_v28 = vld [vmem:[%s26264_s6 + $0x98] sm:$0xff] }
 0x75e   : > { %v20041_v35 = vld [vmem:[%s26264_s6 + $0xc8] sm:$0xff]  ;;  %v20098_v20 = vld [vmem:[%s26264_s6 + $0x200] sm:$0xff]  ;;  %v20039_v62 = vld [vmem:[%s26264_s6 + $0xb8] sm:$0xff] }
 0x75f   : > { %v20045_v17 = vld [vmem:[%s26264_s6 + $0xe8] sm:$0x1]  ;;  %v20102_v1 = vld [vmem:[%s26264_s6 + $0x220] sm:$0xff]  ;;  %v20065_v15 = vld [vmem:[%s26264_s6 + $0x158] sm:$0xff] }
 0x760   : > { %21007 = vmatpush3.bf16.msra.mxu1 %v21006_v63  ;;  %v20107_v19 = vld [vmem:[%s26264_s6 + $0x248] sm:$0xff]  ;;  %v21048_v0 = vpack.c.bf16 %v20045_v17, %v20041_v35  ;;  %v21106_v39 = vpack.c.bf16 %v20102_v1, %v20098_v20  ;;  %v20106_v11 = vld [vmem:[%s26264_s6 + $0x240] sm:$0xff]  ;;  %v20064_v17 = vld [vmem:[%s26264_s6 + $0x150] sm:$0xff] }
 0x761   : > { %21009 = vmatprep.subr.bf16.mxu1 %v21008_v36  ;;  %v20111_v46 = vld [vmem:[%s26264_s6 + $0x268] sm:$0x1]  ;;  %v20110_v40 = vld [vmem:[%s26264_s6 + $0x260] sm:$0x1]  ;;  %v20079_v1 = vld [vmem:[%s26264_s6 + $0x198] sm:$0xff] }
 0x762   : > { %v21108_v47 = vpack.c.bf16 %v20111_v46, %v20107_v19  ;;  %v18946_v54 = vld [vmem:[%s26266_s8 + $0x80] sm:$0xff] }
 0x764   : > { %21011 = vmatpush3.bf16.msra.mxu1 %v21010_v8 }
 0x765   : > { %21013 = vmatprep.subr.bf16.mxu1 %v21012_v31 }
 0x768   : > { %21015 = vmatpush3.bf16.msra.mxu1 %v21014_v53  ;;  %v15667_v53 = vld [vmem:[%s26264_s6 + $0x10] sm:$0xff] }
 0x769   : > { %21017 = vmatprep.subr.bf16.mxu1 %v21016_v6  ;;  %v15671_v6 = vld [vmem:[%s26264_s6 + $0x30] sm:$0xff] }
 0x76a   : > { %v21036_v16 = vpack.c.bf16 %v15671_v6, %v15667_v53  ;;  %v20129_v53 = vld [vmem:[%s26264_s6 + $0x2c8] sm:$0xff] }
 0x76b   : > { %v20133_v6 = vld [vmem:[%s26264_s6 + $0x2e8] sm:$0x1] }
 0x76c   : > { %21019 = vmatpush3.bf16.msra.mxu1 %v21018_v5  ;;  %v20080_v5 = vld [vmem:[%s26264_s6 + $0x1a0] sm:$0xff] }
 0x76d   : > { %21021 = vmatprep.subr.bf16.mxu1 %v21020_v32 }
 0x76f   : > { %15579 = vmatmul.mubr.f32.vlgmr.msra.gmra.mrb[60].mxu1 %v15353_v13 }
 0x770   : > { %15583 = vmatprep.mubr.f32.mxu1 %v15359_v21  ;;  %21023 = vmatpush3.bf16.msra.mxu1 %v21020_v32  ;;  %v21038_v21 = vpack.c.bf16 %v15680_v59, %v15676_v29 }
 0x771   : > { %20893 = vmatprep.subr.msk.mxu1 %vm15435_vm4, %v15427_v12 }
 0x773   : > { %15584 = vmatmul.mubr.f32.gmra.mrb[62].mxu1 %v15358_v10  ;;  %v15679_v10 = vld [vmem:[%s26264_s6 + $0x70] sm:$0x1] }
 0x774   : > { %20895 = vmatprep.mubr.msk.f32.mxu1 %vm15428_vm6, %v15355_v51  ;;  %20894 = vmatpush3.msk.msra.mxu1 %vm15435_vm4, %v15427_v12  ;;  %v15675_v12 = vld [vmem:[%s26264_s6 + $0x50] sm:$0xff]  ;;  %v21086_v51 = vpack.c.bf16 %v20080_v5, %v20076_v55  ;;  %v20057_v5 = vld [vmem:[%s26264_s6 + $0x118] sm:$0xff] }
 0x775   : > { %21025 = vmatprep.subr.bf16.mxu1 %v21024_v58  ;;  %v21088_v58 = vpack.c.bf16 %v20089_v57, %v20085_v49  ;;  %v21128_v49 = vpack.c.bf16 %v20133_v6, %v20129_v53  ;;  %v20128_v57 = vld [vmem:[%s26264_s6 + $0x2c0] sm:$0xff]  ;;  %v20105_v53 = vld [vmem:[%s26264_s6 + $0x238] sm:$0xff] }
 0x777   : > { %20896 = vmatmul.mubr.msk.f32.vlgmr.msra.gmra.mrb[64].mxu1 %vm15428_vm6, %v15360_v25  ;;  %v20033_v25 = vld [vmem:[%s26264_s6 + $0x88] sm:$0xff] }
 0x778   : > { %15761 = vmatprep.mubr.f32.mxu1 %v26337_v41  ;;  %21027 = vmatpush1.bf16.msra.mxu1 %v21026_v9  ;;  %v21041_v9 = vpack.c.bf16 %v15679_v10, %v15675_v12  ;;  %v21044_v42 = vpack.c.bf16 %v20037_v56, %v20033_v25  ;;  %v20143_v10 = vld [vmem:[%s26264_s6 + $0x308] sm:$0xff]  ;;  %v20056_v56 = vld [vmem:[%s26264_s6 + $0x110] sm:$0xff] }
 0x779   : > { %21030 = vmatprep.subr.msk.bf16.mxu1 %vm24854_vm14, %v21028_v4  ;;  %v21104_v4 = vpack.c.bf16 %v20103_v7, %v20099_v18  ;;  %v20142_v7 = vld [vmem:[%s26264_s6 + $0x300] sm:$0xff] }
 0x77c   : > { %21033 = vmatpush1.bf16.msk.msra.mxu1 %vm24854_vm14, %v21031_v3  ;;  %v21046_v3 = vpack.c.bf16 %v20036_v60, %v20032_v22  ;;  %v20151_v60 = vld [vmem:[%s26264_s6 + $0x348] sm:$0xff] }
 0x77d   : > { %21035 = vmatprep.subr.bf16.mxu1 %v21034_v61 }
 0x822   : > { %v20527_v30 = vpop.f32.mrb[56].mxu1 }
 0x823   : > { %v20528_v63 = vpop.f32.mrb[57].mxu1 }
 0x824   : > { %v20529_v36 = vadd.f32 %v20528_v63, %v20527_v30  ;;  %v21051_v30 = vpack.c.bf16 %v20044_v37, %v20040_v2  ;;  %v20121_v63 = vld [vmem:[%s26264_s6 + $0x288] sm:$0xff]  ;;  %v20154_v2 = vld [vmem:[%s26264_s6 + $0x360] sm:$0x1] }
 0x828   : > { %v20530_v48 = vpop.f32.mrb[58].mxu1 }
 0x829   : > { %v20531_v34 = vpop.f32.mrb[59].mxu1 }
 0x82a   : > { %v20532_v45 = vadd.f32 %v20531_v34, %v20530_v48  ;;  %v21054_v48 = vpack.c.bf16 %v20039_v62, %v20035_v28  ;;  %v20034_v34 = vld [vmem:[%s26264_s6 + $0x90] sm:$0xff]  ;;  %v20169_v28 = vld [vmem:[%s26264_s6 + $0x3a8] sm:$0xff] }
 0x842   : > { %v20565_v38 = vpop.f32.mrb[60].mxu1 }
 0x843   : > { %v20566_v8 = vpop.f32.mrb[61].mxu1 }
 0x844   : > { %v20567_v31 = vadd.f32 %v20566_v8, %v20565_v38  ;;  %v21111_v38 = vpack.c.bf16 %v20110_v40, %v20106_v11  ;;  %v20043_v8 = vld [vmem:[%s26264_s6 + $0xd8] sm:$0xff]  ;;  %v20082_v11 = vld [vmem:[%s26264_s6 + $0x1b0] sm:$0xff] }
 0x846   : > { %v20568_v50 = vpop.f32.mrb[62].mxu1  ;;  %v15581_v14 = vadd.f32 %v20567_v31, %v20529_v36  ;;  %v20125_v36 = vld [vmem:[%s26264_s6 + $0x2a8] sm:$0xff]  ;;  %v20047_v31 = vld [vmem:[%s26264_s6 + $0xf8] sm:$0x1] }
 0x847   : > { %v20569_v33 = vpop.f32.mrb[63].mxu1  ;;  %v21058_v59 = vpack.c.bf16 %v20047_v31, %v20043_v8  ;;  %v20177_v8 = vld [vmem:[%s26264_s6 + $0x3e8] sm:$0x1] }
 0x848   : > { %v20570_v43 = vadd.f32 %v20569_v33, %v20568_v50  ;;  %v21124_v50 = vpack.c.bf16 %v20125_v36, %v20121_v63  ;;  %v20124_v33 = vld [vmem:[%s26264_s6 + $0x2a0] sm:$0xff]  ;;  %v20091_v63 = vld [vmem:[%s26264_s6 + $0x1f8] sm:$0x1] }
 0x84a   : > { %v15586_v23 = vadd.f32 %v20570_v43, %v20532_v45  ;;  %v20897_v27 = vpop.f32.mrb[64].mxu1  ;;  %v20038_v45 = vld [vmem:[%s26264_s6 + $0xb0] sm:$0xff] }
 0x84b   : > { %v15655_v32 = vpop.f32.mrb[65].mxu1  ;;  %v21056_v43 = vpack.c.bf16 %v20038_v45, %v20034_v34  ;;  %v20168_v34 = vld [vmem:[%s26264_s6 + $0x3a0] sm:$0xff] }
 0x84c   : > { %v24926_v13 = vadd.f32 %v20897_v27, %v15586_v23  ;;  %v24928_v26 = vadd.f32 %v15655_v32, %v15581_v14  ;;  %v20120_v14 = vld [vmem:[%s26264_s6 + $0x280] sm:$0xff]  ;;  %v20042_v23 = vld [vmem:[%s26264_s6 + $0xd0] sm:$0xff]  ;;  %v20061_v32 = vld [vmem:[%s26264_s6 + $0x138] sm:$0xff] }
 0x84d   : > { %v20046_v27 = vld [vmem:[%s26264_s6 + $0xf0] sm:$0x1]  ;;  %v21126_v55 = vpack.c.bf16 %v20124_v33, %v20120_v14  ;;  %v21074_v25 = vpack.c.bf16 %v20061_v32, %v20057_v5 }
 0x84e   : > { %20028 = vmatmul.mubr.msk.f32.vlgmr.msra.gmra.mrb[66].mxu1 %vm15681_vm8, %v24928_v26  ;;  %v16090_v24 = vrot.slane %v24928_v26, 2  ;;  %v16294_v61 = vrot.slane %v24928_v26, 3  ;;  %v15886_v29 = vrot.slane %v24928_v26, 1  ;;  %v21061_v12 = vpack.c.bf16 %v20046_v27, %v20042_v23  ;;  %v20090_v14 = vld [vmem:[%s26264_s6 + $0x1f0] sm:$0x1] }
 0x84f   : > { %21037 = vmatpush1.bf16.msra.mxu1 %v21036_v16  ;;  %15832 = vmatprep.mubr.f32.mxu1 %v26337_v41  ;;  %v16498_v16 = vrot.slane %v24928_v26, 4  ;;  %v16702_v19 = vrot.slane %v24928_v26, 5  ;;  %v16906_v6 = vrot.slane %v24928_v26, 6  ;;  %v20176_v23 = vld [vmem:[%s26264_s6 + $0x3e0] sm:$0x1]  ;;  %v20100_v32 = vld [vmem:[%s26264_s6 + $0x210] sm:$0xff] }
 0x850   : > { %20072 = vmatmul.mubr.msk.f32.vlgmr.msra.gmra.mrb[10].mxu0 %vm15681_vm8, %v16090_v24  ;;  %21040 = vmatprep.subr.msk.bf16.mxu1 %vm24854_vm14, %v21038_v21  ;;  %v20132_v21 = vld [vmem:[%s26264_s6 + $0x2e0] sm:$0x1] }
 0x851   : > { %21087 = vmatpush1.bf16.msra.mxu0 %v21086_v51  ;;  %16373 = vmatprep.mubr.f32.mxu0 %v26337_v41  ;;  %v20147_v51 = vld [vmem:[%s26264_s6 + $0x328] sm:$0xff]  ;;  %v21131_v52 = vpack.c.bf16 %v20132_v21, %v20128_v57  ;;  %v20109_v21 = vld [vmem:[%s26264_s6 + $0x258] sm:$0xff] }
 0x852   : > { %21090 = vmatprep.subr.msk.bf16.mxu0 %vm24854_vm14, %v21088_v58  ;;  %v20060_v58 = vld [vmem:[%s26264_s6 + $0x130] sm:$0xff]  ;;  %v21144_v18 = vpack.c.bf16 %v20147_v51, %v20143_v10  ;;  %v20186_v51 = vld [vmem:[%s26264_s6 + $0x400] sm:$0xff] }
 0x853   : > { %21043 = vmatpush1.bf16.msk.msra.mxu1 %vm24854_vm14, %v21041_v9  ;;  %v20069_v9 = vld [vmem:[%s26264_s6 + $0x178] sm:$0x1]  ;;  %v21076_v22 = vpack.c.bf16 %v20060_v58, %v20056_v56  ;;  %v20195_v58 = vld [vmem:[%s26264_s6 + $0x448] sm:$0xff] }
 0x854   : > { %21045 = vmatprep.subr.bf16.mxu1 %v21044_v42  ;;  %v20146_v42 = vld [vmem:[%s26264_s6 + $0x320] sm:$0xff]  ;;  %v21078_v35 = vpack.c.bf16 %v20069_v9, %v20065_v15  ;;  %v20108_v9 = vld [vmem:[%s26264_s6 + $0x250] sm:$0xff] }
 0x855   : > { %21093 = vmatpush1.bf16.msk.msra.mxu0 %vm24854_vm14, %v21091_v44  ;;  %v20155_v44 = vld [vmem:[%s26264_s6 + $0x368] sm:$0x1]  ;;  %v21146_v20 = vpack.c.bf16 %v20146_v42, %v20142_v7  ;;  %v20123_v42 = vld [vmem:[%s26264_s6 + $0x298] sm:$0xff] }
 0x856   : > { %20031 = vmatmul.mubr.msk.f32.vlgmr.msra.gmra.mrb[68].mxu1 %vm15681_vm8, %v24928_v26  ;;  %21105 = vmatprep.subr.bf16.mxu0 %v21104_v4  ;;  %v20068_v4 = vld [vmem:[%s26264_s6 + $0x170] sm:$0x1]  ;;  %v21148_v46 = vpack.c.bf16 %v20155_v44, %v20151_v60  ;;  %v17110_v60 = vrot.slane %v24928_v26, 7  ;;  %v20297_v26 = vld [vmem:[%s26264_s6 + $0x688] sm:$0xff] }
 0x857   : > { %21047 = vmatpush1.bf16.msra.mxu1 %v21046_v3  ;;  %15965 = vmatprep.mubr.f32.mxu1 %v26337_v41  ;;  %v20083_v3 = vld [vmem:[%s26264_s6 + $0x1b8] sm:$0xff]  ;;  %v21081_v37 = vpack.c.bf16 %v20068_v4, %v20064_v17  ;;  %v20198_v17 = vld [vmem:[%s26264_s6 + $0x460] sm:$0x1] }
 0x858   : > { %20094 = vmatmul.mubr.msk.f32.vlgmr.msra.gmra.mrb[12].mxu0 %vm15681_vm8, %v16294_v61  ;;  %21050 = vmatprep.subr.msk.bf16.mxu1 %vm24854_vm14, %v21048_v0  ;;  %v20150_v0 = vld [vmem:[%s26264_s6 + $0x340] sm:$0xff]  ;;  %v21094_v62 = vpack.c.bf16 %v20083_v3, %v20079_v1  ;;  %v20122_v3 = vld [vmem:[%s26264_s6 + $0x290] sm:$0xff] }
 0x859   : > { %21107 = vmatpush1.bf16.msra.mxu0 %v21106_v39  ;;  %16577 = vmatprep.mubr.f32.mxu0 %v26337_v41  ;;  %v20165_v39 = vld [vmem:[%s26264_s6 + $0x388] sm:$0xff]  ;;  %v21151_v40 = vpack.c.bf16 %v20154_v2, %v20150_v0  ;;  %v20131_v2 = vld [vmem:[%s26264_s6 + $0x2d8] sm:$0xff] }
 0x85a   : > { %21110 = vmatprep.subr.msk.bf16.mxu0 %vm24854_vm14, %v21108_v47  ;;  %v20078_v47 = vld [vmem:[%s26264_s6 + $0x190] sm:$0xff]  ;;  %v21164_v36 = vpack.c.bf16 %v20169_v28, %v20165_v39  ;;  %v20208_v28 = vld [vmem:[%s26264_s6 + $0x480] sm:$0xff] }
 0x85b   : > { %21053 = vmatpush1.bf16.msk.msra.mxu1 %vm24854_vm14, %v21051_v30  ;;  %v20087_v30 = vld [vmem:[%s26264_s6 + $0x1d8] sm:$0xff]  ;;  %v21096_v45 = vpack.c.bf16 %v20082_v11, %v20078_v47  ;;  %v20217_v11 = vld [vmem:[%s26264_s6 + $0x4c8] sm:$0xff] }
 0x85c   : > { %21055 = vmatprep.subr.bf16.mxu1 %v21054_v48  ;;  %v20164_v48 = vld [vmem:[%s26264_s6 + $0x380] sm:$0xff]  ;;  %v21098_v31 = vpack.c.bf16 %v20091_v63, %v20087_v30  ;;  %v20130_v63 = vld [vmem:[%s26264_s6 + $0x2d0] sm:$0xff] }
 0x85d   : > { %21113 = vmatpush1.bf16.msk.msra.mxu0 %vm24854_vm14, %v21111_v38  ;;  %v20173_v38 = vld [vmem:[%s26264_s6 + $0x3c8] sm:$0xff]  ;;  %v21166_v33 = vpack.c.bf16 %v20168_v34, %v20164_v48  ;;  %v20145_v34 = vld [vmem:[%s26264_s6 + $0x318] sm:$0xff] }
 0x85e   : > { %20050 = vmatmul.mubr.msk.f32.vlgmr.msra.gmra.mrb[70].mxu1 %vm15681_vm8, %v15886_v29  ;;  %21125 = vmatprep.subr.bf16.mxu0 %v21124_v50  ;;  %v20086_v50 = vld [vmem:[%s26264_s6 + $0x1d0] sm:$0xff] }
 0x85f   : > { %21057 = vmatpush1.bf16.msra.mxu1 %v21056_v43  ;;  %16036 = vmatprep.mubr.f32.mxu1 %v26337_v41  ;;  %v20101_v43 = vld [vmem:[%s26264_s6 + $0x218] sm:$0xff]  ;;  %v21101_v27 = vpack.c.bf16 %v20090_v14, %v20086_v50  ;;  %v20231_v14 = vld [vmem:[%s26264_s6 + $0x508] sm:$0xff] }
 0x860   : > { %20116 = vmatmul.mubr.msk.f32.vlgmr.msra.gmra.mrb[14].mxu0 %vm15681_vm8, %v16498_v16  ;;  %21060 = vmatprep.subr.msk.bf16.mxu1 %vm24854_vm14, %v21058_v59  ;;  %v20172_v59 = vld [vmem:[%s26264_s6 + $0x3c0] sm:$0xff]  ;;  %v21114_v5 = vpack.c.bf16 %v20105_v53, %v20101_v43  ;;  %v20144_v43 = vld [vmem:[%s26264_s6 + $0x310] sm:$0xff] }
 0x861   : > { %21127 = vmatpush1.bf16.msra.mxu0 %v21126_v55  ;;  %16781 = vmatprep.mubr.f32.mxu0 %v26337_v41  ;;  %v20191_v55 = vld [vmem:[%s26264_s6 + $0x428] sm:$0xff]  ;;  %v21171_v57 = vpack.c.bf16 %v20176_v23, %v20172_v59  ;;  %v20148_v53 = vld [vmem:[%s26264_s6 + $0x330] sm:$0xff]  ;;  %v20153_v59 = vld [vmem:[%s26264_s6 + $0x358] sm:$0xff] }
 0x862   : > { %21130 = vmatprep.subr.msk.bf16.mxu0 %vm24854_vm14, %v21128_v49  ;;  %v20104_v49 = vld [vmem:[%s26264_s6 + $0x230] sm:$0xff]  ;;  %v20157_v23 = vld [vmem:[%s26264_s6 + $0x378] sm:$0x1] }
 0x863   : > { %21063 = vmatpush1.bf16.msk.msra.mxu1 %vm24854_vm14, %v21061_v12  ;;  %v20113_v12 = vld [vmem:[%s26264_s6 + $0x278] sm:$0x1]  ;;  %v21116_v56 = vpack.c.bf16 %v20104_v49, %v20100_v32  ;;  %v20239_v32 = vld [vmem:[%s26264_s6 + $0x548] sm:$0xff] }
 0x864   : > { %21075 = vmatprep.subr.bf16.mxu1 %v21074_v25  ;;  %v20190_v25 = vld [vmem:[%s26264_s6 + $0x420] sm:$0xff]  ;;  %v21118_v15 = vpack.c.bf16 %v20113_v12, %v20109_v21  ;;  %v20243_v49 = vld [vmem:[%s26264_s6 + $0x568] sm:$0x1]  ;;  %v20152_v21 = vld [vmem:[%s26264_s6 + $0x350] sm:$0xff] }
 0x865   : > { %21133 = vmatpush1.bf16.msk.msra.mxu0 %vm24854_vm14, %v21131_v52  ;;  %v20199_v52 = vld [vmem:[%s26264_s6 + $0x468] sm:$0x1]  ;;  %v21186_v7 = vpack.c.bf16 %v20190_v25, %v20186_v51  ;;  %v20156_v12 = vld [vmem:[%s26264_s6 + $0x370] sm:$0x1]  ;;  %v20167_v51 = vld [vmem:[%s26264_s6 + $0x398] sm:$0xff] }
 0x866   : > { %20053 = vmatmul.mubr.msk.f32.vlgmr.msra.gmra.mrb[72].mxu1 %vm15681_vm8, %v15886_v29  ;;  %21145 = vmatprep.subr.bf16.mxu0 %v21144_v18  ;;  %v21168_v29 = vpack.c.bf16 %v20177_v8, %v20173_v38  ;;  %v20112_v18 = vld [vmem:[%s26264_s6 + $0x270] sm:$0x1]  ;;  %v21188_v44 = vpack.c.bf16 %v20199_v52, %v20195_v58  ;;  %v20216_v8 = vld [vmem:[%s26264_s6 + $0x4c0] sm:$0xff]  ;;  %v20171_v25 = vld [vmem:[%s26264_s6 + $0x3b8] sm:$0xff]  ;;  %v21228_v58 = vpack.c.bf16 %v20243_v49, %v20239_v32 }
 0x867   : > { %21077 = vmatpush1.bf16.msra.mxu1 %v21076_v22  ;;  %16240 = vmatprep.mubr.f32.mxu1 %v26337_v41  ;;  %v20127_v22 = vld [vmem:[%s26264_s6 + $0x2b8] sm:$0xff]  ;;  %v21121_v4 = vpack.c.bf16 %v20112_v18, %v20108_v9  ;;  %v20238_v52 = vld [vmem:[%s26264_s6 + $0x540] sm:$0xff]  ;;  %v21161_v9 = vpack.c.bf16 %v20156_v12, %v20152_v21  ;;  %v20257_v18 = vld [vmem:[%s26264_s6 + $0x5a8] sm:$0xff] }
 0x868   : > { %20138 = vmatmul.mubr.msk.f32.vlgmr.msra.gmra.mrb[16].mxu0 %vm15681_vm8, %v16702_v19  ;;  %21080 = vmatprep.subr.msk.bf16.mxu1 %vm24854_vm14, %v21078_v35  ;;  %v20194_v35 = vld [vmem:[%s26264_s6 + $0x440] sm:$0xff]  ;;  %v21134_v1 = vpack.c.bf16 %v20127_v22, %v20123_v42  ;;  %v20166_v42 = vld [vmem:[%s26264_s6 + $0x390] sm:$0xff] }
 0x869   : > { %21147 = vmatpush1.bf16.msra.mxu0 %v21146_v20  ;;  %16985 = vmatprep.mubr.f32.mxu0 %v26337_v41  ;;  %v20213_v20 = vld [vmem:[%s26264_s6 + $0x4a8] sm:$0xff]  ;;  %v21191_v0 = vpack.c.bf16 %v20198_v17, %v20194_v35  ;;  %v20170_v22 = vld [vmem:[%s26264_s6 + $0x3b0] sm:$0xff]  ;;  %v20175_v35 = vld [vmem:[%s26264_s6 + $0x3d8] sm:$0xff] }
 0x86a   : > { %21150 = vmatprep.subr.msk.bf16.mxu0 %vm24854_vm14, %v21148_v46  ;;  %v20126_v46 = vld [vmem:[%s26264_s6 + $0x2b0] sm:$0xff]  ;;  %v20179_v17 = vld [vmem:[%s26264_s6 + $0x3f8] sm:$0x1]  ;;  %v20282_v49 = vld [vmem:[%s26264_s6 + $0x640] sm:$0xff] }
 0x86b   : > { %21083 = vmatpush1.bf16.msk.msra.mxu1 %vm24854_vm14, %v21081_v37  ;;  %v20135_v37 = vld [vmem:[%s26264_s6 + $0x2f8] sm:$0x1]  ;;  %v21136_v47 = vpack.c.bf16 %v20126_v46, %v20122_v3  ;;  %v20261_v3 = vld [vmem:[%s26264_s6 + $0x5c8] sm:$0xff] }
 0x86c   : > { %21095 = vmatprep.subr.bf16.mxu1 %v21094_v62  ;;  %v20212_v62 = vld [vmem:[%s26264_s6 + $0x4a0] sm:$0xff]  ;;  %v21138_v30 = vpack.c.bf16 %v20135_v37, %v20131_v2  ;;  %v20265_v46 = vld [vmem:[%s26264_s6 + $0x5e8] sm:$0x1]  ;;  %v20174_v2 = vld [vmem:[%s26264_s6 + $0x3d0] sm:$0xff] }
 0x86d   : > { %21153 = vmatpush1.bf16.msk.msra.mxu0 %vm24854_vm14, %v21151_v40  ;;  %v20221_v40 = vld [vmem:[%s26264_s6 + $0x4e8] sm:$0x1]  ;;  %v21206_v48 = vpack.c.bf16 %v20212_v62, %v20208_v28  ;;  %v20178_v37 = vld [vmem:[%s26264_s6 + $0x3f0] sm:$0x1]  ;;  %v20189_v28 = vld [vmem:[%s26264_s6 + $0x418] sm:$0xff] }
 0x86e   : > { %20075 = vmatmul.mubr.msk.f32.vlgmr.msra.gmra.mrb[74].mxu1 %vm15681_vm8, %v16090_v24  ;;  %21165 = vmatprep.subr.bf16.mxu0 %v21164_v36  ;;  %v20187_v24 = vld [vmem:[%s26264_s6 + $0x408] sm:$0xff]  ;;  %v20134_v36 = vld [vmem:[%s26264_s6 + $0x2f0] sm:$0x1]  ;;  %v21208_v38 = vpack.c.bf16 %v20221_v40, %v20217_v11  ;;  %v20193_v62 = vld [vmem:[%s26264_s6 + $0x438] sm:$0xff]  ;;  %v21248_v11 = vpack.c.bf16 %v20265_v46, %v20261_v3 }
 0x86f   : > { %21097 = vmatpush1.bf16.msra.mxu1 %v21096_v45  ;;  %16444 = vmatprep.mubr.f32.mxu1 %v26337_v41  ;;  %v21184_v10 = vpack.c.bf16 %v20191_v55, %v20187_v24  ;;  %v20149_v45 = vld [vmem:[%s26264_s6 + $0x338] sm:$0xff]  ;;  %v21141_v50 = vpack.c.bf16 %v20134_v36, %v20130_v63  ;;  %v20230_v24 = vld [vmem:[%s26264_s6 + $0x500] sm:$0xff]  ;;  %v21181_v63 = vpack.c.bf16 %v20178_v37, %v20174_v2  ;;  %v20279_v36 = vld [vmem:[%s26264_s6 + $0x628] sm:$0xff] }
 0x870   : > { %20160 = vmatmul.mubr.msk.f32.vlgmr.msra.gmra.mrb[18].mxu0 %vm15681_vm8, %v16906_v6  ;;  %21100 = vmatprep.subr.msk.bf16.mxu1 %vm24854_vm14, %v21098_v31  ;;  %v20220_v31 = vld [vmem:[%s26264_s6 + $0x4e0] sm:$0x1]  ;;  %v20319_v2 = vld [vmem:[%s26264_s6 + $0x708] sm:$0xff] }
 0x871   : > { %21167 = vmatpush1.bf16.msra.mxu0 %v21166_v33  ;;  %17189 = vmatprep.mubr.f32.mxu0 %v26337_v41  ;;  %v21154_v33 = vpack.c.bf16 %v20149_v45, %v20145_v34  ;;  %v20234_v55 = vld [vmem:[%s26264_s6 + $0x520] sm:$0xff]  ;;  %v20188_v34 = vld [vmem:[%s26264_s6 + $0x410] sm:$0xff]  ;;  %v20323_v37 = vld [vmem:[%s26264_s6 + $0x728] sm:$0xff] }
 0x872   : > { %21170 = vmatprep.subr.msk.bf16.mxu0 %vm24854_vm14, %v21168_v29  ;;  %v21211_v29 = vpack.c.bf16 %v20220_v31, %v20216_v8  ;;  %v20260_v40 = vld [vmem:[%s26264_s6 + $0x5c0] sm:$0xff]  ;;  %v20192_v45 = vld [vmem:[%s26264_s6 + $0x430] sm:$0xff]  ;;  %v20197_v8 = vld [vmem:[%s26264_s6 + $0x458] sm:$0xff] }
 0x873   : > { %21103 = vmatpush1.bf16.msk.msra.mxu1 %vm24854_vm14, %v21101_v27  ;;  %v20201_v31 = vld [vmem:[%s26264_s6 + $0x478] sm:$0x1]  ;;  %v20304_v3 = vld [vmem:[%s26264_s6 + $0x6c0] sm:$0xff] }
 0x874   : > { %21115 = vmatprep.subr.bf16.mxu1 %v21114_v5  ;;  %v21156_v5 = vpack.c.bf16 %v20148_v53, %v20144_v43  ;;  %v20283_v43 = vld [vmem:[%s26264_s6 + $0x648] sm:$0xff]  ;;  %v20308_v46 = vld [vmem:[%s26264_s6 + $0x6e0] sm:$0x1] }
 0x875   : > { %21173 = vmatpush1.bf16.msk.msra.mxu0 %vm24854_vm14, %v21171_v57  ;;  %v21158_v57 = vpack.c.bf16 %v20157_v23, %v20153_v59  ;;  %v20287_v53 = vld [vmem:[%s26264_s6 + $0x668] sm:$0x1]  ;;  %v20196_v59 = vld [vmem:[%s26264_s6 + $0x450] sm:$0xff] }
 0x876   : > { %20097 = vmatmul.mubr.msk.f32.vlgmr.msra.gmra.mrb[76].mxu1 %vm15681_vm8, %v16294_v61  ;;  %21185 = vmatprep.subr.bf16.mxu0 %v21184_v10  ;;  %v20209_v61 = vld [vmem:[%s26264_s6 + $0x488] sm:$0xff]  ;;  %v21226_v10 = vpack.c.bf16 %v20234_v55, %v20230_v24  ;;  %v20200_v23 = vld [vmem:[%s26264_s6 + $0x470] sm:$0x1]  ;;  %v20211_v24 = vld [vmem:[%s26264_s6 + $0x498] sm:$0xff]  ;;  %v21268_v32 = vpack.c.bf16 %v20287_v53, %v20283_v43 }
 0x877   : > { %21117 = vmatpush1.bf16.msra.mxu1 %v21116_v56  ;;  %16648 = vmatprep.mubr.f32.mxu1 %v26337_v41  ;;  %v21204_v39 = vpack.c.bf16 %v20213_v20, %v20209_v61  ;;  %v17518_v56 = vrot.slane %v24926_v13, 1  ;;  %v20252_v61 = vld [vmem:[%s26264_s6 + $0x580] sm:$0xff]  ;;  %v20215_v55 = vld [vmem:[%s26264_s6 + $0x4b8] sm:$0xff]  ;;  %v21201_v21 = vpack.c.bf16 %v20200_v23, %v20196_v59  ;;  %v20345_v23 = vld [vmem:[%s26264_s6 + $0x7a8] sm:$0xff] }
 0x878   : > { %20182 = vmatmul.mubr.msk.f32.vlgmr.msra.gmra.mrb[20].mxu0 %vm15681_vm8, %v17110_v60  ;;  %21120 = vmatprep.subr.msk.bf16.mxu1 %vm24854_vm14, %v21118_v15  ;;  %v20242_v15 = vld [vmem:[%s26264_s6 + $0x560] sm:$0x1]  ;;  %v21214_v12 = vpack.c.bf16 %v20215_v55, %v20211_v24  ;;  %v20254_v24 = vld [vmem:[%s26264_s6 + $0x590] sm:$0xff] }
 0x879   : > { %21187 = vmatpush1.bf16.msra.mxu0 %v21186_v7  ;;  %17393 = vmatprep.mubr.f32.mxu0 %v26337_v41  ;;  %v21174_v7 = vpack.c.bf16 %v20171_v25, %v20167_v51  ;;  %v20256_v20 = vld [vmem:[%s26264_s6 + $0x5a0] sm:$0xff]  ;;  %v20214_v51 = vld [vmem:[%s26264_s6 + $0x4b0] sm:$0xff] }
 0x87a   : > { %21190 = vmatprep.subr.msk.bf16.mxu0 %vm24854_vm14, %v21188_v44  ;;  %v21231_v44 = vpack.c.bf16 %v20242_v15, %v20238_v52  ;;  %v20223_v52 = vld [vmem:[%s26264_s6 + $0x4f8] sm:$0x1]  ;;  %v20326_v53 = vld [vmem:[%s26264_s6 + $0x740] sm:$0xff]  ;;  %v20258_v55 = vld [vmem:[%s26264_s6 + $0x5b0] sm:$0xff] }
 0x87b   : > { %21123 = vmatpush1.bf16.msk.msra.mxu1 %vm24854_vm14, %v21121_v4 }
 0x87c   : > { %21135 = vmatprep.subr.bf16.mxu1 %v21134_v1  ;;  %v21176_v1 = vpack.c.bf16 %v20170_v22, %v20166_v42  ;;  %v20309_v42 = vld [vmem:[%s26264_s6 + $0x6e8] sm:$0x1] }
 0x87d   : > { %21193 = vmatpush1.bf16.msk.msra.mxu0 %vm24854_vm14, %v21191_v0  ;;  %v21178_v0 = vpack.c.bf16 %v20179_v17, %v20175_v35  ;;  %v20222_v35 = vld [vmem:[%s26264_s6 + $0x4f0] sm:$0x1] }
 0x87e   : > { %20119 = vmatmul.mubr.msk.f32.vlgmr.msra.gmra.mrb[78].mxu1 %vm15681_vm8, %v16498_v16  ;;  %21205 = vmatprep.subr.bf16.mxu0 %v21204_v39  ;;  %v20235_v16 = vld [vmem:[%s26264_s6 + $0x528] sm:$0xff]  ;;  %v21246_v39 = vpack.c.bf16 %v20256_v20, %v20252_v61  ;;  %v20237_v61 = vld [vmem:[%s26264_s6 + $0x538] sm:$0xff]  ;;  %v18130_v20 = vrot.slane %v24926_v13, 4 }
 0x87f   : > { %21137 = vmatpush1.bf16.msra.mxu1 %v21136_v47  ;;  %16852 = vmatprep.mubr.f32.mxu1 %v26337_v41  ;;  %v21224_v27 = vpack.c.bf16 %v20235_v16, %v20231_v14  ;;  %v17722_v47 = vrot.slane %v24926_v13, 2  ;;  %v20274_v14 = vld [vmem:[%s26264_s6 + $0x600] sm:$0xff] }
 0x880   : > { %20204 = vmatmul.mubr.msk.f32.vlgmr.msra.gmra.mrb[22].mxu0 %vm15681_vm8, %v24926_v13  ;;  %21140 = vmatprep.subr.msk.bf16.mxu1 %vm24854_vm14, %v21138_v30  ;;  %v20264_v30 = vld [vmem:[%s26264_s6 + $0x5e0] sm:$0x1] }
 0x881   : > { %21207 = vmatpush1.bf16.msra.mxu0 %v21206_v48  ;;  %17597 = vmatprep.mubr.f32.mxu0 %v26337_v41  ;;  %v21194_v48 = vpack.c.bf16 %v20193_v62, %v20189_v28  ;;  %v20278_v16 = vld [vmem:[%s26264_s6 + $0x620] sm:$0xff]  ;;  %v20232_v28 = vld [vmem:[%s26264_s6 + $0x510] sm:$0xff] }
 0x882   : > { %21210 = vmatprep.subr.msk.bf16.mxu0 %vm24854_vm14, %v21208_v38  ;;  %v21251_v38 = vpack.c.bf16 %v20264_v30, %v20260_v40  ;;  %v20236_v62 = vld [vmem:[%s26264_s6 + $0x530] sm:$0xff]  ;;  %v20241_v40 = vld [vmem:[%s26264_s6 + $0x558] sm:$0xff] }
 0x883   : > { %21143 = vmatpush1.bf16.msk.msra.mxu1 %vm24854_vm14, %v21141_v50  ;;  %v20245_v30 = vld [vmem:[%s26264_s6 + $0x578] sm:$0x1] }
 0x884   : > { %21155 = vmatprep.subr.bf16.mxu1 %v21154_v33  ;;  %v21196_v33 = vpack.c.bf16 %v20192_v45, %v20188_v34  ;;  %v20327_v34 = vld [vmem:[%s26264_s6 + $0x748] sm:$0xff] }
 0x885   : > { %21213 = vmatpush1.bf16.msk.msra.mxu0 %vm24854_vm14, %v21211_v29  ;;  %v21198_v29 = vpack.c.bf16 %v20201_v31, %v20197_v8  ;;  %v20331_v45 = vld [vmem:[%s26264_s6 + $0x768] sm:$0x1]  ;;  %v20240_v8 = vld [vmem:[%s26264_s6 + $0x550] sm:$0xff] }
 0x886   : > { %20141 = vmatmul.mubr.msk.f32.vlgmr.msra.gmra.mrb[80].mxu1 %vm15681_vm8, %v16702_v19  ;;  %21225 = vmatprep.subr.bf16.mxu0 %v21224_v27  ;;  %v20253_v19 = vld [vmem:[%s26264_s6 + $0x588] sm:$0xff]  ;;  %v21266_v27 = vpack.c.bf16 %v20278_v16, %v20274_v14  ;;  %v20244_v31 = vld [vmem:[%s26264_s6 + $0x570] sm:$0x1]  ;;  %v20255_v14 = vld [vmem:[%s26264_s6 + $0x598] sm:$0xff]  ;;  %v21308_v43 = vpack.c.bf16 %v20331_v45, %v20327_v34 }
 0x887   : > { %21157 = vmatpush1.bf16.msra.mxu1 %v21156_v5  ;;  %17056 = vmatprep.mubr.f32.mxu1 %v26337_v41  ;;  %v21244_v4 = vpack.c.bf16 %v20257_v18, %v20253_v19  ;;  %v17926_v5 = vrot.slane %v24926_v13, 3  ;;  %v20300_v19 = vld [vmem:[%s26264_s6 + $0x6a0] sm:$0xff]  ;;  %v20259_v16 = vld [vmem:[%s26264_s6 + $0x5b8] sm:$0xff]  ;;  %v21241_v59 = vpack.c.bf16 %v20244_v31, %v20240_v8  ;;  %v20310_v34 = vld [vmem:[%s26264_s6 + $0x6f0] sm:$0x1] }
 0x888   : > { %20226 = vmatmul.mubr.msk.f32.vlgmr.msra.gmra.mrb[24].mxu0 %vm15681_vm8, %v17518_v56  ;;  %21160 = vmatprep.subr.msk.bf16.mxu1 %vm24854_vm14, %v21158_v57  ;;  %v20286_v57 = vld [vmem:[%s26264_s6 + $0x660] sm:$0x1]  ;;  %v20321_v45 = vld [vmem:[%s26264_s6 + $0x718] sm:$0xff] }
 0x889   : > { %21227 = vmatpush1.bf16.msra.mxu0 %v21226_v10  ;;  %17801 = vmatprep.mubr.f32.mxu0 %v26337_v41  ;;  %v20210_v10 = vld [vmem:[%s26264_s6 + $0x490] sm:$0xff]  ;;  %v21271_v25 = vpack.c.bf16 %v20286_v57, %v20282_v49  ;;  %v20263_v49 = vld [vmem:[%s26264_s6 + $0x5d8] sm:$0xff] }
 0x88a   : > { %21230 = vmatprep.subr.msk.bf16.mxu0 %vm24854_vm14, %v21228_v58  ;;  %v20219_v58 = vld [vmem:[%s26264_s6 + $0x4d8] sm:$0xff]  ;;  %v21216_v18 = vpack.c.bf16 %v20214_v51, %v20210_v10  ;;  %v20349_v10 = vld [vmem:[%s26264_s6 + $0x7c8] sm:$0xff] }
 0x88b   : > { %21163 = vmatpush1.bf16.msk.msra.mxu1 %vm24854_vm14, %v21161_v9  ;;  %v20296_v9 = vld [vmem:[%s26264_s6 + $0x680] sm:$0xff]  ;;  %v21218_v22 = vpack.c.bf16 %v20223_v52, %v20219_v58  ;;  %v20267_v57 = vld [vmem:[%s26264_s6 + $0x5f8] sm:$0x1]  ;;  %v20353_v51 = vld [vmem:[%s26264_s6 + $0x7e8] sm:$0x1] }
 0x88c   : > { %21175 = vmatprep.subr.bf16.mxu1 %v21174_v7  ;;  %v20305_v7 = vld [vmem:[%s26264_s6 + $0x6c8] sm:$0xff]  ;;  %v21286_v17 = vpack.c.bf16 %v20300_v19, %v20296_v9  ;;  %v20262_v58 = vld [vmem:[%s26264_s6 + $0x5d0] sm:$0xff]  ;;  %v20277_v9 = vld [vmem:[%s26264_s6 + $0x618] sm:$0xff] }
 0x88d   : > { %21233 = vmatpush1.bf16.msk.msra.mxu0 %vm24854_vm14, %v21231_v44  ;;  %v20218_v44 = vld [vmem:[%s26264_s6 + $0x4d0] sm:$0xff]  ;;  %v20281_v19 = vld [vmem:[%s26264_s6 + $0x638] sm:$0xff] }
 0x88e   : > { %20163 = vmatmul.mubr.msk.f32.vlgmr.msra.gmra.mrb[82].mxu1 %vm15681_vm8, %v16906_v6  ;;  %21245 = vmatprep.subr.bf16.mxu0 %v21244_v4  ;;  %v20275_v6 = vld [vmem:[%s26264_s6 + $0x608] sm:$0xff]  ;;  %v20233_v4 = vld [vmem:[%s26264_s6 + $0x518] sm:$0xff]  ;;  %v20266_v52 = vld [vmem:[%s26264_s6 + $0x5f0] sm:$0x1] }
 0x88f   : > { %21177 = vmatpush1.bf16.msra.mxu1 %v21176_v1  ;;  %17260 = vmatprep.mubr.f32.mxu1 %v26337_v41  ;;  %v21264_v50 = vpack.c.bf16 %v20279_v36, %v20275_v6  ;;  %v21288_v1 = vpack.c.bf16 %v20309_v42, %v20305_v7  ;;  %v20318_v6 = vld [vmem:[%s26264_s6 + $0x700] sm:$0xff]  ;;  %v21328_v7 = vpack.c.bf16 %v20353_v51, %v20349_v10 }
 0x890   : > { %20248 = vmatmul.mubr.msk.f32.vlgmr.msra.gmra.mrb[26].mxu0 %vm15681_vm8, %v17722_v47  ;;  %21180 = vmatprep.subr.msk.bf16.mxu1 %vm24854_vm14, %v21178_v0  ;;  %v21221_v0 = vpack.c.bf16 %v20222_v35, %v20218_v44  ;;  %v20322_v36 = vld [vmem:[%s26264_s6 + $0x720] sm:$0xff]  ;;  %v21261_v44 = vpack.c.bf16 %v20266_v52, %v20262_v58  ;;  %v20276_v35 = vld [vmem:[%s26264_s6 + $0x610] sm:$0xff]  ;;  %v18947_v58 = vld [vmem:[%s26266_s8 + $0x88] sm:$0xff] }
 0x891   : > { %21247 = vmatpush1.bf16.msra.mxu0 %v21246_v39  ;;  %18005 = vmatprep.mubr.f32.mxu0 %v26337_v41  ;;  %v21234_v39 = vpack.c.bf16 %v20237_v61, %v20233_v4  ;;  %v20348_v42 = vld [vmem:[%s26264_s6 + $0x7c0] sm:$0xff]  ;;  %v20285_v61 = vld [vmem:[%s26264_s6 + $0x658] sm:$0xff]  ;;  %v21344_v52 = vpack.c.bf16 %v18947_v58, %v18946_v54 }
 0x892   : > { %21250 = vmatprep.subr.msk.bf16.mxu0 %vm24854_vm14, %v21248_v11  ;;  %v21291_v11 = vpack.c.bf16 %v20308_v46, %v20304_v3  ;;  %v18962_v10 = vld [vmem:[%s26266_s8 + $0x100] sm:$0xff] }
 0x893   : > { %21183 = vmatpush1.bf16.msk.msra.mxu1 %vm24854_vm14, %v21181_v63  ;;  %v21304_v63 = vpack.c.bf16 %v20323_v37, %v20319_v2  ;;  %v20288_v2 = vld [vmem:[%s26264_s6 + $0x670] sm:$0x1]  ;;  %v20299_v37 = vld [vmem:[%s26264_s6 + $0x698] sm:$0xff] }
 0x894   : > { %21195 = vmatprep.subr.bf16.mxu1 %v21194_v48  ;;  %v21236_v48 = vpack.c.bf16 %v20236_v62, %v20232_v28  ;;  %v18742_v28 = vrot.slane %v24926_v13, 7 }
 0x895   : > { %21253 = vmatpush1.bf16.msk.msra.mxu0 %vm24854_vm14, %v21251_v38  ;;  %v21238_v38 = vpack.c.bf16 %v20245_v30, %v20241_v40  ;;  %v20298_v40 = vld [vmem:[%s26264_s6 + $0x690] sm:$0xff]  ;;  %v20307_v30 = vld [vmem:[%s26264_s6 + $0x6d8] sm:$0xff] }
 0x896   : > { %20185 = vmatmul.mubr.msk.f32.vlgmr.msra.gmra.mrb[84].mxu1 %vm15681_vm8, %v17110_v60  ;;  %21265 = vmatprep.subr.bf16.mxu0 %v21264_v50  ;;  %v20301_v60 = vld [vmem:[%s26264_s6 + $0x6a8] sm:$0xff]  ;;  %v21306_v50 = vpack.c.bf16 %v20322_v36, %v20318_v6 }
 0x897   : > { %21197 = vmatpush1.bf16.msra.mxu1 %v21196_v33  ;;  %17464 = vmatprep.mubr.f32.mxu1 %v26337_v41  ;;  %v21284_v15 = vpack.c.bf16 %v20301_v60, %v20297_v26  ;;  %v18334_v33 = vrot.slane %v24926_v13, 5  ;;  %v20340_v26 = vld [vmem:[%s26264_s6 + $0x780] sm:$0xff] }
 0x898   : > { %20270 = vmatmul.mubr.msk.f32.vlgmr.msra.gmra.mrb[28].mxu0 %vm15681_vm8, %v17926_v5  ;;  %21200 = vmatprep.subr.msk.bf16.mxu1 %vm24854_vm14, %v21198_v29  ;;  %v20330_v29 = vld [vmem:[%s26264_s6 + $0x760] sm:$0x1] }
 0x899   : > { %21267 = vmatpush1.bf16.msra.mxu0 %v21266_v27  ;;  %18209 = vmatprep.mubr.f32.mxu0 %v26337_v41  ;;  %v21254_v27 = vpack.c.bf16 %v20259_v16, %v20255_v14  ;;  %v20344_v60 = vld [vmem:[%s26264_s6 + $0x7a0] sm:$0xff]  ;;  %v20324_v14 = vld [vmem:[%s26264_s6 + $0x730] sm:$0xff]  ;;  %v20333_v16 = vld [vmem:[%s26264_s6 + $0x778] sm:$0x1] }
 0x89a   : > { %21270 = vmatprep.subr.msk.bf16.mxu0 %vm24854_vm14, %v21268_v32  ;;  %v21311_v32 = vpack.c.bf16 %v20330_v29, %v20326_v53  ;;  %v20328_v29 = vld [vmem:[%s26264_s6 + $0x750] sm:$0xff] }
 0x89b   : > { %21203 = vmatpush1.bf16.msk.msra.mxu1 %vm24854_vm14, %v21201_v21 }
 0x89c   : > { %21215 = vmatprep.subr.bf16.mxu1 %v21214_v12  ;;  %v21256_v12 = vpack.c.bf16 %v20258_v55, %v20254_v24  ;;  %v20342_v55 = vld [vmem:[%s26264_s6 + $0x790] sm:$0xff] }
 0x89d   : > { %21273 = vmatpush1.bf16.msk.msra.mxu0 %vm24854_vm14, %v21271_v25  ;;  %v21258_v25 = vpack.c.bf16 %v20267_v57, %v20263_v49  ;;  %v20355_v49 = vld [vmem:[%s26264_s6 + $0x7f8] sm:$0x1] }
 0x89e   : > { %20207 = vmatmul.mubr.msk.f32.vlgmr.msra.gmra.mrb[86].mxu1 %vm15681_vm8, %v24926_v13  ;;  %21285 = vmatprep.subr.bf16.mxu0 %v21284_v15  ;;  %v21326_v15 = vpack.c.bf16 %v20344_v60, %v20340_v26  ;;  %v20350_v26 = vld [vmem:[%s26264_s6 + $0x7d0] sm:$0xff] }
 0x89f   : > { %21217 = vmatpush1.bf16.msra.mxu1 %v21216_v18  ;;  %17668 = vmatprep.mubr.f32.mxu1 %v26337_v41  ;;  %v18538_v18 = vrot.slane %v24926_v13, 6  ;;  %v20354_v60 = vld [vmem:[%s26264_s6 + $0x7f0] sm:$0x1]  ;;  %v18963_v13 = vld [vmem:[%s26266_s8 + $0x108] sm:$0xff] }
 0x8a0   : > { %20292 = vmatmul.mubr.msk.f32.vlgmr.msra.gmra.mrb[30].mxu0 %vm15681_vm8, %v18130_v20  ;;  %21220 = vmatprep.subr.msk.bf16.mxu1 %vm24854_vm14, %v21218_v22  ;;  %v20352_v22 = vld [vmem:[%s26264_s6 + $0x7e0] sm:$0x1]  ;;  %v21377_v51 = vpack.c.bf16 %v18963_v13, %v18962_v10  ;;  %v18973_v10 = vld [vmem:[%s26266_s8 + $0x158] sm:$0xff] }
 0x8a1   : > { %21287 = vmatpush1.bf16.msra.mxu0 %v21286_v17  ;;  %18413 = vmatprep.mubr.f32.mxu0 %v26337_v41  ;;  %v20280_v17 = vld [vmem:[%s26264_s6 + $0x630] sm:$0xff]  ;;  %v21331_v4 = vpack.c.bf16 %v20352_v22, %v20348_v42 }
 0x8a2   : > { %21290 = vmatprep.subr.msk.bf16.mxu0 %vm24854_vm14, %v21288_v1  ;;  %v20289_v1 = vld [vmem:[%s26264_s6 + $0x678] sm:$0x1]  ;;  %v21276_v3 = vpack.c.bf16 %v20280_v17, %v20276_v35  ;;  %v18948_v22 = vld [vmem:[%s26266_s8 + $0x90] sm:$0xff] }
 0x8a3   : > { %21223 = vmatpush1.bf16.msk.msra.mxu1 %vm24854_vm14, %v21221_v0  ;;  %v21278_v46 = vpack.c.bf16 %v20289_v1, %v20285_v61  ;;  %v20284_v0 = vld [vmem:[%s26264_s6 + $0x650] sm:$0xff]  ;;  %v18933_v17 = vld [vmem:[%s26266_s8 + $0x18] sm:$0xff]  ;;  %v18967_v1 = vld [vmem:[%s26266_s8 + $0x128] sm:$0xff] }
 0x8a4   : > { %21235 = vmatprep.subr.bf16.mxu1 %v21234_v39  ;;  %v20303_v39 = vld [vmem:[%s26264_s6 + $0x6b8] sm:$0xff]  ;;  %v21281_v62 = vpack.c.bf16 %v20288_v2, %v20284_v0  ;;  %v18932_v35 = vld [vmem:[%s26266_s8 + $0x10] sm:$0xff]  ;;  %v22028_v0 = vmov 1966171168  }
 0x8a5   : > { %21293 = vmatpush1.bf16.msk.msra.mxu0 %vm24854_vm14, %v21291_v11  ;;  %v21294_v11 = vpack.c.bf16 %v20303_v39, %v20299_v37  ;;  %v21350_v61 = vpack.c.bf16 %v18933_v17, %v18932_v35  ;;  %v15846_v2 = vunpack.c.l.s4 %v22028_v0  ;;  %v15848_v37 = vlaneseq  ;;  %v18950_v39 = vld [vmem:[%s26266_s8 + $0xa0] sm:$0xff]  ;;  %v18943_v0 = vld [vmem:[%s26266_s8 + $0x68] sm:$0xff] }
 0x8a6   : > { %20229 = vmatmul.mubr.msk.f32.vlgmr.msra.gmra.mrb[88].mxu1 %vm15681_vm8, %v17518_v56  ;;  %21305 = vmatprep.subr.bf16.mxu0 %v21304_v63  ;;  %v20341_v56 = vld [vmem:[%s26264_s6 + $0x788] sm:$0xff]  ;;  %v20311_v63 = vld [vmem:[%s26264_s6 + $0x6f8] sm:$0x1] }
 0x8a7   : > { %21237 = vmatpush1.bf16.msra.mxu1 %v21236_v48  ;;  %17872 = vmatprep.mubr.f32.mxu1 %v26337_v41  ;;  %v21324_v21 = vpack.c.bf16 %v20345_v23, %v20341_v56  ;;  %v21298_v36 = vpack.c.bf16 %v20311_v63, %v20307_v30  ;;  %v20306_v48 = vld [vmem:[%s26264_s6 + $0x6d0] sm:$0xff]  ;;  %v20343_v56 = vld [vmem:[%s26264_s6 + $0x798] sm:$0xff] }
 0x8a8   : > { %20314 = vmatmul.mubr.msk.f32.vlgmr.msra.gmra.mrb[32].mxu0 %vm15681_vm8, %v18334_v33  ;;  %21240 = vmatprep.subr.msk.bf16.mxu1 %vm24854_vm14, %v21238_v38  ;;  %v20325_v38 = vld [vmem:[%s26264_s6 + $0x738] sm:$0xff]  ;;  %v21301_v8 = vpack.c.bf16 %v20310_v34, %v20306_v48  ;;  %v18968_v30 = vld [vmem:[%s26266_s8 + $0x130] sm:$0xff] }
 0x8a9   : > { %21307 = vmatpush1.bf16.msra.mxu0 %v21306_v50  ;;  %18617 = vmatprep.mubr.f32.mxu0 %v26337_v41  ;;  %v21314_v31 = vpack.c.bf16 %v20325_v38, %v20321_v45  ;;  %v20320_v50 = vld [vmem:[%s26264_s6 + $0x710] sm:$0xff]  ;;  %v20347_v23 = vld [vmem:[%s26264_s6 + $0x7b8] sm:$0xff]  ;;  %v15847_v38 = vunpack.c.0.s8 %v15846_v2 }
 0x8aa   : > { %21310 = vmatprep.subr.msk.bf16.mxu0 %vm24854_vm14, %v21308_v43  ;;  %v21316_v43 = vpack.c.bf16 %v20324_v14, %v20320_v50  ;;  %v21334_v24 = vpack.c.bf16 %v20347_v23, %v20343_v56  ;;  %v18969_v48 = vld [vmem:[%s26266_s8 + $0x138] sm:$0xff]  ;;  %v18952_v50 = vld [vmem:[%s26266_s8 + $0xb0] sm:$0xff] }
 0x8ab   : > { %21243 = vmatpush1.bf16.msk.msra.mxu1 %vm24854_vm14, %v21241_v59  ;;  %v20332_v59 = vld [vmem:[%s26264_s6 + $0x770] sm:$0x1]  ;;  %v21386_v45 = vpack.c.bf16 %v18969_v48, %v18968_v30  ;;  %v18953_v14 = vld [vmem:[%s26266_s8 + $0xb8] sm:$0xff] }
 0x8ac   : > { %21255 = vmatprep.subr.bf16.mxu1 %v21254_v27  ;;  %v21321_v27 = vpack.c.bf16 %v20332_v59, %v20328_v29  ;;  %v18971_v59 = vld [vmem:[%s26266_s8 + $0x148] sm:$0xff]  ;;  %v18976_v2 = vld [vmem:[%s26266_s8 + $0x170] sm:$0xff] }
 0x8ad   : > { %21313 = vmatpush1.bf16.msk.msra.mxu0 %vm24854_vm14, %v21311_v32  ;;  %v20346_v32 = vld [vmem:[%s26264_s6 + $0x7b0] sm:$0xff] }
 0x8ae   : > { %20251 = vmatmul.mubr.msk.f32.vlgmr.msra.gmra.mrb[90].mxu1 %vm15681_vm8, %v17722_v47  ;;  %21325 = vmatprep.subr.bf16.mxu0 %v21324_v21  ;;  %v21274_v47 = vpack.c.bf16 %v20281_v19, %v20277_v9  ;;  %v21336_v57 = vpack.c.bf16 %v20346_v32, %v20342_v55  ;;  %v18931_v9 = vld [vmem:[%s26266_s8 + $0x8] sm:$0xff]  ;;  %v18964_v19 = vld [vmem:[%s26266_s8 + $0x110] sm:$0xff] }
 0x8af   : > { %21257 = vmatpush1.bf16.msra.mxu1 %v21256_v12  ;;  %18076 = vmatprep.mubr.f32.mxu1 %v26337_v41  ;;  %v21341_v12 = vpack.c.bf16 %v20354_v60, %v20350_v26  ;;  %v18955_v55 = vld [vmem:[%s26266_s8 + $0xc8] sm:$0xff]  ;;  %v18960_v30 = vld [vmem:[%s26266_s8 + $0xf0] sm:$0xff] }
 0x8b0   : > { %20336 = vmatmul.mubr.msk.f32.vlgmr.msra.gmra.mrb[34].mxu0 %vm15681_vm8, %v18538_v18  ;;  %21260 = vmatprep.subr.msk.bf16.mxu1 %vm24854_vm14, %v21258_v25  ;;  %v22027_v25 = vmov 0.0|0.0  }
 0x8b1   : > { %21327 = vmatpush1.bf16.msra.mxu0 %v21326_v15  ;;  %18821 = vmatprep.mubr.f32.mxu0 %v26337_v41  ;;  %v18930_v15 = vld [vmem:[%s26266_s8] sm:$0xff] }
 0x8b2   : > { %21330 = vmatprep.subr.msk.bf16.mxu0 %vm24854_vm14, %v21328_v7  ;;  %v18965_v7 = vld [vmem:[%s26266_s8 + $0x118] sm:$0xff] }
 0x8b3   : > { %21263 = vmatpush1.bf16.msk.msra.mxu1 %vm24854_vm14, %v21261_v44  ;;  %v21380_v42 = vpack.c.bf16 %v18965_v7, %v18964_v19  ;;  %v18949_v44 = vld [vmem:[%s26266_s8 + $0x98] sm:$0xff] }
 0x8b4   : > { %21275 = vmatprep.subr.bf16.mxu1 %v21274_v47  ;;  %v21348_v47 = vpack.c.bf16 %v18949_v44, %v18948_v22  ;;  %v18941_v7 = vld [vmem:[%s26266_s8 + $0x58] sm:$0xff] }
 0x8b5   : > { %21333 = vmatpush1.bf16.msk.msra.mxu0 %vm24854_vm14, %v21331_v4  ;;  %v18966_v4 = vld [vmem:[%s26266_s8 + $0x120] sm:$0xff] }
 0x8b6   : > { %20273 = vmatmul.mubr.msk.f32.vlgmr.msra.gmra.mrb[92].mxu1 %vm15681_vm8, %v17926_v5  ;;  %v20302_v5 = vld [vmem:[%s26264_s6 + $0x6b0] sm:$0xff]  ;;  %21345 = vmatprep.subr.bf16.mxu0 %v21344_v52 }
 0x8b7   : > { %21277 = vmatpush1.bf16.msra.mxu1 %v21276_v3  ;;  %18280 = vmatprep.mubr.f32.mxu1 %v26337_v41  ;;  %v21296_v6 = vpack.c.bf16 %v20302_v5, %v20298_v40  ;;  %v21383_v3 = vpack.c.bf16 %v18967_v1, %v18966_v4  ;;  %v18934_v40 = vld [vmem:[%s26266_s8 + $0x20] sm:$0xff]  ;;  %v18935_v5 = vld [vmem:[%s26266_s8 + $0x28] sm:$0xff] }
 0x8b8   : > { %20358 = vmatmul.mubr.msk.f32.vlgmr.msra.gmra.mrb[36].mxu0 %vm15681_vm8, %v18742_v28  ;;  %21280 = vmatprep.subr.msk.bf16.mxu1 %vm24854_vm14, %v21278_v46  ;;  %v18958_v4 = vld [vmem:[%s26266_s8 + $0xe0] sm:$0xff] }
 0x8bb   : > { %21283 = vmatpush1.bf16.msk.msra.mxu1 %vm24854_vm14, %v21281_v62 }
 0x8bc   : > { %21295 = vmatprep.subr.bf16.mxu1 %v21294_v11 }
 0x8be   : > { %20295 = vmatmul.mubr.msk.f32.vlgmr.msra.gmra.mrb[94].mxu1 %vm15681_vm8, %v18130_v20  ;;  %v20329_v20 = vld [vmem:[%s26264_s6 + $0x758] sm:$0xff] }
 0x8bf   : > { %21297 = vmatpush1.bf16.msra.mxu1 %v21296_v6  ;;  %18484 = vmatprep.mubr.f32.mxu1 %v26337_v41  ;;  %v21318_v53 = vpack.c.bf16 %v20333_v16, %v20329_v20  ;;  %v21356_v20 = vpack.c.bf16 %v18953_v14, %v18952_v50  ;;  %v18936_v16 = vld [vmem:[%s26266_s8 + $0x30] sm:$0xff]  ;;  %v18979_v50 = vld [vmem:[%s26266_s8 + $0x188] sm:$0xff] }
 0x8c0   : > { %21300 = vmatprep.subr.msk.bf16.mxu1 %vm24854_vm14, %v21298_v36  ;;  %v21354_v36 = vpack.c.bf16 %v18935_v5, %v18934_v40 }
 0x8c3   : > { %21303 = vmatpush1.bf16.msk.msra.mxu1 %vm24854_vm14, %v21301_v8  ;;  %v25930_v8 = vshrl.u32 %v15848_v37, 7 }
 0x8c4   : > { %21315 = vmatprep.subr.bf16.mxu1 %v21314_v31 }
 0x8c5   : > { %v25954_v23 = vsub.s32 %v15847_v38, %v25930_v8  ;;  %v18978_v38 = vld [vmem:[%s26266_s8 + $0x180] sm:$0xff] }
 0x8c6   : > { %20317 = vmatmul.mubr.msk.f32.vlgmr.msra.gmra.mrb[96].mxu1 %vm15681_vm8, %v18334_v33  ;;  %v20351_v33 = vld [vmem:[%s26264_s6 + $0x7d8] sm:$0xff] }
 0x8c7   : > { %21317 = vmatpush1.bf16.msra.mxu1 %v21316_v43  ;;  %18688 = vmatprep.mubr.f32.mxu1 %v26337_v41  ;;  %v21338_v21 = vpack.c.bf16 %v20355_v49, %v20351_v33  ;;  %v18937_v43 = vld [vmem:[%s26266_s8 + $0x38] sm:$0xff]  ;;  %v18938_v49 = vld [vmem:[%s26266_s8 + $0x40] sm:$0xff] }
 0x8c8   : > { %21320 = vmatprep.subr.msk.bf16.mxu1 %vm24854_vm14, %v21318_v53  ;;  %v18970_v53 = vld [vmem:[%s26266_s8 + $0x140] sm:$0xff]  ;;  %v21358_v29 = vpack.c.bf16 %v18937_v43, %v18936_v16 }
 0x8c9   : > { %v21389_v56 = vpack.c.bf16 %v18971_v59, %v18970_v53 }
 0x8cb   : > { %21323 = vmatpush1.bf16.msk.msra.mxu1 %vm24854_vm14, %v21321_v27 }
 0x8cc   : > { %21335 = vmatprep.subr.bf16.mxu1 %v21334_v24  ;;  %v18954_v24 = vld [vmem:[%s26266_s8 + $0xc0] sm:$0xff] }
 0x8cd   : > { %v21360_v33 = vpack.c.bf16 %v18955_v55, %v18954_v24 }
 0x8ce   : > { %20339 = vmatmul.mubr.msk.f32.vlgmr.msra.gmra.mrb[98].mxu1 %vm15681_vm8, %v18538_v18  ;;  %v21346_v18 = vpack.c.bf16 %v18931_v9, %v18930_v15  ;;  %v18956_v15 = vld [vmem:[%s26266_s8 + $0xd0] sm:$0xff]  ;;  %v18957_v9 = vld [vmem:[%s26266_s8 + $0xd8] sm:$0xff] }
 0x8cf   : > { %21337 = vmatpush1.bf16.msra.mxu1 %v21336_v57  ;;  %18892 = vmatprep.mubr.f32.mxu1 %v26337_v41  ;;  %v18939_v57 = vld [vmem:[%s26266_s8 + $0x48] sm:$0xff]  ;;  %v21364_v19 = vpack.c.bf16 %v18957_v9, %v18956_v15 }
 0x8d0   : > { %21340 = vmatprep.subr.msk.bf16.mxu1 %vm24854_vm14, %v21338_v21  ;;  %21347 = vmatpush3.bf16.msra.mxu0 %v21346_v18  ;;  %v18972_v21 = vld [vmem:[%s26266_s8 + $0x150] sm:$0xff] }
 0x8d1   : > { %21349 = vmatprep.subr.bf16.mxu0 %v21348_v47  ;;  %v18940_v18 = vld [vmem:[%s26266_s8 + $0x50] sm:$0xff]  ;;  %v18975_v47 = vld [vmem:[%s26266_s8 + $0x168] sm:$0xff] }
 0x8d2   : > { %v21366_v44 = vpack.c.bf16 %v18941_v7, %v18940_v18 }
 0x8d3   : > { %21343 = vmatpush1.bf16.msk.msra.mxu1 %vm24854_vm14, %v21341_v12  ;;  %v21362_v12 = vpack.c.bf16 %v18939_v57, %v18938_v49 }
 0x8d4   : > { %21376 = vmatprep.subr.bf16.mxu1 %v22027_v25  ;;  %21351 = vmatpush3.bf16.msra.mxu0 %v21350_v61  ;;  %v18959_v61 = vld [vmem:[%s26266_s8 + $0xe8] sm:$0xff] }
 0x8d6   : > { %20361 = vmatmul.mubr.msk.f32.vlgmr.msra.gmra.mrb[100].mxu1 %vm15681_vm8, %v18742_v28  ;;  %v18951_v28 = vld [vmem:[%s26266_s8 + $0xa8] sm:$0xff] }
 0x8d7   : > { %21378 = vmatpush1.bf16.msra.mxu1 %v21377_v51  ;;  %v21352_v11 = vpack.c.bf16 %v18951_v28, %v18950_v39  ;;  %v21392_v51 = vpack.c.bf16 %v18973_v10, %v18972_v21 }
 0x8d8   : > { %21379 = vmatprep.subr.bf16.mxu1 %v22027_v25 }
 0x8d9   : > { %21353 = vmatprep.subr.bf16.mxu0 %v21352_v11 }
 0x8da   : > { %21355 = vmatpush3.bf16.msra.mxu0 %v21354_v36  ;;  %v18944_v36 = vld [vmem:[%s26266_s8 + $0x70] sm:$0xff] }
 0x8db   : > { %21381 = vmatpush1.bf16.msra.mxu1 %v21380_v42  ;;  %21357 = vmatprep.subr.bf16.mxu0 %v21356_v20  ;;  %v18974_v42 = vld [vmem:[%s26266_s8 + $0x160] sm:$0xff]  ;;  %v21401_v20 = vpack.c.bf16 %v18979_v50, %v18978_v38 }
 0x8dc   : > { %21382 = vmatprep.subr.bf16.mxu1 %v22027_v25  ;;  %v21395_v35 = vpack.c.bf16 %v18975_v47, %v18974_v42 }
 0x8de   : > { %21359 = vmatpush3.bf16.msra.mxu0 %v21358_v29 }
 0x8df   : > { %21384 = vmatpush1.bf16.msra.mxu1 %v21383_v3  ;;  %21361 = vmatprep.subr.bf16.mxu0 %v21360_v33  ;;  %v21368_v3 = vpack.c.bf16 %v18959_v61, %v18958_v4 }
 0x8e0   : > { %21385 = vmatprep.subr.bf16.mxu1 %v22027_v25 }
 0x8e2   : > { %21363 = vmatpush3.bf16.msra.mxu0 %v21362_v12 }
 0x8e3   : > { %21387 = vmatpush1.bf16.msra.mxu1 %v21386_v45  ;;  %21365 = vmatprep.subr.bf16.mxu0 %v21364_v19  ;;  %v18945_v45 = vld [vmem:[%s26266_s8 + $0x78] sm:$0xff] }
 0x8e4   : > { %21388 = vmatprep.subr.bf16.mxu1 %v22027_v25  ;;  %v21374_v14 = vpack.c.bf16 %v18945_v45, %v18944_v36 }
 0x8e6   : > { %21367 = vmatpush3.bf16.msra.mxu0 %v21366_v44 }
 0x8e7   : > { %21390 = vmatpush1.bf16.msra.mxu1 %v21389_v56  ;;  %21369 = vmatprep.subr.bf16.mxu0 %v21368_v3 }
 0x8e8   : > { %21391 = vmatprep.subr.bf16.mxu1 %v22027_v25 }
 0x8eb   : > { %21393 = vmatpush1.bf16.msra.mxu1 %v21392_v51 }
 0x8ec   : > { %21394 = vmatprep.subr.bf16.mxu1 %v22027_v25 }
 0x8ef   : > { %21396 = vmatpush1.bf16.msra.mxu1 %v21395_v35 }
 0x8f0   : > { %21397 = vmatprep.subr.bf16.mxu1 %v22027_v25 }
 0x921   : > { %v15763_v46 = vpop.f32.mrb[66].mxu1 }
 0x922   : > { %v15765_v62 = vpop.f32.mrb[67].mxu1 }
 0x923   : > { %v15843_v63 = vcombine.low %v15763_v46, %v15765_v62  ;;  %v25922_v6 = vpop.f32.mrb[10].mxu0  ;;  %v18942_v46 = vld [vmem:[%s26266_s8 + $0x60] sm:$0xff]  ;;  %v18977_v62 = vld [vmem:[%s26266_s8 + $0x178] sm:$0xff] }
 0x924   : > { %v25928_v34 = vpop.f32.mrb[11].mxu0  ;;  %v21370_v28 = vpack.c.bf16 %v18943_v0, %v18942_v46  ;;  %v21398_v40 = vpack.c.bf16 %v18977_v62, %v18976_v2 }
 0x925   : > { %v16251_v31 = vcombine.low %v25922_v6, %v25928_v34  ;;  %v15851_v54 = vrot.slane %v15843_v63, %v25954_v23  ;;  %v18961_v63 = vld [vmem:[%s26266_s8 + $0xf8] sm:$0xff] }
 0x926   : > { %21371 = vmatpush3.bf16.msra.mxu0 %v21370_v28  ;;  %21399 = vmatpush1.bf16.msra.mxu1 %v21398_v40  ;;  %v21372_v48 = vpack.c.bf16 %v18961_v63, %v18960_v30 }
 0x927   : > { %21400 = vmatprep.subr.bf16.mxu1 %v22027_v25 }
 0x928   : > { %21373 = vmatprep.subr.bf16.mxu0 %v21372_v48 }
 0x929   : > { %v15834_v27 = vpop.f32.mrb[68].mxu1 }
 0x92a   : > { %v15836_v32 = vpop.f32.mrb[69].mxu1  ;;  %21375 = vmatpush3.bf16.msra.mxu0 %v21374_v14  ;;  %21402 = vmatpush1.bf16.msra.mxu1 %v21401_v20 }
 0x92b   : > { %v15844_v26 = vcombine.low %v15834_v27, %v15836_v32  ;;  %v25971_v60 = vpop.f32.mrb[12].mxu0  ;;  %21403 = vmatprep.subr.bf16.mxu0 %v22027_v25  ;;  %21424 = vmatprep.subr.bf16.mxu1 %v22027_v25  ;;  %v15664_v32 = vld [vmem:[%s26265_s7] sm:$0xf] }
 0x92c   : > { %v25977_v13 = vpop.f32.mrb[13].mxu0 }
 0x92d   : > { %v15858_v58 = vrot.slane %v15844_v26, %v25954_v23  ;;  %v16455_v52 = vcombine.low %v25971_v60, %v25977_v13 }
 0x92f   : > { %v15859_v22 = vcombine.low %v15851_v54, %v15858_v58  ;;  %v16259_v58 = vrot.slane %v16251_v31, %v25954_v23 }
 0x931   : > { %v15967_v17 = vpop.f32.mrb[70].mxu1  ;;  %v15866_v56 = vrot.slane %v15859_v22, %v25954_v23 }
 0x932   : > { %v15969_v1 = vpop.f32.mrb[71].mxu1 }
 0x933   : > { %v16047_v37 = vcombine.low %v15967_v17, %v15969_v1  ;;  %v26017_v39 = vpop.f32.mrb[14].mxu0  ;;  %v15868_v49 = vadd.f32 %v15866_v56, %v15664_v32  ;;  %v16463_v17 = vrot.slane %v16455_v52, %v25954_v23 }
 0x934   : > { %v26023_v11 = vpop.f32.mrb[15].mxu0 }
 0x935   : > { %v16659_v5 = vcombine.low %v26017_v39, %v26023_v11  ;;  %v16055_v27 = vrot.slane %v16047_v37, %v25954_v23 }
 0x937   : > { %v16667_v37 = vrot.slane %v16659_v5, %v25954_v23 }
 0x939   : > { %v16038_v16 = vpop.f32.mrb[72].mxu1 }
 0x93a   : > { %v16040_v43 = vpop.f32.mrb[73].mxu1 }
 0x93b   : > { %v16048_v53 = vcombine.low %v16038_v16, %v16040_v43  ;;  %v16783_v29 = vpop.f32.mrb[16].mxu0 }
 0x93c   : > { %v16785_v59 = vpop.f32.mrb[17].mxu0 }
 0x93d   : > { %v16062_v24 = vrot.slane %v16048_v53, %v25954_v23  ;;  %v16863_v55 = vcombine.low %v16783_v29, %v16785_v59 }
 0x93f   : > { %v16063_v33 = vcombine.low %v16055_v27, %v16062_v24  ;;  %v16871_v36 = vrot.slane %v16863_v55, %v25954_v23 }
 0x941   : > { %v16070_v57 = vrot.slane %v16063_v33, %v25954_v23  ;;  %v16242_v21 = vpop.f32.mrb[74].mxu1 }
 0x942   : > { %v16244_v26 = vpop.f32.mrb[75].mxu1 }
 0x943   : > { %v16072_v12 = vadd.f32 %v16070_v57, %v15868_v49  ;;  %v16252_v10 = vcombine.low %v16242_v21, %v16244_v26  ;;  %v16987_v51 = vpop.f32.mrb[18].mxu0 }
 0x944   : > { %v16989_v54 = vpop.f32.mrb[19].mxu0 }
 0x945   : > { %v16266_v15 = vrot.slane %v16252_v10, %v25954_v23  ;;  %v17067_v9 = vcombine.low %v16987_v51, %v16989_v54 }
 0x947   : > { %v16267_v19 = vcombine.low %v16259_v58, %v16266_v15  ;;  %v17075_v29 = vrot.slane %v17067_v9, %v25954_v23 }
 0x949   : > { %v16274_v18 = vrot.slane %v16267_v19, %v25954_v23  ;;  %v16446_v7 = vpop.f32.mrb[76].mxu1 }
 0x94a   : > { %v16448_v42 = vpop.f32.mrb[77].mxu1 }
 0x94b   : > { %v16276_v22 = vadd.f32 %v16274_v18, %v16072_v12  ;;  %v16456_v44 = vcombine.low %v16446_v7, %v16448_v42  ;;  %v17191_v47 = vpop.f32.mrb[20].mxu0 }
 0x94c   : > { %v17193_v35 = vpop.f32.mrb[21].mxu0 }
 0x94d   : > { %v16470_v6 = vrot.slane %v16456_v44, %v25954_v23  ;;  %v17271_v34 = vcombine.low %v17191_v47, %v17193_v35 }
 0x94f   : > { %v16471_v31 = vcombine.low %v16463_v17, %v16470_v6  ;;  %v17279_v26 = vrot.slane %v17271_v34, %v25954_v23 }
 0x951   : > { %v16478_v4 = vrot.slane %v16471_v31, %v25954_v23  ;;  %v16650_v61 = vpop.f32.mrb[78].mxu1 }
 0x952   : > { %v16652_v1 = vpop.f32.mrb[79].mxu1 }
 0x953   : > { %v16480_v3 = vadd.f32 %v16478_v4, %v16276_v22  ;;  %v16660_v46 = vcombine.low %v16650_v61, %v16652_v1  ;;  %v17395_v0 = vpop.f32.mrb[22].mxu0 }
 0x954   : > { %v17397_v2 = vpop.f32.mrb[23].mxu0 }
 0x955   : > { %v16674_v39 = vrot.slane %v16660_v46, %v25954_v23  ;;  %v17475_v28 = vcombine.low %v17395_v0, %v17397_v2 }
 0x957   : > { %v16675_v62 = vcombine.low %v16667_v37, %v16674_v39  ;;  %v17483_v42 = vrot.slane %v17475_v28, %v25954_v23 }
 0x959   : > { %v16682_v60 = vrot.slane %v16675_v62, %v25954_v23  ;;  %v16854_v13 = vpop.f32.mrb[80].mxu1 }
 0x95a   : > { %v16856_v52 = vpop.f32.mrb[81].mxu1 }
 0x95b   : > { %v16684_v11 = vadd.f32 %v16682_v60, %v16480_v3  ;;  %v16864_v40 = vcombine.low %v16854_v13, %v16856_v52  ;;  %v17599_v30 = vpop.f32.mrb[24].mxu0 }
 0x95c   : > { %v17601_v63 = vpop.f32.mrb[25].mxu0 }
 0x95d   : > { %v16878_v48 = vrot.slane %v16864_v40, %v25954_v23  ;;  %v17679_v45 = vcombine.low %v17599_v30, %v17601_v63 }
 0x95f   : > { %v16879_v38 = vcombine.low %v16871_v36, %v16878_v48  ;;  %v17687_v1 = vrot.slane %v17679_v45, %v25954_v23 }
 0x961   : > { %v16886_v5 = vrot.slane %v16879_v38, %v25954_v23  ;;  %v17058_v50 = vpop.f32.mrb[82].mxu1 }
 0x962   : > { %v17060_v14 = vpop.f32.mrb[83].mxu1 }
 0x963   : > { %v16888_v20 = vadd.f32 %v16886_v5, %v16684_v11  ;;  %v17068_v16 = vcombine.low %v17058_v50, %v17060_v14  ;;  %v17803_v43 = vpop.f32.mrb[26].mxu0 }
 0x964   : > { %v17805_v53 = vpop.f32.mrb[27].mxu0 }
 0x965   : > { %v17082_v59 = vrot.slane %v17068_v16, %v25954_v23  ;;  %v17883_v56 = vcombine.low %v17803_v43, %v17805_v53 }
 0x967   : > { %v17083_v27 = vcombine.low %v17075_v29, %v17082_v59  ;;  %v17891_v52 = vrot.slane %v17883_v56, %v25954_v23 }
 0x969   : > { %v17090_v24 = vrot.slane %v17083_v27, %v25954_v23  ;;  %v17262_v55 = vpop.f32.mrb[84].mxu1 }
 0x96a   : > { %v17264_v32 = vpop.f32.mrb[85].mxu1 }
 0x96b   : > { %v17092_v33 = vadd.f32 %v17090_v24, %v16888_v20  ;;  %v17272_v49 = vcombine.low %v17262_v55, %v17264_v32  ;;  %v18007_v57 = vpop.f32.mrb[28].mxu0 }
 0x96c   : > { %v18009_v21 = vpop.f32.mrb[29].mxu0 }
 0x96d   : > { %v17286_v12 = vrot.slane %v17272_v49, %v25954_v23  ;;  %v18087_v10 = vcombine.low %v18007_v57, %v18009_v21 }
 0x96f   : > { %v17287_v51 = vcombine.low %v17279_v26, %v17286_v12  ;;  %v18095_v14 = vrot.slane %v18087_v10, %v25954_v23 }
 0x971   : > { %v17294_v54 = vrot.slane %v17287_v51, %v25954_v23  ;;  %v17466_v58 = vpop.f32.mrb[86].mxu1 }
 0x972   : > { %v17468_v15 = vpop.f32.mrb[87].mxu1 }
 0x973   : > { %v17296_v9 = vadd.f32 %v17294_v54, %v17092_v33  ;;  %v17476_v19 = vcombine.low %v17466_v58, %v17468_v15  ;;  %v18211_v18 = vpop.f32.mrb[30].mxu0 }
 0x974   : > { %v18213_v7 = vpop.f32.mrb[31].mxu0 }
 0x975   : > { %v17490_v22 = vrot.slane %v17476_v19, %v25954_v23  ;;  %v18291_v44 = vcombine.low %v18211_v18, %v18213_v7 }
 0x977   : > { %v17491_v47 = vcombine.low %v17483_v42, %v17490_v22  ;;  %v18299_v24 = vrot.slane %v18291_v44, %v25954_v23 }
 0x979   : > { %v17498_v35 = vrot.slane %v17491_v47, %v25954_v23  ;;  %v17670_v17 = vpop.f32.mrb[88].mxu1 }
 0x97a   : > { %v17672_v6 = vpop.f32.mrb[89].mxu1 }
 0x97b   : > { %v17500_v34 = vadd.f32 %v17498_v35, %v17296_v9  ;;  %v17680_v31 = vcombine.low %v17670_v17, %v17672_v6  ;;  %v18415_v4 = vpop.f32.mrb[32].mxu0 }
 0x97c   : > { %v18417_v61 = vpop.f32.mrb[33].mxu0 }
 0x97d   : > { %v17694_v3 = vrot.slane %v17680_v31, %v25954_v23  ;;  %v18495_v46 = vcombine.low %v18415_v4, %v18417_v61  ;;  %v18988_v61 = vsub.s32 1, %v25930_v8 }
 0x97f   : > { %v17695_v0 = vcombine.low %v17687_v1, %v17694_v3  ;;  %v18503_v12 = vrot.slane %v18495_v46, %v25954_v23  ;;  %v18996_v3 = vsub.s32 3, %v25930_v8  ;;  %v18984_v46 = vsub.s32 0, %v25930_v8 }
 0x981   : > { %v17702_v2 = vrot.slane %v17695_v0, %v25954_v23  ;;  %v17874_v37 = vpop.f32.mrb[90].mxu1  ;;  %v18992_v0 = vsub.s32 2, %v25930_v8  ;;  %v19148_v8 = vld [vmem:[%s26268_s10 + $0x18] sm:$0xff] }
 0x982   : > { %v17876_v39 = vpop.f32.mrb[91].mxu1 }
 0x983   : > { %v17704_v28 = vadd.f32 %v17702_v2, %v17500_v34  ;;  %v17884_v62 = vcombine.low %v17874_v37, %v17876_v39  ;;  %v18619_v60 = vpop.f32.mrb[34].mxu0  ;;  %v19145_v2 = vld [vmem:[%s26268_s10] sm:$0xff]  ;;  %v19146_v37 = vld [vmem:[%s26268_s10 + $0x8] sm:$0xff] }
 0x984   : > { %v18621_v13 = vpop.f32.mrb[35].mxu0 }
 0x985   : > { %v17898_v11 = vrot.slane %v17884_v62, %v25954_v23  ;;  %v18699_v40 = vcombine.low %v18619_v60, %v18621_v13 }
 0x987   : > { %v17899_v30 = vcombine.low %v17891_v52, %v17898_v11  ;;  %v18707_v18 = vrot.slane %v18699_v40, %v25954_v23  ;;  %v19147_v52 = vld [vmem:[%s26268_s10 + $0x10] sm:$0xff]  ;;  %v19149_v40 = vld [vmem:[%s26268_s10 + $0x20] sm:$0xff] }
 0x988   : > { %v21407_v11 = vpack.c.bf16 %v19148_v8, %v19147_v52 }
 0x989   : > { %v17906_v63 = vrot.slane %v17899_v30, %v25954_v23  ;;  %v18078_v36 = vpop.f32.mrb[92].mxu1  ;;  %v19150_v30 = vld [vmem:[%s26268_s10 + $0x28] sm:$0xff] }
 0x98a   : > { %v18080_v48 = vpop.f32.mrb[93].mxu1 }
 0x98b   : > { %v17908_v45 = vadd.f32 %v17906_v63, %v17704_v28  ;;  %v18088_v38 = vcombine.low %v18078_v36, %v18080_v48  ;;  %v18823_v5 = vpop.f32.mrb[36].mxu0  ;;  %v21410_v63 = vpack.c.bf16 %v19150_v30, %v19149_v40  ;;  %v19151_v36 = vld [vmem:[%s26268_s10 + $0x30] sm:$0xff]  ;;  %v19152_v48 = vld [vmem:[%s26268_s10 + $0x38] sm:$0xff] }
 0x98c   : > { %v18825_v50 = vpop.f32.mrb[37].mxu0 }
 0x98d   : > { %v18102_v20 = vrot.slane %v18088_v38, %v25954_v23  ;;  %v18903_v16 = vcombine.low %v18823_v5, %v18825_v50  ;;  %v19153_v38 = vld [vmem:[%s26268_s10 + $0x40] sm:$0xff]  ;;  %v19154_v5 = vld [vmem:[%s26268_s10 + $0x48] sm:$0xff] }
 0x98e   : > { %v21416_v50 = vpack.c.bf16 %v19154_v5, %v19153_v38 }
 0x98f   : > { %v18103_v43 = vcombine.low %v18095_v14, %v18102_v20  ;;  %v18911_v6 = vrot.slane %v18903_v16, %v25954_v23  ;;  %v19155_v14 = vld [vmem:[%s26268_s10 + $0x50] sm:$0xff]  ;;  %v19156_v20 = vld [vmem:[%s26268_s10 + $0x58] sm:$0xff] }
 0x990   : > { %v21419_v16 = vpack.c.bf16 %v19156_v20, %v19155_v14 }
 0x991   : > { %v18110_v53 = vrot.slane %v18103_v43, %v25954_v23  ;;  %v18282_v29 = vpop.f32.mrb[94].mxu1  ;;  %v19157_v43 = vld [vmem:[%s26268_s10 + $0x60] sm:$0xff] }
 0x992   : > { %v18284_v59 = vpop.f32.mrb[95].mxu1 }
 0x993   : > { %v18112_v56 = vadd.f32 %v18110_v53, %v17908_v45  ;;  %v18292_v27 = vcombine.low %v18282_v29, %v18284_v59  ;;  %v21413_v45 = vpack.c.bf16 %v19152_v48, %v19151_v36  ;;  %v19158_v53 = vld [vmem:[%s26268_s10 + $0x68] sm:$0xff]  ;;  %v19159_v59 = vld [vmem:[%s26268_s10 + $0x70] sm:$0xff] }
 0x994   : > { %v21422_v29 = vpack.c.bf16 %v19158_v53, %v19157_v43 }
 0x995   : > { %v18306_v55 = vrot.slane %v18292_v27, %v25954_v23  ;;  %v19236_v27 = vld [vmem:[%s26270_s12 + $0x8] sm:$0xff] }
 0x997   : > { %v18307_v32 = vcombine.low %v18299_v24, %v18306_v55  ;;  %v19237_v24 = vld [vmem:[%s26270_s12 + $0x10] sm:$0xff] }
 0x999   : > { %v18314_v33 = vrot.slane %v18307_v32, %v25954_v23  ;;  %v18486_v49 = vpop.f32.mrb[96].mxu1  ;;  %v19238_v32 = vld [vmem:[%s26270_s12 + $0x18] sm:$0xff] }
 0x99a   : > { %v18488_v57 = vpop.f32.mrb[97].mxu1 }
 0x99b   : > { %v18316_v21 = vadd.f32 %v18314_v33, %v18112_v56  ;;  %v18496_v26 = vcombine.low %v18486_v49, %v18488_v57  ;;  %v19235_v56 = vld [vmem:[%s26270_s12] sm:$0xff]  ;;  %v21428_v33 = vpack.c.bf16 %v19238_v32, %v19237_v24  ;;  %v19240_v57 = vld [vmem:[%s26270_s12 + $0x28] sm:$0xff] }
 0x99c   : > { %v21425_v55 = vpack.c.bf16 %v19236_v27, %v19235_v56  ;;  %v19239_v49 = vld [vmem:[%s26270_s12 + $0x20] sm:$0xff] }
 0x99d   : > { %v18510_v10 = vrot.slane %v18496_v26, %v25954_v23  ;;  %v19241_v26 = vld [vmem:[%s26270_s12 + $0x30] sm:$0xff] }
 0x99f   : > { %v18511_v51 = vcombine.low %v18503_v12, %v18510_v10  ;;  %v19242_v12 = vld [vmem:[%s26270_s12 + $0x38] sm:$0xff] }
 0x9a0   : > { %v21434_v10 = vpack.c.bf16 %v19242_v12, %v19241_v26 }
 0x9a1   : > { %v18518_v54 = vrot.slane %v18511_v51, %v25954_v23  ;;  %v18690_v58 = vpop.f32.mrb[98].mxu1 }
 0x9a2   : > { %v18692_v15 = vpop.f32.mrb[99].mxu1 }
 0x9a3   : > { %v18520_v9 = vadd.f32 %v18518_v54, %v18316_v21  ;;  %v18700_v19 = vcombine.low %v18690_v58, %v18692_v15  ;;  %v21431_v21 = vpack.c.bf16 %v19240_v57, %v19239_v49  ;;  %v18980_v58 = vld [vmem:[%s26267_s9] sm:$0x1] }
 0x9a5   : > { %v18714_v7 = vrot.slane %v18700_v19, %v25954_v23 }
 0x9a7   : > { %v18715_v42 = vcombine.low %v18707_v18, %v18714_v7 }
 0x9a9   : > { %v18722_v22 = vrot.slane %v18715_v42, %v25954_v23  ;;  %v18894_v44 = vpop.f32.mrb[100].mxu1 }
 0x9aa   : > { %v18896_v47 = vpop.f32.mrb[101].mxu1 }
 0x9ab   : > { %v18724_v35 = vadd.f32 %v18722_v22, %v18520_v9  ;;  %v18904_v17 = vcombine.low %v18894_v44, %v18896_v47  ;;  %v19243_v22 = vld [vmem:[%s26270_s12 + $0x40] sm:$0xff]  ;;  %v19245_v47 = vld [vmem:[%s26270_s12 + $0x50] sm:$0xf] }
 0x9ad   : > { %v18918_v34 = vrot.slane %v18904_v17, %v25954_v23 }
 0x9af   : > { %v18919_v31 = vcombine.low %v18911_v6, %v18918_v34 }
 0x9b1   : > { %v18926_v4 = vrot.slane %v18919_v31, %v25954_v23  ;;  %v21404_v23 = vpack.c.bf16 %v19146_v37, %v19145_v2 }
 0x9b3   : > { %v18928_v1 = vadd.f32 %v18926_v4, %v18724_v35  ;;  %v19160_v35 = vld [vmem:[%s26269_s11] sm:$0x1] }
 0x9b5   : > { %v18929_v39 = vmax.f32 %v18928_v1, 0.0 }
 0x9b7   : > { %v18989_v28 = vrot.slane %v18929_v39, %v18988_v61  ;;  %v18997_v62 = vrot.slane %v18929_v39, %v18996_v3  ;;  %v18985_v60 = vrot.slane %v18929_v39, %v18984_v46  ;;  %v18993_v13 = vrot.slane %v18929_v39, %v18992_v0 }
 0x9b9   : > { %19068 = vmatprep.mubr.f32.mxu0 %v18989_v28  ;;  %20362 = vmatprep.mubr.msk.f32.mxu1 %vm19001_vm10, %v18997_v62 }
 0x9ba   : > { %19069 = vmatmul.mubr.f32.vlgmr.msra.gmra.mrb[38].mxu0 %v18985_v60  ;;  %19139 = vmatmul.mubr.f32.vlgmr.msra.gmra.mrb[102].mxu1 %v18993_v13 }
 0x9bb   : > { %21405 = vmatpush3.bf16.msra.mxu0 %v21404_v23  ;;  %20928 = vmatprep.mubr.msk.f32.mxu0 %vm22010_vm3, %v26337_v41 }
 0x9bc   : > { %21406 = vmatprep.subr.bf16.mxu0 %v22027_v25  ;;  %20953 = vmatprep.mubr.msk.f32.mxu1 %vm22010_vm3, %v26337_v41  ;;  %vm19251_vm3 = vcmask 1043456  }
 0x9bd   : > { %21426 = vmatpush3.bf16.msra.mxu1 %v21425_v55 }
 0x9be   : > { %21427 = vmatprep.subr.bf16.mxu1 %v22027_v25 }
 0x9bf   : > { %21408 = vmatpush3.bf16.msra.mxu0 %v21407_v11 }
 0x9c0   : > { %21409 = vmatprep.subr.bf16.mxu0 %v22027_v25 }
 0x9c1   : > { %21429 = vmatpush3.bf16.msra.mxu1 %v21428_v33 }
 0x9c2   : > { %21430 = vmatprep.subr.bf16.mxu1 %v22027_v25 }
 0x9c3   : > { %21411 = vmatpush3.bf16.msra.mxu0 %v21410_v63 }
 0x9c4   : > { %21412 = vmatprep.subr.bf16.mxu0 %v22027_v25 }
 0x9c5   : > { %21432 = vmatpush3.bf16.msra.mxu1 %v21431_v21 }
 0x9c6   : > { %21433 = vmatprep.subr.bf16.mxu1 %v22027_v25 }
 0x9c7   : > { %21414 = vmatpush3.bf16.msra.mxu0 %v21413_v45 }
 0x9c8   : > { %21415 = vmatprep.subr.bf16.mxu0 %v22027_v25 }
 0x9c9   : > { %21435 = vmatpush3.bf16.msra.mxu1 %v21434_v10 }
 0x9ca   : > { %21436 = vmatprep.subr.bf16.mxu1 %v22027_v25 }
 0x9cb   : > { %21417 = vmatpush3.bf16.msra.mxu0 %v21416_v50 }
 0x9cc   : > { %21418 = vmatprep.subr.bf16.mxu0 %v22027_v25 }
 0x9cf   : > { %21420 = vmatpush3.bf16.msra.mxu0 %v21419_v16 }
 0x9d0   : > { %21421 = vmatprep.subr.bf16.mxu0 %v22027_v25  ;;  %v19244_v25 = vld [vmem:[%s26270_s12 + $0x48] sm:$0xff] }
 0x9d1   : > { %v21437_v44 = vpack.c.bf16 %v19244_v25, %v19243_v22 }
 0x9d3   : > { %21423 = vmatpush3.bf16.msra.mxu0 %v21422_v29  ;;  %21438 = vmatpush3.bf16.msra.mxu1 %v21437_v44 }
 0x9d4   : > { %20926 = vmatprep.subr.mxu0 %v26337_v41  ;;  %20951 = vmatprep.subr.mxu1 %v26337_v41  ;;  %v19246_v41 = vld [vmem:[%s26271_s13] sm:$0x1] }
 0x9d7   : > { %20927 = vmatpush3.msra.mxu0 %v19159_v59  ;;  %20952 = vmatpush3.msk.msra.mxu1 %vm19251_vm3, %v19245_v47 }
 0xa8d   : > { %v20608_v51 = vpop.f32.mrb[38].mxu0  ;;  %v19140_v54 = vpop.f32.mrb[102].mxu1 }
 0xa8e   : > { %v20609_v15 = vpop.f32.mrb[39].mxu0  ;;  %v19142_v9 = vpop.f32.mrb[103].mxu1 }
 0xa8f   : > { %v20610_v19 = vadd.f32 %v20609_v15, %v20608_v51 }
 0xa91   : > { %v19071_v18 = vadd.f32 %v20610_v19, %v18980_v58 }
 0xa93   : > { %v19141_v7 = vadd.f32 %v19140_v54, %v19071_v18 }
 0xa95   : > { %v19144_v42 = vmax.f32 %v19141_v7, 0.0 }
 0xa97   : > { %20929 = vmatmul.mubr.msk.f32.vlgmr.msra.gmra.mrb[40].mxu0 %vm9769_vm5, %v19144_v42 }
 0xb6a   : > { %v19230_v17 = vpop.f32.mrb[40].mxu0 }
 0xb6b   : > { %v19231_v6 = vadd.f32 %v19230_v17, %v19160_v35  ;;  %v20930_v34 = vpop.f32.mrb[41].mxu0 }
 0xb6d   : > { %v19234_v31 = vmax.f32 %v19231_v6, 0.0 }
 0xb6f   : > { %20954 = vmatmul.mubr.msk.f32.vlgmr.msra.gmra.mrb[104].mxu1 %vm19247_vm11, %v19234_v31 }
 0xc42   : > { %v19321_v4 = vpop.f32.mrb[104].mxu1 }
 0xc43   : > { %v19322_v61 = vadd.f32 %v19321_v4, %v19246_v41  ;;  %v20955_v1 = vpop.f32.mrb[105].mxu1 }
 0xc45   : > { %19326 = vst.msk [vmem:[%s459_s0] sm:$0x1] %vm19325_vm13, %v19322_v61 }
 0xc46   : > { %21949 = shalt.err (!%p21946_p3)
}
 0xc47   : > { %s21950_s25 = scalar_lea.hbm %s26216_s2, 16  ;;  %s21954_s28 = scalar_lea.hbm %s26272_s14, 32 }
 0xc48   : > { %p21951_p4 = scmp.ne.s32.totalorder %s26216_s2, %s21950_s25  ;;  %p21955_p9 = scmp.lt.u32.totalorder %s26216_s2, %s26272_s14 }
 0xc49   : > { %p21956_p10 = scmp.lt.u32.totalorder %s21954_s28, %s21950_s25  ;;  %p21958_p12 = scmp.lt.u32.totalorder %s21950_s25, %s26216_s2 }
 0xc4a   : > { %p21952_p7 = pnand %p21951_p4, %p22143_p5 }
 0xc4b   : > { %p21957_p11 = por %p21956_p10, %p21955_p9 }
 0xc4c   : > { %p21953_p8 = pneg %p21952_p7 }
 0xc4d   : > { %p21959_p13 = por %p21958_p12, %p21957_p11 }
 0xc4f   : > { %p21960_p0 = pnand %p21959_p13, %p21953_p8 }
 0xc51   : > { %21963 = shalt.err (!%p21960_p0)
}
 0xc52   : > { %21823 = dma.vmem_to_hbm [thread:$0]  (%p22143_p5), %s26218_s21, 16, %s26216_s2, %s19328_s19  }
 0xc53 PF: > { %p21829_p1 = scmp.ge.s32.totalorder %s21998_s16, 2  ;;  %s19352_s1 = sand.u32 1, %s21986_s29  }
 0xc54   : > { %s19353_s22 = scalar_lea.sflag [#allocation3], %s19352_s1 }
 0xc55   : > { %p21826_p2 = pnand %p21829_p1, %p22147_p6 }
 0xc57   : > { %21981 = dma.done.wait (!%p21826_p2), %s19353_s22, 16  }
 0xc58   : > { %21983 = vsyncadd (!%p21826_p2), %s19353_s22, 4294967280  ;;  %s26349_s16 = sld [smem:[#allocation6_spill]]  ;;  %s26350_s17 = sld [smem:[#allocation5_spill]] }
 0xc59   : > { %s26351_s15 = sld [smem:[#allocation7_spill]]  ;;  %s26352_s29 = smov %s21990_s30 }
 0xc5e   : > { %p24_p3 = scmp.ge.s32.totalorder %s26349_s16, 4   ;;  %s26353_s30 = smov %s26350_s17 }
 0xc60   :  { %26 = sbr.rel (!%p24_p3) target bundleno = 7 (0x7), region = 174 }
 0xc67   :  { %19357 = vsyncpa [#allocation3], 1 }
 0xc68   :  { %19359 = vsyncpa [#allocation3 + $0x1], 1 }

</bundles_post_ra>
